<compile_context>
chip_gen: v5e
topology: v5e:2x2
jax: 0.10.0
libtpu: 0.0.40
codegen_flags: <defaults>
</compile_context>

<pallas_src>
import functools

import jax
import jax.numpy as jnp
from jax.experimental import pallas as pl
from jax.experimental.pallas import tpu as pltpu


# --------------------------------- kernel ------------------------------------

def dreemnet_kernel(x_ref, w1c_ref, b1c_ref, w2c_ref, b2c_ref, wq_ref, bfc_ref,
                    o_ref, a1p_ref, *, conv_size, pool_size, window, lanes):
    K, P, Bb = conv_size, pool_size, lanes
    pad = K // 2
    T0 = window
    T1 = T0 // P
    T2 = T1 // P
    VH = w1c_ref.shape[1]

    # ---- SpatialFiltering + ConvBlock1 conv fused: K accumulated matmuls ----
    # x_ref is (C, (T0+2*pad)*Bb), already zero time-padded in the wrapper, so
    # every tap is just a 128-lane-aligned slice (no in-kernel pad/concat).
    acc1 = jnp.dot(w1c_ref[0], x_ref[:, 0:T0 * Bb],
                   preferred_element_type=jnp.float32)
    for k in range(1, K):
        acc1 = acc1 + jnp.dot(w1c_ref[k], x_ref[:, k * Bb:(k + T0) * Bb],
                              preferred_element_type=jnp.float32)

    # ---- bias + ReLU + MaxPool1, written straight into the padded conv2 input.
    # (relu/max/bias commute, so pooling raw accumulator columns is exact.)
    b1 = b1c_ref[...]
    zpad = jnp.zeros((VH, pad * Bb), a1p_ref.dtype)
    a1p_ref[:, 0:pad * Bb] = zpad                      # zero halo, rewritten
    a1p_ref[:, (T1 + pad) * Bb:(T1 + 2 * pad) * Bb] = zpad  # every step (megacore-safe)
    for t in range(T1):
        m = acc1[:, (t * P) * Bb:(t * P + 1) * Bb]
        for p in range(1, P):
            m = jnp.maximum(m, acc1[:, (t * P + p) * Bb:(t * P + p + 1) * Bb])
        a1p_ref[:, (pad + t) * Bb:(pad + t + 1) * Bb] = (
            jnp.maximum(m + b1, 0.0).astype(a1p_ref.dtype))

    # ---- ConvBlock2 conv: K accumulated matmuls on the padded scratch ----
    acc2 = jnp.dot(w2c_ref[0], a1p_ref[:, 0:T1 * Bb],
                   preferred_element_type=jnp.float32)
    for k in range(1, K):
        acc2 = acc2 + jnp.dot(w2c_ref[k], a1p_ref[:, k * Bb:(k + T1) * Bb],
                              preferred_element_type=jnp.float32)

    # ---- bias + ReLU + MaxPool2 fused with the dense head (lane-dense output).
    # TODO(synk): Dropout(p=0.5) omitted -- eval-mode (identity) semantics.
    b2 = b2c_ref[...]
    res = jnp.zeros((1, Bb), jnp.float32)
    for t in range(T2):
        m = acc2[:, (t * P) * Bb:(t * P + 1) * Bb]
        for p in range(1, P):
            m = jnp.maximum(m, acc2[:, (t * P + p) * Bb:(t * P + p + 1) * Bb])
        m = jnp.maximum(m + b2, 0.0)
        res = res + jnp.dot(wq_ref[t:t + 1, :], m,
                            preferred_element_type=jnp.float32)
    o_ref[...] = res + bfc_ref[...]                    # (1, Bb) lane-dense


# -------------------------------- wrapper -------------------------------------

def dreemnet_forward(x, params, *, conv_size, pool_size, block_batch=1024,
                     compute_dtype=jnp.bfloat16,
                     vmem_limit_bytes=48 * 1024 * 1024):
    """x: (B, 1, n_channels, window) float32 (PyTorch NCHW)."""
    wsf, w1, b1, w2, b2, wfc, bfc = params
    B, one, C, T = x.shape
    assert one == 1
    V = wsf.shape[0]
    H = w1.shape[0]
    K, P = conv_size, pool_size

    assert K % 2 == 1, "convolution_size must be odd (Conv2d 'same'-style padding)"
    assert w1.shape[1] == 1, "fusion assumes conv_block_1 has a single input channel"
    assert T % (P * P) == 0, "window_size must be divisible by pool_size**2"
    assert block_batch % 128 == 0, "block_batch must be a multiple of 128 lanes"

    T1 = T // P
    T2 = T1 // P
    F = T2 * V * H
    assert wfc.shape == (1, F)
    pad = K // 2
    Tp = T + 2 * pad

    def cdiv(a, b):
        return -(-a // b)

    # Block size: as large as requested, but (a) never pad the batch past one
    # block of slack and (b) prefer nblk >= 2 so both v7x TensorCores get work.
    Bb = max(128, min(block_batch, 128 * cdiv(B, 2 * 128)))
    nblk = cdiv(B, Bb)
    Bpad = nblk * Bb
    cd = compute_dtype

    # --- data layout: lanes = (block, time, batch-within-block), batch fastest.
    # NOTE: this transpose is a full HBM read+write relayout in XLA, on the same
    # order as the kernel's own HBM traffic.  It is done in the compute dtype
    # (bf16 by default) to halve that cost; emit this layout upstream to remove
    # it entirely.  The conv1 zero time-halo is also added here.
    x3 = x[:, 0].astype(cd)                                  # (B, C, T)
    if Bpad != B:
        x3 = jnp.concatenate([x3, jnp.zeros((Bpad - B, C, T), cd)], axis=0)
    x4 = x3.reshape(nblk, Bb, C, T).transpose(2, 0, 3, 1)    # (C, nblk, T, Bb)
    x4 = jnp.pad(x4, ((0, 0), (0, 0), (pad, pad), (0, 0)))   # (C, nblk, Tp, Bb)
    x2 = x4.reshape(C, nblk * Tp * Bb)

    # --- pre-packed / fused weights (tiny; done once in plain XLA) ---
    f32 = jnp.float32
    wsf_f = wsf.astype(f32)
    w1_t = w1[:, 0, :].astype(f32)                           # (H, K)
    # per-tap fused spatial-filter x conv1 weight: (K, V*H, C), rows (v,h)
    w1c = jnp.einsum('hk,vc->kvhc', w1_t, wsf_f).reshape(K, V * H, C).astype(cd)
    b1c = jnp.tile(b1.astype(f32), V).reshape(V * H, 1)
    # per-tap block-diagonal conv2 weight: (K, V*H, V*H), rows/cols (v,h)
    eye_v = jnp.eye(V, dtype=f32)
    w2c = jnp.einsum('abk,vw->kvawb', w2.astype(f32), eye_v).reshape(
        K, V * H, V * H).astype(cd)
    b2c = jnp.tile(b2.astype(f32), V).reshape(V * H, 1)
    # dense head: rows t2, cols (v,h)  (torch flatten order of (H,V,T2))
    wq = jnp.transpose(wfc.astype(f32).reshape(H, V, T2),
                       (2, 1, 0)).reshape(T2, V * H)
    bfc2 = bfc.astype(f32).reshape(1, 1)

    kernel = functools.partial(dreemnet_kernel, conv_size=K, pool_size=P,
                               window=T, lanes=Bb)

    def full_spec(a):
        n = a.ndim
        return pl.BlockSpec(a.shape, lambda i, _n=n: (0,) * _n)

    out = pl.pallas_call(
        kernel,
        out_shape=jax.ShapeDtypeStruct((1, Bpad), jnp.float32),
        grid=(nblk,),
        in_specs=[
            pl.BlockSpec((C, Tp * Bb), lambda i: (0, i)),
            full_spec(w1c), full_spec(b1c),
            full_spec(w2c), full_spec(b2c),
            full_spec(wq), full_spec(bfc2),
        ],
        out_specs=pl.BlockSpec((1, Bb), lambda i: (0, i)),
        scratch_shapes=[pltpu.VMEM((V * H, (T1 + 2 * pad) * Bb), cd)],
        compiler_params=pltpu.CompilerParams(
            dimension_semantics=("parallel",),
            vmem_limit_bytes=int(vmem_limit_bytes)),
    )(x2, w1c, b1c, w2c, b2c, wq, bfc2)

    return out[0, :B].reshape(B, 1)


# ---------------------------- pure-JAX reference -------------------------------

def dreemnet_ref(x, params, *, pool_size):
    wsf, w1, b1, w2, b2, wfc, bfc = params
    B = x.shape[0]
    y = jnp.einsum('vc,bct->bvt', wsf, x[:, 0])             # spatial filtering
    y = y[:, None]                                          # (B, 1, V, T)

    def block(y, w, b):
        K = w.shape[-1]
        pad = K // 2
        T = y.shape[-1]
        yp = jnp.pad(y, ((0, 0), (0, 0), (0, 0), (pad, pad)))
        out = jnp.zeros((y.shape[0], w.shape[0], y.shape[2], T), jnp.float32)
        for k in range(K):
            out = out + jnp.einsum('oc,bcvt->bovt', w[:, :, k], yp[..., k:k + T])
        out = out + b[None, :, None, None]
        out = jnp.maximum(out, 0.0)
        out = out.reshape(*out.shape[:3], T // pool_size, pool_size).max(-1)
        return out

    y = block(y, w1, b1)
    y = block(y, w2, b2)
    flat = y.reshape(B, -1)
    return flat @ wfc.T + bfc[None, :]


# ----------------------------------- main --------------------------------------

if __name__ == "__main__":
    # DreemNet(n_channels=4, n_virtual_channels=8, convolution_size=5,
    #          pool_size=2, n_hidden_channels=8, window_size=16)
    n_channels, n_virtual, K, P, H, T = 4, 8, 5, 2, 8, 16
    B = 2
    F = T // (P ** 2) * n_virtual * H                       # 4 * 8 * 8 = 256

    keys = jax.random.split(jax.random.PRNGKey(0), 8)
    x = jax.random.normal(keys[0], (B, 1, n_channels, T), jnp.float32)
    wsf = jax.random.normal(keys[1], (n_virtual, n_channels), jnp.float32) * 0.3
    w1 = jax.random.normal(keys[2], (H, 1, K), jnp.float32) * 0.3
    b1 = jax.random.normal(keys[3], (H,), jnp.float32) * 0.1
    w2 = jax.random.normal(keys[4], (H, H, K), jnp.float32) * 0.2
    b2 = jax.random.normal(keys[5], (H,), jnp.float32) * 0.1
    wfc = jax.random.normal(keys[6], (1, F), jnp.float32) * 0.05
    bfc = jax.random.normal(keys[7], (1,), jnp.float32) * 0.1
    params = (wsf, w1, b1, w2, b2, wfc, bfc)

    # Small batch, default bf16 matmul operands.
    out = jax.block_until_ready(
        dreemnet_forward(x, params, conv_size=K, pool_size=P))
    ref = dreemnet_ref(x, params, pool_size=P)
    assert out.shape == (B, 1), out.shape
    assert jnp.allclose(out, ref, rtol=2e-2, atol=2e-2), (out, ref)

    # Larger batch: exercises multi-block grid (nblk>=2), batch padding and a
    # block size above 128 lanes, still with bf16 operands.
    B2 = 600
    x_big = jax.random.normal(jax.random.PRNGKey(1), (B2, 1, n_channels, T),
                              jnp.float32)
    ref_big = dreemnet_ref(x_big, params, pool_size=P)
    out_big = jax.block_until_ready(
        dreemnet_forward(x_big, params, conv_size=K, pool_size=P))
    assert out_big.shape == (B2, 1), out_big.shape
    assert jnp.allclose(out_big, ref_big, rtol=2e-2, atol=2e-2)

    # Same batch with strict f32 operands: matches the reference tightly.
    out_f32 = jax.block_until_ready(
        dreemnet_forward(x_big, params, conv_size=K, pool_size=P,
                         compute_dtype=jnp.float32))
    assert jnp.allclose(out_f32, ref_big, rtol=1e-2, atol=1e-2)

    print("KERNEL_OK")
</pallas_src>

<mosaic_0001>
module attributes {stable_mosaic.version = 11 : i64} {
  func.func @dreemnet_kernel(%arg0: i32, %arg1: memref<4x2560xbf16, #tpu.memory_space<vmem>>, %arg2: memref<5x64x4xbf16, #tpu.memory_space<vmem>>, %arg3: memref<64x1xf32, #tpu.memory_space<vmem>>, %arg4: memref<5x64x64xbf16, #tpu.memory_space<vmem>>, %arg5: memref<64x1xf32, #tpu.memory_space<vmem>>, %arg6: memref<4x64xf32, #tpu.memory_space<vmem>>, %arg7: memref<1x1xf32, #tpu.memory_space<vmem>>, %arg8: memref<1x128xf32, #tpu.memory_space<vmem>>, %arg9: memref<64x1536xbf16, #tpu.memory_space<vmem>>) attributes {dimension_semantics = [#tpu.dimension_semantics<parallel>], iteration_bounds = array<i64: 1>, scalar_prefetch = 0 : i64, scratch_operands = 1 : i64, tpu.core_type = #tpu.core_type<tc>, window_params = [{transform_indices = @transform_0, window_bounds = array<i64: 4, 2560>}, {pipeline_mode = #tpu.pipeline_mode<synchronous>, transform_indices = @transform_1, window_bounds = array<i64: 5, 64, 4>}, {pipeline_mode = #tpu.pipeline_mode<synchronous>, transform_indices = @transform_2, window_bounds = array<i64: 64, 1>}, {pipeline_mode = #tpu.pipeline_mode<synchronous>, transform_indices = @transform_3, window_bounds = array<i64: 5, 64, 64>}, {pipeline_mode = #tpu.pipeline_mode<synchronous>, transform_indices = @transform_4, window_bounds = array<i64: 64, 1>}, {pipeline_mode = #tpu.pipeline_mode<synchronous>, transform_indices = @transform_5, window_bounds = array<i64: 4, 64>}, {pipeline_mode = #tpu.pipeline_mode<synchronous>, transform_indices = @transform_6, window_bounds = array<i64: 1, 1>}, {transform_indices = @transform_7, window_bounds = array<i64: 1, 128>}]} {
    %c0 = arith.constant 0 : index
    %c0_0 = arith.constant 0 : index
    %c0_1 = arith.constant 0 : index
    %0 = vector.load %arg2[%c0, %c0_0, %c0_1] : memref<5x64x4xbf16, #tpu.memory_space<vmem>>, vector<1x64x4xbf16>
    %1 = vector.shape_cast %0 : vector<1x64x4xbf16> to vector<64x4xbf16>
    %c0_2 = arith.constant 0 : index
    %c0_3 = arith.constant 0 : index
    %2 = vector.load %arg1[%c0_2, %c0_3] : memref<4x2560xbf16, #tpu.memory_space<vmem>>, vector<4x2048xbf16>
    %cst = arith.constant dense<0.000000e+00> : vector<64x2048xf32>
    %3 = tpu.matmul %1, %2, %cst {dimension_numbers = #tpu.dot_dimension_numbers<[1], [0], [0], [1], [0, 0, 1, 1], [], []>} : vector<64x4xbf16>, vector<4x2048xbf16>, vector<64x2048xf32> -> vector<64x2048xf32>
    %c1 = arith.constant 1 : index
    %c0_4 = arith.constant 0 : index
    %c0_5 = arith.constant 0 : index
    %4 = vector.load %arg2[%c1, %c0_4, %c0_5] : memref<5x64x4xbf16, #tpu.memory_space<vmem>>, vector<1x64x4xbf16>
    %5 = vector.shape_cast %4 : vector<1x64x4xbf16> to vector<64x4xbf16>
    %c0_6 = arith.constant 0 : index
    %c128 = arith.constant 128 : index
    %6 = vector.load %arg1[%c0_6, %c128] : memref<4x2560xbf16, #tpu.memory_space<vmem>>, vector<4x2048xbf16>
    %cst_7 = arith.constant dense<0.000000e+00> : vector<64x2048xf32>
    %7 = tpu.matmul %5, %6, %cst_7 {dimension_numbers = #tpu.dot_dimension_numbers<[1], [0], [0], [1], [0, 0, 1, 1], [], []>} : vector<64x4xbf16>, vector<4x2048xbf16>, vector<64x2048xf32> -> vector<64x2048xf32>
    %8 = arith.addf %3, %7 : vector<64x2048xf32>
    %c2 = arith.constant 2 : index
    %c0_8 = arith.constant 0 : index
    %c0_9 = arith.constant 0 : index
    %9 = vector.load %arg2[%c2, %c0_8, %c0_9] : memref<5x64x4xbf16, #tpu.memory_space<vmem>>, vector<1x64x4xbf16>
    %10 = vector.shape_cast %9 : vector<1x64x4xbf16> to vector<64x4xbf16>
    %c0_10 = arith.constant 0 : index
    %c256 = arith.constant 256 : index
    %11 = vector.load %arg1[%c0_10, %c256] : memref<4x2560xbf16, #tpu.memory_space<vmem>>, vector<4x2048xbf16>
    %cst_11 = arith.constant dense<0.000000e+00> : vector<64x2048xf32>
    %12 = tpu.matmul %10, %11, %cst_11 {dimension_numbers = #tpu.dot_dimension_numbers<[1], [0], [0], [1], [0, 0, 1, 1], [], []>} : vector<64x4xbf16>, vector<4x2048xbf16>, vector<64x2048xf32> -> vector<64x2048xf32>
    %13 = arith.addf %8, %12 : vector<64x2048xf32>
    %c3 = arith.constant 3 : index
    %c0_12 = arith.constant 0 : index
    %c0_13 = arith.constant 0 : index
    %14 = vector.load %arg2[%c3, %c0_12, %c0_13] : memref<5x64x4xbf16, #tpu.memory_space<vmem>>, vector<1x64x4xbf16>
    %15 = vector.shape_cast %14 : vector<1x64x4xbf16> to vector<64x4xbf16>
    %c0_14 = arith.constant 0 : index
    %c384 = arith.constant 384 : index
    %16 = vector.load %arg1[%c0_14, %c384] : memref<4x2560xbf16, #tpu.memory_space<vmem>>, vector<4x2048xbf16>
    %cst_15 = arith.constant dense<0.000000e+00> : vector<64x2048xf32>
    %17 = tpu.matmul %15, %16, %cst_15 {dimension_numbers = #tpu.dot_dimension_numbers<[1], [0], [0], [1], [0, 0, 1, 1], [], []>} : vector<64x4xbf16>, vector<4x2048xbf16>, vector<64x2048xf32> -> vector<64x2048xf32>
    %18 = arith.addf %13, %17 : vector<64x2048xf32>
    %c4 = arith.constant 4 : index
    %c0_16 = arith.constant 0 : index
    %c0_17 = arith.constant 0 : index
    %19 = vector.load %arg2[%c4, %c0_16, %c0_17] : memref<5x64x4xbf16, #tpu.memory_space<vmem>>, vector<1x64x4xbf16>
    %20 = vector.shape_cast %19 : vector<1x64x4xbf16> to vector<64x4xbf16>
    %c0_18 = arith.constant 0 : index
    %c512 = arith.constant 512 : index
    %21 = vector.load %arg1[%c0_18, %c512] : memref<4x2560xbf16, #tpu.memory_space<vmem>>, vector<4x2048xbf16>
    %cst_19 = arith.constant dense<0.000000e+00> : vector<64x2048xf32>
    %22 = tpu.matmul %20, %21, %cst_19 {dimension_numbers = #tpu.dot_dimension_numbers<[1], [0], [0], [1], [0, 0, 1, 1], [], []>} : vector<64x4xbf16>, vector<4x2048xbf16>, vector<64x2048xf32> -> vector<64x2048xf32>
    %23 = arith.addf %18, %22 : vector<64x2048xf32>
    %c0_20 = arith.constant 0 : index
    %c0_21 = arith.constant 0 : index
    %24 = vector.load %arg3[%c0_20, %c0_21] : memref<64x1xf32, #tpu.memory_space<vmem>>, vector<64x1xf32>
    %cst_22 = arith.constant 0.000000e+00 : bf16
    %25 = vector.broadcast %cst_22 : bf16 to vector<64x256xbf16>
    %c0_23 = arith.constant 0 : index
    %c0_24 = arith.constant 0 : index
    %26 = vector.load %arg9[%c0_23, %c0_24] : memref<64x1536xbf16, #tpu.memory_space<vmem>>, vector<64x256xbf16>
    tpu.vector_store %arg9[%c0_23, %c0_24], %25 {strides = array<i32>} : memref<64x1536xbf16, #tpu.memory_space<vmem>>, vector<64x256xbf16>,
    %c0_25 = arith.constant 0 : index
    %c1280 = arith.constant 1280 : index
    %27 = vector.load %arg9[%c0_25, %c1280] : memref<64x1536xbf16, #tpu.memory_space<vmem>>, vector<64x256xbf16>
    tpu.vector_store %arg9[%c0_25, %c1280], %25 {strides = array<i32>} : memref<64x1536xbf16, #tpu.memory_space<vmem>>, vector<64x256xbf16>,
    %28 = vector.extract_strided_slice %23 {offsets = [0, 0], sizes = [64, 128], strides = [1, 1]} : vector<64x2048xf32> to vector<64x128xf32>
    %29 = vector.extract_strided_slice %23 {offsets = [0, 128], sizes = [64, 128], strides = [1, 1]} : vector<64x2048xf32> to vector<64x128xf32>
    %30 = arith.maximumf %28, %29 : vector<64x128xf32>
    %31 = vector.broadcast %24 : vector<64x1xf32> to vector<64x128xf32>
    %32 = arith.addf %30, %31 : vector<64x128xf32>
    %cst_26 = arith.constant 0.000000e+00 : f32
    %33 = vector.broadcast %cst_26 : f32 to vector<64x128xf32>
    %34 = arith.maximumf %32, %33 : vector<64x128xf32>
    %35 = arith.truncf %34 : vector<64x128xf32> to vector<64x128xbf16>
    %c0_27 = arith.constant 0 : index
    %c256_28 = arith.constant 256 : index
    %36 = vector.load %arg9[%c0_27, %c256_28] : memref<64x1536xbf16, #tpu.memory_space<vmem>>, vector<64x128xbf16>
    tpu.vector_store %arg9[%c0_27, %c256_28], %35 {strides = array<i32>} : memref<64x1536xbf16, #tpu.memory_space<vmem>>, vector<64x128xbf16>,
    %37 = vector.extract_strided_slice %23 {offsets = [0, 256], sizes = [64, 128], strides = [1, 1]} : vector<64x2048xf32> to vector<64x128xf32>
    %38 = vector.extract_strided_slice %23 {offsets = [0, 384], sizes = [64, 128], strides = [1, 1]} : vector<64x2048xf32> to vector<64x128xf32>
    %39 = arith.maximumf %37, %38 : vector<64x128xf32>
    %40 = vector.broadcast %24 : vector<64x1xf32> to vector<64x128xf32>
    %41 = arith.addf %39, %40 : vector<64x128xf32>
    %cst_29 = arith.constant 0.000000e+00 : f32
    %42 = vector.broadcast %cst_29 : f32 to vector<64x128xf32>
    %43 = arith.maximumf %41, %42 : vector<64x128xf32>
    %44 = arith.truncf %43 : vector<64x128xf32> to vector<64x128xbf16>
    %c0_30 = arith.constant 0 : index
    %c384_31 = arith.constant 384 : index
    %45 = vector.load %arg9[%c0_30, %c384_31] : memref<64x1536xbf16, #tpu.memory_space<vmem>>, vector<64x128xbf16>
    tpu.vector_store %arg9[%c0_30, %c384_31], %44 {strides = array<i32>} : memref<64x1536xbf16, #tpu.memory_space<vmem>>, vector<64x128xbf16>,
    %46 = vector.extract_strided_slice %23 {offsets = [0, 512], sizes = [64, 128], strides = [1, 1]} : vector<64x2048xf32> to vector<64x128xf32>
    %47 = vector.extract_strided_slice %23 {offsets = [0, 640], sizes = [64, 128], strides = [1, 1]} : vector<64x2048xf32> to vector<64x128xf32>
    %48 = arith.maximumf %46, %47 : vector<64x128xf32>
    %49 = vector.broadcast %24 : vector<64x1xf32> to vector<64x128xf32>
    %50 = arith.addf %48, %49 : vector<64x128xf32>
    %cst_32 = arith.constant 0.000000e+00 : f32
    %51 = vector.broadcast %cst_32 : f32 to vector<64x128xf32>
    %52 = arith.maximumf %50, %51 : vector<64x128xf32>
    %53 = arith.truncf %52 : vector<64x128xf32> to vector<64x128xbf16>
    %c0_33 = arith.constant 0 : index
    %c512_34 = arith.constant 512 : index
    %54 = vector.load %arg9[%c0_33, %c512_34] : memref<64x1536xbf16, #tpu.memory_space<vmem>>, vector<64x128xbf16>
    tpu.vector_store %arg9[%c0_33, %c512_34], %53 {strides = array<i32>} : memref<64x1536xbf16, #tpu.memory_space<vmem>>, vector<64x128xbf16>,
    %55 = vector.extract_strided_slice %23 {offsets = [0, 768], sizes = [64, 128], strides = [1, 1]} : vector<64x2048xf32> to vector<64x128xf32>
    %56 = vector.extract_strided_slice %23 {offsets = [0, 896], sizes = [64, 128], strides = [1, 1]} : vector<64x2048xf32> to vector<64x128xf32>
    %57 = arith.maximumf %55, %56 : vector<64x128xf32>
    %58 = vector.broadcast %24 : vector<64x1xf32> to vector<64x128xf32>
    %59 = arith.addf %57, %58 : vector<64x128xf32>
    %cst_35 = arith.constant 0.000000e+00 : f32
    %60 = vector.broadcast %cst_35 : f32 to vector<64x128xf32>
    %61 = arith.maximumf %59, %60 : vector<64x128xf32>
    %62 = arith.truncf %61 : vector<64x128xf32> to vector<64x128xbf16>
    %c0_36 = arith.constant 0 : index
    %c640 = arith.constant 640 : index
    %63 = vector.load %arg9[%c0_36, %c640] : memref<64x1536xbf16, #tpu.memory_space<vmem>>, vector<64x128xbf16>
    tpu.vector_store %arg9[%c0_36, %c640], %62 {strides = array<i32>} : memref<64x1536xbf16, #tpu.memory_space<vmem>>, vector<64x128xbf16>,
    %64 = vector.extract_strided_slice %23 {offsets = [0, 1024], sizes = [64, 128], strides = [1, 1]} : vector<64x2048xf32> to vector<64x128xf32>
    %65 = vector.extract_strided_slice %23 {offsets = [0, 1152], sizes = [64, 128], strides = [1, 1]} : vector<64x2048xf32> to vector<64x128xf32>
    %66 = arith.maximumf %64, %65 : vector<64x128xf32>
    %67 = vector.broadcast %24 : vector<64x1xf32> to vector<64x128xf32>
    %68 = arith.addf %66, %67 : vector<64x128xf32>
    %cst_37 = arith.constant 0.000000e+00 : f32
    %69 = vector.broadcast %cst_37 : f32 to vector<64x128xf32>
    %70 = arith.maximumf %68, %69 : vector<64x128xf32>
    %71 = arith.truncf %70 : vector<64x128xf32> to vector<64x128xbf16>
    %c0_38 = arith.constant 0 : index
    %c768 = arith.constant 768 : index
    %72 = vector.load %arg9[%c0_38, %c768] : memref<64x1536xbf16, #tpu.memory_space<vmem>>, vector<64x128xbf16>
    tpu.vector_store %arg9[%c0_38, %c768], %71 {strides = array<i32>} : memref<64x1536xbf16, #tpu.memory_space<vmem>>, vector<64x128xbf16>,
    %73 = vector.extract_strided_slice %23 {offsets = [0, 1280], sizes = [64, 128], strides = [1, 1]} : vector<64x2048xf32> to vector<64x128xf32>
    %74 = vector.extract_strided_slice %23 {offsets = [0, 1408], sizes = [64, 128], strides = [1, 1]} : vector<64x2048xf32> to vector<64x128xf32>
    %75 = arith.maximumf %73, %74 : vector<64x128xf32>
    %76 = vector.broadcast %24 : vector<64x1xf32> to vector<64x128xf32>
    %77 = arith.addf %75, %76 : vector<64x128xf32>
    %cst_39 = arith.constant 0.000000e+00 : f32
    %78 = vector.broadcast %cst_39 : f32 to vector<64x128xf32>
    %79 = arith.maximumf %77, %78 : vector<64x128xf32>
    %80 = arith.truncf %79 : vector<64x128xf32> to vector<64x128xbf16>
    %c0_40 = arith.constant 0 : index
    %c896 = arith.constant 896 : index
    %81 = vector.load %arg9[%c0_40, %c896] : memref<64x1536xbf16, #tpu.memory_space<vmem>>, vector<64x128xbf16>
    tpu.vector_store %arg9[%c0_40, %c896], %80 {strides = array<i32>} : memref<64x1536xbf16, #tpu.memory_space<vmem>>, vector<64x128xbf16>,
    %82 = vector.extract_strided_slice %23 {offsets = [0, 1536], sizes = [64, 128], strides = [1, 1]} : vector<64x2048xf32> to vector<64x128xf32>
    %83 = vector.extract_strided_slice %23 {offsets = [0, 1664], sizes = [64, 128], strides = [1, 1]} : vector<64x2048xf32> to vector<64x128xf32>
    %84 = arith.maximumf %82, %83 : vector<64x128xf32>
    %85 = vector.broadcast %24 : vector<64x1xf32> to vector<64x128xf32>
    %86 = arith.addf %84, %85 : vector<64x128xf32>
    %cst_41 = arith.constant 0.000000e+00 : f32
    %87 = vector.broadcast %cst_41 : f32 to vector<64x128xf32>
    %88 = arith.maximumf %86, %87 : vector<64x128xf32>
    %89 = arith.truncf %88 : vector<64x128xf32> to vector<64x128xbf16>
    %c0_42 = arith.constant 0 : index
    %c1024 = arith.constant 1024 : index
    %90 = vector.load %arg9[%c0_42, %c1024] : memref<64x1536xbf16, #tpu.memory_space<vmem>>, vector<64x128xbf16>
    tpu.vector_store %arg9[%c0_42, %c1024], %89 {strides = array<i32>} : memref<64x1536xbf16, #tpu.memory_space<vmem>>, vector<64x128xbf16>,
    %91 = vector.extract_strided_slice %23 {offsets = [0, 1792], sizes = [64, 128], strides = [1, 1]} : vector<64x2048xf32> to vector<64x128xf32>
    %92 = vector.extract_strided_slice %23 {offsets = [0, 1920], sizes = [64, 128], strides = [1, 1]} : vector<64x2048xf32> to vector<64x128xf32>
    %93 = arith.maximumf %91, %92 : vector<64x128xf32>
    %94 = vector.broadcast %24 : vector<64x1xf32> to vector<64x128xf32>
    %95 = arith.addf %93, %94 : vector<64x128xf32>
    %cst_43 = arith.constant 0.000000e+00 : f32
    %96 = vector.broadcast %cst_43 : f32 to vector<64x128xf32>
    %97 = arith.maximumf %95, %96 : vector<64x128xf32>
    %98 = arith.truncf %97 : vector<64x128xf32> to vector<64x128xbf16>
    %c0_44 = arith.constant 0 : index
    %c1152 = arith.constant 1152 : index
    %99 = vector.load %arg9[%c0_44, %c1152] : memref<64x1536xbf16, #tpu.memory_space<vmem>>, vector<64x128xbf16>
    tpu.vector_store %arg9[%c0_44, %c1152], %98 {strides = array<i32>} : memref<64x1536xbf16, #tpu.memory_space<vmem>>, vector<64x128xbf16>,
    %c0_45 = arith.constant 0 : index
    %c0_46 = arith.constant 0 : index
    %c0_47 = arith.constant 0 : index
    %100 = vector.load %arg4[%c0_45, %c0_46, %c0_47] : memref<5x64x64xbf16, #tpu.memory_space<vmem>>, vector<1x64x64xbf16>
    %101 = vector.shape_cast %100 : vector<1x64x64xbf16> to vector<64x64xbf16>
    %c0_48 = arith.constant 0 : index
    %c0_49 = arith.constant 0 : index
    %102 = vector.load %arg9[%c0_48, %c0_49] : memref<64x1536xbf16, #tpu.memory_space<vmem>>, vector<64x1024xbf16>
    %cst_50 = arith.constant dense<0.000000e+00> : vector<64x1024xf32>
    %103 = tpu.matmul %101, %102, %cst_50 {dimension_numbers = #tpu.dot_dimension_numbers<[1], [0], [0], [1], [0, 0, 1, 1], [], []>} : vector<64x64xbf16>, vector<64x1024xbf16>, vector<64x1024xf32> -> vector<64x1024xf32>
    %c1_51 = arith.constant 1 : index
    %c0_52 = arith.constant 0 : index
    %c0_53 = arith.constant 0 : index
    %104 = vector.load %arg4[%c1_51, %c0_52, %c0_53] : memref<5x64x64xbf16, #tpu.memory_space<vmem>>, vector<1x64x64xbf16>
    %105 = vector.shape_cast %104 : vector<1x64x64xbf16> to vector<64x64xbf16>
    %c0_54 = arith.constant 0 : index
    %c128_55 = arith.constant 128 : index
    %106 = vector.load %arg9[%c0_54, %c128_55] : memref<64x1536xbf16, #tpu.memory_space<vmem>>, vector<64x1024xbf16>
    %cst_56 = arith.constant dense<0.000000e+00> : vector<64x1024xf32>
    %107 = tpu.matmul %105, %106, %cst_56 {dimension_numbers = #tpu.dot_dimension_numbers<[1], [0], [0], [1], [0, 0, 1, 1], [], []>} : vector<64x64xbf16>, vector<64x1024xbf16>, vector<64x1024xf32> -> vector<64x1024xf32>
    %108 = arith.addf %103, %107 : vector<64x1024xf32>
    %c2_57 = arith.constant 2 : index
    %c0_58 = arith.constant 0 : index
    %c0_59 = arith.constant 0 : index
    %109 = vector.load %arg4[%c2_57, %c0_58, %c0_59] : memref<5x64x64xbf16, #tpu.memory_space<vmem>>, vector<1x64x64xbf16>
    %110 = vector.shape_cast %109 : vector<1x64x64xbf16> to vector<64x64xbf16>
    %c0_60 = arith.constant 0 : index
    %c256_61 = arith.constant 256 : index
    %111 = vector.load %arg9[%c0_60, %c256_61] : memref<64x1536xbf16, #tpu.memory_space<vmem>>, vector<64x1024xbf16>
    %cst_62 = arith.constant dense<0.000000e+00> : vector<64x1024xf32>
    %112 = tpu.matmul %110, %111, %cst_62 {dimension_numbers = #tpu.dot_dimension_numbers<[1], [0], [0], [1], [0, 0, 1, 1], [], []>} : vector<64x64xbf16>, vector<64x1024xbf16>, vector<64x1024xf32> -> vector<64x1024xf32>
    %113 = arith.addf %108, %112 : vector<64x1024xf32>
    %c3_63 = arith.constant 3 : index
    %c0_64 = arith.constant 0 : index
    %c0_65 = arith.constant 0 : index
    %114 = vector.load %arg4[%c3_63, %c0_64, %c0_65] : memref<5x64x64xbf16, #tpu.memory_space<vmem>>, vector<1x64x64xbf16>
    %115 = vector.shape_cast %114 : vector<1x64x64xbf16> to vector<64x64xbf16>
    %c0_66 = arith.constant 0 : index
    %c384_67 = arith.constant 384 : index
    %116 = vector.load %arg9[%c0_66, %c384_67] : memref<64x1536xbf16, #tpu.memory_space<vmem>>, vector<64x1024xbf16>
    %cst_68 = arith.constant dense<0.000000e+00> : vector<64x1024xf32>
    %117 = tpu.matmul %115, %116, %cst_68 {dimension_numbers = #tpu.dot_dimension_numbers<[1], [0], [0], [1], [0, 0, 1, 1], [], []>} : vector<64x64xbf16>, vector<64x1024xbf16>, vector<64x1024xf32> -> vector<64x1024xf32>
    %118 = arith.addf %113, %117 : vector<64x1024xf32>
    %c4_69 = arith.constant 4 : index
    %c0_70 = arith.constant 0 : index
    %c0_71 = arith.constant 0 : index
    %119 = vector.load %arg4[%c4_69, %c0_70, %c0_71] : memref<5x64x64xbf16, #tpu.memory_space<vmem>>, vector<1x64x64xbf16>
    %120 = vector.shape_cast %119 : vector<1x64x64xbf16> to vector<64x64xbf16>
    %c0_72 = arith.constant 0 : index
    %c512_73 = arith.constant 512 : index
    %121 = vector.load %arg9[%c0_72, %c512_73] : memref<64x1536xbf16, #tpu.memory_space<vmem>>, vector<64x1024xbf16>
    %cst_74 = arith.constant dense<0.000000e+00> : vector<64x1024xf32>
    %122 = tpu.matmul %120, %121, %cst_74 {dimension_numbers = #tpu.dot_dimension_numbers<[1], [0], [0], [1], [0, 0, 1, 1], [], []>} : vector<64x64xbf16>, vector<64x1024xbf16>, vector<64x1024xf32> -> vector<64x1024xf32>
    %123 = arith.addf %118, %122 : vector<64x1024xf32>
    %c0_75 = arith.constant 0 : index
    %c0_76 = arith.constant 0 : index
    %124 = vector.load %arg5[%c0_75, %c0_76] : memref<64x1xf32, #tpu.memory_space<vmem>>, vector<64x1xf32>
    %cst_77 = arith.constant 0.000000e+00 : f32
    %125 = vector.broadcast %cst_77 : f32 to vector<1x128xf32>
    %126 = vector.extract_strided_slice %123 {offsets = [0, 0], sizes = [64, 128], strides = [1, 1]} : vector<64x1024xf32> to vector<64x128xf32>
    %127 = vector.extract_strided_slice %123 {offsets = [0, 128], sizes = [64, 128], strides = [1, 1]} : vector<64x1024xf32> to vector<64x128xf32>
    %128 = arith.maximumf %126, %127 : vector<64x128xf32>
    %129 = vector.broadcast %124 : vector<64x1xf32> to vector<64x128xf32>
    %130 = arith.addf %128, %129 : vector<64x128xf32>
    %cst_78 = arith.constant 0.000000e+00 : f32
    %131 = vector.broadcast %cst_78 : f32 to vector<64x128xf32>
    %132 = arith.maximumf %130, %131 : vector<64x128xf32>
    %c0_79 = arith.constant 0 : index
    %c0_80 = arith.constant 0 : index
    %133 = vector.load %arg6[%c0_79, %c0_80] : memref<4x64xf32, #tpu.memory_space<vmem>>, vector<1x64xf32>
    %cst_81 = arith.constant dense<0.000000e+00> : vector<1x128xf32>
    %134 = tpu.matmul %133, %132, %cst_81 {dimension_numbers = #tpu.dot_dimension_numbers<[1], [0], [0], [1], [0, 0, 1, 1], [], []>} : vector<1x64xf32>, vector<64x128xf32>, vector<1x128xf32> -> vector<1x128xf32>
    %135 = arith.addf %125, %134 : vector<1x128xf32>
    %136 = vector.extract_strided_slice %123 {offsets = [0, 256], sizes = [64, 128], strides = [1, 1]} : vector<64x1024xf32> to vector<64x128xf32>
    %137 = vector.extract_strided_slice %123 {offsets = [0, 384], sizes = [64, 128], strides = [1, 1]} : vector<64x1024xf32> to vector<64x128xf32>
    %138 = arith.maximumf %136, %137 : vector<64x128xf32>
    %139 = vector.broadcast %124 : vector<64x1xf32> to vector<64x128xf32>
    %140 = arith.addf %138, %139 : vector<64x128xf32>
    %cst_82 = arith.constant 0.000000e+00 : f32
    %141 = vector.broadcast %cst_82 : f32 to vector<64x128xf32>
    %142 = arith.maximumf %140, %141 : vector<64x128xf32>
    %c1_83 = arith.constant 1 : index
    %c0_84 = arith.constant 0 : index
    %143 = vector.load %arg6[%c1_83, %c0_84] : memref<4x64xf32, #tpu.memory_space<vmem>>, vector<1x64xf32>
    %cst_85 = arith.constant dense<0.000000e+00> : vector<1x128xf32>
    %144 = tpu.matmul %143, %142, %cst_85 {dimension_numbers = #tpu.dot_dimension_numbers<[1], [0], [0], [1], [0, 0, 1, 1], [], []>} : vector<1x64xf32>, vector<64x128xf32>, vector<1x128xf32> -> vector<1x128xf32>
    %145 = arith.addf %135, %144 : vector<1x128xf32>
    %146 = vector.extract_strided_slice %123 {offsets = [0, 512], sizes = [64, 128], strides = [1, 1]} : vector<64x1024xf32> to vector<64x128xf32>
    %147 = vector.extract_strided_slice %123 {offsets = [0, 640], sizes = [64, 128], strides = [1, 1]} : vector<64x1024xf32> to vector<64x128xf32>
    %148 = arith.maximumf %146, %147 : vector<64x128xf32>
    %149 = vector.broadcast %124 : vector<64x1xf32> to vector<64x128xf32>
    %150 = arith.addf %148, %149 : vector<64x128xf32>
    %cst_86 = arith.constant 0.000000e+00 : f32
    %151 = vector.broadcast %cst_86 : f32 to vector<64x128xf32>
    %152 = arith.maximumf %150, %151 : vector<64x128xf32>
    %c2_87 = arith.constant 2 : index
    %c0_88 = arith.constant 0 : index
    %153 = vector.load %arg6[%c2_87, %c0_88] : memref<4x64xf32, #tpu.memory_space<vmem>>, vector<1x64xf32>
    %cst_89 = arith.constant dense<0.000000e+00> : vector<1x128xf32>
    %154 = tpu.matmul %153, %152, %cst_89 {dimension_numbers = #tpu.dot_dimension_numbers<[1], [0], [0], [1], [0, 0, 1, 1], [], []>} : vector<1x64xf32>, vector<64x128xf32>, vector<1x128xf32> -> vector<1x128xf32>
    %155 = arith.addf %145, %154 : vector<1x128xf32>
    %156 = vector.extract_strided_slice %123 {offsets = [0, 768], sizes = [64, 128], strides = [1, 1]} : vector<64x1024xf32> to vector<64x128xf32>
    %157 = vector.extract_strided_slice %123 {offsets = [0, 896], sizes = [64, 128], strides = [1, 1]} : vector<64x1024xf32> to vector<64x128xf32>
    %158 = arith.maximumf %156, %157 : vector<64x128xf32>
    %159 = vector.broadcast %124 : vector<64x1xf32> to vector<64x128xf32>
    %160 = arith.addf %158, %159 : vector<64x128xf32>
    %cst_90 = arith.constant 0.000000e+00 : f32
    %161 = vector.broadcast %cst_90 : f32 to vector<64x128xf32>
    %162 = arith.maximumf %160, %161 : vector<64x128xf32>
    %c3_91 = arith.constant 3 : index
    %c0_92 = arith.constant 0 : index
    %163 = vector.load %arg6[%c3_91, %c0_92] : memref<4x64xf32, #tpu.memory_space<vmem>>, vector<1x64xf32>
    %cst_93 = arith.constant dense<0.000000e+00> : vector<1x128xf32>
    %164 = tpu.matmul %163, %162, %cst_93 {dimension_numbers = #tpu.dot_dimension_numbers<[1], [0], [0], [1], [0, 0, 1, 1], [], []>} : vector<1x64xf32>, vector<64x128xf32>, vector<1x128xf32> -> vector<1x128xf32>
    %165 = arith.addf %155, %164 : vector<1x128xf32>
    %c0_94 = arith.constant 0 : index
    %c0_95 = arith.constant 0 : index
    %166 = vector.load %arg7[%c0_94, %c0_95] : memref<1x1xf32, #tpu.memory_space<vmem>>, vector<1x1xf32>
    %167 = vector.broadcast %166 : vector<1x1xf32> to vector<1x128xf32>
    %168 = arith.addf %165, %167 : vector<1x128xf32>
    %c0_96 = arith.constant 0 : index
    %c0_97 = arith.constant 0 : index
    %169 = vector.load %arg8[%c0_96, %c0_97] : memref<1x128xf32, #tpu.memory_space<vmem>>, vector<1x128xf32>
    tpu.vector_store %arg8[%c0_96, %c0_97], %168 {strides = array<i32>} : memref<1x128xf32, #tpu.memory_space<vmem>>, vector<1x128xf32>,
    return
  }
  func.func @transform_0(%arg0: i32) -> (i32, i32) {
    %c0_i32 = arith.constant 0 : i32
    %c0_i32_0 = arith.constant 0 : i32
    return %c0_i32, %arg0 : i32, i32
  }
  func.func @transform_1(%arg0: i32) -> (i32, i32, i32) {
    %c0_i32 = arith.constant 0 : i32
    %c0_i32_0 = arith.constant 0 : i32
    %c0_i32_1 = arith.constant 0 : i32
    %c0_i32_2 = arith.constant 0 : i32
    return %c0_i32, %c0_i32_0, %c0_i32_1 : i32, i32, i32
  }
  func.func @transform_2(%arg0: i32) -> (i32, i32) {
    %c0_i32 = arith.constant 0 : i32
    %c0_i32_0 = arith.constant 0 : i32
    %c0_i32_1 = arith.constant 0 : i32
    return %c0_i32, %c0_i32_0 : i32, i32
  }
  func.func @transform_3(%arg0: i32) -> (i32, i32, i32) {
    %c0_i32 = arith.constant 0 : i32
    %c0_i32_0 = arith.constant 0 : i32
    %c0_i32_1 = arith.constant 0 : i32
    %c0_i32_2 = arith.constant 0 : i32
    return %c0_i32, %c0_i32_0, %c0_i32_1 : i32, i32, i32
  }
  func.func @transform_4(%arg0: i32) -> (i32, i32) {
    %c0_i32 = arith.constant 0 : i32
    %c0_i32_0 = arith.constant 0 : i32
    %c0_i32_1 = arith.constant 0 : i32
    return %c0_i32, %c0_i32_0 : i32, i32
  }
  func.func @transform_5(%arg0: i32) -> (i32, i32) {
    %c0_i32 = arith.constant 0 : i32
    %c0_i32_0 = arith.constant 0 : i32
    %c0_i32_1 = arith.constant 0 : i32
    return %c0_i32, %c0_i32_0 : i32, i32
  }
  func.func @transform_6(%arg0: i32) -> (i32, i32) {
    %c0_i32 = arith.constant 0 : i32
    %c0_i32_0 = arith.constant 0 : i32
    %c0_i32_1 = arith.constant 0 : i32
    return %c0_i32, %c0_i32_0 : i32, i32
  }
  func.func @transform_7(%arg0: i32) -> (i32, i32) {
    %c0_i32 = arith.constant 0 : i32
    %c0_i32_0 = arith.constant 0 : i32
    return %c0_i32, %arg0 : i32, i32
  }
}

</mosaic_0001>

<bundles_post_ra>
// kernel: tpu_custom_call.1
= control target key start
LH: loop header
LB: loop body
LE: loop exit
PB: predicated region body
PF: predicated region fallthrough
CT: control target
= control target key end

     0   :  { %s11965_s0 = inlined_call_operand.vmem [shape: bf16[4,2560], index: 0, kind: input, shape index: {}]   ;;  %s11966_s1 = inlined_call_operand.vmem [shape: bf16[5,64,4], index: 1, kind: input, shape index: {}]   ;;  %s11967_s2 = inlined_call_operand.vmem [shape: f32[64,1], index: 2, kind: input, shape index: {}]   ;;  %s11968_s3 = inlined_call_operand.vmem [shape: bf16[5,64,64], index: 3, kind: input, shape index: {}]   ;;  %s11969_s4 = inlined_call_operand.vmem [shape: f32[64,1], index: 4, kind: input, shape index: {}]   ;;  %s11970_s5 = inlined_call_operand.vmem [shape: f32[4,64], index: 5, kind: input, shape index: {}]   ;;  %s11971_s6 = inlined_call_operand.<no memory space> [shape: f32[1,1], index: 6, kind: input, shape index: {}]   ;;  %s11972_s7 = inlined_call_operand.hbm [shape: f32[1,128], index: 7, kind: output, shape index: {}]  }
   0x1   :  { %v12_v0 = vstv %s11971_s6 }
   0x2   :  { %13 = vst [vmem:[#allocation3] sm:$0x1] %v12_v0 }
   0x3   :  { %v51_v1 = vld [vmem:[%s11965_s0 + $0x2] sm:$0xff] }
   0x4   :  { %76 = vst [vmem:[#allocation1] ss:$4 sm:$0xff] %v51_v1 }
   0x5   :  { %14 = vsyncpa [#allocation5], 0  ;;  %vm113_vm0 = vcmask 1041408   ;;  %v53_v2 = vld [vmem:[%s11965_s0 + $0x12] sm:$0xff]  ;;  %v8050_v8 = vld [vmem:[%s11966_s1 + $0x20] sm:$0xff]  ;;  %vm100_vm1 = vcmask 31744  }
   0x6   :  { %v8065_v12 = vld [vmem:[%s11966_s1 + $0x28] sm:$0xff]  ;;  %v54_v14 = vld [vmem:[%s11965_s0 + $0x1a] sm:$0xff]  ;;  %v8086_v20 = vld [vmem:[%s11966_s1 + $0x30] sm:$0xff]  ;;  %vm3890_vm2 = vcmask 523264   ;;  %s7995_s10 = smov [#allocation4]   ;;  %s6404_s14 = sshll.u32 %s11972_s7, 4  ;;  %s6405_s14 = int_to_ptr.hbm [resolvable:$true] %s6404_s14 }
   0x7   :  { %v52_v13 = vld [vmem:[%s11965_s0 + $0xa] sm:$0xff]  ;;  %v8101_v24 = vld [vmem:[%s11966_s1 + $0x38] sm:$0xff]  ;;  %v38_v30 = vld [vmem:[%s11965_s0] sm:$0xff]  ;;  %s6402_s11 = sshll.u32 %s7995_s10, 4  ;;  %s6403_s11 = int_to_ptr.vmem [resolvable:$true] %s6402_s11 }
   0x8   :  { %79 = vst [vmem:[#allocation1 + $0x20] ss:$4 sm:$0xff] %v52_v13  ;;  %v39_v59 = vld [vmem:[%s11965_s0 + $0x8] sm:$0xff] }
   0xb   :  { %v80_v3 = vld.sshfl [vmem:[#allocation1] sm:$0xff pattern:$0x73625140]  ;;  %v81_v4 = vld.sshfl [vmem:[#allocation1 + $0x8] sm:$0xff pattern:$0x73625140] }
   0xc   :  { %v114_v5 = vsel %vm113_vm0, %v80_v3, 0  ;;  %v116_v6 = vsel %vm113_vm0, %v81_v4, 0  ;;  %v82_v7 = vld.sshfl [vmem:[#allocation1 + $0x10] sm:$0xff pattern:$0x73625140] }
   0xd   :  { %153 = vmatpush.bf16.msra.mxu0 %v114_v5  ;;  %182 = vmatpush.bf16.msra.mxu1 %v116_v6  ;;  %v118_v9 = vsel %vm113_vm0, %v82_v7, 0  ;;  %v83_v10 = vld.sshfl [vmem:[#allocation1 + $0x18] sm:$0xff pattern:$0x73625140] }
   0xe   :  { %211 = vmatpush.bf16.msra.mxu2 %v118_v9  ;;  %89 = vst [vmem:[#allocation1] ss:$4 sm:$0xff] %v53_v2  ;;  %v120_v11 = vsel %vm113_vm0, %v83_v10, 0 }
   0xf   :  { %240 = vmatpush.bf16.msra.mxu3 %v120_v11  ;;  %v84_v15 = vld.sshfl [vmem:[#allocation1 + $0x20] sm:$0xff pattern:$0x73625140]  ;;  %v85_v16 = vld.sshfl [vmem:[#allocation1 + $0x28] sm:$0xff pattern:$0x73625140] }
  0x10   :  { %6437 = vmatmul.msk.bf16.vlgmr.msra.gmra.mxu0 %vm100_vm1, %v8050_v8  ;;  %6441 = vmatmul.msk.bf16.vlgmr.msra.gmra.mxu1 %vm100_vm1, %v8050_v8  ;;  %v122_v17 = vsel %vm113_vm0, %v84_v15, 0  ;;  %v124_v18 = vsel %vm113_vm0, %v85_v16, 0  ;;  %v86_v19 = vld.sshfl [vmem:[#allocation1 + $0x30] sm:$0xff pattern:$0x73625140] }
  0x11   :  { %6445 = vmatmul.msk.bf16.vlgmr.msra.gmra.mxu2 %vm100_vm1, %v8050_v8  ;;  %269 = vmatpush.bf16.msrb.mxu0 %v122_v17  ;;  %v126_v21 = vsel %vm113_vm0, %v86_v19, 0  ;;  %v87_v22 = vld.sshfl [vmem:[#allocation1 + $0x38] sm:$0xff pattern:$0x73625140] }
  0x12   :  { %6449 = vmatmul.msk.bf16.vlgmr.msra.gmra.mxu3 %vm100_vm1, %v8050_v8  ;;  %298 = vmatpush.bf16.msrb.mxu1 %v124_v18  ;;  %91 = vst [vmem:[#allocation1 + $0x20] ss:$4 sm:$0xff] %v54_v14  ;;  %v128_v23 = vsel %vm113_vm0, %v87_v22, 0 }
  0x13   :  { %327 = vmatpush.bf16.msrb.mxu2 %v126_v21  ;;  %356 = vmatpush.bf16.msrb.mxu3 %v128_v23 }
  0x15   :  { %v92_v25 = vld.sshfl [vmem:[#allocation1] sm:$0xff pattern:$0x73625140]  ;;  %v93_v26 = vld.sshfl [vmem:[#allocation1 + $0x8] sm:$0xff pattern:$0x73625140] }
  0x16   :  { %v130_v27 = vsel %vm113_vm0, %v92_v25, 0  ;;  %v132_v28 = vsel %vm113_vm0, %v93_v26, 0  ;;  %v94_v29 = vld.sshfl [vmem:[#allocation1 + $0x10] sm:$0xff pattern:$0x73625140] }
  0x17   :  { %385 = vmatpush.bf16.msra.mxu0 %v130_v27  ;;  %414 = vmatpush.bf16.msra.mxu1 %v132_v28  ;;  %v134_v31 = vsel %vm113_vm0, %v94_v29, 0  ;;  %v95_v32 = vld.sshfl [vmem:[#allocation1 + $0x18] sm:$0xff pattern:$0x73625140] }
  0x18   :  { %443 = vmatpush.bf16.msra.mxu2 %v134_v31  ;;  %v136_v33 = vsel %vm113_vm0, %v95_v32, 0  ;;  %631 = vst [vmem:[#allocation1] ss:$4 sm:$0xff] %v38_v30 }
  0x19   :  { %472 = vmatpush.bf16.msra.mxu3 %v136_v33  ;;  %v96_v44 = vld.sshfl [vmem:[#allocation1 + $0x20] sm:$0xff pattern:$0x73625140]  ;;  %v97_v45 = vld.sshfl [vmem:[#allocation1 + $0x28] sm:$0xff pattern:$0x73625140] }
  0x1a   :  { %v138_v46 = vsel %vm113_vm0, %v96_v44, 0  ;;  %v140_v47 = vsel %vm113_vm0, %v97_v45, 0  ;;  %v98_v55 = vld.sshfl [vmem:[#allocation1 + $0x30] sm:$0xff pattern:$0x73625140] }
  0x1b   :  { %v99_v56 = vld.sshfl [vmem:[#allocation1 + $0x38] sm:$0xff pattern:$0x73625140]  ;;  %v142_v58 = vsel %vm113_vm0, %v98_v55, 0 }
  0x1c   :  { %v144_v60 = vsel %vm113_vm0, %v99_v56, 0  ;;  %634 = vst [vmem:[#allocation1 + $0x20] ss:$4 sm:$0xff] %v39_v59 }
  0x1f   :  { %v636_v25 = vld.sshfl [vmem:[#allocation1 + $0x8] sm:$0xff pattern:$0x73625140]  ;;  %v637_v44 = vld.sshfl [vmem:[#allocation1 + $0x10] sm:$0xff pattern:$0x73625140] }
  0x20   :  { %6438 = vmatmul.msk.bf16.gmra.mxu0 %vm100_vm1, %v8065_v12  ;;  %6442 = vmatmul.msk.bf16.gmra.mxu1 %vm100_vm1, %v8065_v12  ;;  %v669_v27 = vsel %vm113_vm0, %v636_v25, 0  ;;  %v638_v45 = vld.sshfl [vmem:[#allocation1 + $0x18] sm:$0xff pattern:$0x73625140] }
  0x21   :  { %6446 = vmatmul.msk.bf16.gmra.mxu2 %vm100_vm1, %v8065_v12  ;;  %v673_v55 = vsel %vm113_vm0, %v638_v45, 0 }
  0x22   :  { %6450 = vmatmul.msk.bf16.gmra.mxu3 %vm100_vm1, %v8065_v12 }
  0x30   :  { %6439 = vmatmul.msk.bf16.gmra.mxu0 %vm100_vm1, %v8086_v20  ;;  %6443 = vmatmul.msk.bf16.gmra.mxu1 %vm100_vm1, %v8086_v20 }
  0x31   :  { %6447 = vmatmul.msk.bf16.gmra.mxu2 %vm100_vm1, %v8086_v20 }
  0x32   :  { %6451 = vmatmul.msk.bf16.gmra.mxu3 %vm100_vm1, %v8086_v20 }
  0x40   :  { %6440 = vmatmul.msk.bf16.gmra.mxu0 %vm100_vm1, %v8101_v24  ;;  %6444 = vmatmul.msk.bf16.gmra.mxu1 %vm100_vm1, %v8101_v24 }
  0x41   :  { %6448 = vmatmul.msk.bf16.gmra.mxu2 %vm100_vm1, %v8101_v24 }
  0x42   :  { %6452 = vmatmul.msk.bf16.gmra.mxu3 %vm100_vm1, %v8101_v24 }
  0x50   :  { %6453 = vmatmul.msk.bf16.vlgmr.msrb.gmra.mxu0 %vm100_vm1, %v8050_v8  ;;  %6457 = vmatmul.msk.bf16.vlgmr.msrb.gmra.mxu1 %vm100_vm1, %v8050_v8 }
  0x51   :  { %6461 = vmatmul.msk.bf16.vlgmr.msrb.gmra.mxu2 %vm100_vm1, %v8050_v8  ;;  %501 = vmatpush.bf16.msrb.mxu0 %v138_v46 }
  0x52   :  { %6465 = vmatmul.msk.bf16.vlgmr.msrb.gmra.mxu3 %vm100_vm1, %v8050_v8  ;;  %530 = vmatpush.bf16.msrb.mxu1 %v140_v47  ;;  %v671_v47 = vsel %vm113_vm0, %v637_v44, 0 }
  0x53   :  { %559 = vmatpush.bf16.msrb.mxu2 %v142_v58  ;;  %588 = vmatpush.bf16.msrb.mxu3 %v144_v60 }
  0x60   :  { %6454 = vmatmul.msk.bf16.gmra.mxu0 %vm100_vm1, %v8065_v12  ;;  %6458 = vmatmul.msk.bf16.gmra.mxu1 %vm100_vm1, %v8065_v12 }
  0x61   :  { %6462 = vmatmul.msk.bf16.gmra.mxu2 %vm100_vm1, %v8065_v12 }
  0x62   :  { %6466 = vmatmul.msk.bf16.gmra.mxu3 %vm100_vm1, %v8065_v12 }
  0x70   :  { %6455 = vmatmul.msk.bf16.gmra.mxu0 %vm100_vm1, %v8086_v20  ;;  %6459 = vmatmul.msk.bf16.gmra.mxu1 %vm100_vm1, %v8086_v20 }
  0x71   :  { %6463 = vmatmul.msk.bf16.gmra.mxu2 %vm100_vm1, %v8086_v20 }
  0x72   :  { %6467 = vmatmul.msk.bf16.gmra.mxu3 %vm100_vm1, %v8086_v20 }
  0x80   :  { %6456 = vmatmul.msk.bf16.gmra.mxu0 %vm100_vm1, %v8101_v24  ;;  %6460 = vmatmul.msk.bf16.gmra.mxu1 %vm100_vm1, %v8101_v24 }
  0x81   :  { %6464 = vmatmul.msk.bf16.gmra.mxu2 %vm100_vm1, %v8101_v24 }
  0x82   :  { %6468 = vmatmul.msk.bf16.gmra.mxu3 %vm100_vm1, %v8101_v24 }
  0x8d   :  { %v8150_v34 = vpop.f32.mrf.mxu0  ;;  %v8152_v35 = vpop.f32.mrf.mxu1 }
  0x90   :  { %6469 = vmatmul.msk.bf16.vlgmr.msra.gmra.mxu0 %vm100_vm1, %v8050_v8  ;;  %6473 = vmatmul.msk.bf16.vlgmr.msra.gmra.mxu1 %vm100_vm1, %v8050_v8 }
  0x91   :  { %6477 = vmatmul.msk.bf16.vlgmr.msra.gmra.mxu2 %vm100_vm1, %v8050_v8  ;;  %735 = vmatpush.bf16.msra.mxu1 %v669_v27 }
  0x92   :  { %6481 = vmatmul.msk.bf16.vlgmr.msra.gmra.mxu3 %vm100_vm1, %v8050_v8  ;;  %764 = vmatpush.bf16.msra.mxu2 %v671_v47 }
  0x93   :  { %793 = vmatpush.bf16.msra.mxu3 %v673_v55 }
  0x94   :  { %v8162_v36 = vpop.f32.mrf.mxu2 }
  0x95   :  { %v8164_v37 = vpop.f32.mrf.mxu3  ;;  %v8166_v38 = vpop.f32.mrf.mxu0 }
  0x96   :  { %v8168_v39 = vpop.f32.mrf.mxu1 }
  0x9c   :  { %v8170_v40 = vpop.f32.mrf.mxu2 }
  0x9d   :  { %v8172_v41 = vpop.f32.mrf.mxu3  ;;  %v8174_v42 = vpop.f32.mrf.mxu0 }
  0x9e   :  { %v8176_v43 = vpop.f32.mrf.mxu1 }
  0xa0   :  { %6470 = vmatmul.msk.bf16.gmra.mxu0 %vm100_vm1, %v8065_v12  ;;  %6474 = vmatmul.msk.bf16.gmra.mxu1 %vm100_vm1, %v8065_v12 }
  0xa1   :  { %6478 = vmatmul.msk.bf16.gmra.mxu2 %vm100_vm1, %v8065_v12 }
  0xa2   :  { %6482 = vmatmul.msk.bf16.gmra.mxu3 %vm100_vm1, %v8065_v12 }
  0xa4   :  { %v8188_v48 = vpop.f32.mrf.mxu2 }
  0xa5   :  { %v8190_v49 = vpop.f32.mrf.mxu3  ;;  %v8192_v50 = vpop.f32.mrf.mxu0 }
  0xa6   :  { %v8194_v51 = vpop.f32.mrf.mxu1 }
  0xac   :  { %v8196_v52 = vpop.f32.mrf.mxu2 }
  0xad   :  { %v8198_v53 = vpop.f32.mrf.mxu3  ;;  %v8200_v54 = vpop.f32.mrf.mxu0 }
  0xae   :  { %v8202_v57 = vpop.f32.mrf.mxu1 }
  0xb0   :  { %6471 = vmatmul.msk.bf16.gmra.mxu0 %vm100_vm1, %v8086_v20  ;;  %6475 = vmatmul.msk.bf16.gmra.mxu1 %vm100_vm1, %v8086_v20 }
  0xb1   :  { %6479 = vmatmul.msk.bf16.gmra.mxu2 %vm100_vm1, %v8086_v20 }
  0xb2   :  { %6483 = vmatmul.msk.bf16.gmra.mxu3 %vm100_vm1, %v8086_v20 }
  0xb4   :  { %v8217_v61 = vpop.f32.mrf.mxu2 }
  0xb5   :  { %v8219_v62 = vpop.f32.mrf.mxu3  ;;  %v8221_v63 = vpop.f32.mrf.mxu0 }
  0xb6   :  { %v8223_v0 = vpop.f32.mrf.mxu1 }
  0xbc   :  { %v8225_v1 = vpop.f32.mrf.mxu2 }
  0xbd   :  { %v8227_v2 = vpop.f32.mrf.mxu3  ;;  %v8229_v3 = vpop.f32.mrf.mxu0 }
  0xbe   :  { %11973 = vst [vmem:[#allocation7_spill] sm:$0xff] %v8229_v3  ;;  %v8231_v4 = vpop.f32.mrf.mxu1 }
  0xbf   :  { %11974 = vst [vmem:[#allocation8_spill] sm:$0xff] %v8231_v4 }
  0xc0   :  { %6472 = vmatmul.msk.bf16.gmra.mxu0 %vm100_vm1, %v8101_v24  ;;  %6476 = vmatmul.msk.bf16.gmra.mxu1 %vm100_vm1, %v8101_v24 }
  0xc1   :  { %6480 = vmatmul.msk.bf16.gmra.mxu2 %vm100_vm1, %v8101_v24 }
  0xc2   :  { %6484 = vmatmul.msk.bf16.gmra.mxu3 %vm100_vm1, %v8101_v24 }
  0xc4   :  { %v8241_v5 = vpop.f32.mrf.mxu2 }
  0xc5   :  { %11975 = vst [vmem:[#allocation9_spill] sm:$0xff] %v8241_v5  ;;  %v8243_v6 = vpop.f32.mrf.mxu3  ;;  %v8245_v7 = vpop.f32.mrf.mxu0 }
  0xc6   :  { %11976 = vst [vmem:[#allocation10_spill] sm:$0xff] %v8243_v6  ;;  %v8247_v9 = vpop.f32.mrf.mxu1 }
  0xc7   :  { %11977 = vst [vmem:[#allocation11_spill] sm:$0xff] %v8245_v7 }
  0xc8   :  { %11978 = vst [vmem:[#allocation12_spill] sm:$0xff] %v8247_v9 }
  0xcc   :  { %v8249_v10 = vpop.f32.mrf.mxu2 }
  0xcd   :  { %11979 = vst [vmem:[#allocation13_spill] sm:$0xff] %v8249_v10  ;;  %v8251_v11 = vpop.f32.mrf.mxu3  ;;  %v8253_v13 = vpop.f32.mrf.mxu0 }
  0xce   :  { %11980 = vst [vmem:[#allocation14_spill] sm:$0xff] %v8251_v11  ;;  %v8255_v14 = vpop.f32.mrf.mxu1 }
  0xcf   :  { %11981 = vst [vmem:[#allocation15_spill] sm:$0xff] %v8253_v13 }
  0xd0   :  { %11982 = vst [vmem:[#allocation16_spill] sm:$0xff] %v8255_v14  ;;  %6485 = vmatmul.msk.bf16.vlgmr.msrb.gmra.mxu0 %vm100_vm1, %v8050_v8  ;;  %6489 = vmatmul.msk.bf16.vlgmr.msrb.gmra.mxu1 %vm100_vm1, %v8050_v8 }
  0xd1   :  { %6493 = vmatmul.msk.bf16.vlgmr.msrb.gmra.mxu2 %vm100_vm1, %v8050_v8 }
  0xd2   :  { %6497 = vmatmul.msk.bf16.vlgmr.msrb.gmra.mxu3 %vm100_vm1, %v8050_v8  ;;  %v635_v8 = vld.sshfl [vmem:[#allocation1] sm:$0xff pattern:$0x73625140] }
  0xd3   :  { %v667_v26 = vsel %vm113_vm0, %v635_v8, 0 }
  0xd4   :  { %v8265_v15 = vpop.f32.mrf.mxu2  ;;  %706 = vmatpush.bf16.msra.mxu0 %v667_v26 }
  0xd5   :  { %11983 = vst [vmem:[#allocation17_spill] sm:$0xff] %v8265_v15  ;;  %v8267_v16 = vpop.f32.mrf.mxu3  ;;  %v8269_v17 = vpop.f32.mrf.mxu0 }
  0xd6   :  { %11984 = vst [vmem:[#allocation18_spill] sm:$0xff] %v8267_v16  ;;  %v8271_v18 = vpop.f32.mrf.mxu1 }
  0xd7   :  { %11985 = vst [vmem:[#allocation19_spill] sm:$0xff] %v8269_v17 }
  0xd8   :  { %11986 = vst [vmem:[#allocation20_spill] sm:$0xff] %v8271_v18 }
  0xdc   :  { %v8273_v19 = vpop.f32.mrf.mxu2 }
  0xdd   :  { %11987 = vst [vmem:[#allocation21_spill] sm:$0xff] %v8273_v19  ;;  %v8275_v21 = vpop.f32.mrf.mxu3  ;;  %v8277_v22 = vpop.f32.mrf.mxu0 }
  0xde   :  { %11988 = vst [vmem:[#allocation22_spill] sm:$0xff] %v8275_v21  ;;  %v8279_v23 = vpop.f32.mrf.mxu1 }
  0xdf   :  { %11989 = vst [vmem:[#allocation23_spill] sm:$0xff] %v8277_v22 }
  0xe0   :  { %11990 = vst [vmem:[#allocation24_spill] sm:$0xff] %v8279_v23  ;;  %6486 = vmatmul.msk.bf16.gmra.mxu0 %vm100_vm1, %v8065_v12  ;;  %6490 = vmatmul.msk.bf16.gmra.mxu1 %vm100_vm1, %v8065_v12 }
  0xe1   :  { %6494 = vmatmul.msk.bf16.gmra.mxu2 %vm100_vm1, %v8065_v12 }
  0xe2   :  { %6498 = vmatmul.msk.bf16.gmra.mxu3 %vm100_vm1, %v8065_v12 }
  0xe4   :  { %v8291_v28 = vpop.f32.mrf.mxu2 }
  0xe5   :  { %11991 = vst [vmem:[#allocation25_spill] sm:$0xff] %v8291_v28  ;;  %v8293_v29 = vpop.f32.mrf.mxu3  ;;  %v8295_v30 = vpop.f32.mrf.mxu0 }
  0xe6   :  { %11992 = vst [vmem:[#allocation26_spill] sm:$0xff] %v8293_v29  ;;  %v8297_v31 = vpop.f32.mrf.mxu1 }
  0xe7   :  { %11993 = vst [vmem:[#allocation27_spill] sm:$0xff] %v8295_v30 }
  0xe8   :  { %11994 = vst [vmem:[#allocation28_spill] sm:$0xff] %v8297_v31 }
  0xec   :  { %v8299_v32 = vpop.f32.mrf.mxu2 }
  0xed   :  { %11995 = vst [vmem:[#allocation29_spill] sm:$0xff] %v8299_v32  ;;  %v8301_v33 = vpop.f32.mrf.mxu3  ;;  %v8303_v12 = vpop.f32.mrf.mxu0 }
  0xee   :  { %11996 = vst [vmem:[#allocation30_spill] sm:$0xff] %v8301_v33  ;;  %v8305_v46 = vpop.f32.mrf.mxu1 }
  0xef   :  { %11997 = vst [vmem:[#allocation31_spill] sm:$0xff] %v8303_v12 }
  0xf0   :  { %11998 = vst [vmem:[#allocation32_spill] sm:$0xff] %v8305_v46  ;;  %6487 = vmatmul.msk.bf16.gmra.mxu0 %vm100_vm1, %v8086_v20  ;;  %6491 = vmatmul.msk.bf16.gmra.mxu1 %vm100_vm1, %v8086_v20 }
  0xf1   :  { %6495 = vmatmul.msk.bf16.gmra.mxu2 %vm100_vm1, %v8086_v20 }
  0xf2   :  { %6499 = vmatmul.msk.bf16.gmra.mxu3 %vm100_vm1, %v8086_v20 }
  0xf4   :  { %v8317_v56 = vpop.f32.mrf.mxu2 }
  0xf5   :  { %11999 = vst [vmem:[#allocation33_spill] sm:$0xff] %v8317_v56  ;;  %v8319_v58 = vpop.f32.mrf.mxu3  ;;  %v8321_v59 = vpop.f32.mrf.mxu0 }
  0xf6   :  { %12000 = vst [vmem:[#allocation34_spill] sm:$0xff] %v8319_v58  ;;  %v8323_v60 = vpop.f32.mrf.mxu1 }
  0xf7   :  { %12001 = vst [vmem:[#allocation35_spill] sm:$0xff] %v8321_v59  ;;  %v8414_v59 = vld [vmem:[%s11966_s1 + $0x10] sm:$0xff] }
  0xf8   :  { %12002 = vst [vmem:[#allocation36_spill] sm:$0xff] %v8323_v60 }
  0xfc   :  { %v8325_v8 = vpop.f32.mrf.mxu2 }
  0xfd   :  { %12003 = vst [vmem:[#allocation37_spill] sm:$0xff] %v8325_v8  ;;  %v8327_v25 = vpop.f32.mrf.mxu3  ;;  %v8329_v26 = vpop.f32.mrf.mxu0 }
  0xfe   :  { %12004 = vst [vmem:[#allocation38_spill] sm:$0xff] %v8327_v25  ;;  %v8331_v27 = vpop.f32.mrf.mxu1 }
  0xff   :  { %12005 = vst [vmem:[#allocation39_spill] sm:$0xff] %v8329_v26 }
 0x100   :  { %12006 = vst [vmem:[#allocation40_spill] sm:$0xff] %v8331_v27  ;;  %6488 = vmatmul.msk.bf16.gmra.mxu0 %vm100_vm1, %v8101_v24  ;;  %6492 = vmatmul.msk.bf16.gmra.mxu1 %vm100_vm1, %v8101_v24  ;;  %v8354_v27 = vld [vmem:[%s11966_s1] sm:$0xff] }
 0x101   :  { %6496 = vmatmul.msk.bf16.gmra.mxu2 %vm100_vm1, %v8101_v24 }
 0x102   :  { %6500 = vmatmul.msk.bf16.gmra.mxu3 %vm100_vm1, %v8101_v24 }
 0x104   :  { %v8341_v20 = vpop.f32.mrf.mxu2 }
 0x105   :  { %12007 = vst [vmem:[#allocation41_spill] sm:$0xff] %v8341_v20  ;;  %v8343_v44 = vpop.f32.mrf.mxu3  ;;  %v8345_v45 = vpop.f32.mrf.mxu0 }
 0x106   :  { %12008 = vst [vmem:[#allocation42_spill] sm:$0xff] %v8343_v44  ;;  %v8347_v47 = vpop.f32.mrf.mxu1 }
 0x107   :  { %12009 = vst [vmem:[#allocation43_spill] sm:$0xff] %v8345_v45  ;;  %v8383_v45 = vld [vmem:[%s11966_s1 + $0x8] sm:$0xff] }
 0x108   :  { %12010 = vst [vmem:[#allocation44_spill] sm:$0xff] %v8347_v47 }
 0x10c   :  { %v8349_v55 = vpop.f32.mrf.mxu2 }
 0x10d   :  { %12011 = vst [vmem:[#allocation45_spill] sm:$0xff] %v8349_v55  ;;  %v8356_v26 = vpop.f32.mrf.mxu3  ;;  %v8358_v25 = vpop.f32.mrf.mxu0 }
 0x10e   :  { %12012 = vst [vmem:[#allocation46_spill] sm:$0xff] %v8356_v26  ;;  %v8360_v24 = vpop.f32.mrf.mxu1 }
 0x10f   :  { %12013 = vst [vmem:[#allocation47_spill] sm:$0xff] %v8358_v25 }
 0x110   :  { %12014 = vst [vmem:[#allocation48_spill] sm:$0xff] %v8360_v24  ;;  %6517 = vmatmul.msk.bf16.vlgmr.msra.gmra.mxu0 %vm100_vm1, %v8354_v27  ;;  %6521 = vmatmul.msk.bf16.vlgmr.msra.gmra.mxu1 %vm100_vm1, %v8354_v27 }
 0x111   :  { %6525 = vmatmul.msk.bf16.vlgmr.msra.gmra.mxu2 %vm100_vm1, %v8354_v27 }
 0x112   :  { %6529 = vmatmul.msk.bf16.vlgmr.msra.gmra.mxu3 %vm100_vm1, %v8354_v27 }
 0x114   :  { %v8370_v55 = vpop.f32.mrf.mxu2 }
 0x115   :  { %12015 = vst [vmem:[#allocation49_spill] sm:$0xff] %v8370_v55  ;;  %v8372_v47 = vpop.f32.mrf.mxu3  ;;  %v8374_v26 = vpop.f32.mrf.mxu0 }
 0x116   :  { %12016 = vst [vmem:[#allocation50_spill] sm:$0xff] %v8372_v47  ;;  %v8376_v25 = vpop.f32.mrf.mxu1 }
 0x117   :  { %12017 = vst [vmem:[#allocation51_spill] sm:$0xff] %v8374_v26 }
 0x118   :  { %12018 = vst [vmem:[#allocation52_spill] sm:$0xff] %v8376_v25  ;;  %v640_v25 = vld.sshfl [vmem:[#allocation1 + $0x28] sm:$0xff pattern:$0x73625140] }
 0x11c   :  { %v8378_v24 = vpop.f32.mrf.mxu2 }
 0x11d   :  { %12019 = vst [vmem:[#allocation53_spill] sm:$0xff] %v8378_v24  ;;  %v8385_v44 = vpop.f32.mrf.mxu3  ;;  %v8387_v20 = vpop.f32.mrf.mxu0  ;;  %v639_v24 = vld.sshfl [vmem:[#allocation1 + $0x20] sm:$0xff pattern:$0x73625140] }
 0x11e   :  { %12020 = vst [vmem:[#allocation54_spill] sm:$0xff] %v8385_v44  ;;  %v8389_v8 = vpop.f32.mrf.mxu1  ;;  %v675_v44 = vsel %vm113_vm0, %v639_v24, 0 }
 0x11f   :  { %12021 = vst [vmem:[#allocation55_spill] sm:$0xff] %v8387_v20  ;;  %v677_v20 = vsel %vm113_vm0, %v640_v25, 0  ;;  %822 = vmatpush.bf16.msrb.mxu0 %v675_v44  ;;  %v642_v44 = vld.sshfl [vmem:[#allocation1 + $0x38] sm:$0xff pattern:$0x73625140] }
 0x120   :  { %12022 = vst [vmem:[#allocation56_spill] sm:$0xff] %v8389_v8  ;;  %6518 = vmatmul.msk.bf16.gmra.mxu0 %vm100_vm1, %v8383_v45  ;;  %6522 = vmatmul.msk.bf16.gmra.mxu1 %vm100_vm1, %v8383_v45 }
 0x121   :  { %6526 = vmatmul.msk.bf16.gmra.mxu2 %vm100_vm1, %v8383_v45  ;;  %851 = vmatpush.bf16.msrb.mxu1 %v677_v20 }
 0x122   :  { %6530 = vmatmul.msk.bf16.gmra.mxu3 %vm100_vm1, %v8383_v45 }
 0x124   :  { %v8401_v26 = vpop.f32.mrf.mxu2 }
 0x125   :  { %12023 = vst [vmem:[#allocation57_spill] sm:$0xff] %v8401_v26  ;;  %v8403_v8 = vpop.f32.mrf.mxu3  ;;  %v8405_v47 = vpop.f32.mrf.mxu0  ;;  %v641_v26 = vld.sshfl [vmem:[#allocation1 + $0x30] sm:$0xff pattern:$0x73625140] }
 0x126   :  { %12024 = vst [vmem:[#allocation58_spill] sm:$0xff] %v8403_v8  ;;  %v8407_v55 = vpop.f32.mrf.mxu1  ;;  %v679_v8 = vsel %vm113_vm0, %v641_v26, 0 }
 0x127   :  { %12025 = vst [vmem:[#allocation59_spill] sm:$0xff] %v8405_v47  ;;  %v681_v47 = vsel %vm113_vm0, %v642_v44, 0  ;;  %880 = vmatpush.bf16.msrb.mxu2 %v679_v8  ;;  %v8445_v44 = vld [vmem:[%s11966_s1 + $0x18] sm:$0xff] }
 0x128   :  { %12026 = vst [vmem:[#allocation60_spill] sm:$0xff] %v8407_v55  ;;  %909 = vmatpush.bf16.msrb.mxu3 %v681_v47 }
 0x12c   :  { %v8409_v60 = vpop.f32.mrf.mxu2 }
 0x12d   :  { %12027 = vst [vmem:[#allocation61_spill] sm:$0xff] %v8409_v60  ;;  %v8416_v24 = vpop.f32.mrf.mxu3  ;;  %v8418_v25 = vpop.f32.mrf.mxu0 }
 0x12e   :  { %12028 = vst [vmem:[#allocation62_spill] sm:$0xff] %v8416_v24  ;;  %v8420_v20 = vpop.f32.mrf.mxu1 }
 0x12f   :  { %12029 = vst [vmem:[#allocation63_spill] sm:$0xff] %v8418_v25 }
 0x130   :  { %12030 = vst [vmem:[#allocation64_spill] sm:$0xff] %v8420_v20  ;;  %6519 = vmatmul.msk.bf16.gmra.mxu0 %vm100_vm1, %v8414_v59  ;;  %6523 = vmatmul.msk.bf16.gmra.mxu1 %vm100_vm1, %v8414_v59 }
 0x131   :  { %6527 = vmatmul.msk.bf16.gmra.mxu2 %vm100_vm1, %v8414_v59 }
 0x132   :  { %6531 = vmatmul.msk.bf16.gmra.mxu3 %vm100_vm1, %v8414_v59 }
 0x134   :  { %v8432_v25 = vpop.f32.mrf.mxu2 }
 0x135   :  { %12031 = vst [vmem:[#allocation65_spill] sm:$0xff] %v8432_v25  ;;  %v8434_v20 = vpop.f32.mrf.mxu3  ;;  %v8436_v26 = vpop.f32.mrf.mxu0 }
 0x136   :  { %12032 = vst [vmem:[#allocation66_spill] sm:$0xff] %v8434_v20  ;;  %v8438_v8 = vpop.f32.mrf.mxu1 }
 0x137   :  { %12033 = vst [vmem:[#allocation67_spill] sm:$0xff] %v8436_v26 }
 0x138   :  { %12034 = vst [vmem:[#allocation68_spill] sm:$0xff] %v8438_v8 }
 0x13c   :  { %v8440_v47 = vpop.f32.mrf.mxu2 }
 0x13d   :  { %12035 = vst [vmem:[#allocation69_spill] sm:$0xff] %v8440_v47  ;;  %v8447_v24 = vpop.f32.mrf.mxu3  ;;  %v8449_v60 = vpop.f32.mrf.mxu0 }
 0x13e   :  { %12036 = vst [vmem:[#allocation70_spill] sm:$0xff] %v8447_v24  ;;  %v8451_v55 = vpop.f32.mrf.mxu1 }
 0x13f   :  { %12037 = vst [vmem:[#allocation71_spill] sm:$0xff] %v8449_v60 }
 0x140   :  { %12038 = vst [vmem:[#allocation72_spill] sm:$0xff] %v8451_v55  ;;  %6520 = vmatmul.msk.bf16.gmra.mxu0 %vm100_vm1, %v8445_v44  ;;  %6524 = vmatmul.msk.bf16.gmra.mxu1 %vm100_vm1, %v8445_v44 }
 0x141   :  { %6528 = vmatmul.msk.bf16.gmra.mxu2 %vm100_vm1, %v8445_v44 }
 0x142   :  { %6532 = vmatmul.msk.bf16.gmra.mxu3 %vm100_vm1, %v8445_v44 }
 0x144   :  { %v8461_v47 = vpop.f32.mrf.mxu2 }
 0x145   :  { %12039 = vst [vmem:[#allocation73_spill] sm:$0xff] %v8461_v47  ;;  %v8463_v8 = vpop.f32.mrf.mxu3  ;;  %v8465_v24 = vpop.f32.mrf.mxu0 }
 0x146   :  { %12040 = vst [vmem:[#allocation74_spill] sm:$0xff] %v8463_v8  ;;  %v8467_v60 = vpop.f32.mrf.mxu1 }
 0x147   :  { %12041 = vst [vmem:[#allocation75_spill] sm:$0xff] %v8465_v24 }
 0x148   :  { %12042 = vst [vmem:[#allocation76_spill] sm:$0xff] %v8467_v60 }
 0x14c   :  { %v8469_v55 = vpop.f32.mrf.mxu2 }
 0x14d   :  { %12043 = vst [vmem:[#allocation77_spill] sm:$0xff] %v8469_v55  ;;  %v8471_v26 = vpop.f32.mrf.mxu3  ;;  %v8473_v20 = vpop.f32.mrf.mxu0 }
 0x14e   :  { %12044 = vst [vmem:[#allocation78_spill] sm:$0xff] %v8471_v26  ;;  %v8475_v25 = vpop.f32.mrf.mxu1 }
 0x14f   :  { %12045 = vst [vmem:[#allocation79_spill] sm:$0xff] %v8473_v20 }
 0x150   :  { %12046 = vst [vmem:[#allocation80_spill] sm:$0xff] %v8475_v25  ;;  %6533 = vmatmul.msk.bf16.vlgmr.msrb.gmra.mxu0 %vm100_vm1, %v8354_v27  ;;  %6537 = vmatmul.msk.bf16.vlgmr.msrb.gmra.mxu1 %vm100_vm1, %v8354_v27 }
 0x151   :  { %6541 = vmatmul.msk.bf16.vlgmr.msrb.gmra.mxu2 %vm100_vm1, %v8354_v27 }
 0x152   :  { %6545 = vmatmul.msk.bf16.vlgmr.msrb.gmra.mxu3 %vm100_vm1, %v8354_v27 }
 0x154   :  { %v8485_v60 = vpop.f32.mrf.mxu2 }
 0x155   :  { %12047 = vst [vmem:[#allocation81_spill] sm:$0xff] %v8485_v60  ;;  %v8487_v55 = vpop.f32.mrf.mxu3  ;;  %v8489_v26 = vpop.f32.mrf.mxu0 }
 0x156   :  { %12048 = vst [vmem:[#allocation82_spill] sm:$0xff] %v8487_v55  ;;  %v8491_v20 = vpop.f32.mrf.mxu1 }
 0x157   :  { %12049 = vst [vmem:[#allocation83_spill] sm:$0xff] %v8489_v26 }
 0x158   :  { %12050 = vst [vmem:[#allocation84_spill] sm:$0xff] %v8491_v20 }
 0x15c   :  { %v8493_v25 = vpop.f32.mrf.mxu2 }
 0x15d   :  { %12051 = vst [vmem:[#allocation85_spill] sm:$0xff] %v8493_v25  ;;  %v8495_v24 = vpop.f32.mrf.mxu3  ;;  %v8497_v8 = vpop.f32.mrf.mxu0 }
 0x15e   :  { %12052 = vst [vmem:[#allocation86_spill] sm:$0xff] %v8495_v24  ;;  %v8499_v47 = vpop.f32.mrf.mxu1  ;;  %v40_v24 = vld [vmem:[%s11965_s0 + $0x10] sm:$0xff] }
 0x15f   :  { %12053 = vst [vmem:[#allocation87_spill] sm:$0xff] %v8497_v8 }
 0x160   :  { %12054 = vst [vmem:[#allocation88_spill] sm:$0xff] %v8499_v47  ;;  %6534 = vmatmul.msk.bf16.gmra.mxu0 %vm100_vm1, %v8383_v45  ;;  %6538 = vmatmul.msk.bf16.gmra.mxu1 %vm100_vm1, %v8383_v45 }
 0x161   :  { %6542 = vmatmul.msk.bf16.gmra.mxu2 %vm100_vm1, %v8383_v45  ;;  %644 = vst [vmem:[#allocation1] ss:$4 sm:$0xff] %v40_v24 }
 0x162   :  { %6546 = vmatmul.msk.bf16.gmra.mxu3 %vm100_vm1, %v8383_v45 }
 0x164   :  { %v8512_v8 = vpop.f32.mrf.mxu2 }
 0x165   :  { %12055 = vst [vmem:[#allocation89_spill] sm:$0xff] %v8512_v8  ;;  %v8514_v47 = vpop.f32.mrf.mxu3  ;;  %v8516_v25 = vpop.f32.mrf.mxu0 }
 0x166   :  { %12056 = vst [vmem:[#allocation90_spill] sm:$0xff] %v8514_v47  ;;  %v8518_v20 = vpop.f32.mrf.mxu1 }
 0x167   :  { %12057 = vst [vmem:[#allocation91_spill] sm:$0xff] %v8516_v25 }
 0x168   :  { %12058 = vst [vmem:[#allocation92_spill] sm:$0xff] %v8518_v20  ;;  %v647_v26 = vld.sshfl [vmem:[#allocation1] sm:$0xff pattern:$0x73625140] }
 0x169   :  { %v648_v55 = vld.sshfl [vmem:[#allocation1 + $0x8] sm:$0xff pattern:$0x73625140]  ;;  %v683_v60 = vsel %vm113_vm0, %v647_v26, 0 }
 0x16a   :  { %v685_v58 = vsel %vm113_vm0, %v648_v55, 0  ;;  %938 = vmatpush.bf16.msra.mxu0 %v683_v60  ;;  %v649_v8 = vld.sshfl [vmem:[#allocation1 + $0x10] sm:$0xff pattern:$0x73625140] }
 0x16b   :  { %967 = vmatpush.bf16.msra.mxu1 %v685_v58  ;;  %v650_v47 = vld.sshfl [vmem:[#allocation1 + $0x18] sm:$0xff pattern:$0x73625140]  ;;  %v687_v20 = vsel %vm113_vm0, %v649_v8, 0 }
 0x16c   :  { %v8522_v56 = vpop.f32.mrf.mxu2  ;;  %v689_v25 = vsel %vm113_vm0, %v650_v47, 0  ;;  %996 = vmatpush.bf16.msra.mxu2 %v687_v20 }
 0x16d   :  { %12059 = vst [vmem:[#allocation93_spill] sm:$0xff] %v8522_v56  ;;  %v8524_v46 = vpop.f32.mrf.mxu3  ;;  %v8526_v24 = vpop.f32.mrf.mxu0  ;;  %1025 = vmatpush.bf16.msra.mxu3 %v689_v25 }
 0x16e   :  { %12060 = vst [vmem:[#allocation94_spill] sm:$0xff] %v8524_v46  ;;  %v8528_v12 = vpop.f32.mrf.mxu1  ;;  %v41_v46 = vld [vmem:[%s11965_s0 + $0x18] sm:$0xff] }
 0x16f   :  { %12061 = vst [vmem:[#allocation95_spill] sm:$0xff] %v8526_v24 }
 0x170   :  { %12062 = vst [vmem:[#allocation96_spill] sm:$0xff] %v8528_v12  ;;  %6535 = vmatmul.msk.bf16.gmra.mxu0 %vm100_vm1, %v8414_v59  ;;  %6539 = vmatmul.msk.bf16.gmra.mxu1 %vm100_vm1, %v8414_v59 }
 0x171   :  { %6543 = vmatmul.msk.bf16.gmra.mxu2 %vm100_vm1, %v8414_v59  ;;  %646 = vst [vmem:[#allocation1 + $0x20] ss:$4 sm:$0xff] %v41_v46 }
 0x172   :  { %6547 = vmatmul.msk.bf16.gmra.mxu3 %vm100_vm1, %v8414_v59 }
 0x174   :  { %v8540_v58 = vpop.f32.mrf.mxu2 }
 0x175   :  { %12063 = vst [vmem:[#allocation97_spill] sm:$0xff] %v8540_v58  ;;  %v8542_v60 = vpop.f32.mrf.mxu3  ;;  %v8544_v55 = vpop.f32.mrf.mxu0 }
 0x176   :  { %12064 = vst [vmem:[#allocation98_spill] sm:$0xff] %v8542_v60  ;;  %v8546_v20 = vpop.f32.mrf.mxu1 }
 0x177   :  { %12065 = vst [vmem:[#allocation99_spill] sm:$0xff] %v8544_v55 }
 0x178   :  { %12066 = vst [vmem:[#allocation100_spill] sm:$0xff] %v8546_v20  ;;  %v651_v30 = vld.sshfl [vmem:[#allocation1 + $0x20] sm:$0xff pattern:$0x73625140] }
 0x179   :  { %v652_v29 = vld.sshfl [vmem:[#allocation1 + $0x28] sm:$0xff pattern:$0x73625140]  ;;  %v691_v28 = vsel %vm113_vm0, %v651_v30, 0 }
 0x17a   :  { %v693_v23 = vsel %vm113_vm0, %v652_v29, 0  ;;  %1054 = vmatpush.bf16.msrb.mxu0 %v691_v28  ;;  %v653_v19 = vld.sshfl [vmem:[#allocation1 + $0x30] sm:$0xff pattern:$0x73625140] }
 0x17b   :  { %1083 = vmatpush.bf16.msrb.mxu1 %v693_v23  ;;  %v654_v18 = vld.sshfl [vmem:[#allocation1 + $0x38] sm:$0xff pattern:$0x73625140]  ;;  %v695_v16 = vsel %vm113_vm0, %v653_v19, 0 }
 0x17c   :  { %v8548_v25 = vpop.f32.mrf.mxu2  ;;  %v697_v15 = vsel %vm113_vm0, %v654_v18, 0  ;;  %1112 = vmatpush.bf16.msrb.mxu2 %v695_v16 }
 0x17d   :  { %12067 = vst [vmem:[#allocation101_spill] sm:$0xff] %v8548_v25  ;;  %v8550_v26 = vpop.f32.mrf.mxu3  ;;  %v8552_v8 = vpop.f32.mrf.mxu0  ;;  %1141 = vmatpush.bf16.msrb.mxu3 %v697_v15 }
 0x17e   :  { %12068 = vst [vmem:[#allocation102_spill] sm:$0xff] %v8550_v26  ;;  %v8554_v47 = vpop.f32.mrf.mxu1 }
 0x17f   :  { %12069 = vst [vmem:[#allocation103_spill] sm:$0xff] %v8552_v8 }
 0x180   :  { %12070 = vst [vmem:[#allocation104_spill] sm:$0xff] %v8554_v47  ;;  %6536 = vmatmul.msk.bf16.gmra.mxu0 %vm100_vm1, %v8445_v44  ;;  %6540 = vmatmul.msk.bf16.gmra.mxu1 %vm100_vm1, %v8445_v44 }
 0x181   :  { %6544 = vmatmul.msk.bf16.gmra.mxu2 %vm100_vm1, %v8445_v44 }
 0x182   :  { %6548 = vmatmul.msk.bf16.gmra.mxu3 %vm100_vm1, %v8445_v44 }
 0x184   :  { %v8564_v20 = vpop.f32.mrf.mxu2 }
 0x185   :  { %12071 = vst [vmem:[#allocation105_spill] sm:$0xff] %v8564_v20  ;;  %v8566_v25 = vpop.f32.mrf.mxu3  ;;  %v8568_v26 = vpop.f32.mrf.mxu0 }
 0x186   :  { %12072 = vst [vmem:[#allocation106_spill] sm:$0xff] %v8566_v25  ;;  %v8570_v8 = vpop.f32.mrf.mxu1 }
 0x187   :  { %12073 = vst [vmem:[#allocation107_spill] sm:$0xff] %v8568_v26 }
 0x188   :  { %12074 = vst [vmem:[#allocation108_spill] sm:$0xff] %v8570_v8 }
 0x18c   :  { %v8572_v47 = vpop.f32.mrf.mxu2 }
 0x18d   :  { %12075 = vst [vmem:[#allocation109_spill] sm:$0xff] %v8572_v47  ;;  %v8574_v55 = vpop.f32.mrf.mxu3  ;;  %v8576_v60 = vpop.f32.mrf.mxu0 }
 0x18e   :  { %12076 = vst [vmem:[#allocation110_spill] sm:$0xff] %v8574_v55  ;;  %v8578_v58 = vpop.f32.mrf.mxu1 }
 0x190   :  { %6549 = vmatmul.msk.bf16.vlgmr.msra.gmra.mxu0 %vm100_vm1, %v8354_v27  ;;  %6553 = vmatmul.msk.bf16.vlgmr.msra.gmra.mxu1 %vm100_vm1, %v8354_v27 }
 0x191   :  { %6557 = vmatmul.msk.bf16.vlgmr.msra.gmra.mxu2 %vm100_vm1, %v8354_v27 }
 0x192   :  { %6561 = vmatmul.msk.bf16.vlgmr.msra.gmra.mxu3 %vm100_vm1, %v8354_v27 }
 0x194   :  { %v8588_v8 = vpop.f32.mrf.mxu2 }
 0x195   :  { %v8590_v47 = vpop.f32.mrf.mxu3  ;;  %v8592_v55 = vpop.f32.mrf.mxu0 }
 0x196   :  { %v8594_v26 = vpop.f32.mrf.mxu1 }
 0x19c   :  { %v8596_v25 = vpop.f32.mrf.mxu2 }
 0x19d   :  { %v8598_v20 = vpop.f32.mrf.mxu3  ;;  %v8600_v12 = vpop.f32.mrf.mxu0 }
 0x19e   :  { %v8602_v24 = vpop.f32.mrf.mxu1 }
 0x1a0   :  { %6550 = vmatmul.msk.bf16.gmra.mxu0 %vm100_vm1, %v8383_v45  ;;  %6554 = vmatmul.msk.bf16.gmra.mxu1 %vm100_vm1, %v8383_v45 }
 0x1a1   :  { %6558 = vmatmul.msk.bf16.gmra.mxu2 %vm100_vm1, %v8383_v45 }
 0x1a2   :  { %6562 = vmatmul.msk.bf16.gmra.mxu3 %vm100_vm1, %v8383_v45 }
 0x1a4   :  { %v8615_v56 = vpop.f32.mrf.mxu2 }
 0x1a5   :  { %v8617_v33 = vpop.f32.mrf.mxu3  ;;  %v8619_v32 = vpop.f32.mrf.mxu0 }
 0x1a6   :  { %v8621_v31 = vpop.f32.mrf.mxu1 }
 0x1ac   :  { %v8625_v22 = vpop.f32.mrf.mxu2 }
 0x1ad   :  { %v8627_v21 = vpop.f32.mrf.mxu3  ;;  %v8629_v46 = vpop.f32.mrf.mxu0 }
 0x1ae   :  { %v8631_v17 = vpop.f32.mrf.mxu1 }
 0x1b0   :  { %6551 = vmatmul.msk.bf16.gmra.mxu0 %vm100_vm1, %v8414_v59  ;;  %6555 = vmatmul.msk.bf16.gmra.mxu1 %vm100_vm1, %v8414_v59 }
 0x1b1   :  { %6559 = vmatmul.msk.bf16.gmra.mxu2 %vm100_vm1, %v8414_v59 }
 0x1b2   :  { %6563 = vmatmul.msk.bf16.gmra.mxu3 %vm100_vm1, %v8414_v59 }
 0x1b4   :  { %v8643_v23 = vpop.f32.mrf.mxu2 }
 0x1b5   :  { %v8645_v28 = vpop.f32.mrf.mxu3  ;;  %v8647_v19 = vpop.f32.mrf.mxu0 }
 0x1b6   :  { %v8649_v16 = vpop.f32.mrf.mxu1 }
 0x1bc   :  { %v8651_v15 = vpop.f32.mrf.mxu2 }
 0x1bd   :  { %v8653_v18 = vpop.f32.mrf.mxu3  ;;  %v8655_v29 = vpop.f32.mrf.mxu0 }
 0x1be   :  { %12077 = vst [vmem:[#allocation111_spill] sm:$0xff] %v8655_v29  ;;  %v8657_v30 = vpop.f32.mrf.mxu1 }
 0x1bf   :  { %12078 = vst [vmem:[#allocation112_spill] sm:$0xff] %v8657_v30 }
 0x1c0   :  { %6552 = vmatmul.msk.bf16.gmra.mxu0 %vm100_vm1, %v8445_v44  ;;  %6556 = vmatmul.msk.bf16.gmra.mxu1 %vm100_vm1, %v8445_v44 }
 0x1c1   :  { %6560 = vmatmul.msk.bf16.gmra.mxu2 %vm100_vm1, %v8445_v44 }
 0x1c2   :  { %6564 = vmatmul.msk.bf16.gmra.mxu3 %vm100_vm1, %v8445_v44 }
 0x1c4   :  { %v8667_v14 = vpop.f32.mrf.mxu2 }
 0x1c5   :  { %12079 = vst [vmem:[#allocation113_spill] sm:$0xff] %v8667_v14  ;;  %v8669_v13 = vpop.f32.mrf.mxu3  ;;  %v8671_v11 = vpop.f32.mrf.mxu0 }
 0x1c6   :  { %12080 = vst [vmem:[#allocation114_spill] sm:$0xff] %v8669_v13  ;;  %v8673_v10 = vpop.f32.mrf.mxu1 }
 0x1c7   :  { %12081 = vst [vmem:[#allocation115_spill] sm:$0xff] %v8671_v11 }
 0x1c8   :  { %12082 = vst [vmem:[#allocation116_spill] sm:$0xff] %v8673_v10 }
 0x1cc   :  { %v8675_v9 = vpop.f32.mrf.mxu2 }
 0x1cd   :  { %12083 = vst [vmem:[#allocation117_spill] sm:$0xff] %v8675_v9  ;;  %v8677_v7 = vpop.f32.mrf.mxu3  ;;  %v8679_v6 = vpop.f32.mrf.mxu0 }
 0x1ce   :  { %12084 = vst [vmem:[#allocation118_spill] sm:$0xff] %v8677_v7  ;;  %v8681_v5 = vpop.f32.mrf.mxu1 }
 0x1cf   :  { %12085 = vst [vmem:[#allocation119_spill] sm:$0xff] %v8679_v6 }
 0x1d0   :  { %12086 = vst [vmem:[#allocation120_spill] sm:$0xff] %v8681_v5  ;;  %6565 = vmatmul.msk.bf16.vlgmr.msrb.gmra.mxu0 %vm100_vm1, %v8354_v27  ;;  %6569 = vmatmul.msk.bf16.vlgmr.msrb.gmra.mxu1 %vm100_vm1, %v8354_v27 }
 0x1d1   :  { %6573 = vmatmul.msk.bf16.vlgmr.msrb.gmra.mxu2 %vm100_vm1, %v8354_v27 }
 0x1d2   :  { %6577 = vmatmul.msk.bf16.vlgmr.msrb.gmra.mxu3 %vm100_vm1, %v8354_v27  ;;  %v1172_v27 = vld [vmem:[%s11965_s0 + $0x4] sm:$0xff] }
 0x1d3   :  { %1197 = vst [vmem:[#allocation1] ss:$4 sm:$0xff] %v1172_v27 }
 0x1d4   :  { %v8691_v10 = vpop.f32.mrf.mxu2 }
 0x1d5   :  { %12087 = vst [vmem:[#allocation121_spill] sm:$0xff] %v8691_v10  ;;  %v8693_v9 = vpop.f32.mrf.mxu3  ;;  %v8695_v7 = vpop.f32.mrf.mxu0 }
 0x1d6   :  { %12088 = vst [vmem:[#allocation122_spill] sm:$0xff] %v8693_v9  ;;  %v8697_v6 = vpop.f32.mrf.mxu1 }
 0x1d7   :  { %12089 = vst [vmem:[#allocation123_spill] sm:$0xff] %v8695_v7 }
 0x1d8   :  { %12090 = vst [vmem:[#allocation124_spill] sm:$0xff] %v8697_v6 }
 0x1da   :  { %v1201_v6 = vld.sshfl [vmem:[#allocation1] sm:$0xff pattern:$0x73625140]  ;;  %v1202_v7 = vld.sshfl [vmem:[#allocation1 + $0x8] sm:$0xff pattern:$0x73625140] }
 0x1db   :  { %v1233_v9 = vsel %vm113_vm0, %v1201_v6, 0  ;;  %v1235_v10 = vsel %vm113_vm0, %v1202_v7, 0 }
 0x1dc   :  { %v8699_v5 = vpop.f32.mrf.mxu2  ;;  %1272 = vmatpush.bf16.msra.mxu0 %v1233_v9  ;;  %1301 = vmatpush.bf16.msra.mxu1 %v1235_v10 }
 0x1dd   :  { %12091 = vst [vmem:[#allocation125_spill] sm:$0xff] %v8699_v5  ;;  %v8701_v11 = vpop.f32.mrf.mxu3  ;;  %v8703_v13 = vpop.f32.mrf.mxu0 }
 0x1de   :  { %12092 = vst [vmem:[#allocation126_spill] sm:$0xff] %v8701_v11  ;;  %v8705_v14 = vpop.f32.mrf.mxu1 }
 0x1df   :  { %12093 = vst [vmem:[#allocation127_spill] sm:$0xff] %v8703_v13 }
 0x1e0   :  { %12094 = vst [vmem:[#allocation128_spill] sm:$0xff] %v8705_v14  ;;  %6566 = vmatmul.msk.bf16.gmra.mxu0 %vm100_vm1, %v8383_v45  ;;  %6570 = vmatmul.msk.bf16.gmra.mxu1 %vm100_vm1, %v8383_v45 }
 0x1e1   :  { %6574 = vmatmul.msk.bf16.gmra.mxu2 %vm100_vm1, %v8383_v45 }
 0x1e2   :  { %6578 = vmatmul.msk.bf16.gmra.mxu3 %vm100_vm1, %v8383_v45 }
 0x1e4   :  { %v8718_v13 = vpop.f32.mrf.mxu2 }
 0x1e5   :  { %12095 = vst [vmem:[#allocation129_spill] sm:$0xff] %v8718_v13  ;;  %v8720_v14 = vpop.f32.mrf.mxu3  ;;  %v8722_v11 = vpop.f32.mrf.mxu0  ;;  %v1203_v13 = vld.sshfl [vmem:[#allocation1 + $0x10] sm:$0xff pattern:$0x73625140] }
 0x1e6   :  { %12096 = vst [vmem:[#allocation130_spill] sm:$0xff] %v8720_v14  ;;  %v8724_v5 = vpop.f32.mrf.mxu1  ;;  %v1204_v14 = vld.sshfl [vmem:[#allocation1 + $0x18] sm:$0xff pattern:$0x73625140] }
 0x1e7   :  { %12097 = vst [vmem:[#allocation131_spill] sm:$0xff] %v8722_v11  ;;  %v1239_v11 = vsel %vm113_vm0, %v1204_v14, 0 }
 0x1e8   :  { %12098 = vst [vmem:[#allocation132_spill] sm:$0xff] %v8724_v5  ;;  %v1237_v5 = vsel %vm113_vm0, %v1203_v13, 0  ;;  %1359 = vmatpush.bf16.msra.mxu3 %v1239_v11 }
 0x1e9   :  { %1330 = vmatpush.bf16.msra.mxu2 %v1237_v5 }
 0x1ec   :  { %v8728_v45 = vpop.f32.mrf.mxu2 }
 0x1ed   :  { %12099 = vst [vmem:[#allocation133_spill] sm:$0xff] %v8728_v45  ;;  %v8730_v30 = vpop.f32.mrf.mxu3  ;;  %v8732_v27 = vpop.f32.mrf.mxu0 }
 0x1ee   :  { %12100 = vst [vmem:[#allocation134_spill] sm:$0xff] %v8730_v30  ;;  %v8734_v4 = vpop.f32.mrf.mxu1 }
 0x1ef   :  { %12101 = vst [vmem:[#allocation135_spill] sm:$0xff] %v8732_v27 }
 0x1f0   :  { %12102 = vst [vmem:[#allocation136_spill] sm:$0xff] %v8734_v4  ;;  %6567 = vmatmul.msk.bf16.gmra.mxu0 %vm100_vm1, %v8414_v59  ;;  %6571 = vmatmul.msk.bf16.gmra.mxu1 %vm100_vm1, %v8414_v59 }
 0x1f1   :  { %6575 = vmatmul.msk.bf16.gmra.mxu2 %vm100_vm1, %v8414_v59 }
 0x1f2   :  { %6579 = vmatmul.msk.bf16.gmra.mxu3 %vm100_vm1, %v8414_v59 }
 0x1f4   :  { %v8746_v6 = vpop.f32.mrf.mxu2 }
 0x1f5   :  { %12103 = vst [vmem:[#allocation137_spill] sm:$0xff] %v8746_v6  ;;  %v8748_v7 = vpop.f32.mrf.mxu3  ;;  %v8750_v9 = vpop.f32.mrf.mxu0 }
 0x1f6   :  { %12104 = vst [vmem:[#allocation138_spill] sm:$0xff] %v8748_v7  ;;  %v8752_v5 = vpop.f32.mrf.mxu1 }
 0x1f7   :  { %12105 = vst [vmem:[#allocation139_spill] sm:$0xff] %v8750_v9 }
 0x1f8   :  { %12106 = vst [vmem:[#allocation140_spill] sm:$0xff] %v8752_v5  ;;  %v8783_v5 = vld [vmem:[%s11966_s1 + $0x40] sm:$0xff] }
 0x1fc   :  { %v8754_v10 = vpop.f32.mrf.mxu2 }
 0x1fd   :  { %12107 = vst [vmem:[#allocation141_spill] sm:$0xff] %v8754_v10  ;;  %v8756_v11 = vpop.f32.mrf.mxu3  ;;  %v8758_v13 = vpop.f32.mrf.mxu0 }
 0x1fe   :  { %12108 = vst [vmem:[#allocation142_spill] sm:$0xff] %v8756_v11  ;;  %v8760_v14 = vpop.f32.mrf.mxu1 }
 0x1ff   :  { %12109 = vst [vmem:[#allocation143_spill] sm:$0xff] %v8758_v13 }
 0x200   :  { %12110 = vst [vmem:[#allocation144_spill] sm:$0xff] %v8760_v14  ;;  %6568 = vmatmul.msk.bf16.gmra.mxu0 %vm100_vm1, %v8445_v44  ;;  %6572 = vmatmul.msk.bf16.gmra.mxu1 %vm100_vm1, %v8445_v44 }
 0x201   :  { %6576 = vmatmul.msk.bf16.gmra.mxu2 %vm100_vm1, %v8445_v44 }
 0x202   :  { %6580 = vmatmul.msk.bf16.gmra.mxu3 %vm100_vm1, %v8445_v44 }
 0x204   :  { %v8770_v59 = vpop.f32.mrf.mxu2 }
 0x205   :  { %12111 = vst [vmem:[#allocation145_spill] sm:$0xff] %v8770_v59  ;;  %v8772_v10 = vpop.f32.mrf.mxu3  ;;  %v8774_v11 = vpop.f32.mrf.mxu0 }
 0x206   :  { %12112 = vst [vmem:[#allocation146_spill] sm:$0xff] %v8772_v10  ;;  %v8776_v13 = vpop.f32.mrf.mxu1 }
 0x207   :  { %12113 = vst [vmem:[#allocation147_spill] sm:$0xff] %v8774_v11  ;;  %v8812_v11 = vld [vmem:[%s11966_s1 + $0x48] sm:$0xff] }
 0x208   :  { %12114 = vst [vmem:[#allocation148_spill] sm:$0xff] %v8776_v13 }
 0x20c   :  { %v8778_v14 = vpop.f32.mrf.mxu2 }
 0x20d   :  { %12115 = vst [vmem:[#allocation149_spill] sm:$0xff] %v8778_v14  ;;  %v8785_v9 = vpop.f32.mrf.mxu3  ;;  %v8787_v7 = vpop.f32.mrf.mxu0 }
 0x20e   :  { %12116 = vst [vmem:[#allocation150_spill] sm:$0xff] %v8785_v9  ;;  %v8789_v44 = vpop.f32.mrf.mxu1 }
 0x20f   :  { %12117 = vst [vmem:[#allocation151_spill] sm:$0xff] %v8787_v7 }
 0x210   :  { %12118 = vst [vmem:[#allocation152_spill] sm:$0xff] %v8789_v44  ;;  %6605 = vmatmul.msk.bf16.vlgmr.msra.gmra.mxu0 %vm100_vm1, %v8783_v5  ;;  %6609 = vmatmul.msk.bf16.vlgmr.msra.gmra.mxu1 %vm100_vm1, %v8783_v5 }
 0x211   :  { %6613 = vmatmul.msk.bf16.vlgmr.msra.gmra.mxu2 %vm100_vm1, %v8783_v5 }
 0x212   :  { %6617 = vmatmul.msk.bf16.vlgmr.msra.gmra.mxu3 %vm100_vm1, %v8783_v5 }
 0x214   :  { %v8799_v14 = vpop.f32.mrf.mxu2 }
 0x215   :  { %12119 = vst [vmem:[#allocation153_spill] sm:$0xff] %v8799_v14  ;;  %v8801_v13 = vpop.f32.mrf.mxu3  ;;  %v8803_v9 = vpop.f32.mrf.mxu0 }
 0x216   :  { %12120 = vst [vmem:[#allocation154_spill] sm:$0xff] %v8801_v13  ;;  %v8805_v7 = vpop.f32.mrf.mxu1 }
 0x217   :  { %12121 = vst [vmem:[#allocation155_spill] sm:$0xff] %v8803_v9 }
 0x218   :  { %12122 = vst [vmem:[#allocation156_spill] sm:$0xff] %v8805_v7 }
 0x21c   :  { %v8807_v44 = vpop.f32.mrf.mxu2 }
 0x21d   :  { %12123 = vst [vmem:[#allocation157_spill] sm:$0xff] %v8807_v44  ;;  %v8814_v10 = vpop.f32.mrf.mxu3  ;;  %v8816_v59 = vpop.f32.mrf.mxu0 }
 0x21e   :  { %12124 = vst [vmem:[#allocation158_spill] sm:$0xff] %v8814_v10  ;;  %v8818_v6 = vpop.f32.mrf.mxu1  ;;  %v1173_v10 = vld [vmem:[%s11965_s0 + $0xc] sm:$0xff] }
 0x21f   :  { %12125 = vst [vmem:[#allocation159_spill] sm:$0xff] %v8816_v59 }
 0x220   :  { %12126 = vst [vmem:[#allocation160_spill] sm:$0xff] %v8818_v6  ;;  %6606 = vmatmul.msk.bf16.gmra.mxu0 %vm100_vm1, %v8812_v11  ;;  %6610 = vmatmul.msk.bf16.gmra.mxu1 %vm100_vm1, %v8812_v11 }
 0x221   :  { %6614 = vmatmul.msk.bf16.gmra.mxu2 %vm100_vm1, %v8812_v11  ;;  %1200 = vst [vmem:[#allocation1 + $0x20] ss:$4 sm:$0xff] %v1173_v10  ;;  %v8846_v10 = vld [vmem:[%s11966_s1 + $0x50] sm:$0xff] }
 0x222   :  { %6618 = vmatmul.msk.bf16.gmra.mxu3 %vm100_vm1, %v8812_v11 }
 0x224   :  { %v8831_v59 = vpop.f32.mrf.mxu2 }
 0x225   :  { %12127 = vst [vmem:[#allocation161_spill] sm:$0xff] %v8831_v59  ;;  %v8833_v6 = vpop.f32.mrf.mxu3  ;;  %v8835_v44 = vpop.f32.mrf.mxu0 }
 0x226   :  { %12128 = vst [vmem:[#allocation162_spill] sm:$0xff] %v8833_v6  ;;  %v8837_v7 = vpop.f32.mrf.mxu1 }
 0x227   :  { %12129 = vst [vmem:[#allocation163_spill] sm:$0xff] %v8835_v44 }
 0x228   :  { %12130 = vst [vmem:[#allocation164_spill] sm:$0xff] %v8837_v7  ;;  %v1205_v9 = vld.sshfl [vmem:[#allocation1 + $0x20] sm:$0xff pattern:$0x73625140] }
 0x229   :  { %v1206_v13 = vld.sshfl [vmem:[#allocation1 + $0x28] sm:$0xff pattern:$0x73625140]  ;;  %v1241_v14 = vsel %vm113_vm0, %v1205_v9, 0 }
 0x22a   :  { %v1243_v4 = vsel %vm113_vm0, %v1206_v13, 0  ;;  %1388 = vmatpush.bf16.msrb.mxu0 %v1241_v14  ;;  %v1207_v7 = vld.sshfl [vmem:[#allocation1 + $0x30] sm:$0xff pattern:$0x73625140] }
 0x22b   :  { %1417 = vmatpush.bf16.msrb.mxu1 %v1243_v4  ;;  %v1208_v59 = vld.sshfl [vmem:[#allocation1 + $0x38] sm:$0xff pattern:$0x73625140]  ;;  %v1245_v9 = vsel %vm113_vm0, %v1207_v7, 0 }
 0x22c   :  { %v8841_v27 = vpop.f32.mrf.mxu2  ;;  %v1247_v13 = vsel %vm113_vm0, %v1208_v59, 0  ;;  %1446 = vmatpush.bf16.msrb.mxu2 %v1245_v9 }
 0x22d   :  { %12131 = vst [vmem:[#allocation165_spill] sm:$0xff] %v8841_v27  ;;  %v8848_v6 = vpop.f32.mrf.mxu3  ;;  %v8850_v44 = vpop.f32.mrf.mxu0  ;;  %1475 = vmatpush.bf16.msrb.mxu3 %v1247_v13  ;;  %v8877_v13 = vld [vmem:[%s11966_s1 + $0x58] sm:$0xff] }
 0x22e   :  { %12132 = vst [vmem:[#allocation166_spill] sm:$0xff] %v8848_v6  ;;  %v8852_v30 = vpop.f32.mrf.mxu1 }
 0x22f   :  { %12133 = vst [vmem:[#allocation167_spill] sm:$0xff] %v8850_v44 }
 0x230   :  { %12134 = vst [vmem:[#allocation168_spill] sm:$0xff] %v8852_v30  ;;  %6607 = vmatmul.msk.bf16.gmra.mxu0 %vm100_vm1, %v8846_v10  ;;  %6611 = vmatmul.msk.bf16.gmra.mxu1 %vm100_vm1, %v8846_v10 }
 0x231   :  { %6615 = vmatmul.msk.bf16.gmra.mxu2 %vm100_vm1, %v8846_v10 }
 0x232   :  { %6619 = vmatmul.msk.bf16.gmra.mxu3 %vm100_vm1, %v8846_v10 }
 0x234   :  { %v8864_v4 = vpop.f32.mrf.mxu2 }
 0x235   :  { %12135 = vst [vmem:[#allocation169_spill] sm:$0xff] %v8864_v4  ;;  %v8866_v14 = vpop.f32.mrf.mxu3  ;;  %v8868_v7 = vpop.f32.mrf.mxu0 }
 0x236   :  { %12136 = vst [vmem:[#allocation170_spill] sm:$0xff] %v8866_v14  ;;  %v8870_v59 = vpop.f32.mrf.mxu1 }
 0x237   :  { %12137 = vst [vmem:[#allocation171_spill] sm:$0xff] %v8868_v7 }
 0x238   :  { %12138 = vst [vmem:[#allocation172_spill] sm:$0xff] %v8870_v59 }
 0x23c   :  { %v8872_v9 = vpop.f32.mrf.mxu2 }
 0x23d   :  { %12139 = vst [vmem:[#allocation173_spill] sm:$0xff] %v8872_v9  ;;  %v8879_v30 = vpop.f32.mrf.mxu3  ;;  %v8881_v44 = vpop.f32.mrf.mxu0 }
 0x23e   :  { %12140 = vst [vmem:[#allocation174_spill] sm:$0xff] %v8879_v30  ;;  %v8883_v6 = vpop.f32.mrf.mxu1 }
 0x23f   :  { %12141 = vst [vmem:[#allocation175_spill] sm:$0xff] %v8881_v44 }
 0x240   :  { %12142 = vst [vmem:[#allocation176_spill] sm:$0xff] %v8883_v6  ;;  %6608 = vmatmul.msk.bf16.gmra.mxu0 %vm100_vm1, %v8877_v13  ;;  %6612 = vmatmul.msk.bf16.gmra.mxu1 %vm100_vm1, %v8877_v13 }
 0x241   :  { %6616 = vmatmul.msk.bf16.gmra.mxu2 %vm100_vm1, %v8877_v13 }
 0x242   :  { %6620 = vmatmul.msk.bf16.gmra.mxu3 %vm100_vm1, %v8877_v13 }
 0x244   :  { %v8893_v9 = vpop.f32.mrf.mxu2 }
 0x245   :  { %12143 = vst [vmem:[#allocation177_spill] sm:$0xff] %v8893_v9  ;;  %v8895_v59 = vpop.f32.mrf.mxu3  ;;  %v8897_v30 = vpop.f32.mrf.mxu0 }
 0x246   :  { %12144 = vst [vmem:[#allocation178_spill] sm:$0xff] %v8895_v59  ;;  %v8899_v44 = vpop.f32.mrf.mxu1 }
 0x247   :  { %12145 = vst [vmem:[#allocation179_spill] sm:$0xff] %v8897_v30 }
 0x248   :  { %12146 = vst [vmem:[#allocation180_spill] sm:$0xff] %v8899_v44 }
 0x24c   :  { %v8901_v6 = vpop.f32.mrf.mxu2 }
 0x24d   :  { %12147 = vst [vmem:[#allocation181_spill] sm:$0xff] %v8901_v6  ;;  %v8903_v7 = vpop.f32.mrf.mxu3  ;;  %v8905_v14 = vpop.f32.mrf.mxu0 }
 0x24e   :  { %12148 = vst [vmem:[#allocation182_spill] sm:$0xff] %v8903_v7  ;;  %v8907_v4 = vpop.f32.mrf.mxu1 }
 0x24f   :  { %12149 = vst [vmem:[#allocation183_spill] sm:$0xff] %v8905_v14 }
 0x250   :  { %12150 = vst [vmem:[#allocation184_spill] sm:$0xff] %v8907_v4  ;;  %6621 = vmatmul.msk.bf16.vlgmr.msrb.gmra.mxu0 %vm100_vm1, %v8783_v5  ;;  %6625 = vmatmul.msk.bf16.vlgmr.msrb.gmra.mxu1 %vm100_vm1, %v8783_v5 }
 0x251   :  { %6629 = vmatmul.msk.bf16.vlgmr.msrb.gmra.mxu2 %vm100_vm1, %v8783_v5 }
 0x252   :  { %6633 = vmatmul.msk.bf16.vlgmr.msrb.gmra.mxu3 %vm100_vm1, %v8783_v5 }
 0x254   :  { %v8917_v44 = vpop.f32.mrf.mxu2 }
 0x255   :  { %12151 = vst [vmem:[#allocation185_spill] sm:$0xff] %v8917_v44  ;;  %v8919_v6 = vpop.f32.mrf.mxu3  ;;  %v8921_v7 = vpop.f32.mrf.mxu0 }
 0x256   :  { %12152 = vst [vmem:[#allocation186_spill] sm:$0xff] %v8919_v6  ;;  %v8923_v14 = vpop.f32.mrf.mxu1 }
 0x257   :  { %12153 = vst [vmem:[#allocation187_spill] sm:$0xff] %v8921_v7 }
 0x258   :  { %12154 = vst [vmem:[#allocation188_spill] sm:$0xff] %v8923_v14 }
 0x25c   :  { %v8925_v4 = vpop.f32.mrf.mxu2 }
 0x25d   :  { %12155 = vst [vmem:[#allocation189_spill] sm:$0xff] %v8925_v4  ;;  %v8927_v30 = vpop.f32.mrf.mxu3  ;;  %v8929_v59 = vpop.f32.mrf.mxu0 }
 0x25e   :  { %12156 = vst [vmem:[#allocation190_spill] sm:$0xff] %v8927_v30  ;;  %v8931_v9 = vpop.f32.mrf.mxu1  ;;  %v1174_v30 = vld [vmem:[%s11965_s0 + $0x14] sm:$0xff] }
 0x25f   :  { %12157 = vst [vmem:[#allocation191_spill] sm:$0xff] %v8929_v59 }
 0x260   :  { %12158 = vst [vmem:[#allocation192_spill] sm:$0xff] %v8931_v9  ;;  %6622 = vmatmul.msk.bf16.gmra.mxu0 %vm100_vm1, %v8812_v11  ;;  %6626 = vmatmul.msk.bf16.gmra.mxu1 %vm100_vm1, %v8812_v11 }
 0x261   :  { %6630 = vmatmul.msk.bf16.gmra.mxu2 %vm100_vm1, %v8812_v11  ;;  %1210 = vst [vmem:[#allocation1] ss:$4 sm:$0xff] %v1174_v30 }
 0x262   :  { %6634 = vmatmul.msk.bf16.gmra.mxu3 %vm100_vm1, %v8812_v11 }
 0x264   :  { %v8944_v59 = vpop.f32.mrf.mxu2 }
 0x265   :  { %12159 = vst [vmem:[#allocation193_spill] sm:$0xff] %v8944_v59  ;;  %v8946_v9 = vpop.f32.mrf.mxu3  ;;  %v8948_v4 = vpop.f32.mrf.mxu0 }
 0x266   :  { %12160 = vst [vmem:[#allocation194_spill] sm:$0xff] %v8946_v9  ;;  %v8950_v14 = vpop.f32.mrf.mxu1 }
 0x267   :  { %12161 = vst [vmem:[#allocation195_spill] sm:$0xff] %v8948_v4 }
 0x268   :  { %12162 = vst [vmem:[#allocation196_spill] sm:$0xff] %v8950_v14  ;;  %v1213_v7 = vld.sshfl [vmem:[#allocation1] sm:$0xff pattern:$0x73625140] }
 0x269   :  { %v1214_v6 = vld.sshfl [vmem:[#allocation1 + $0x8] sm:$0xff pattern:$0x73625140]  ;;  %v1249_v44 = vsel %vm113_vm0, %v1213_v7, 0 }
 0x26a   :  { %v1251_v27 = vsel %vm113_vm0, %v1214_v6, 0  ;;  %1504 = vmatpush.bf16.msra.mxu0 %v1249_v44  ;;  %v1215_v59 = vld.sshfl [vmem:[#allocation1 + $0x10] sm:$0xff pattern:$0x73625140] }
 0x26b   :  { %1533 = vmatpush.bf16.msra.mxu1 %v1251_v27  ;;  %v1216_v9 = vld.sshfl [vmem:[#allocation1 + $0x18] sm:$0xff pattern:$0x73625140]  ;;  %v1253_v14 = vsel %vm113_vm0, %v1215_v59, 0 }
 0x26c   :  { %v8954_v45 = vpop.f32.mrf.mxu2  ;;  %v1255_v4 = vsel %vm113_vm0, %v1216_v9, 0  ;;  %1562 = vmatpush.bf16.msra.mxu2 %v1253_v14 }
 0x26d   :  { %v8956_v29 = vpop.f32.mrf.mxu3  ;;  %v8958_v30 = vpop.f32.mrf.mxu0  ;;  %1591 = vmatpush.bf16.msra.mxu3 %v1255_v4 }
 0x26e   :  { %12163 = vst [vmem:[#allocation197_spill] sm:$0xff] %v8956_v29  ;;  %v8960_v3 = vpop.f32.mrf.mxu1 }
 0x26f   :  { %12164 = vst [vmem:[#allocation198_spill] sm:$0xff] %v8958_v30 }
 0x270   :  { %12165 = vst [vmem:[#allocation199_spill] sm:$0xff] %v8960_v3  ;;  %6623 = vmatmul.msk.bf16.gmra.mxu0 %vm100_vm1, %v8846_v10  ;;  %6627 = vmatmul.msk.bf16.gmra.mxu1 %vm100_vm1, %v8846_v10 }
 0x271   :  { %6631 = vmatmul.msk.bf16.gmra.mxu2 %vm100_vm1, %v8846_v10 }
 0x272   :  { %6635 = vmatmul.msk.bf16.gmra.mxu3 %vm100_vm1, %v8846_v10 }
 0x274   :  { %v8972_v27 = vpop.f32.mrf.mxu2 }
 0x275   :  { %12166 = vst [vmem:[#allocation200_spill] sm:$0xff] %v8972_v27  ;;  %v8974_v6 = vpop.f32.mrf.mxu3  ;;  %v8976_v44 = vpop.f32.mrf.mxu0 }
 0x276   :  { %12167 = vst [vmem:[#allocation201_spill] sm:$0xff] %v8974_v6  ;;  %v8978_v14 = vpop.f32.mrf.mxu1  ;;  %v738_v6 = vadd.f32 %v8578_v58, %v8152_v35  ;;  %v796_v35 = vadd.f32 %v8590_v47, %v8164_v37  ;;  %v769_v37 = vadd.f32 %v8596_v25, %v8170_v40 }
 0x277   :  { %12168 = vst [vmem:[#allocation202_spill] sm:$0xff] %v8976_v44 }
 0x278   :  { %12169 = vst [vmem:[#allocation203_spill] sm:$0xff] %v8978_v14 }
 0x27c   :  { %v8980_v4 = vpop.f32.mrf.mxu2 }
 0x27d   :  { %12170 = vst [vmem:[#allocation204_spill] sm:$0xff] %v8980_v4  ;;  %v8982_v7 = vpop.f32.mrf.mxu3  ;;  %v8984_v59 = vpop.f32.mrf.mxu0 }
 0x27e   :  { %12171 = vst [vmem:[#allocation205_spill] sm:$0xff] %v8982_v7  ;;  %v8986_v9 = vpop.f32.mrf.mxu1 }
 0x27f   :  { %12172 = vst [vmem:[#allocation206_spill] sm:$0xff] %v8984_v59 }
 0x280   :  { %12173 = vst [vmem:[#allocation207_spill] sm:$0xff] %v8986_v9  ;;  %6624 = vmatmul.msk.bf16.gmra.mxu0 %vm100_vm1, %v8877_v13  ;;  %6628 = vmatmul.msk.bf16.gmra.mxu1 %vm100_vm1, %v8877_v13  ;;  %v709_v9 = vadd.f32 %v8576_v60, %v8150_v34  ;;  %v767_v34 = vadd.f32 %v8588_v8, %v8162_v36 }
 0x281   :  { %6632 = vmatmul.msk.bf16.gmra.mxu2 %vm100_vm1, %v8877_v13  ;;  %v740_v60 = vadd.f32 %v8594_v26, %v8168_v39  ;;  %v714_v39 = vadd.f32 %v8600_v12, %v8174_v42  ;;  %v743_v26 = vadd.f32 %v8602_v24, %v8176_v43  ;;  %v772_v42 = vadd.f32 %v8615_v56, %v8188_v48 }
 0x282   :  { %6636 = vmatmul.msk.bf16.gmra.mxu3 %vm100_vm1, %v8877_v13  ;;  %v801_v43 = vadd.f32 %v8617_v33, %v8190_v49  ;;  %v716_v12 = vadd.f32 %v8619_v32, %v8192_v50  ;;  %v774_v50 = vadd.f32 %v8625_v22, %v8196_v52  ;;  %v719_v33 = vadd.f32 %v8629_v46, %v8200_v54 }
 0x284   :  { %v8996_v14 = vpop.f32.mrf.mxu2 }
 0x285   :  { %12174 = vst [vmem:[#allocation208_spill] sm:$0xff] %v8996_v14  ;;  %v8998_v4 = vpop.f32.mrf.mxu3  ;;  %v9000_v7 = vpop.f32.mrf.mxu0 }
 0x286   :  { %v9002_v59 = vpop.f32.mrf.mxu1 }
 0x28c   :  { %v9006_v44 = vpop.f32.mrf.mxu2 }
 0x28d   :  { %v9010_v27 = vpop.f32.mrf.mxu3  ;;  %v1274_v3 = vpop.f32.mrf.mxu0 }
 0x28e   :  { %12175 = vst [vmem:[#allocation209_spill] sm:$0xff] %v9010_v27  ;;  %v9012_v30 = vadd.f32 %v1274_v3, %v709_v9  ;;  %v1303_v14 = vpop.f32.mrf.mxu1  ;;  %v711_v3 = vadd.f32 %v8592_v55, %v8166_v38  ;;  %v798_v38 = vadd.f32 %v8598_v20, %v8172_v41  ;;  %v1175_v41 = vld [vmem:[%s11965_s0 + $0x1c] sm:$0xff]  ;;  %v745_v20 = vadd.f32 %v8621_v31, %v8194_v51 }
 0x28f   :  { %v9014_v29 = vadd.f32 %v1303_v14, %v738_v6  ;;  %1212 = vst [vmem:[#allocation1 + $0x20] ss:$4 sm:$0xff] %v1175_v41  ;;  %v803_v31 = vadd.f32 %v8627_v21, %v8198_v53  ;;  %v721_v41 = vadd.f32 %v8647_v19, %v8221_v63  ;;  %v808_v63 = vadd.f32 %v8653_v18, %v8227_v2  ;;  %v12182_v2 = vld [vmem:[#allocation9_spill] sm:$0xff] }
 0x290   :  { %12176 = vst [vmem:[#allocation210_spill] sm:$0xff] %v9012_v30  ;;  %6637 = vmatmul.msk.bf16.vlgmr.msra.gmra.mxu0 %vm100_vm1, %v8783_v5  ;;  %6641 = vmatmul.msk.bf16.vlgmr.msra.gmra.mxu1 %vm100_vm1, %v8783_v5 }
 0x291   :  { %12177 = vst [vmem:[#allocation211_spill] sm:$0xff] %v9014_v29  ;;  %6645 = vmatmul.msk.bf16.vlgmr.msra.gmra.mxu2 %vm100_vm1, %v8783_v5 }
 0x292   :  { %6649 = vmatmul.msk.bf16.vlgmr.msra.gmra.mxu3 %vm100_vm1, %v8783_v5 }
 0x294   :  { %v1332_v58 = vpop.f32.mrf.mxu2 }
 0x295   :  { %v9032_v6 = vadd.f32 %v1332_v58, %v767_v34  ;;  %v1361_v14 = vpop.f32.mrf.mxu3  ;;  %v1276_v9 = vpop.f32.mrf.mxu0 }
 0x296   :  { %v9034_v29 = vadd.f32 %v1361_v14, %v796_v35  ;;  %v9036_v30 = vadd.f32 %v1276_v9, %v711_v3  ;;  %v1305_v27 = vpop.f32.mrf.mxu1  ;;  %v1218_v49 = vld.sshfl [vmem:[#allocation1 + $0x28] sm:$0xff pattern:$0x73625140]  ;;  %v1219_v22 = vld.sshfl [vmem:[#allocation1 + $0x30] sm:$0xff pattern:$0x73625140] }
 0x297   :  { %v9038_v36 = vadd.f32 %v1305_v27, %v740_v60  ;;  %v1259_v51 = vsel %vm113_vm0, %v1218_v49, 0  ;;  %v1261_v21 = vsel %vm113_vm0, %v1219_v22, 0  ;;  %v12186_v22 = vld [vmem:[#allocation11_spill] sm:$0xff] }
 0x298   :  { %1649 = vmatpush.bf16.msrb.mxu1 %v1259_v51  ;;  %1678 = vmatpush.bf16.msrb.mxu2 %v1261_v21 }
 0x29c   :  { %v1334_v55 = vpop.f32.mrf.mxu2 }
 0x29d   :  { %v9048_v8 = vadd.f32 %v1334_v55, %v769_v37  ;;  %v1363_v47 = vpop.f32.mrf.mxu3  ;;  %v1279_v34 = vpop.f32.mrf.mxu0  ;;  %v1217_v37 = vld.sshfl [vmem:[#allocation1 + $0x20] sm:$0xff pattern:$0x73625140] }
 0x29e   :  { %v9050_v35 = vadd.f32 %v1363_v47, %v798_v38  ;;  %v9052_v27 = vadd.f32 %v1279_v34, %v714_v39  ;;  %v1308_v3 = vpop.f32.mrf.mxu1  ;;  %v1257_v32 = vsel %vm113_vm0, %v1217_v37, 0  ;;  %v748_v39 = vadd.f32 %v8631_v17, %v8202_v57  ;;  %v1220_v47 = vld.sshfl [vmem:[#allocation1 + $0x38] sm:$0xff pattern:$0x73625140] }
 0x29f   :  { %v9054_v40 = vadd.f32 %v1308_v3, %v743_v26  ;;  %1620 = vmatpush.bf16.msrb.mxu0 %v1257_v32  ;;  %v1263_v54 = vsel %vm113_vm0, %v1220_v47, 0  ;;  %v777_v57 = vadd.f32 %v8643_v23, %v8217_v61  ;;  %v806_v17 = vadd.f32 %v8645_v28, %v8219_v62  ;;  %v12178_v23 = vld [vmem:[#allocation7_spill] sm:$0xff]  ;;  %v12181_v37 = vld [vmem:[#allocation112_spill] sm:$0xff] }
 0x2a0   :  { %6638 = vmatmul.msk.bf16.gmra.mxu0 %vm100_vm1, %v8812_v11  ;;  %6642 = vmatmul.msk.bf16.gmra.mxu1 %vm100_vm1, %v8812_v11  ;;  %v779_v62 = vadd.f32 %v8651_v15, %v8225_v1  ;;  %v12179_v28 = vld [vmem:[#allocation111_spill] sm:$0xff]  ;;  %v12183_v15 = vld [vmem:[#allocation113_spill] sm:$0xff] }
 0x2a1   :  { %6646 = vmatmul.msk.bf16.gmra.mxu2 %vm100_vm1, %v8812_v11  ;;  %1707 = vmatpush.bf16.msrb.mxu3 %v1263_v54  ;;  %v782_v18 = vadd.f32 %v12183_v15, %v12182_v2  ;;  %v12187_v47 = vld [vmem:[#allocation115_spill] sm:$0xff]  ;;  %v12188_v54 = vld [vmem:[#allocation12_spill] sm:$0xff] }
 0x2a2   :  { %6650 = vmatmul.msk.bf16.gmra.mxu3 %vm100_vm1, %v8812_v11  ;;  %v12197_v2 = vld [vmem:[#allocation120_spill] sm:$0xff] }
 0x2a4   :  { %v1337_v24 = vpop.f32.mrf.mxu2 }
 0x2a5   :  { %v9075_v25 = vadd.f32 %v1337_v24, %v772_v42  ;;  %v1366_v58 = vpop.f32.mrf.mxu3  ;;  %v1281_v60 = vpop.f32.mrf.mxu0 }
 0x2a6   :  { %v9077_v14 = vadd.f32 %v1366_v58, %v801_v43  ;;  %v9079_v9 = vadd.f32 %v1281_v60, %v716_v12  ;;  %v1310_v48 = vpop.f32.mrf.mxu1  ;;  %v750_v43 = vadd.f32 %v8649_v16, %v8223_v0  ;;  %v724_v0 = vadd.f32 %v12179_v28, %v12178_v23  ;;  %v12180_v16 = vld [vmem:[#allocation8_spill] sm:$0xff]  ;;  %v12191_v23 = vld [vmem:[#allocation117_spill] sm:$0xff] }
 0x2a7   :  { %v9081_v56 = vadd.f32 %v1310_v48, %v745_v20  ;;  %v753_v49 = vadd.f32 %v12181_v37, %v12180_v16  ;;  %v12194_v37 = vld [vmem:[#allocation15_spill] sm:$0xff] }
 0x2ac   :  { %v1339_v38 = vpop.f32.mrf.mxu2 }
 0x2ad   :  { %v9093_v55 = vadd.f32 %v1339_v38, %v774_v50  ;;  %v1368_v26 = vpop.f32.mrf.mxu3  ;;  %v1284_v52 = vpop.f32.mrf.mxu0 }
 0x2ae   :  { %v9095_v34 = vadd.f32 %v1368_v26, %v803_v31  ;;  %v9097_v3 = vadd.f32 %v1284_v52, %v719_v33  ;;  %v1313_v53 = vpop.f32.mrf.mxu1  ;;  %v12185_v26 = vld [vmem:[#allocation114_spill] sm:$0xff] }
 0x2af   :  { %v9101_v46 = vadd.f32 %v1313_v53, %v748_v39  ;;  %v12184_v39 = vld [vmem:[#allocation10_spill] sm:$0xff]  ;;  %v726_v53 = vadd.f32 %v12187_v47, %v12186_v22 }
 0x2b0   :  { %6639 = vmatmul.msk.bf16.gmra.mxu0 %vm100_vm1, %v8846_v10  ;;  %6643 = vmatmul.msk.bf16.gmra.mxu1 %vm100_vm1, %v8846_v10  ;;  %v811_v52 = vadd.f32 %v12185_v26, %v12184_v39 }
 0x2b1   :  { %6647 = vmatmul.msk.bf16.gmra.mxu2 %vm100_vm1, %v8846_v10 }
 0x2b2   :  { %6651 = vmatmul.msk.bf16.gmra.mxu3 %vm100_vm1, %v8846_v10 }
 0x2b4   :  { %v1342_v42 = vpop.f32.mrf.mxu2 }
 0x2b5   :  { %v9119_v12 = vadd.f32 %v1342_v42, %v777_v57  ;;  %v1371_v24 = vpop.f32.mrf.mxu3  ;;  %v1286_v20 = vpop.f32.mrf.mxu0  ;;  %v12189_v57 = vld [vmem:[#allocation116_spill] sm:$0xff] }
 0x2b6   :  { %v9121_v58 = vadd.f32 %v1371_v24, %v806_v17  ;;  %v9123_v60 = vadd.f32 %v1286_v20, %v721_v41  ;;  %v1315_v48 = vpop.f32.mrf.mxu1  ;;  %v755_v17 = vadd.f32 %v12189_v57, %v12188_v54  ;;  %v12199_v54 = vld [vmem:[#allocation121_spill] sm:$0xff] }
 0x2b7   :  { %v9125_v61 = vadd.f32 %v1315_v48, %v750_v43 }
 0x2bc   :  { %v1344_v19 = vpop.f32.mrf.mxu2 }
 0x2bd   :  { %v9135_v50 = vadd.f32 %v1344_v19, %v779_v62  ;;  %v1373_v32 = vpop.f32.mrf.mxu3  ;;  %v1289_v51 = vpop.f32.mrf.mxu0  ;;  %v12193_v19 = vld [vmem:[#allocation118_spill] sm:$0xff] }
 0x2be   :  { %v9137_v31 = vadd.f32 %v1373_v32, %v808_v63  ;;  %v9139_v33 = vadd.f32 %v1289_v51, %v724_v0  ;;  %v1318_v38 = vpop.f32.mrf.mxu1  ;;  %v12190_v63 = vld [vmem:[#allocation13_spill] sm:$0xff]  ;;  %v12192_v0 = vld [vmem:[#allocation14_spill] sm:$0xff] }
 0x2bf   :  { %v9141_v1 = vadd.f32 %v1318_v38, %v753_v49  ;;  %v784_v28 = vadd.f32 %v12191_v23, %v12190_v63  ;;  %v813_v16 = vadd.f32 %v12193_v19, %v12192_v0  ;;  %v12195_v49 = vld [vmem:[#allocation119_spill] sm:$0xff]  ;;  %v12196_v38 = vld [vmem:[#allocation16_spill] sm:$0xff] }
 0x2c0   :  { %6640 = vmatmul.msk.bf16.gmra.mxu0 %vm100_vm1, %v8877_v13  ;;  %6644 = vmatmul.msk.bf16.gmra.mxu1 %vm100_vm1, %v8877_v13  ;;  %v825_v32 = vadd.f32 %v12195_v49, %v12194_v37  ;;  %v854_v15 = vadd.f32 %v12197_v2, %v12196_v38  ;;  %v12203_v63 = vld [vmem:[#allocation123_spill] sm:$0xff]  ;;  %v12204_v0 = vld [vmem:[#allocation20_spill] sm:$0xff] }
 0x2c1   :  { %6648 = vmatmul.msk.bf16.gmra.mxu2 %vm100_vm1, %v8877_v13  ;;  %v12205_v19 = vld [vmem:[#allocation124_spill] sm:$0xff] }
 0x2c2   :  { %6652 = vmatmul.msk.bf16.gmra.mxu3 %vm100_vm1, %v8877_v13 }
 0x2c4   :  { %v1347_v21 = vpop.f32.mrf.mxu2 }
 0x2c5   :  { %v9159_v41 = vadd.f32 %v1347_v21, %v782_v18  ;;  %v1376_v42 = vpop.f32.mrf.mxu3  ;;  %v1291_v43 = vpop.f32.mrf.mxu0  ;;  %v12198_v21 = vld [vmem:[#allocation17_spill] sm:$0xff] }
 0x2c6   :  { %v9161_v24 = vadd.f32 %v1376_v42, %v811_v52  ;;  %v9163_v20 = vadd.f32 %v1291_v43, %v726_v53  ;;  %v1320_v48 = vpop.f32.mrf.mxu1  ;;  %v883_v57 = vadd.f32 %v12199_v54, %v12198_v21  ;;  %v12201_v42 = vld [vmem:[#allocation122_spill] sm:$0xff] }
 0x2c7   :  { %v9165_v62 = vadd.f32 %v1320_v48, %v755_v17  ;;  %v12200_v17 = vld [vmem:[#allocation18_spill] sm:$0xff]  ;;  %v12202_v48 = vld [vmem:[#allocation19_spill] sm:$0xff] }
 0x2c8   :  { %v912_v43 = vadd.f32 %v12201_v42, %v12200_v17  ;;  %v827_v23 = vadd.f32 %v12203_v63, %v12202_v48  ;;  %v12212_v21 = vld [vmem:[#allocation126_spill] sm:$0xff]  ;;  %v12213_v17 = vld [vmem:[#allocation23_spill] sm:$0xff]  ;;  %v12215_v63 = vld [vmem:[#allocation24_spill] sm:$0xff] }
 0x2c9   :  { %v12214_v42 = vld [vmem:[#allocation127_spill] sm:$0xff] }
 0x2ca   :  { %v830_v48 = vadd.f32 %v12214_v42, %v12213_v17  ;;  %v12225_v42 = vld [vmem:[#allocation27_spill] sm:$0xff] }
 0x2cc   :  { %v1349_v51 = vpop.f32.mrf.mxu2 }
 0x2cd   :  { %v9175_v18 = vadd.f32 %v1349_v51, %v784_v28  ;;  %v1378_v39 = vpop.f32.mrf.mxu3  ;;  %v1390_v26 = vpop.f32.mrf.mxu0 }
 0x2ce   :  { %v9177_v52 = vadd.f32 %v1378_v39, %v813_v16  ;;  %v9179_v22 = vadd.f32 %v1390_v26, %v825_v32  ;;  %v1419_v47 = vpop.f32.mrf.mxu1  ;;  %v856_v16 = vadd.f32 %v12205_v19, %v12204_v0  ;;  %v12210_v39 = vld [vmem:[#allocation125_spill] sm:$0xff] }
 0x2cf   :  { %v9181_v53 = vadd.f32 %v1419_v47, %v854_v15  ;;  %v12209_v15 = vld [vmem:[#allocation21_spill] sm:$0xff]  ;;  %v12211_v47 = vld [vmem:[#allocation22_spill] sm:$0xff] }
 0x2d0   :  { %6653 = vmatmul.msk.bf16.vlgmr.msrb.gmra.mxu0 %vm100_vm1, %v8783_v5  ;;  %6657 = vmatmul.msk.bf16.vlgmr.msrb.gmra.mxu1 %vm100_vm1, %v8783_v5  ;;  %v885_v26 = vadd.f32 %v12210_v39, %v12209_v15  ;;  %v914_v54 = vadd.f32 %v12212_v21, %v12211_v47  ;;  %v1866_v15 = vld [vmem:[%s11965_s0 + $0x6] sm:$0xff]  ;;  %v12221_v39 = vld [vmem:[#allocation25_spill] sm:$0xff] }
 0x2d1   :  { %6661 = vmatmul.msk.bf16.vlgmr.msrb.gmra.mxu2 %vm100_vm1, %v8783_v5  ;;  %1891 = vst [vmem:[#allocation1] ss:$4 sm:$0xff] %v1866_v15  ;;  %v12223_v21 = vld [vmem:[#allocation26_spill] sm:$0xff] }
 0x2d2   :  { %6665 = vmatmul.msk.bf16.vlgmr.msrb.gmra.mxu3 %vm100_vm1, %v8783_v5 }
 0x2d4   :  { %v1448_v28 = vpop.f32.mrf.mxu2 }
 0x2d5   :  { %v9199_v37 = vadd.f32 %v1448_v28, %v883_v57  ;;  %v1477_v49 = vpop.f32.mrf.mxu3  ;;  %v1392_v32 = vpop.f32.mrf.mxu0  ;;  %v12216_v28 = vld [vmem:[#allocation128_spill] sm:$0xff] }
 0x2d6   :  { %v9201_v51 = vadd.f32 %v1477_v49, %v912_v43  ;;  %v9203_v5 = vadd.f32 %v1392_v32, %v827_v23  ;;  %v1421_v38 = vpop.f32.mrf.mxu1  ;;  %v859_v0 = vadd.f32 %v12216_v28, %v12215_v63  ;;  %v12227_v28 = vld [vmem:[#allocation28_spill] sm:$0xff] }
 0x2d7   :  { %v9205_v2 = vadd.f32 %v1421_v38, %v856_v16 }
 0x2d8   :  { %12206 = vst [vmem:[#allocation7_spill] sm:$0xff] %v9201_v51  ;;  %v12382_v51 = vld [vmem:[#allocation183_spill] sm:$0xff] }
 0x2d9   :  { %12207 = vst [vmem:[#allocation111_spill] sm:$0xff] %v9203_v5  ;;  %v12358_v5 = vld [vmem:[#allocation175_spill] sm:$0xff] }
 0x2da   :  { %12208 = vst [vmem:[#allocation8_spill] sm:$0xff] %v9205_v2  ;;  %v12357_v2 = vld [vmem:[#allocation71_spill] sm:$0xff] }
 0x2dc   :  { %v1450_v57 = vpop.f32.mrf.mxu2 }
 0x2dd   :  { %v9215_v43 = vadd.f32 %v1450_v57, %v885_v26  ;;  %v1479_v23 = vpop.f32.mrf.mxu3  ;;  %v1395_v19 = vpop.f32.mrf.mxu0  ;;  %v12222_v26 = vld [vmem:[#allocation129_spill] sm:$0xff] }
 0x2de   :  { %v9217_v49 = vadd.f32 %v1479_v23, %v914_v54  ;;  %v9219_v16 = vadd.f32 %v1395_v19, %v830_v48  ;;  %v1424_v32 = vpop.f32.mrf.mxu1  ;;  %v888_v47 = vadd.f32 %v12222_v26, %v12221_v39  ;;  %v12224_v54 = vld [vmem:[#allocation130_spill] sm:$0xff]  ;;  %v12226_v48 = vld [vmem:[#allocation131_spill] sm:$0xff] }
 0x2df   :  { %12217 = vst [vmem:[#allocation112_spill] sm:$0xff] %v9215_v43  ;;  %v9221_v38 = vadd.f32 %v1424_v32, %v859_v0  ;;  %v917_v17 = vadd.f32 %v12224_v54, %v12223_v21  ;;  %v832_v57 = vadd.f32 %v12226_v48, %v12225_v42  ;;  %v12228_v0 = vld [vmem:[#allocation132_spill] sm:$0xff]  ;;  %v1895_v26 = vld.sshfl [vmem:[#allocation1] sm:$0xff pattern:$0x73625140]  ;;  %v12262_v43 = vld [vmem:[#allocation143_spill] sm:$0xff] }
 0x2e0   :  { %12218 = vst [vmem:[#allocation9_spill] sm:$0xff] %v9217_v49  ;;  %6654 = vmatmul.msk.bf16.gmra.mxu0 %vm100_vm1, %v8812_v11  ;;  %6658 = vmatmul.msk.bf16.gmra.mxu1 %vm100_vm1, %v8812_v11  ;;  %v861_v23 = vadd.f32 %v12228_v0, %v12227_v28  ;;  %v1896_v21 = vld.sshfl [vmem:[#allocation1 + $0x8] sm:$0xff pattern:$0x73625140]  ;;  %v12233_v54 = vld [vmem:[#allocation29_spill] sm:$0xff]  ;;  %v1927_v48 = vsel %vm113_vm0, %v1895_v26, 0 }
 0x2e1   :  { %12219 = vst [vmem:[#allocation113_spill] sm:$0xff] %v9219_v16  ;;  %6662 = vmatmul.msk.bf16.gmra.mxu2 %vm100_vm1, %v8812_v11  ;;  %v12234_v49 = vld [vmem:[#allocation133_spill] sm:$0xff]  ;;  %v1929_v28 = vsel %vm113_vm0, %v1896_v21, 0  ;;  %1966 = vmatpush.bf16.msra.mxu0 %v1927_v48 }
 0x2e2   :  { %12220 = vst [vmem:[#allocation10_spill] sm:$0xff] %v9221_v38  ;;  %6666 = vmatmul.msk.bf16.gmra.mxu3 %vm100_vm1, %v8812_v11  ;;  %v890_v42 = vadd.f32 %v12234_v49, %v12233_v54  ;;  %1995 = vmatpush.bf16.msra.mxu1 %v1929_v28  ;;  %v1897_v54 = vld.sshfl [vmem:[#allocation1 + $0x10] sm:$0xff pattern:$0x73625140] }
 0x2e3   :  { %v1898_v26 = vld.sshfl [vmem:[#allocation1 + $0x18] sm:$0xff pattern:$0x73625140] }
 0x2e4   :  { %v1453_v63 = vpop.f32.mrf.mxu2 }
 0x2e5   :  { %v9242_v19 = vadd.f32 %v1453_v63, %v888_v47  ;;  %v1482_v11 = vpop.f32.mrf.mxu3  ;;  %v1397_v32 = vpop.f32.mrf.mxu0  ;;  %v12235_v47 = vld [vmem:[#allocation30_spill] sm:$0xff] }
 0x2e6   :  { %v9244_v38 = vadd.f32 %v1482_v11, %v917_v17  ;;  %v9246_v16 = vadd.f32 %v1397_v32, %v832_v57  ;;  %v1426_v39 = vpop.f32.mrf.mxu1  ;;  %v12236_v63 = vld [vmem:[#allocation134_spill] sm:$0xff]  ;;  %v12238_v17 = vld [vmem:[#allocation135_spill] sm:$0xff]  ;;  %v12240_v32 = vld [vmem:[#allocation136_spill] sm:$0xff] }
 0x2e7   :  { %12229 = vst [vmem:[#allocation114_spill] sm:$0xff] %v9242_v19  ;;  %v9248_v15 = vadd.f32 %v1426_v39, %v861_v23  ;;  %v919_v0 = vadd.f32 %v12236_v63, %v12235_v47  ;;  %v12237_v19 = vld [vmem:[#allocation31_spill] sm:$0xff]  ;;  %v12239_v23 = vld [vmem:[#allocation32_spill] sm:$0xff]  ;;  %v1931_v63 = vsel %vm113_vm0, %v1897_v54, 0 }
 0x2e8   :  { %12230 = vst [vmem:[#allocation11_spill] sm:$0xff] %v9244_v38  ;;  %v835_v11 = vadd.f32 %v12238_v17, %v12237_v19  ;;  %v864_v39 = vadd.f32 %v12240_v32, %v12239_v23  ;;  %v1933_v19 = vsel %vm113_vm0, %v1898_v26, 0  ;;  %2024 = vmatpush.bf16.msra.mxu2 %v1931_v63  ;;  %v12248_v17 = vld [vmem:[#allocation138_spill] sm:$0xff]  ;;  %v12250_v23 = vld [vmem:[#allocation139_spill] sm:$0xff]  ;;  %v12252_v54 = vld [vmem:[#allocation140_spill] sm:$0xff] }
 0x2e9   :  { %12231 = vst [vmem:[#allocation115_spill] sm:$0xff] %v9246_v16  ;;  %2053 = vmatpush.bf16.msra.mxu3 %v1933_v19 }
 0x2ea   :  { %12232 = vst [vmem:[#allocation12_spill] sm:$0xff] %v9248_v15 }
 0x2ec   :  { %v1455_v57 = vpop.f32.mrf.mxu2 }
 0x2ed   :  { %v9260_v15 = vadd.f32 %v1455_v57, %v890_v42  ;;  %v1484_v16 = vpop.f32.mrf.mxu3  ;;  %v1400_v49 = vpop.f32.mrf.mxu0  ;;  %v12246_v42 = vld [vmem:[#allocation137_spill] sm:$0xff]  ;;  %v12249_v57 = vld [vmem:[#allocation35_spill] sm:$0xff] }
 0x2ee   :  { %v9262_v38 = vadd.f32 %v1484_v16, %v919_v0  ;;  %v9264_v21 = vadd.f32 %v1400_v49, %v835_v11  ;;  %v1429_v47 = vpop.f32.mrf.mxu1  ;;  %v12245_v16 = vld [vmem:[#allocation33_spill] sm:$0xff]  ;;  %v12247_v0 = vld [vmem:[#allocation34_spill] sm:$0xff]  ;;  %v837_v32 = vadd.f32 %v12250_v23, %v12249_v57  ;;  %v12251_v49 = vld [vmem:[#allocation36_spill] sm:$0xff] }
 0x2ef   :  { %12241 = vst [vmem:[#allocation116_spill] sm:$0xff] %v9260_v15  ;;  %v9268_v48 = vadd.f32 %v1429_v47, %v864_v39  ;;  %v893_v28 = vadd.f32 %v12246_v42, %v12245_v16  ;;  %v922_v11 = vadd.f32 %v12248_v17, %v12247_v0  ;;  %v866_v26 = vadd.f32 %v12252_v54, %v12251_v49  ;;  %v12257_v42 = vld [vmem:[#allocation37_spill] sm:$0xff]  ;;  %v12260_v57 = vld [vmem:[#allocation142_spill] sm:$0xff]  ;;  %v12261_v15 = vld [vmem:[#allocation39_spill] sm:$0xff] }
 0x2f0   :  { %12242 = vst [vmem:[#allocation13_spill] sm:$0xff] %v9262_v38  ;;  %6655 = vmatmul.msk.bf16.gmra.mxu0 %vm100_vm1, %v8846_v10  ;;  %6659 = vmatmul.msk.bf16.gmra.mxu1 %vm100_vm1, %v8846_v10  ;;  %v12258_v0 = vld [vmem:[#allocation141_spill] sm:$0xff]  ;;  %v12259_v38 = vld [vmem:[#allocation38_spill] sm:$0xff]  ;;  %v840_v49 = vadd.f32 %v12262_v43, %v12261_v15  ;;  %v12264_v54 = vld [vmem:[#allocation144_spill] sm:$0xff] }
 0x2f1   :  { %12243 = vst [vmem:[#allocation117_spill] sm:$0xff] %v9264_v21  ;;  %6663 = vmatmul.msk.bf16.gmra.mxu2 %vm100_vm1, %v8846_v10  ;;  %v895_v17 = vadd.f32 %v12258_v0, %v12257_v42  ;;  %v924_v23 = vadd.f32 %v12260_v57, %v12259_v38  ;;  %v12269_v43 = vld [vmem:[#allocation41_spill] sm:$0xff]  ;;  %v12271_v0 = vld [vmem:[#allocation42_spill] sm:$0xff] }
 0x2f2   :  { %12244 = vst [vmem:[#allocation14_spill] sm:$0xff] %v9268_v48  ;;  %6667 = vmatmul.msk.bf16.gmra.mxu3 %vm100_vm1, %v8846_v10  ;;  %v12270_v38 = vld [vmem:[#allocation145_spill] sm:$0xff] }
 0x2f3   :  { %v898_v15 = vadd.f32 %v12270_v38, %v12269_v43  ;;  %v12281_v38 = vld [vmem:[#allocation45_spill] sm:$0xff] }
 0x2f4   :  { %v1458_v39 = vpop.f32.mrf.mxu2 }
 0x2f5   :  { %v9286_v47 = vadd.f32 %v1458_v39, %v893_v28  ;;  %v1487_v63 = vpop.f32.mrf.mxu3  ;;  %v1402_v19 = vpop.f32.mrf.mxu0  ;;  %v12263_v39 = vld [vmem:[#allocation40_spill] sm:$0xff] }
 0x2f6   :  { %v9288_v48 = vadd.f32 %v1487_v63, %v922_v11  ;;  %v9290_v10 = vadd.f32 %v1402_v19, %v837_v32  ;;  %v1431_v21 = vpop.f32.mrf.mxu1 }
 0x2f7   :  { %12253 = vst [vmem:[#allocation118_spill] sm:$0xff] %v9286_v47  ;;  %v9292_v16 = vadd.f32 %v1431_v21, %v866_v26  ;;  %v869_v47 = vadd.f32 %v12264_v54, %v12263_v39  ;;  %v12275_v39 = vld [vmem:[#allocation44_spill] sm:$0xff] }
 0x2f8   :  { %12254 = vst [vmem:[#allocation15_spill] sm:$0xff] %v9288_v48  ;;  %v12276_v54 = vld [vmem:[#allocation148_spill] sm:$0xff]  ;;  %v12310_v48 = vld [vmem:[#allocation159_spill] sm:$0xff] }
 0x2f9   :  { %12255 = vst [vmem:[#allocation119_spill] sm:$0xff] %v9290_v10  ;;  %v12286_v10 = vld [vmem:[#allocation151_spill] sm:$0xff] }
 0x2fa   :  { %12256 = vst [vmem:[#allocation16_spill] sm:$0xff] %v9292_v16  ;;  %v12285_v16 = vld [vmem:[#allocation47_spill] sm:$0xff] }
 0x2fc   :  { %v1460_v28 = vpop.f32.mrf.mxu2 }
 0x2fd   :  { %v9302_v11 = vadd.f32 %v1460_v28, %v895_v17  ;;  %v1489_v32 = vpop.f32.mrf.mxu3  ;;  %v1405_v63 = vpop.f32.mrf.mxu0  ;;  %v12272_v17 = vld [vmem:[#allocation146_spill] sm:$0xff] }
 0x2fe   :  { %v9304_v19 = vadd.f32 %v1489_v32, %v924_v23  ;;  %v9306_v21 = vadd.f32 %v1405_v63, %v840_v49  ;;  %v1434_v26 = vpop.f32.mrf.mxu1  ;;  %v927_v57 = vadd.f32 %v12272_v17, %v12271_v0  ;;  %v12274_v23 = vld [vmem:[#allocation147_spill] sm:$0xff]  ;;  %v871_v32 = vadd.f32 %v12276_v54, %v12275_v39  ;;  %v12282_v0 = vld [vmem:[#allocation149_spill] sm:$0xff] }
 0x2ff   :  { %12265 = vst [vmem:[#allocation120_spill] sm:$0xff] %v9302_v11  ;;  %v9308_v42 = vadd.f32 %v1434_v26, %v869_v47  ;;  %v12273_v47 = vld [vmem:[#allocation43_spill] sm:$0xff]  ;;  %v900_v17 = vadd.f32 %v12282_v0, %v12281_v38  ;;  %v12283_v11 = vld [vmem:[#allocation46_spill] sm:$0xff]  ;;  %v941_v39 = vadd.f32 %v12286_v10, %v12285_v16  ;;  %v12293_v10 = vld [vmem:[#allocation49_spill] sm:$0xff] }
 0x300   :  { %12266 = vst [vmem:[#allocation17_spill] sm:$0xff] %v9304_v19  ;;  %6656 = vmatmul.msk.bf16.gmra.mxu0 %vm100_vm1, %v8877_v13  ;;  %6660 = vmatmul.msk.bf16.gmra.mxu1 %vm100_vm1, %v8877_v13  ;;  %v842_v49 = vadd.f32 %v12274_v23, %v12273_v47  ;;  %v12284_v47 = vld [vmem:[#allocation150_spill] sm:$0xff]  ;;  %v12294_v16 = vld [vmem:[#allocation153_spill] sm:$0xff] }
 0x301   :  { %12267 = vst [vmem:[#allocation121_spill] sm:$0xff] %v9306_v21  ;;  %6664 = vmatmul.msk.bf16.gmra.mxu2 %vm100_vm1, %v8877_v13  ;;  %v929_v23 = vadd.f32 %v12284_v47, %v12283_v11  ;;  %v12295_v47 = vld [vmem:[#allocation50_spill] sm:$0xff] }
 0x302   :  { %12268 = vst [vmem:[#allocation18_spill] sm:$0xff] %v9308_v42  ;;  %6668 = vmatmul.msk.bf16.gmra.mxu3 %vm100_vm1, %v8877_v13 }
 0x304   :  { %v1463_v28 = vpop.f32.mrf.mxu2 }
 0x305   :  { %v9326_v63 = vadd.f32 %v1463_v28, %v898_v15  ;;  %v1492_v26 = vpop.f32.mrf.mxu3  ;;  %v1407_v42 = vpop.f32.mrf.mxu0 }
 0x306   :  { %v9328_v21 = vadd.f32 %v1492_v26, %v927_v57  ;;  %v9330_v13 = vadd.f32 %v1407_v42, %v842_v49  ;;  %v1436_v19 = vpop.f32.mrf.mxu1  ;;  %v9343_v57 = vld [vmem:[%s11966_s1 + $0x60] sm:$0xff]  ;;  %v12287_v42 = vld [vmem:[#allocation48_spill] sm:$0xff] }
 0x307   :  { %12277 = vst [vmem:[#allocation122_spill] sm:$0xff] %v9326_v63  ;;  %v9332_v43 = vadd.f32 %v1436_v19, %v871_v32  ;;  %v12288_v49 = vld [vmem:[#allocation152_spill] sm:$0xff]  ;;  %v12309_v63 = vld [vmem:[#allocation55_spill] sm:$0xff] }
 0x308   :  { %12278 = vst [vmem:[#allocation19_spill] sm:$0xff] %v9328_v21  ;;  %v970_v28 = vadd.f32 %v12288_v49, %v12287_v42  ;;  %v12298_v42 = vld [vmem:[#allocation155_spill] sm:$0xff]  ;;  %v12307_v21 = vld [vmem:[#allocation54_spill] sm:$0xff] }
 0x309   :  { %12279 = vst [vmem:[#allocation123_spill] sm:$0xff] %v9330_v13 }
 0x30a   :  { %12280 = vst [vmem:[#allocation20_spill] sm:$0xff] %v9332_v43 }
 0x30c   :  { %v1465_v15 = vpop.f32.mrf.mxu2 }
 0x30d   :  { %v9347_v19 = vadd.f32 %v1465_v15, %v900_v17  ;;  %v1494_v54 = vpop.f32.mrf.mxu3  ;;  %v1506_v32 = vpop.f32.mrf.mxu0  ;;  %v999_v17 = vadd.f32 %v12294_v16, %v12293_v10  ;;  %v12297_v15 = vld [vmem:[#allocation51_spill] sm:$0xff]  ;;  %v12305_v16 = vld [vmem:[#allocation53_spill] sm:$0xff] }
 0x30e   :  { %v9349_v26 = vadd.f32 %v1494_v54, %v929_v23  ;;  %v9351_v38 = vadd.f32 %v1506_v32, %v941_v39  ;;  %v1535_v11 = vpop.f32.mrf.mxu1  ;;  %v12296_v23 = vld [vmem:[#allocation154_spill] sm:$0xff]  ;;  %v943_v49 = vadd.f32 %v12298_v42, %v12297_v15  ;;  %v12299_v54 = vld [vmem:[#allocation52_spill] sm:$0xff] }
 0x30f   :  { %12289 = vst [vmem:[#allocation124_spill] sm:$0xff] %v9347_v19  ;;  %v9353_v0 = vadd.f32 %v1535_v11, %v970_v28  ;;  %v1028_v39 = vadd.f32 %v12296_v23, %v12295_v47  ;;  %v12300_v32 = vld [vmem:[#allocation156_spill] sm:$0xff]  ;;  %v12306_v47 = vld [vmem:[#allocation157_spill] sm:$0xff]  ;;  %v12308_v15 = vld [vmem:[#allocation158_spill] sm:$0xff] }
 0x310   :  { %12290 = vst [vmem:[#allocation21_spill] sm:$0xff] %v9349_v26  ;;  %6693 = vmatmul.msk.bf16.vlgmr.msra.gmra.mxu0 %vm100_vm1, %v9343_v57  ;;  %6697 = vmatmul.msk.bf16.vlgmr.msra.gmra.mxu1 %vm100_vm1, %v9343_v57  ;;  %v972_v11 = vadd.f32 %v12300_v32, %v12299_v54  ;;  %v1001_v23 = vadd.f32 %v12306_v47, %v12305_v16 }
 0x311   :  { %12291 = vst [vmem:[#allocation125_spill] sm:$0xff] %v9351_v38  ;;  %6701 = vmatmul.msk.bf16.vlgmr.msra.gmra.mxu2 %vm100_vm1, %v9343_v57  ;;  %v1030_v42 = vadd.f32 %v12308_v15, %v12307_v21  ;;  %v946_v54 = vadd.f32 %v12310_v48, %v12309_v63  ;;  %v1867_v48 = vld [vmem:[%s11965_s0 + $0xe] sm:$0xff]  ;;  %v12317_v63 = vld [vmem:[#allocation57_spill] sm:$0xff] }
 0x312   :  { %12292 = vst [vmem:[#allocation22_spill] sm:$0xff] %v9353_v0  ;;  %6705 = vmatmul.msk.bf16.vlgmr.msra.gmra.mxu3 %vm100_vm1, %v9343_v57 }
 0x313   :  { %1894 = vst [vmem:[#allocation1 + $0x20] ss:$4 sm:$0xff] %v1867_v48 }
 0x314   :  { %v1564_v28 = vpop.f32.mrf.mxu2 }
 0x315   :  { %v9371_v0 = vadd.f32 %v1564_v28, %v999_v17  ;;  %v1593_v38 = vpop.f32.mrf.mxu3  ;;  %v1508_v26 = vpop.f32.mrf.mxu0 }
 0x316   :  { %v9373_v19 = vadd.f32 %v1593_v38, %v1028_v39  ;;  %v9375_v43 = vadd.f32 %v1508_v26, %v943_v49  ;;  %v1537_v13 = vpop.f32.mrf.mxu1  ;;  %v9388_v38 = vld [vmem:[%s11966_s1 + $0x68] sm:$0xff]  ;;  %v12311_v26 = vld [vmem:[#allocation56_spill] sm:$0xff] }
 0x317   :  { %12301 = vst [vmem:[#allocation126_spill] sm:$0xff] %v9371_v0  ;;  %v9377_v10 = vadd.f32 %v1537_v13, %v972_v11  ;;  %v12312_v39 = vld [vmem:[#allocation160_spill] sm:$0xff]  ;;  %v12355_v0 = vld [vmem:[#allocation70_spill] sm:$0xff] }
 0x318   :  { %12302 = vst [vmem:[#allocation23_spill] sm:$0xff] %v9373_v19  ;;  %v975_v49 = vadd.f32 %v12312_v39, %v12311_v26  ;;  %v12321_v26 = vld [vmem:[#allocation59_spill] sm:$0xff]  ;;  %v12330_v19 = vld [vmem:[#allocation165_spill] sm:$0xff] }
 0x319   :  { %12303 = vst [vmem:[#allocation127_spill] sm:$0xff] %v9375_v43  ;;  %v12322_v39 = vld [vmem:[#allocation163_spill] sm:$0xff] }
 0x31a   :  { %12304 = vst [vmem:[#allocation24_spill] sm:$0xff] %v9377_v10 }
 0x31c   :  { %v1566_v17 = vpop.f32.mrf.mxu2 }
 0x31d   :  { %v9392_v13 = vadd.f32 %v1566_v17, %v1001_v23  ;;  %v1595_v28 = vpop.f32.mrf.mxu3  ;;  %v1511_v32 = vpop.f32.mrf.mxu0  ;;  %v12318_v23 = vld [vmem:[#allocation161_spill] sm:$0xff] }
 0x31e   :  { %v9394_v11 = vadd.f32 %v1595_v28, %v1030_v42  ;;  %v9396_v16 = vadd.f32 %v1511_v32, %v946_v54  ;;  %v1540_v21 = vpop.f32.mrf.mxu1  ;;  %v1004_v15 = vadd.f32 %v12318_v23, %v12317_v63  ;;  %v12319_v42 = vld [vmem:[#allocation58_spill] sm:$0xff]  ;;  %v12323_v32 = vld [vmem:[#allocation60_spill] sm:$0xff] }
 0x31f   :  { %12313 = vst [vmem:[#allocation128_spill] sm:$0xff] %v9392_v13  ;;  %v9398_v47 = vadd.f32 %v1540_v21, %v975_v49  ;;  %v12320_v54 = vld [vmem:[#allocation162_spill] sm:$0xff]  ;;  %v948_v49 = vadd.f32 %v12322_v39, %v12321_v26  ;;  %v12324_v21 = vld [vmem:[#allocation164_spill] sm:$0xff] }
 0x320   :  { %12314 = vst [vmem:[#allocation25_spill] sm:$0xff] %v9394_v11  ;;  %6694 = vmatmul.msk.bf16.gmra.mxu0 %vm100_vm1, %v9388_v38  ;;  %6698 = vmatmul.msk.bf16.gmra.mxu1 %vm100_vm1, %v9388_v38  ;;  %v1033_v17 = vadd.f32 %v12320_v54, %v12319_v42  ;;  %v1899_v23 = vld.sshfl [vmem:[#allocation1 + $0x20] sm:$0xff pattern:$0x73625140] }
 0x321   :  { %12315 = vst [vmem:[#allocation129_spill] sm:$0xff] %v9396_v16  ;;  %6702 = vmatmul.msk.bf16.gmra.mxu2 %vm100_vm1, %v9388_v38  ;;  %v1900_v42 = vld.sshfl [vmem:[#allocation1 + $0x28] sm:$0xff pattern:$0x73625140]  ;;  %v12329_v54 = vld [vmem:[#allocation61_spill] sm:$0xff]  ;;  %v1935_v39 = vsel %vm113_vm0, %v1899_v23, 0 }
 0x322   :  { %12316 = vst [vmem:[#allocation26_spill] sm:$0xff] %v9398_v47  ;;  %6706 = vmatmul.msk.bf16.gmra.mxu3 %vm100_vm1, %v9388_v38  ;;  %v977_v47 = vadd.f32 %v12324_v21, %v12323_v32  ;;  %v1006_v26 = vadd.f32 %v12330_v19, %v12329_v54  ;;  %v1937_v32 = vsel %vm113_vm0, %v1900_v42, 0  ;;  %2082 = vmatpush.bf16.msrb.mxu0 %v1935_v39  ;;  %v12336_v19 = vld [vmem:[#allocation168_spill] sm:$0xff] }
 0x323   :  { %2111 = vmatpush.bf16.msrb.mxu1 %v1937_v32 }
 0x324   :  { %v1569_v28 = vpop.f32.mrf.mxu2 }
 0x325   :  { %v9419_v16 = vadd.f32 %v1569_v28, %v1004_v15  ;;  %v1598_v11 = vpop.f32.mrf.mxu3  ;;  %v1513_v13 = vpop.f32.mrf.mxu0  ;;  %v12331_v15 = vld [vmem:[#allocation62_spill] sm:$0xff] }
 0x326   :  { %v9421_v10 = vadd.f32 %v1598_v11, %v1033_v17  ;;  %v9423_v43 = vadd.f32 %v1513_v13, %v948_v49  ;;  %v1542_v63 = vpop.f32.mrf.mxu1  ;;  %v12332_v28 = vld [vmem:[#allocation166_spill] sm:$0xff]  ;;  %v12334_v11 = vld [vmem:[#allocation167_spill] sm:$0xff]  ;;  %v12335_v49 = vld [vmem:[#allocation64_spill] sm:$0xff] }
 0x327   :  { %12325 = vst [vmem:[#allocation130_spill] sm:$0xff] %v9419_v16  ;;  %v9425_v48 = vadd.f32 %v1542_v63, %v977_v47  ;;  %v1035_v21 = vadd.f32 %v12332_v28, %v12331_v15  ;;  %v12333_v16 = vld [vmem:[#allocation63_spill] sm:$0xff]  ;;  %v980_v63 = vadd.f32 %v12336_v19, %v12335_v49  ;;  %v1902_v15 = vld.sshfl [vmem:[#allocation1 + $0x38] sm:$0xff pattern:$0x73625140] }
 0x328   :  { %12326 = vst [vmem:[#allocation27_spill] sm:$0xff] %v9421_v10  ;;  %v951_v17 = vadd.f32 %v12334_v11, %v12333_v16  ;;  %v9438_v47 = vld [vmem:[%s11966_s1 + $0x70] sm:$0xff]  ;;  %v1941_v10 = vsel %vm113_vm0, %v1902_v15, 0 }
 0x329   :  { %12327 = vst [vmem:[#allocation131_spill] sm:$0xff] %v9423_v43  ;;  %2169 = vmatpush.bf16.msrb.mxu3 %v1941_v10  ;;  %v12346_v10 = vld [vmem:[#allocation171_spill] sm:$0xff] }
 0x32a   :  { %12328 = vst [vmem:[#allocation28_spill] sm:$0xff] %v9425_v48  ;;  %v1901_v48 = vld.sshfl [vmem:[#allocation1 + $0x30] sm:$0xff pattern:$0x73625140] }
 0x32b   :  { %v1939_v43 = vsel %vm113_vm0, %v1901_v48, 0  ;;  %v12342_v48 = vld [vmem:[#allocation169_spill] sm:$0xff] }
 0x32c   :  { %v1571_v13 = vpop.f32.mrf.mxu2  ;;  %2140 = vmatpush.bf16.msrb.mxu2 %v1939_v43  ;;  %v12345_v43 = vld [vmem:[#allocation67_spill] sm:$0xff] }
 0x32d   :  { %v9442_v23 = vadd.f32 %v1571_v13, %v1006_v26  ;;  %v1600_v42 = vpop.f32.mrf.mxu3  ;;  %v1516_v54 = vpop.f32.mrf.mxu0  ;;  %v12341_v26 = vld [vmem:[#allocation65_spill] sm:$0xff]  ;;  %v953_v49 = vadd.f32 %v12346_v10, %v12345_v43  ;;  %v12356_v43 = vld [vmem:[#allocation174_spill] sm:$0xff] }
 0x32e   :  { %v9444_v28 = vadd.f32 %v1600_v42, %v1035_v21  ;;  %v9446_v16 = vadd.f32 %v1516_v54, %v951_v17  ;;  %v1545_v11 = vpop.f32.mrf.mxu1  ;;  %v1009_v32 = vadd.f32 %v12342_v48, %v12341_v26  ;;  %v12343_v21 = vld [vmem:[#allocation66_spill] sm:$0xff]  ;;  %v12348_v42 = vld [vmem:[#allocation172_spill] sm:$0xff]  ;;  %v12353_v48 = vld [vmem:[#allocation69_spill] sm:$0xff]  ;;  %v1040_v10 = vadd.f32 %v12356_v43, %v12355_v0 }
 0x32f   :  { %12337 = vst [vmem:[#allocation132_spill] sm:$0xff] %v9442_v23  ;;  %v9450_v39 = vadd.f32 %v1545_v11, %v980_v63  ;;  %v12344_v17 = vld [vmem:[#allocation170_spill] sm:$0xff]  ;;  %v12347_v63 = vld [vmem:[#allocation68_spill] sm:$0xff] }
 0x330   :  { %12338 = vst [vmem:[#allocation29_spill] sm:$0xff] %v9444_v28  ;;  %6695 = vmatmul.msk.bf16.gmra.mxu0 %vm100_vm1, %v9438_v47  ;;  %6699 = vmatmul.msk.bf16.gmra.mxu1 %vm100_vm1, %v9438_v47  ;;  %v1038_v13 = vadd.f32 %v12344_v17, %v12343_v21  ;;  %v982_v54 = vadd.f32 %v12348_v42, %v12347_v63  ;;  %v12354_v21 = vld [vmem:[#allocation173_spill] sm:$0xff]  ;;  %v12367_v43 = vld [vmem:[#allocation74_spill] sm:$0xff] }
 0x331   :  { %12339 = vst [vmem:[#allocation133_spill] sm:$0xff] %v9446_v16  ;;  %6703 = vmatmul.msk.bf16.gmra.mxu2 %vm100_vm1, %v9438_v47  ;;  %v1011_v17 = vadd.f32 %v12354_v21, %v12353_v48  ;;  %v956_v63 = vadd.f32 %v12358_v5, %v12357_v2  ;;  %v12365_v5 = vld [vmem:[#allocation73_spill] sm:$0xff] }
 0x332   :  { %12340 = vst [vmem:[#allocation30_spill] sm:$0xff] %v9450_v39  ;;  %6707 = vmatmul.msk.bf16.gmra.mxu3 %vm100_vm1, %v9438_v47  ;;  %v12366_v2 = vld [vmem:[#allocation177_spill] sm:$0xff] }
 0x334   :  { %v1574_v19 = vpop.f32.mrf.mxu2 }
 0x335   :  { %v9468_v15 = vadd.f32 %v1574_v19, %v1009_v32  ;;  %v1603_v11 = vpop.f32.mrf.mxu3  ;;  %v1518_v39 = vpop.f32.mrf.mxu0 }
 0x336   :  { %v9470_v16 = vadd.f32 %v1603_v11, %v1038_v13  ;;  %v9472_v28 = vadd.f32 %v1518_v39, %v953_v49  ;;  %v1547_v23 = vpop.f32.mrf.mxu1  ;;  %v9485_v13 = vld [vmem:[%s11966_s1 + $0x78] sm:$0xff] }
 0x337   :  { %12349 = vst [vmem:[#allocation134_spill] sm:$0xff] %v9468_v15  ;;  %v9474_v26 = vadd.f32 %v1547_v23, %v982_v54  ;;  %v12359_v39 = vld [vmem:[#allocation72_spill] sm:$0xff]  ;;  %v12381_v15 = vld [vmem:[#allocation79_spill] sm:$0xff] }
 0x338   :  { %12350 = vst [vmem:[#allocation31_spill] sm:$0xff] %v9470_v16  ;;  %v12360_v49 = vld [vmem:[#allocation176_spill] sm:$0xff]  ;;  %v12379_v16 = vld [vmem:[#allocation78_spill] sm:$0xff] }
 0x339   :  { %12351 = vst [vmem:[#allocation135_spill] sm:$0xff] %v9472_v28  ;;  %v985_v19 = vadd.f32 %v12360_v49, %v12359_v39  ;;  %v12370_v39 = vld [vmem:[#allocation179_spill] sm:$0xff] }
 0x33a   :  { %12352 = vst [vmem:[#allocation32_spill] sm:$0xff] %v9474_v26 }
 0x33c   :  { %v1576_v32 = vpop.f32.mrf.mxu2 }
 0x33d   :  { %v9489_v23 = vadd.f32 %v1576_v32, %v1011_v17  ;;  %v1605_v42 = vpop.f32.mrf.mxu3  ;;  %v1521_v54 = vpop.f32.mrf.mxu0  ;;  %v1014_v17 = vadd.f32 %v12366_v2, %v12365_v5  ;;  %v12369_v32 = vld [vmem:[#allocation75_spill] sm:$0xff]  ;;  %v12377_v2 = vld [vmem:[#allocation77_spill] sm:$0xff] }
 0x33e   :  { %v9491_v11 = vadd.f32 %v1605_v42, %v1040_v10  ;;  %v9493_v48 = vadd.f32 %v1521_v54, %v956_v63  ;;  %v1550_v0 = vpop.f32.mrf.mxu1  ;;  %v12368_v10 = vld [vmem:[#allocation178_spill] sm:$0xff]  ;;  %v958_v49 = vadd.f32 %v12370_v39, %v12369_v32  ;;  %v12371_v42 = vld [vmem:[#allocation76_spill] sm:$0xff] }
 0x33f   :  { %12361 = vst [vmem:[#allocation136_spill] sm:$0xff] %v9489_v23  ;;  %v9495_v21 = vadd.f32 %v1550_v0, %v985_v19  ;;  %v1043_v63 = vadd.f32 %v12368_v10, %v12367_v43  ;;  %v12372_v54 = vld [vmem:[#allocation180_spill] sm:$0xff]  ;;  %v12378_v43 = vld [vmem:[#allocation181_spill] sm:$0xff]  ;;  %v12380_v32 = vld [vmem:[#allocation182_spill] sm:$0xff] }
 0x340   :  { %12362 = vst [vmem:[#allocation33_spill] sm:$0xff] %v9491_v11  ;;  %6696 = vmatmul.msk.bf16.gmra.mxu0 %vm100_vm1, %v9485_v13  ;;  %6700 = vmatmul.msk.bf16.gmra.mxu1 %vm100_vm1, %v9485_v13  ;;  %v987_v0 = vadd.f32 %v12372_v54, %v12371_v42  ;;  %v1016_v10 = vadd.f32 %v12378_v43, %v12377_v2  ;;  %v12384_v54 = vld [vmem:[#allocation184_spill] sm:$0xff]  ;;  %v12391_v43 = vld [vmem:[#allocation82_spill] sm:$0xff] }
 0x341   :  { %12363 = vst [vmem:[#allocation137_spill] sm:$0xff] %v9493_v48  ;;  %6704 = vmatmul.msk.bf16.gmra.mxu2 %vm100_vm1, %v9485_v13  ;;  %v1045_v39 = vadd.f32 %v12380_v32, %v12379_v16  ;;  %v1057_v42 = vadd.f32 %v12382_v51, %v12381_v15  ;;  %v12389_v51 = vld [vmem:[#allocation81_spill] sm:$0xff] }
 0x342   :  { %12364 = vst [vmem:[#allocation34_spill] sm:$0xff] %v9495_v21  ;;  %6708 = vmatmul.msk.bf16.gmra.mxu3 %vm100_vm1, %v9485_v13  ;;  %v12390_v16 = vld [vmem:[#allocation185_spill] sm:$0xff] }
 0x343   :  { %v1115_v15 = vadd.f32 %v12390_v16, %v12389_v51  ;;  %v12400_v16 = vld [vmem:[#allocation85_spill] sm:$0xff] }
 0x344   :  { %v1579_v19 = vpop.f32.mrf.mxu2 }
 0x345   :  { %v9513_v21 = vadd.f32 %v1579_v19, %v1014_v17  ;;  %v1608_v48 = vpop.f32.mrf.mxu3  ;;  %v1523_v11 = vpop.f32.mrf.mxu0  ;;  %v12383_v19 = vld [vmem:[#allocation80_spill] sm:$0xff] }
 0x346   :  { %v9515_v23 = vadd.f32 %v1608_v48, %v1043_v63  ;;  %v9517_v26 = vadd.f32 %v1523_v11, %v958_v49  ;;  %v1552_v28 = vpop.f32.mrf.mxu1 }
 0x347   :  { %12373 = vst [vmem:[#allocation138_spill] sm:$0xff] %v9513_v21  ;;  %v9519_v5 = vadd.f32 %v1552_v28, %v987_v0  ;;  %v1086_v21 = vadd.f32 %v12384_v54, %v12383_v19  ;;  %v12395_v19 = vld [vmem:[#allocation84_spill] sm:$0xff] }
 0x348   :  { %12374 = vst [vmem:[#allocation35_spill] sm:$0xff] %v9515_v23  ;;  %v12396_v54 = vld [vmem:[#allocation188_spill] sm:$0xff]  ;;  %v12405_v23 = vld [vmem:[#allocation191_spill] sm:$0xff] }
 0x349   :  { %12375 = vst [vmem:[#allocation139_spill] sm:$0xff] %v9517_v26  ;;  %v12404_v26 = vld [vmem:[#allocation87_spill] sm:$0xff] }
 0x34a   :  { %12376 = vst [vmem:[#allocation36_spill] sm:$0xff] %v9519_v5  ;;  %v12402_v5 = vld [vmem:[#allocation86_spill] sm:$0xff] }
 0x34c   :  { %v1581_v17 = vpop.f32.mrf.mxu2 }
 0x34d   :  { %v9529_v48 = vadd.f32 %v1581_v17, %v1016_v10  ;;  %v1610_v11 = vpop.f32.mrf.mxu3  ;;  %v1622_v63 = vpop.f32.mrf.mxu0  ;;  %v12392_v10 = vld [vmem:[#allocation186_spill] sm:$0xff] }
 0x34e   :  { %v9531_v49 = vadd.f32 %v1610_v11, %v1045_v39  ;;  %v9533_v28 = vadd.f32 %v1622_v63, %v1057_v42  ;;  %v1651_v0 = vpop.f32.mrf.mxu1  ;;  %v1144_v32 = vadd.f32 %v12392_v10, %v12391_v43  ;;  %v12394_v39 = vld [vmem:[#allocation187_spill] sm:$0xff]  ;;  %v1088_v11 = vadd.f32 %v12396_v54, %v12395_v19  ;;  %v12401_v43 = vld [vmem:[#allocation189_spill] sm:$0xff]  ;;  %v12407_v54 = vld [vmem:[#allocation192_spill] sm:$0xff] }
 0x34f   :  { %12385 = vst [vmem:[#allocation140_spill] sm:$0xff] %v9529_v48  ;;  %v9535_v2 = vadd.f32 %v1651_v0, %v1086_v21  ;;  %v12393_v21 = vld [vmem:[#allocation83_spill] sm:$0xff]  ;;  %v1117_v10 = vadd.f32 %v12401_v43, %v12400_v16  ;;  %v1062_v19 = vadd.f32 %v12405_v23, %v12404_v26  ;;  %v1868_v26 = vld [vmem:[%s11965_s0 + $0x16] sm:$0xff]  ;;  %v12414_v43 = vld [vmem:[#allocation90_spill] sm:$0xff] }
 0x350   :  { %12386 = vst [vmem:[#allocation37_spill] sm:$0xff] %v9531_v49  ;;  %6709 = vmatmul.msk.bf16.vlgmr.msrb.gmra.mxu0 %vm100_vm1, %v9343_v57  ;;  %6713 = vmatmul.msk.bf16.vlgmr.msrb.gmra.mxu1 %vm100_vm1, %v9343_v57  ;;  %v1059_v42 = vadd.f32 %v12394_v39, %v12393_v21  ;;  %v12403_v21 = vld [vmem:[#allocation190_spill] sm:$0xff]  ;;  %v12412_v23 = vld [vmem:[#allocation89_spill] sm:$0xff] }
 0x351   :  { %12387 = vst [vmem:[#allocation141_spill] sm:$0xff] %v9533_v28  ;;  %6717 = vmatmul.msk.bf16.vlgmr.msrb.gmra.mxu2 %vm100_vm1, %v9343_v57  ;;  %v1146_v39 = vadd.f32 %v12403_v21, %v12402_v5  ;;  %v12413_v5 = vld [vmem:[#allocation193_spill] sm:$0xff] }
 0x352   :  { %12388 = vst [vmem:[#allocation38_spill] sm:$0xff] %v9535_v2  ;;  %6721 = vmatmul.msk.bf16.vlgmr.msrb.gmra.mxu3 %vm100_vm1, %v9343_v57 }
 0x353   :  { %1904 = vst [vmem:[#allocation1] ss:$4 sm:$0xff] %v1868_v26 }
 0x354   :  { %v1680_v17 = vpop.f32.mrf.mxu2 }
 0x355   :  { %v9553_v63 = vadd.f32 %v1680_v17, %v1115_v15  ;;  %v1709_v0 = vpop.f32.mrf.mxu3  ;;  %v1624_v2 = vpop.f32.mrf.mxu0  ;;  %v12406_v17 = vld [vmem:[#allocation88_spill] sm:$0xff] }
 0x356   :  { %v9555_v28 = vadd.f32 %v1709_v0, %v1144_v32  ;;  %v9557_v49 = vadd.f32 %v1624_v2, %v1059_v42  ;;  %v1653_v48 = vpop.f32.mrf.mxu1 }
 0x357   :  { %12397 = vst [vmem:[#allocation142_spill] sm:$0xff] %v9553_v63  ;;  %v9559_v51 = vadd.f32 %v1653_v48, %v1088_v11  ;;  %v1091_v63 = vadd.f32 %v12407_v54, %v12406_v17  ;;  %v12418_v54 = vld [vmem:[#allocation92_spill] sm:$0xff] }
 0x358   :  { %12398 = vst [vmem:[#allocation39_spill] sm:$0xff] %v9557_v49  ;;  %v12449_v49 = vld [vmem:[#allocation206_spill] sm:$0xff] }
 0x359   :  { %12399 = vst [vmem:[#allocation143_spill] sm:$0xff] %v9559_v51  ;;  %v12448_v51 = vld [vmem:[#allocation103_spill] sm:$0xff] }
 0x35c   :  { %v1682_v15 = vpop.f32.mrf.mxu2 }
 0x35d   :  { %v9569_v32 = vadd.f32 %v1682_v15, %v1117_v10  ;;  %v1711_v2 = vpop.f32.mrf.mxu3  ;;  %v1627_v42 = vpop.f32.mrf.mxu0  ;;  %v12415_v10 = vld [vmem:[#allocation194_spill] sm:$0xff] }
 0x35e   :  { %v9571_v0 = vadd.f32 %v1711_v2, %v1146_v39  ;;  %v9573_v48 = vadd.f32 %v1627_v42, %v1062_v19  ;;  %v1656_v11 = vpop.f32.mrf.mxu1  ;;  %v1149_v21 = vadd.f32 %v12415_v10, %v12414_v43  ;;  %v12416_v39 = vld [vmem:[#allocation91_spill] sm:$0xff]  ;;  %v12419_v2 = vld [vmem:[#allocation196_spill] sm:$0xff]  ;;  %v12424_v10 = vld [vmem:[#allocation93_spill] sm:$0xff] }
 0x35f   :  { %12408 = vst [vmem:[#allocation40_spill] sm:$0xff] %v9569_v32  ;;  %v9575_v16 = vadd.f32 %v1656_v11, %v1091_v63  ;;  %v1120_v63 = vadd.f32 %v12413_v5, %v12412_v23  ;;  %v12417_v19 = vld [vmem:[#allocation195_spill] sm:$0xff]  ;;  %v1093_v42 = vadd.f32 %v12419_v2, %v12418_v54  ;;  %v1907_v5 = vld.sshfl [vmem:[#allocation1] sm:$0xff pattern:$0x73625140] }
 0x360   :  { %12409 = vst [vmem:[#allocation144_spill] sm:$0xff] %v9571_v0  ;;  %6710 = vmatmul.msk.bf16.gmra.mxu0 %vm100_vm1, %v9388_v38  ;;  %6714 = vmatmul.msk.bf16.gmra.mxu1 %vm100_vm1, %v9388_v38  ;;  %v1064_v15 = vadd.f32 %v12417_v19, %v12416_v39  ;;  %v1908_v43 = vld.sshfl [vmem:[#allocation1 + $0x8] sm:$0xff pattern:$0x73625140]  ;;  %v1122_v39 = vadd.f32 %v8954_v45, %v12424_v10  ;;  %v1943_v19 = vsel %vm113_vm0, %v1907_v5, 0 }
 0x361   :  { %12410 = vst [vmem:[#allocation41_spill] sm:$0xff] %v9573_v48  ;;  %6718 = vmatmul.msk.bf16.gmra.mxu2 %vm100_vm1, %v9388_v38  ;;  %v1945_v54 = vsel %vm113_vm0, %v1908_v43, 0  ;;  %2198 = vmatpush.bf16.msra.mxu0 %v1943_v19  ;;  %v1909_v10 = vld.sshfl [vmem:[#allocation1 + $0x10] sm:$0xff pattern:$0x73625140] }
 0x362   :  { %12411 = vst [vmem:[#allocation145_spill] sm:$0xff] %v9575_v16  ;;  %6722 = vmatmul.msk.bf16.gmra.mxu3 %vm100_vm1, %v9388_v38  ;;  %2227 = vmatpush.bf16.msra.mxu1 %v1945_v54  ;;  %v1910_v5 = vld.sshfl [vmem:[#allocation1 + $0x18] sm:$0xff pattern:$0x73625140] }
 0x364   :  { %v1685_v17 = vpop.f32.mrf.mxu2 }
 0x365   :  { %v9596_v11 = vadd.f32 %v1685_v17, %v1120_v63  ;;  %v1714_v16 = vpop.f32.mrf.mxu3  ;;  %v1629_v48 = vpop.f32.mrf.mxu0  ;;  %v12425_v63 = vld [vmem:[#allocation94_spill] sm:$0xff]  ;;  %v12426_v17 = vld [vmem:[#allocation197_spill] sm:$0xff] }
 0x366   :  { %v9598_v0 = vadd.f32 %v1714_v16, %v1149_v21  ;;  %v9600_v32 = vadd.f32 %v1629_v48, %v1064_v15  ;;  %v1658_v23 = vpop.f32.mrf.mxu1  ;;  %v1151_v2 = vadd.f32 %v12426_v17, %v12425_v63  ;;  %v12428_v16 = vld [vmem:[#allocation198_spill] sm:$0xff]  ;;  %v12429_v15 = vld [vmem:[#allocation96_spill] sm:$0xff]  ;;  %v1947_v17 = vsel %vm113_vm0, %v1909_v10, 0  ;;  %v12442_v10 = vld [vmem:[#allocation203_spill] sm:$0xff] }
 0x367   :  { %12420 = vst [vmem:[#allocation42_spill] sm:$0xff] %v9596_v11  ;;  %v9602_v26 = vadd.f32 %v1658_v23, %v1093_v42  ;;  %v12427_v11 = vld [vmem:[#allocation95_spill] sm:$0xff]  ;;  %2256 = vmatpush.bf16.msra.mxu2 %v1947_v17 }
 0x368   :  { %12421 = vst [vmem:[#allocation146_spill] sm:$0xff] %v9598_v0  ;;  %v1067_v21 = vadd.f32 %v12428_v16, %v12427_v11  ;;  %v12430_v42 = vld [vmem:[#allocation199_spill] sm:$0xff]  ;;  %v1949_v11 = vsel %vm113_vm0, %v1910_v5, 0  ;;  %v12438_v16 = vld [vmem:[#allocation201_spill] sm:$0xff] }
 0x369   :  { %12422 = vst [vmem:[#allocation43_spill] sm:$0xff] %v9600_v32  ;;  %v1096_v23 = vadd.f32 %v12430_v42, %v12429_v15  ;;  %2285 = vmatpush.bf16.msra.mxu3 %v1949_v11  ;;  %v12440_v15 = vld [vmem:[#allocation202_spill] sm:$0xff] }
 0x36a   :  { %12423 = vst [vmem:[#allocation147_spill] sm:$0xff] %v9602_v26 }
 0x36c   :  { %v1687_v48 = vpop.f32.mrf.mxu2 }
 0x36d   :  { %v9614_v26 = vadd.f32 %v1687_v48, %v1122_v39  ;;  %v1716_v32 = vpop.f32.mrf.mxu3  ;;  %v1632_v45 = vpop.f32.mrf.mxu0  ;;  %v12436_v39 = vld [vmem:[#allocation200_spill] sm:$0xff]  ;;  %v12439_v48 = vld [vmem:[#allocation99_spill] sm:$0xff] }
 0x36e   :  { %v9616_v0 = vadd.f32 %v1716_v32, %v1151_v2  ;;  %v9618_v43 = vadd.f32 %v1632_v45, %v1067_v21  ;;  %v1661_v63 = vpop.f32.mrf.mxu1  ;;  %v12435_v32 = vld [vmem:[#allocation97_spill] sm:$0xff]  ;;  %v12437_v2 = vld [vmem:[#allocation98_spill] sm:$0xff]  ;;  %v1069_v42 = vadd.f32 %v12440_v15, %v12439_v48  ;;  %v12441_v45 = vld [vmem:[#allocation100_spill] sm:$0xff] }
 0x36f   :  { %12431 = vst [vmem:[#allocation44_spill] sm:$0xff] %v9614_v26  ;;  %v9622_v19 = vadd.f32 %v1661_v63, %v1096_v23  ;;  %v1125_v54 = vadd.f32 %v12436_v39, %v12435_v32  ;;  %v1154_v21 = vadd.f32 %v12438_v16, %v12437_v2  ;;  %v1098_v5 = vadd.f32 %v12442_v10, %v12441_v45  ;;  %v12444_v39 = vld [vmem:[#allocation101_spill] sm:$0xff]  ;;  %v12445_v2 = vld [vmem:[#allocation204_spill] sm:$0xff]  ;;  %v12446_v26 = vld [vmem:[#allocation102_spill] sm:$0xff] }
 0x370   :  { %12432 = vst [vmem:[#allocation148_spill] sm:$0xff] %v9616_v0  ;;  %6711 = vmatmul.msk.bf16.gmra.mxu0 %vm100_vm1, %v9438_v47  ;;  %6715 = vmatmul.msk.bf16.gmra.mxu1 %vm100_vm1, %v9438_v47  ;;  %v1127_v16 = vadd.f32 %v12445_v2, %v12444_v39  ;;  %v12447_v48 = vld [vmem:[#allocation205_spill] sm:$0xff]  ;;  %v1072_v45 = vadd.f32 %v12449_v49, %v12448_v51  ;;  %v12451_v10 = vld [vmem:[#allocation207_spill] sm:$0xff]  ;;  %v12456_v51 = vld [vmem:[#allocation208_spill] sm:$0xff] }
 0x371   :  { %12433 = vst [vmem:[#allocation45_spill] sm:$0xff] %v9618_v43  ;;  %6719 = vmatmul.msk.bf16.gmra.mxu2 %vm100_vm1, %v9438_v47  ;;  %v1156_v15 = vadd.f32 %v12447_v48, %v12446_v26  ;;  %v12455_v49 = vld [vmem:[#allocation105_spill] sm:$0xff]  ;;  %v12457_v2 = vld [vmem:[#allocation106_spill] sm:$0xff] }
 0x372   :  { %12434 = vst [vmem:[#allocation149_spill] sm:$0xff] %v9622_v19  ;;  %6723 = vmatmul.msk.bf16.gmra.mxu3 %vm100_vm1, %v9438_v47  ;;  %v1130_v26 = vadd.f32 %v12456_v51, %v12455_v49  ;;  %v12460_v51 = vld [vmem:[#allocation109_spill] sm:$0xff] }
 0x374   :  { %v1690_v23 = vpop.f32.mrf.mxu2 }
 0x375   :  { %v9640_v63 = vadd.f32 %v1690_v23, %v1125_v54  ;;  %v1719_v17 = vpop.f32.mrf.mxu3  ;;  %v1634_v11 = vpop.f32.mrf.mxu0  ;;  %v12450_v23 = vld [vmem:[#allocation104_spill] sm:$0xff] }
 0x376   :  { %v9642_v19 = vadd.f32 %v1719_v17, %v1154_v21  ;;  %v9644_v43 = vadd.f32 %v1634_v11, %v1069_v42  ;;  %v1663_v0 = vpop.f32.mrf.mxu1 }
 0x377   :  { %12443 = vst [vmem:[#allocation46_spill] sm:$0xff] %v9640_v63  ;;  %v9646_v32 = vadd.f32 %v1663_v0, %v1098_v5  ;;  %v1101_v63 = vadd.f32 %v12451_v10, %v12450_v23 }
 0x37c   :  { %v1692_v54 = vpop.f32.mrf.mxu2 }
 0x37d   :  { %v9656_v21 = vadd.f32 %v1692_v54, %v1127_v16  ;;  %v1721_v42 = vpop.f32.mrf.mxu3  ;;  %v1637_v17 = vpop.f32.mrf.mxu0  ;;  %v1159_v16 = vadd.f32 %v8998_v4, %v12457_v2  ;;  %v1132_v4 = vadd.f32 %v9006_v44, %v12460_v51  ;;  %v12461_v2 = vld [vmem:[#allocation110_spill] sm:$0xff] }
 0x37e   :  { %v9658_v11 = vadd.f32 %v1721_v42, %v1156_v15  ;;  %v9660_v0 = vadd.f32 %v1637_v17, %v1072_v45  ;;  %v1666_v5 = vpop.f32.mrf.mxu1  ;;  %v12459_v45 = vld [vmem:[#allocation108_spill] sm:$0xff] }
 0x37f   :  { %v9662_v39 = vadd.f32 %v1666_v5, %v1101_v63  ;;  %v12458_v63 = vld [vmem:[#allocation107_spill] sm:$0xff]  ;;  %v1103_v54 = vadd.f32 %v9002_v59, %v12459_v45 }
 0x380   :  { %12452 = vst [vmem:[#allocation150_spill] sm:$0xff] %v9658_v11  ;;  %6712 = vmatmul.msk.bf16.gmra.mxu0 %vm100_vm1, %v9485_v13  ;;  %6716 = vmatmul.msk.bf16.gmra.mxu1 %vm100_vm1, %v9485_v13  ;;  %v1074_v48 = vadd.f32 %v9000_v7, %v12458_v63  ;;  %v12462_v7 = vld [vmem:[#allocation209_spill] sm:$0xff] }
 0x381   :  { %12453 = vst [vmem:[#allocation47_spill] sm:$0xff] %v9660_v0  ;;  %6720 = vmatmul.msk.bf16.gmra.mxu2 %vm100_vm1, %v9485_v13  ;;  %v1161_v63 = vadd.f32 %v12462_v7, %v12461_v2 }
 0x382   :  { %12454 = vst [vmem:[#allocation151_spill] sm:$0xff] %v9662_v39  ;;  %6724 = vmatmul.msk.bf16.gmra.mxu3 %vm100_vm1, %v9485_v13 }
 0x384   :  { %v1695_v15 = vpop.f32.mrf.mxu2 }
 0x385   :  { %v9680_v23 = vadd.f32 %v1695_v15, %v1130_v26  ;;  %v1724_v10 = vpop.f32.mrf.mxu3  ;;  %v1639_v42 = vpop.f32.mrf.mxu0 }
 0x386   :  { %v9682_v17 = vadd.f32 %v1724_v10, %v1159_v16  ;;  %v9684_v5 = vadd.f32 %v1639_v42, %v1074_v48  ;;  %v1668_v39 = vpop.f32.mrf.mxu1  ;;  %v12463_v16 = vld [vmem:[#allocation210_spill] sm:$0xff]  ;;  %v12464_v10 = vld [vmem:[#allocation211_spill] sm:$0xff] }
 0x387   :  { %v9686_v49 = vadd.f32 %v1668_v39, %v1103_v54 }
 0x38c   :  { %v1697_v0 = vpop.f32.mrf.mxu2 }
 0x38d   :  { %v9692_v11 = vadd.f32 %v1697_v0, %v1132_v4  ;;  %v1726_v59 = vpop.f32.mrf.mxu3  ;;  %v1968_v26 = vpop.f32.mrf.mxu0 }
 0x38e   :  { %v9694_v15 = vadd.f32 %v1726_v59, %v1161_v63  ;;  %v9697_v45 = vadd.f32 %v1968_v26, %v12463_v16  ;;  %v1997_v48 = vpop.f32.mrf.mxu1 }
 0x38f   :  { %v9700_v39 = vadd.f32 %v1997_v48, %v12464_v10 }
 0x390   :  { %6725 = vmatmul.msk.bf16.vlgmr.msra.gmra.mxu0 %vm100_vm1, %v9343_v57  ;;  %6729 = vmatmul.msk.bf16.vlgmr.msra.gmra.mxu1 %vm100_vm1, %v9343_v57 }
 0x391   :  { %6733 = vmatmul.msk.bf16.vlgmr.msra.gmra.mxu2 %vm100_vm1, %v9343_v57 }
 0x392   :  { %6737 = vmatmul.msk.bf16.vlgmr.msra.gmra.mxu3 %vm100_vm1, %v9343_v57 }
 0x394   :  { %v2026_v44 = vpop.f32.mrf.mxu2 }
 0x395   :  { %v9711_v0 = vadd.f32 %v2026_v44, %v9032_v6  ;;  %v2055_v54 = vpop.f32.mrf.mxu3  ;;  %v1970_v42 = vpop.f32.mrf.mxu0 }
 0x396   :  { %v9714_v51 = vadd.f32 %v2055_v54, %v9034_v29  ;;  %v9717_v4 = vadd.f32 %v1970_v42, %v9036_v30  ;;  %v1999_v2 = vpop.f32.mrf.mxu1 }
 0x397   :  { %v9720_v7 = vadd.f32 %v1999_v2, %v9038_v36  ;;  %v1869_v36 = vld [vmem:[%s11965_s0 + $0x1e] sm:$0xff] }
 0x398   :  { %1906 = vst [vmem:[#allocation1 + $0x20] ss:$4 sm:$0xff] %v1869_v36 }
 0x39c   :  { %v2028_v63 = vpop.f32.mrf.mxu2 }
 0x39d   :  { %v9723_v59 = vadd.f32 %v2028_v63, %v9048_v8  ;;  %v2057_v26 = vpop.f32.mrf.mxu3  ;;  %v1973_v16 = vpop.f32.mrf.mxu0 }
 0x39e   :  { %v9726_v6 = vadd.f32 %v2057_v26, %v9050_v35  ;;  %v9729_v48 = vadd.f32 %v1973_v16, %v9052_v27  ;;  %v2002_v29 = vpop.f32.mrf.mxu1 }
 0x39f   :  { %v9732_v30 = vadd.f32 %v2002_v29, %v9054_v40  ;;  %v1911_v2 = vld.sshfl [vmem:[#allocation1 + $0x20] sm:$0xff pattern:$0x73625140]  ;;  %v1912_v63 = vld.sshfl [vmem:[#allocation1 + $0x28] sm:$0xff pattern:$0x73625140] }
 0x3a0   :  { %6726 = vmatmul.msk.bf16.gmra.mxu0 %vm100_vm1, %v9388_v38  ;;  %6730 = vmatmul.msk.bf16.gmra.mxu1 %vm100_vm1, %v9388_v38  ;;  %v1951_v26 = vsel %vm113_vm0, %v1911_v2, 0  ;;  %v1953_v16 = vsel %vm113_vm0, %v1912_v63, 0 }
 0x3a1   :  { %6734 = vmatmul.msk.bf16.gmra.mxu2 %vm100_vm1, %v9388_v38  ;;  %2314 = vmatpush.bf16.msrb.mxu0 %v1951_v26 }
 0x3a2   :  { %6738 = vmatmul.msk.bf16.gmra.mxu3 %vm100_vm1, %v9388_v38  ;;  %2343 = vmatpush.bf16.msrb.mxu1 %v1953_v16 }
 0x3a4   :  { %v2031_v8 = vpop.f32.mrf.mxu2 }
 0x3a5   :  { %v9746_v35 = vadd.f32 %v2031_v8, %v9075_v25  ;;  %v2060_v27 = vpop.f32.mrf.mxu3  ;;  %v1975_v40 = vpop.f32.mrf.mxu0  ;;  %v1914_v8 = vld.sshfl [vmem:[#allocation1 + $0x38] sm:$0xff pattern:$0x73625140] }
 0x3a6   :  { %v9749_v10 = vadd.f32 %v2060_v27, %v9077_v14  ;;  %v9752_v44 = vadd.f32 %v1975_v40, %v9079_v9  ;;  %v2004_v54 = vpop.f32.mrf.mxu1  ;;  %v1913_v9 = vld.sshfl [vmem:[#allocation1 + $0x30] sm:$0xff pattern:$0x73625140]  ;;  %v1957_v2 = vsel %vm113_vm0, %v1914_v8, 0 }
 0x3a7   :  { %v9755_v42 = vadd.f32 %v2004_v54, %v9081_v56  ;;  %v1955_v54 = vsel %vm113_vm0, %v1913_v9, 0  ;;  %2401 = vmatpush.bf16.msrb.mxu3 %v1957_v2 }
 0x3a8   :  { %2372 = vmatpush.bf16.msrb.mxu2 %v1955_v54 }
 0x3ac   :  { %v2033_v25 = vpop.f32.mrf.mxu2 }
 0x3ad   :  { %v9760_v29 = vadd.f32 %v2033_v25, %v9093_v55  ;;  %v2062_v14 = vpop.f32.mrf.mxu3  ;;  %v1978_v36 = vpop.f32.mrf.mxu0 }
 0x3ae   :  { %v9763_v27 = vadd.f32 %v2062_v14, %v9095_v34  ;;  %v9766_v56 = vadd.f32 %v1978_v36, %v9097_v3  ;;  %v2007_v40 = vpop.f32.mrf.mxu1 }
 0x3af   :  { %v9771_v63 = vadd.f32 %v2007_v40, %v9101_v46 }
 0x3b0   :  { %6727 = vmatmul.msk.bf16.gmra.mxu0 %vm100_vm1, %v9438_v47  ;;  %6731 = vmatmul.msk.bf16.gmra.mxu1 %vm100_vm1, %v9438_v47 }
 0x3b1   :  { %6735 = vmatmul.msk.bf16.gmra.mxu2 %vm100_vm1, %v9438_v47 }
 0x3b2   :  { %6739 = vmatmul.msk.bf16.gmra.mxu3 %vm100_vm1, %v9438_v47 }
 0x3b4   :  { %v2036_v55 = vpop.f32.mrf.mxu2 }
 0x3b5   :  { %v9782_v34 = vadd.f32 %v2036_v55, %v9119_v12  ;;  %v2065_v3 = vpop.f32.mrf.mxu3  ;;  %v1980_v46 = vpop.f32.mrf.mxu0 }
 0x3b6   :  { %v9785_v26 = vadd.f32 %v2065_v3, %v9121_v58  ;;  %v9788_v16 = vadd.f32 %v1980_v46, %v9123_v60  ;;  %v2009_v25 = vpop.f32.mrf.mxu1 }
 0x3b7   :  { %v9791_v14 = vadd.f32 %v2009_v25, %v9125_v61 }
 0x3bc   :  { %v2038_v36 = vpop.f32.mrf.mxu2 }
 0x3bd   :  { %v9794_v9 = vadd.f32 %v2038_v36, %v9135_v50  ;;  %v2067_v8 = vpop.f32.mrf.mxu3  ;;  %v1983_v40 = vpop.f32.mrf.mxu0 }
 0x3be   :  { %v9797_v12 = vadd.f32 %v2067_v8, %v9137_v31  ;;  %v9800_v54 = vadd.f32 %v1983_v40, %v9139_v33  ;;  %v2012_v58 = vpop.f32.mrf.mxu1 }
 0x3bf   :  { %v9803_v60 = vadd.f32 %v2012_v58, %v9141_v1 }
 0x3c0   :  { %6728 = vmatmul.msk.bf16.gmra.mxu0 %vm100_vm1, %v9485_v13  ;;  %6732 = vmatmul.msk.bf16.gmra.mxu1 %vm100_vm1, %v9485_v13 }
 0x3c1   :  { %6736 = vmatmul.msk.bf16.gmra.mxu2 %vm100_vm1, %v9485_v13 }
 0x3c2   :  { %6740 = vmatmul.msk.bf16.gmra.mxu3 %vm100_vm1, %v9485_v13 }
 0x3c4   :  { %v2041_v61 = vpop.f32.mrf.mxu2 }
 0x3c5   :  { %v9814_v50 = vadd.f32 %v2041_v61, %v9159_v41  ;;  %v2070_v31 = vpop.f32.mrf.mxu3  ;;  %v1985_v33 = vpop.f32.mrf.mxu0  ;;  %v12471_v61 = vld [vmem:[#allocation111_spill] sm:$0xff] }
 0x3c6   :  { %v9817_v1 = vadd.f32 %v2070_v31, %v9161_v24  ;;  %v9820_v2 = vadd.f32 %v1985_v33, %v9163_v20  ;;  %v2014_v55 = vpop.f32.mrf.mxu1 }
 0x3c7   :  { %v9823_v3 = vadd.f32 %v2014_v55, %v9165_v62  ;;  %v12473_v55 = vld [vmem:[#allocation8_spill] sm:$0xff] }
 0x3cc   :  { %v2043_v46 = vpop.f32.mrf.mxu2 }
 0x3cd   :  { %v9826_v25 = vadd.f32 %v2043_v46, %v9175_v18  ;;  %v2072_v36 = vpop.f32.mrf.mxu3  ;;  %v2084_v8 = vpop.f32.mrf.mxu0 }
 0x3ce   :  { %v9829_v41 = vadd.f32 %v2072_v36, %v9177_v52  ;;  %v9832_v40 = vadd.f32 %v2084_v8, %v9179_v22  ;;  %v2113_v24 = vpop.f32.mrf.mxu1  ;;  %v12475_v8 = vld [vmem:[#allocation112_spill] sm:$0xff] }
 0x3cf   :  { %v9835_v20 = vadd.f32 %v2113_v24, %v9181_v53  ;;  %v12469_v53 = vld [vmem:[#allocation7_spill] sm:$0xff] }
 0x3d0   :  { %12465 = vst [vmem:[#allocation48_spill] sm:$0xff] %v9829_v41  ;;  %6741 = vmatmul.msk.bf16.vlgmr.msrb.gmra.mxu0 %vm100_vm1, %v9343_v57  ;;  %6745 = vmatmul.msk.bf16.vlgmr.msrb.gmra.mxu1 %vm100_vm1, %v9343_v57 }
 0x3d1   :  { %12466 = vst [vmem:[#allocation152_spill] sm:$0xff] %v9832_v40  ;;  %6749 = vmatmul.msk.bf16.vlgmr.msrb.gmra.mxu2 %vm100_vm1, %v9343_v57 }
 0x3d2   :  { %12467 = vst [vmem:[#allocation49_spill] sm:$0xff] %v9835_v20  ;;  %6753 = vmatmul.msk.bf16.vlgmr.msrb.gmra.mxu3 %vm100_vm1, %v9343_v57 }
 0x3d4   :  { %v2142_v62 = vpop.f32.mrf.mxu2 }
 0x3d5   :  { %v9846_v18 = vadd.f32 %v2142_v62, %v9199_v37  ;;  %v2171_v52 = vpop.f32.mrf.mxu3  ;;  %v2086_v22 = vpop.f32.mrf.mxu0  ;;  %v12477_v37 = vld [vmem:[#allocation9_spill] sm:$0xff] }
 0x3d6   :  { %v9849_v58 = vadd.f32 %v2171_v52, %v12469_v53  ;;  %v9852_v31 = vadd.f32 %v2086_v22, %v12471_v61  ;;  %v2115_v33 = vpop.f32.mrf.mxu1  ;;  %v12481_v53 = vld [vmem:[#allocation10_spill] sm:$0xff] }
 0x3d7   :  { %12468 = vst [vmem:[#allocation153_spill] sm:$0xff] %v9846_v18  ;;  %v9855_v46 = vadd.f32 %v2115_v33, %v12473_v55  ;;  %v12479_v18 = vld [vmem:[#allocation113_spill] sm:$0xff]  ;;  %v12483_v61 = vld [vmem:[#allocation114_spill] sm:$0xff] }
 0x3d8   :  { %12470 = vst [vmem:[#allocation50_spill] sm:$0xff] %v9849_v58 }
 0x3d9   :  { %12472 = vst [vmem:[#allocation154_spill] sm:$0xff] %v9852_v31 }
 0x3da   :  { %12474 = vst [vmem:[#allocation51_spill] sm:$0xff] %v9855_v46 }
 0x3dc   :  { %v2144_v36 = vpop.f32.mrf.mxu2 }
 0x3dd   :  { %v9858_v24 = vadd.f32 %v2144_v36, %v12475_v8  ;;  %v2173_v57 = vpop.f32.mrf.mxu3  ;;  %v2089_v20 = vpop.f32.mrf.mxu0  ;;  %v12485_v8 = vld [vmem:[#allocation11_spill] sm:$0xff] }
 0x3de   :  { %v9861_v62 = vadd.f32 %v2173_v57, %v12477_v37  ;;  %v9864_v40 = vadd.f32 %v2089_v20, %v12479_v18  ;;  %v2118_v52 = vpop.f32.mrf.mxu1  ;;  %v2560_v20 = vld [vmem:[%s11965_s0 + $0x8] sm:$0xff] }
 0x3df   :  { %12476 = vst [vmem:[#allocation155_spill] sm:$0xff] %v9858_v24  ;;  %v9867_v22 = vadd.f32 %v2118_v52, %v12481_v53  ;;  %v12487_v37 = vld [vmem:[#allocation115_spill] sm:$0xff] }
 0x3e0   :  { %12478 = vst [vmem:[#allocation52_spill] sm:$0xff] %v9861_v62  ;;  %6742 = vmatmul.msk.bf16.gmra.mxu0 %vm100_vm1, %v9388_v38  ;;  %6746 = vmatmul.msk.bf16.gmra.mxu1 %vm100_vm1, %v9388_v38 }
 0x3e1   :  { %12480 = vst [vmem:[#allocation156_spill] sm:$0xff] %v9864_v40  ;;  %6750 = vmatmul.msk.bf16.gmra.mxu2 %vm100_vm1, %v9388_v38 }
 0x3e2   :  { %12482 = vst [vmem:[#allocation53_spill] sm:$0xff] %v9867_v22  ;;  %6754 = vmatmul.msk.bf16.gmra.mxu3 %vm100_vm1, %v9388_v38  ;;  %v12489_v22 = vld [vmem:[#allocation12_spill] sm:$0xff] }
 0x3e3   :  { %2585 = vst [vmem:[#allocation1] ss:$4 sm:$0xff] %v2560_v20 }
 0x3e4   :  { %v2147_v18 = vpop.f32.mrf.mxu2 }
 0x3e5   :  { %v9881_v33 = vadd.f32 %v2147_v18, %v12483_v61  ;;  %v2176_v55 = vpop.f32.mrf.mxu3  ;;  %v2091_v36 = vpop.f32.mrf.mxu0  ;;  %v12491_v61 = vld [vmem:[#allocation116_spill] sm:$0xff] }
 0x3e6   :  { %v9884_v57 = vadd.f32 %v2176_v55, %v12485_v8  ;;  %v9887_v52 = vadd.f32 %v2091_v36, %v12487_v37  ;;  %v2120_v53 = vpop.f32.mrf.mxu1 }
 0x3e7   :  { %12484 = vst [vmem:[#allocation157_spill] sm:$0xff] %v9881_v33  ;;  %v9890_v38 = vadd.f32 %v2120_v53, %v12489_v22  ;;  %v12495_v22 = vld [vmem:[#allocation117_spill] sm:$0xff] }
 0x3e8   :  { %12486 = vst [vmem:[#allocation54_spill] sm:$0xff] %v9884_v57 }
 0x3e9   :  { %12488 = vst [vmem:[#allocation158_spill] sm:$0xff] %v9887_v52  ;;  %v12493_v52 = vld [vmem:[#allocation13_spill] sm:$0xff] }
 0x3ea   :  { %12490 = vst [vmem:[#allocation55_spill] sm:$0xff] %v9890_v38  ;;  %v2589_v40 = vld.sshfl [vmem:[#allocation1] sm:$0xff pattern:$0x73625140] }
 0x3eb   :  { %v2590_v62 = vld.sshfl [vmem:[#allocation1 + $0x8] sm:$0xff pattern:$0x73625140]  ;;  %v2621_v20 = vsel %vm113_vm0, %v2589_v40, 0 }
 0x3ec   :  { %v2623_v24 = vsel %vm113_vm0, %v2590_v62, 0  ;;  %v2149_v18 = vpop.f32.mrf.mxu2  ;;  %2660 = vmatpush.bf16.msra.mxu0 %v2621_v20  ;;  %v2591_v36 = vld.sshfl [vmem:[#allocation1 + $0x10] sm:$0xff pattern:$0x73625140]  ;;  %v12497_v20 = vld [vmem:[#allocation14_spill] sm:$0xff] }
 0x3ed   :  { %2689 = vmatpush.bf16.msra.mxu1 %v2623_v24  ;;  %v9895_v33 = vadd.f32 %v2149_v18, %v12491_v61  ;;  %v2178_v55 = vpop.f32.mrf.mxu3  ;;  %v2094_v8 = vpop.f32.mrf.mxu0  ;;  %v2592_v37 = vld.sshfl [vmem:[#allocation1 + $0x18] sm:$0xff pattern:$0x73625140]  ;;  %v2625_v40 = vsel %vm113_vm0, %v2591_v36, 0  ;;  %v3251_v18 = vld [vmem:[%s11967_s2 + $0x30] sm:$0xff]  ;;  %v12499_v61 = vld [vmem:[#allocation118_spill] sm:$0xff] }
 0x3ee   :  { %v9898_v57 = vadd.f32 %v2178_v55, %v12493_v52  ;;  %v9901_v53 = vadd.f32 %v2094_v8, %v12495_v22  ;;  %v2123_v38 = vpop.f32.mrf.mxu1  ;;  %v2627_v62 = vsel %vm113_vm0, %v2592_v37, 0  ;;  %2718 = vmatpush.bf16.msra.mxu2 %v2625_v40  ;;  %v7994_v52 = vmov 0   ;;  %v12501_v37 = vld [vmem:[#allocation15_spill] sm:$0xff] }
 0x3ef   :  { %12492 = vst [vmem:[#allocation159_spill] sm:$0xff] %v9895_v33  ;;  %v9906_v24 = vadd.f32 %v2123_v38, %v12497_v20  ;;  %2747 = vmatpush.bf16.msra.mxu3 %v2627_v62  ;;  %7963 = vset.pattern.permute.xlu0 %v7994_v52  ;;  %v12503_v40 = vld [vmem:[#allocation119_spill] sm:$0xff]  ;;  %v12505_v20 = vld [vmem:[#allocation16_spill] sm:$0xff] }
 0x3f0   :  { %12494 = vst [vmem:[#allocation56_spill] sm:$0xff] %v9898_v57  ;;  %6743 = vmatmul.msk.bf16.gmra.mxu0 %vm100_vm1, %v9438_v47  ;;  %6747 = vmatmul.msk.bf16.gmra.mxu1 %vm100_vm1, %v9438_v47 }
 0x3f1   :  { %12496 = vst [vmem:[#allocation160_spill] sm:$0xff] %v9901_v53  ;;  %6751 = vmatmul.msk.bf16.gmra.mxu2 %vm100_vm1, %v9438_v47  ;;  %3309 = vperm.xlu0 %7963, %v3251_v18  }
 0x3f2   :  { %12498 = vst [vmem:[#allocation57_spill] sm:$0xff] %v9906_v24  ;;  %6755 = vmatmul.msk.bf16.gmra.mxu3 %vm100_vm1, %v9438_v47  ;;  %7964 = vset.pattern.permute.xlu1 %v7994_v52 }
 0x3f3   :  { %3253 = vst [vmem:[#allocation2] sm:$0xff] %v7994_v52  ;;  %7965 = vset.pattern.permute.xlu2 %v7994_v52 }
 0x3f4   :  { %3254 = vst [vmem:[#allocation2 + $0x30] sm:$0xff] %v7994_v52  ;;  %v2152_v38 = vpop.f32.mrf.mxu2 }
 0x3f5   :  { %3255 = vst [vmem:[#allocation2 + $0x60] sm:$0xff] %v7994_v52  ;;  %v9920_v55 = vadd.f32 %v2152_v38, %v12499_v61  ;;  %v2181_v8 = vpop.f32.mrf.mxu3  ;;  %v2096_v36 = vpop.f32.mrf.mxu0  ;;  %v3252_v38 = vld [vmem:[%s11967_s2 + $0x38] sm:$0xff]  ;;  %v3249_v61 = vld [vmem:[%s11967_s2 + $0x20] sm:$0xff] }
 0x3f6   :  { %3256 = vst [vmem:[#allocation2 + $0x90] sm:$0xff] %v7994_v52  ;;  %v9923_v22 = vadd.f32 %v2181_v8, %v12501_v37  ;;  %v9926_v62 = vadd.f32 %v2096_v36, %v12503_v40  ;;  %v2125_v47 = vpop.f32.mrf.mxu1  ;;  %3299 = vperm.xlu1 %7964, %v3249_v61   ;;  %v12507_v36 = vld [vmem:[#allocation120_spill] sm:$0xff]  ;;  %v12513_v61 = vld [vmem:[#allocation18_spill] sm:$0xff] }
 0x3f7   :  { %3257 = vst [vmem:[#allocation2 + $0xc0] sm:$0xff] %v7994_v52  ;;  %v9929_v18 = vadd.f32 %v2125_v47, %v12505_v20  ;;  %v12509_v20 = vld [vmem:[#allocation17_spill] sm:$0xff] }
 0x3f8   :  { %12500 = vst [vmem:[#allocation161_spill] sm:$0xff] %v9920_v55 }
 0x3f9   :  { %3258 = vst [vmem:[#allocation2 + $0xf0] sm:$0xff] %v7994_v52  ;;  %3314 = vperm.xlu0 %7963, %v3252_v38   ;;  %v3250_v38 = vld [vmem:[%s11967_s2 + $0x28] sm:$0xff] }
 0x3fa   :  { %12502 = vst [vmem:[#allocation58_spill] sm:$0xff] %v9923_v22 }
 0x3fb   :  { %12504 = vst [vmem:[#allocation162_spill] sm:$0xff] %v9926_v62  ;;  %v12511_v62 = vld [vmem:[#allocation121_spill] sm:$0xff] }
 0x3fc   :  { %3259 = vst [vmem:[#allocation2 + $0x120] sm:$0xff] %v7994_v52  ;;  %v2154_v8 = vpop.f32.mrf.mxu2 }
 0x3fd   :  { %12506 = vst [vmem:[#allocation59_spill] sm:$0xff] %v9929_v18  ;;  %v9938_v37 = vadd.f32 %v2154_v8, %v12507_v36  ;;  %v2183_v40 = vpop.f32.mrf.mxu3  ;;  %v2099_v47 = vpop.f32.mrf.mxu0  ;;  %v3245_v8 = vld [vmem:[%s11967_s2] sm:$0xff] }
 0x3fe   :  { %3260 = vst [vmem:[#allocation2 + $0x150] sm:$0xff] %v7994_v52  ;;  %v9941_v18 = vadd.f32 %v2183_v40, %v12509_v20  ;;  %v9944_v22 = vadd.f32 %v2099_v47, %v12511_v62  ;;  %v2128_v55 = vpop.f32.mrf.mxu1  ;;  %3304 = vperm.xlu1 %7964, %v3250_v38   ;;  %v12517_v47 = vld [vmem:[#allocation19_spill] sm:$0xff] }
 0x3ff   :  { %3261 = vst [vmem:[#allocation2 + $0x28] sm:$0xff] %v7994_v52  ;;  %v9947_v24 = vadd.f32 %v2128_v55, %v12513_v61  ;;  %v12515_v55 = vld [vmem:[#allocation122_spill] sm:$0xff]  ;;  %v12519_v61 = vld [vmem:[#allocation123_spill] sm:$0xff] }
 0x400   :  { %3262 = vst [vmem:[#allocation2 + $0x58] sm:$0xff] %v7994_v52  ;;  %6744 = vmatmul.msk.bf16.gmra.mxu0 %vm100_vm1, %v9485_v13  ;;  %6748 = vmatmul.msk.bf16.gmra.mxu1 %vm100_vm1, %v9485_v13 }
 0x401   :  { %3263 = vst [vmem:[#allocation2 + $0x88] sm:$0xff] %v7994_v52  ;;  %6752 = vmatmul.msk.bf16.gmra.mxu2 %vm100_vm1, %v9485_v13  ;;  %3279 = vperm.xlu0 %7963, %v3245_v8   ;;  %v9981_v8 = vld [vmem:[%s11966_s1 + $0x80] sm:$0xff] }
 0x402   :  { %3264 = vst [vmem:[#allocation2 + $0xb8] sm:$0xff] %v7994_v52  ;;  %6756 = vmatmul.msk.bf16.gmra.mxu3 %vm100_vm1, %v9485_v13  ;;  %v3246_v13 = vld [vmem:[%s11967_s2 + $0x8] sm:$0xff] }
 0x403   :  { %3265 = vst [vmem:[#allocation2 + $0xe8] sm:$0xff] %v7994_v52 }
 0x404   :  { %12508 = vst [vmem:[#allocation163_spill] sm:$0xff] %v9938_v37 }
 0x405   :  { %3266 = vst [vmem:[#allocation2 + $0x118] sm:$0xff] %v7994_v52  ;;  %v2186_v36 = vpop.f32.mrf.mxu3  ;;  %v2101_v40 = vpop.f32.mrf.mxu0 }
 0x406   :  { %12510 = vst [vmem:[#allocation60_spill] sm:$0xff] %v9941_v18  ;;  %v9967_v20 = vadd.f32 %v2186_v36, %v12517_v47  ;;  %v12521_v18 = vld [vmem:[#allocation20_spill] sm:$0xff]  ;;  %3284 = vperm.xlu1 %7964, %v3246_v13   ;;  %v12525_v47 = vld [vmem:[#allocation21_spill] sm:$0xff] }
 0x407   :  { %12512 = vst [vmem:[#allocation164_spill] sm:$0xff] %v9944_v22  ;;  %v2130_v22 = vpop.f32.mrf.mxu1 }
 0x408   :  { %3267 = vst [vmem:[#allocation2 + $0x148] sm:$0xff] %v7994_v52  ;;  %v9973_v37 = vadd.f32 %v2130_v22, %v12521_v18  ;;  %v12527_v22 = vld [vmem:[#allocation125_spill] sm:$0xff] }
 0x409   :  { %12514 = vst [vmem:[#allocation61_spill] sm:$0xff] %v9947_v24  ;;  %v9970_v24 = vadd.f32 %v2101_v40, %v12519_v61 }
 0x40a   :  { %3268 = vst [vmem:[#allocation2 + $0x178] sm:$0xff] %v7994_v52  ;;  %v2157_v52 = vpop.f32.mrf.mxu2 }
 0x40b   :  { %v9964_v62 = vadd.f32 %v2157_v52, %v12515_v55  ;;  %12518 = vst [vmem:[#allocation62_spill] sm:$0xff] %v9967_v20  ;;  %v12523_v52 = vld [vmem:[#allocation124_spill] sm:$0xff] }
 0x40c   :  { %12520 = vst [vmem:[#allocation166_spill] sm:$0xff] %v9970_v24  ;;  %v12529_v24 = vld [vmem:[#allocation22_spill] sm:$0xff] }
 0x40d   :  { %12516 = vst [vmem:[#allocation165_spill] sm:$0xff] %v9964_v62  ;;  %v2188_v36 = vpop.f32.mrf.mxu3  ;;  %v2200_v40 = vpop.f32.mrf.mxu0  ;;  %v10018_v62 = vld [vmem:[%s11966_s1 + $0x88] sm:$0xff] }
 0x40e   :  { %12522 = vst [vmem:[#allocation63_spill] sm:$0xff] %v9973_v37  ;;  %v9987_v61 = vadd.f32 %v2188_v36, %v12525_v47  ;;  %v9990_v18 = vadd.f32 %v2200_v40, %v12527_v22  ;;  %v12535_v22 = vld [vmem:[#allocation127_spill] sm:$0xff] }
 0x40f   :  { %v2229_v37 = vpop.f32.mrf.mxu1 }
 0x410   :  { %12526 = vst [vmem:[#allocation64_spill] sm:$0xff] %v9987_v61  ;;  %v9993_v13 = vadd.f32 %v2229_v37, %v12529_v24  ;;  %6781 = vmatmul.msk.bf16.vlgmr.msra.gmra.mxu0 %vm100_vm1, %v9981_v8  ;;  %6785 = vmatmul.msk.bf16.vlgmr.msra.gmra.mxu1 %vm100_vm1, %v9981_v8  ;;  %v12533_v24 = vld [vmem:[#allocation23_spill] sm:$0xff]  ;;  %v12537_v61 = vld [vmem:[#allocation24_spill] sm:$0xff] }
 0x411   :  { %12528 = vst [vmem:[#allocation168_spill] sm:$0xff] %v9990_v18  ;;  %6789 = vmatmul.msk.bf16.vlgmr.msra.gmra.mxu2 %vm100_vm1, %v9981_v8 }
 0x412   :  { %v2159_v38 = vpop.f32.mrf.mxu2  ;;  %12530 = vst [vmem:[#allocation65_spill] sm:$0xff] %v9993_v13  ;;  %6793 = vmatmul.msk.bf16.vlgmr.msra.gmra.mxu3 %vm100_vm1, %v9981_v8 }
 0x413   :  { %v9984_v55 = vadd.f32 %v2159_v38, %v12523_v52  ;;  %v12531_v52 = vld [vmem:[#allocation126_spill] sm:$0xff] }
 0x415   :  { %12524 = vst [vmem:[#allocation167_spill] sm:$0xff] %v9984_v55  ;;  %v2287_v40 = vpop.f32.mrf.mxu3  ;;  %v2202_v47 = vpop.f32.mrf.mxu0 }
 0x416   :  { %v10007_v37 = vadd.f32 %v2287_v40, %v12533_v24  ;;  %v10010_v13 = vadd.f32 %v2202_v47, %v12535_v22  ;;  %v12541_v40 = vld [vmem:[#allocation25_spill] sm:$0xff] }
 0x417   :  { %v2231_v18 = vpop.f32.mrf.mxu1  ;;  %v12543_v47 = vld [vmem:[#allocation129_spill] sm:$0xff] }
 0x418   :  { %12534 = vst [vmem:[#allocation66_spill] sm:$0xff] %v10007_v37  ;;  %v10013_v55 = vadd.f32 %v2231_v18, %v12537_v61  ;;  %v12545_v61 = vld [vmem:[#allocation26_spill] sm:$0xff] }
 0x419   :  { %12536 = vst [vmem:[#allocation170_spill] sm:$0xff] %v10010_v13 }
 0x41a   :  { %v2258_v38 = vpop.f32.mrf.mxu2  ;;  %12538 = vst [vmem:[#allocation67_spill] sm:$0xff] %v10013_v55 }
 0x41b   :  { %v10004_v36 = vadd.f32 %v2258_v38, %v12531_v52  ;;  %v12539_v38 = vld [vmem:[#allocation128_spill] sm:$0xff] }
 0x41d   :  { %12532 = vst [vmem:[#allocation169_spill] sm:$0xff] %v10004_v36  ;;  %v2289_v36 = vpop.f32.mrf.mxu3  ;;  %v2205_v53 = vpop.f32.mrf.mxu0 }
 0x41e   :  { %v10024_v24 = vadd.f32 %v2289_v36, %v12541_v40  ;;  %v10027_v22 = vadd.f32 %v2205_v53, %v12543_v47  ;;  %v2561_v53 = vld [vmem:[%s11965_s0 + $0x10] sm:$0xff] }
 0x41f   :  { %v2234_v13 = vpop.f32.mrf.mxu1  ;;  %2588 = vst [vmem:[#allocation1 + $0x20] ss:$4 sm:$0xff] %v2561_v53  ;;  %v12549_v47 = vld [vmem:[#allocation27_spill] sm:$0xff] }
 0x420   :  { %12542 = vst [vmem:[#allocation68_spill] sm:$0xff] %v10024_v24  ;;  %v10030_v18 = vadd.f32 %v2234_v13, %v12545_v61  ;;  %6782 = vmatmul.msk.bf16.gmra.mxu0 %vm100_vm1, %v10018_v62  ;;  %6786 = vmatmul.msk.bf16.gmra.mxu1 %vm100_vm1, %v10018_v62  ;;  %v12547_v13 = vld [vmem:[#allocation130_spill] sm:$0xff]  ;;  %v3247_v53 = vld [vmem:[%s11967_s2 + $0x10] sm:$0xff] }
 0x421   :  { %12544 = vst [vmem:[#allocation172_spill] sm:$0xff] %v10027_v22  ;;  %6790 = vmatmul.msk.bf16.gmra.mxu2 %vm100_vm1, %v10018_v62  ;;  %3289 = vperm.xlu2 %7965, %v3247_v53  }
 0x422   :  { %v2260_v20 = vpop.f32.mrf.mxu2  ;;  %12546 = vst [vmem:[#allocation69_spill] sm:$0xff] %v10030_v18  ;;  %6794 = vmatmul.msk.bf16.gmra.mxu3 %vm100_vm1, %v10018_v62  ;;  %v12551_v18 = vld [vmem:[#allocation131_spill] sm:$0xff] }
 0x423   :  { %v10021_v52 = vadd.f32 %v2260_v20, %v12539_v38 }
 0x425   :  { %12540 = vst [vmem:[#allocation171_spill] sm:$0xff] %v10021_v52  ;;  %v2292_v38 = vpop.f32.mrf.mxu3  ;;  %v2207_v40 = vpop.f32.mrf.mxu0  ;;  %v12553_v52 = vld [vmem:[#allocation28_spill] sm:$0xff] }
 0x426   :  { %v10047_v61 = vadd.f32 %v2292_v38, %v12549_v47  ;;  %v10050_v22 = vadd.f32 %v2207_v40, %v12551_v18  ;;  %v2593_v37 = vld.sshfl [vmem:[#allocation1 + $0x20] sm:$0xff pattern:$0x73625140]  ;;  %v10063_v18 = vld [vmem:[%s11966_s1 + $0x90] sm:$0xff] }
 0x427   :  { %v2236_v24 = vpop.f32.mrf.mxu1  ;;  %v2595_v53 = vld.sshfl [vmem:[#allocation1 + $0x30] sm:$0xff pattern:$0x73625140] }
 0x428   :  { %12550 = vst [vmem:[#allocation70_spill] sm:$0xff] %v10047_v61  ;;  %v10053_v55 = vadd.f32 %v2236_v24, %v12553_v52  ;;  %v12555_v52 = vld [vmem:[#allocation132_spill] sm:$0xff]  ;;  %v2633_v33 = vsel %vm113_vm0, %v2595_v53, 0 }
 0x429   :  { %12552 = vst [vmem:[#allocation174_spill] sm:$0xff] %v10050_v22  ;;  %v12557_v22 = vld [vmem:[#allocation29_spill] sm:$0xff]  ;;  %2834 = vmatpush.bf16.msrb.mxu2 %v2633_v33  ;;  %v12563_v33 = vld [vmem:[#allocation134_spill] sm:$0xff] }
 0x42a   :  { %v2263_v20 = vpop.f32.mrf.mxu2  ;;  %12554 = vst [vmem:[#allocation71_spill] sm:$0xff] %v10053_v55  ;;  %v2596_v55 = vld.sshfl [vmem:[#allocation1 + $0x38] sm:$0xff pattern:$0x73625140] }
 0x42b   :  { %v10044_v36 = vadd.f32 %v2263_v20, %v12547_v13  ;;  %v2594_v20 = vld.sshfl [vmem:[#allocation1 + $0x28] sm:$0xff pattern:$0x73625140]  ;;  %v2629_v13 = vsel %vm113_vm0, %v2593_v37, 0  ;;  %v12559_v37 = vld [vmem:[#allocation133_spill] sm:$0xff]  ;;  %v2635_v46 = vsel %vm113_vm0, %v2596_v55, 0 }
 0x42c   :  { %2776 = vmatpush.bf16.msrb.mxu0 %v2629_v13  ;;  %v12561_v13 = vld [vmem:[#allocation30_spill] sm:$0xff]  ;;  %2863 = vmatpush.bf16.msrb.mxu3 %v2635_v46 }
 0x42d   :  { %12548 = vst [vmem:[#allocation173_spill] sm:$0xff] %v10044_v36  ;;  %v2631_v36 = vsel %vm113_vm0, %v2594_v20, 0  ;;  %v2294_v40 = vpop.f32.mrf.mxu3  ;;  %v2210_v47 = vpop.f32.mrf.mxu0 }
 0x42e   :  { %2805 = vmatpush.bf16.msrb.mxu1 %v2631_v36  ;;  %v10069_v61 = vadd.f32 %v2294_v40, %v12557_v22  ;;  %v10072_v20 = vadd.f32 %v2210_v47, %v12559_v37  ;;  %v12567_v47 = vld [vmem:[#allocation135_spill] sm:$0xff] }
 0x42f   :  { %v2239_v57 = vpop.f32.mrf.mxu1 }
 0x430   :  { %12558 = vst [vmem:[#allocation72_spill] sm:$0xff] %v10069_v61  ;;  %v10077_v36 = vadd.f32 %v2239_v57, %v12561_v13  ;;  %6783 = vmatmul.msk.bf16.gmra.mxu0 %vm100_vm1, %v10063_v18  ;;  %6787 = vmatmul.msk.bf16.gmra.mxu1 %vm100_vm1, %v10063_v18  ;;  %v12569_v13 = vld [vmem:[#allocation32_spill] sm:$0xff] }
 0x431   :  { %12560 = vst [vmem:[#allocation176_spill] sm:$0xff] %v10072_v20  ;;  %6791 = vmatmul.msk.bf16.gmra.mxu2 %vm100_vm1, %v10063_v18  ;;  %v10105_v20 = vld [vmem:[%s11966_s1 + $0x98] sm:$0xff] }
 0x432   :  { %v2265_v38 = vpop.f32.mrf.mxu2  ;;  %12562 = vst [vmem:[#allocation73_spill] sm:$0xff] %v10077_v36  ;;  %6795 = vmatmul.msk.bf16.gmra.mxu3 %vm100_vm1, %v10063_v18 }
 0x433   :  { %v10066_v24 = vadd.f32 %v2265_v38, %v12555_v52  ;;  %v3248_v38 = vld [vmem:[%s11967_s2 + $0x18] sm:$0xff]  ;;  %v12565_v52 = vld [vmem:[#allocation31_spill] sm:$0xff] }
 0x434   :  { %3294 = vperm.xlu2 %7965, %v3248_v38  }
 0x435   :  { %12556 = vst [vmem:[#allocation175_spill] sm:$0xff] %v10066_v24  ;;  %v2297_v55 = vpop.f32.mrf.mxu3  ;;  %v2212_v22 = vpop.f32.mrf.mxu0 }
 0x436   :  { %v10094_v40 = vadd.f32 %v2297_v55, %v12565_v52  ;;  %v10097_v53 = vadd.f32 %v2212_v22, %v12567_v47  ;;  %v12573_v55 = vld [vmem:[#allocation33_spill] sm:$0xff] }
 0x437   :  { %v2241_v37 = vpop.f32.mrf.mxu1  ;;  %v12575_v22 = vld [vmem:[#allocation137_spill] sm:$0xff] }
 0x438   :  { %12566 = vst [vmem:[#allocation74_spill] sm:$0xff] %v10094_v40  ;;  %v10100_v36 = vadd.f32 %v2241_v37, %v12569_v13  ;;  %v12577_v37 = vld [vmem:[#allocation34_spill] sm:$0xff]  ;;  %v12586_v40 = vld [vmem:[#allocation140_spill] sm:$0xff] }
 0x439   :  { %12568 = vst [vmem:[#allocation178_spill] sm:$0xff] %v10097_v53 }
 0x43a   :  { %v2268_v57 = vpop.f32.mrf.mxu2  ;;  %12570 = vst [vmem:[#allocation75_spill] sm:$0xff] %v10100_v36 }
 0x43b   :  { %v10091_v46 = vadd.f32 %v2268_v57, %v12563_v33  ;;  %v12571_v57 = vld [vmem:[#allocation136_spill] sm:$0xff] }
 0x43d   :  { %12564 = vst [vmem:[#allocation177_spill] sm:$0xff] %v10091_v46  ;;  %v2299_v46 = vpop.f32.mrf.mxu3  ;;  %v2215_v61 = vpop.f32.mrf.mxu0 }
 0x43e   :  { %v10111_v52 = vadd.f32 %v2299_v46, %v12573_v55  ;;  %v10114_v47 = vadd.f32 %v2215_v61, %v12575_v22 }
 0x43f   :  { %v2244_v53 = vpop.f32.mrf.mxu1 }
 0x440   :  { %12574 = vst [vmem:[#allocation76_spill] sm:$0xff] %v10111_v52  ;;  %v10117_v13 = vadd.f32 %v2244_v53, %v12577_v37  ;;  %6784 = vmatmul.msk.bf16.gmra.mxu0 %vm100_vm1, %v10105_v20  ;;  %6788 = vmatmul.msk.bf16.gmra.mxu1 %vm100_vm1, %v10105_v20  ;;  %v12581_v53 = vld [vmem:[#allocation35_spill] sm:$0xff]  ;;  %v12584_v52 = vld [vmem:[#allocation36_spill] sm:$0xff] }
 0x441   :  { %12576 = vst [vmem:[#allocation180_spill] sm:$0xff] %v10114_v47  ;;  %6792 = vmatmul.msk.bf16.gmra.mxu2 %vm100_vm1, %v10105_v20  ;;  %v12582_v37 = vld [vmem:[#allocation139_spill] sm:$0xff] }
 0x442   :  { %v2270_v38 = vpop.f32.mrf.mxu2  ;;  %12578 = vst [vmem:[#allocation77_spill] sm:$0xff] %v10117_v13  ;;  %6796 = vmatmul.msk.bf16.gmra.mxu3 %vm100_vm1, %v10105_v20 }
 0x443   :  { %v10108_v33 = vadd.f32 %v2270_v38, %v12571_v57  ;;  %v12579_v38 = vld [vmem:[#allocation138_spill] sm:$0xff] }
 0x445   :  { %12572 = vst [vmem:[#allocation179_spill] sm:$0xff] %v10108_v33  ;;  %v2302_v57 = vpop.f32.mrf.mxu3  ;;  %v2217_v55 = vpop.f32.mrf.mxu0 }
 0x446   :  { %v10131_v22 = vadd.f32 %v2302_v57, %v12581_v53  ;;  %v10134_v13 = vadd.f32 %v2217_v55, %v12582_v37  ;;  %v12592_v53 = vld [vmem:[#allocation38_spill] sm:$0xff] }
 0x447   :  { %v2246_v47 = vpop.f32.mrf.mxu1 }
 0x448   :  { %12583 = vst [vmem:[#allocation78_spill] sm:$0xff] %v10134_v13  ;;  %v10137_v33 = vadd.f32 %v2246_v47, %v12584_v52 }
 0x44a   :  { %v2273_v46 = vpop.f32.mrf.mxu2  ;;  %12585 = vst [vmem:[#allocation182_spill] sm:$0xff] %v10137_v33 }
 0x44b   :  { %v10128_v61 = vadd.f32 %v2273_v46, %v12579_v38  ;;  %v12588_v46 = vld [vmem:[#allocation37_spill] sm:$0xff] }
 0x44d   :  { %12580 = vst [vmem:[#allocation181_spill] sm:$0xff] %v10128_v61  ;;  %v2304_v31 = vpop.f32.mrf.mxu3  ;;  %v2316_v58 = vpop.f32.mrf.mxu0  ;;  %v12590_v61 = vld [vmem:[#allocation141_spill] sm:$0xff] }
 0x44e   :  { %v10143_v38 = vadd.f32 %v2304_v31, %v12588_v46  ;;  %v10146_v41 = vadd.f32 %v2316_v58, %v12590_v61  ;;  %v12596_v61 = vld [vmem:[#allocation39_spill] sm:$0xff] }
 0x44f   :  { %v2345_v57 = vpop.f32.mrf.mxu1 }
 0x450   :  { %12589 = vst [vmem:[#allocation183_spill] sm:$0xff] %v10143_v38  ;;  %v10149_v55 = vadd.f32 %v2345_v57, %v12592_v53  ;;  %6797 = vmatmul.msk.bf16.vlgmr.msrb.gmra.mxu0 %vm100_vm1, %v9981_v8  ;;  %6801 = vmatmul.msk.bf16.vlgmr.msrb.gmra.mxu1 %vm100_vm1, %v9981_v8  ;;  %v12597_v57 = vld [vmem:[#allocation143_spill] sm:$0xff] }
 0x451   :  { %12591 = vst [vmem:[#allocation80_spill] sm:$0xff] %v10146_v41  ;;  %6805 = vmatmul.msk.bf16.vlgmr.msrb.gmra.mxu2 %vm100_vm1, %v9981_v8  ;;  %v12599_v41 = vld [vmem:[#allocation40_spill] sm:$0xff] }
 0x452   :  { %v2275_v36 = vpop.f32.mrf.mxu2  ;;  %12593 = vst [vmem:[#allocation184_spill] sm:$0xff] %v10149_v55  ;;  %6809 = vmatmul.msk.bf16.vlgmr.msrb.gmra.mxu3 %vm100_vm1, %v9981_v8 }
 0x453   :  { %v10140_v24 = vadd.f32 %v2275_v36, %v12586_v40  ;;  %v12594_v36 = vld [vmem:[#allocation142_spill] sm:$0xff] }
 0x455   :  { %12587 = vst [vmem:[#allocation79_spill] sm:$0xff] %v10140_v24  ;;  %v2403_v40 = vpop.f32.mrf.mxu3  ;;  %v2318_v52 = vpop.f32.mrf.mxu0 }
 0x456   :  { %v10163_v47 = vadd.f32 %v2403_v40, %v9555_v28  ;;  %v10166_v37 = vadd.f32 %v2318_v52, %v12596_v61  ;;  %v12605_v40 = vld [vmem:[#allocation145_spill] sm:$0xff] }
 0x457   :  { %v2347_v46 = vpop.f32.mrf.mxu1 }
 0x458   :  { %v10169_v53 = vadd.f32 %v2347_v46, %v12597_v57  ;;  %v12609_v46 = vld [vmem:[#allocation146_spill] sm:$0xff] }
 0x45a   :  { %v2374_v31 = vpop.f32.mrf.mxu2  ;;  %12598 = vst [vmem:[#allocation185_spill] sm:$0xff] %v10169_v53 }
 0x45b   :  { %v10160_v58 = vadd.f32 %v2374_v31, %v12594_v36  ;;  %v12601_v31 = vld [vmem:[#allocation144_spill] sm:$0xff] }
 0x45d   :  { %12595 = vst [vmem:[#allocation81_spill] sm:$0xff] %v10160_v58  ;;  %v2405_v24 = vpop.f32.mrf.mxu3  ;;  %v2321_v33 = vpop.f32.mrf.mxu0  ;;  %v12603_v58 = vld [vmem:[#allocation41_spill] sm:$0xff] }
 0x45e   :  { %v10175_v36 = vadd.f32 %v2405_v24, %v12601_v31  ;;  %v10178_v13 = vadd.f32 %v2321_v33, %v12603_v58  ;;  %v12607_v33 = vld [vmem:[#allocation42_spill] sm:$0xff]  ;;  %v12611_v31 = vld [vmem:[#allocation43_spill] sm:$0xff] }
 0x45f   :  { %v2350_v28 = vpop.f32.mrf.mxu1 }
 0x460   :  { %12602 = vst [vmem:[#allocation186_spill] sm:$0xff] %v10175_v36  ;;  %v10181_v52 = vadd.f32 %v2350_v28, %v12605_v40  ;;  %6798 = vmatmul.msk.bf16.gmra.mxu0 %vm100_vm1, %v10018_v62  ;;  %6802 = vmatmul.msk.bf16.gmra.mxu1 %vm100_vm1, %v10018_v62 }
 0x461   :  { %12604 = vst [vmem:[#allocation83_spill] sm:$0xff] %v10178_v13  ;;  %6806 = vmatmul.msk.bf16.gmra.mxu2 %vm100_vm1, %v10018_v62 }
 0x462   :  { %v2376_v55 = vpop.f32.mrf.mxu2  ;;  %12606 = vst [vmem:[#allocation187_spill] sm:$0xff] %v10181_v52  ;;  %6810 = vmatmul.msk.bf16.gmra.mxu3 %vm100_vm1, %v10018_v62  ;;  %v12613_v52 = vld [vmem:[#allocation147_spill] sm:$0xff] }
 0x463   :  { %v10172_v38 = vadd.f32 %v2376_v55, %v12599_v41  ;;  %v2562_v41 = vld [vmem:[%s11965_s0 + $0x18] sm:$0xff] }
 0x464   :  { %2598 = vst [vmem:[#allocation1] ss:$4 sm:$0xff] %v2562_v41 }
 0x465   :  { %12600 = vst [vmem:[#allocation82_spill] sm:$0xff] %v10172_v38  ;;  %v2408_v58 = vpop.f32.mrf.mxu3  ;;  %v2323_v61 = vpop.f32.mrf.mxu0 }
 0x466   :  { %v10198_v57 = vadd.f32 %v2408_v58, %v12609_v46  ;;  %v10201_v28 = vadd.f32 %v2323_v61, %v12611_v31 }
 0x467   :  { %v2352_v40 = vpop.f32.mrf.mxu1 }
 0x468   :  { %12610 = vst [vmem:[#allocation188_spill] sm:$0xff] %v10198_v57  ;;  %v10204_v13 = vadd.f32 %v2352_v40, %v12613_v52  ;;  %v12617_v52 = vld [vmem:[#allocation45_spill] sm:$0xff] }
 0x469   :  { %12612 = vst [vmem:[#allocation85_spill] sm:$0xff] %v10201_v28  ;;  %v12616_v28 = vld [vmem:[#allocation148_spill] sm:$0xff] }
 0x46a   :  { %v2379_v24 = vpop.f32.mrf.mxu2  ;;  %12614 = vst [vmem:[#allocation189_spill] sm:$0xff] %v10204_v13 }
 0x46b   :  { %v10195_v55 = vadd.f32 %v2379_v24, %v12607_v33  ;;  %v2601_v36 = vld.sshfl [vmem:[#allocation1] sm:$0xff pattern:$0x73625140]  ;;  %v2602_v38 = vld.sshfl [vmem:[#allocation1 + $0x8] sm:$0xff pattern:$0x73625140] }
 0x46c   :  { %v2637_v41 = vsel %vm113_vm0, %v2601_v36, 0  ;;  %v2639_v53 = vsel %vm113_vm0, %v2602_v38, 0  ;;  %v12615_v33 = vld [vmem:[#allocation44_spill] sm:$0xff] }
 0x46d   :  { %12608 = vst [vmem:[#allocation84_spill] sm:$0xff] %v10195_v55  ;;  %2892 = vmatpush.bf16.msra.mxu0 %v2637_v41  ;;  %2921 = vmatpush.bf16.msra.mxu1 %v2639_v53  ;;  %v2410_v58 = vpop.f32.mrf.mxu3  ;;  %v2326_v46 = vpop.f32.mrf.mxu0  ;;  %v2603_v61 = vld.sshfl [vmem:[#allocation1 + $0x10] sm:$0xff pattern:$0x73625140]  ;;  %v12618_v41 = vld [vmem:[#allocation149_spill] sm:$0xff] }
 0x46e   :  { %v2604_v31 = vld.sshfl [vmem:[#allocation1 + $0x18] sm:$0xff pattern:$0x73625140]  ;;  %v10212_v57 = vadd.f32 %v2410_v58, %v12616_v28  ;;  %v10215_v40 = vadd.f32 %v2326_v46, %v12617_v52  ;;  %v2641_v36 = vsel %vm113_vm0, %v2603_v61, 0 }
 0x46f   :  { %v2355_v13 = vpop.f32.mrf.mxu1  ;;  %v2643_v38 = vsel %vm113_vm0, %v2604_v31, 0  ;;  %2950 = vmatpush.bf16.msra.mxu2 %v2641_v36 }
 0x470   :  { %v10220_v53 = vadd.f32 %v2355_v13, %v12618_v41  ;;  %2979 = vmatpush.bf16.msra.mxu3 %v2643_v38  ;;  %6799 = vmatmul.msk.bf16.gmra.mxu0 %vm100_vm1, %v10063_v18  ;;  %v10242_v38 = vpop.permute.xlu0 %3309 }
 0x471   :  { %6803 = vmatmul.msk.bf16.gmra.mxu1 %vm100_vm1, %v10063_v18  ;;  %6807 = vmatmul.msk.bf16.gmra.mxu2 %vm100_vm1, %v10063_v18 }
 0x472   :  { %v2381_v24 = vpop.f32.mrf.mxu2  ;;  %12619 = vst [vmem:[#allocation86_spill] sm:$0xff] %v10220_v53  ;;  %6811 = vmatmul.msk.bf16.gmra.mxu3 %vm100_vm1, %v10063_v18 }
 0x473   :  { %v10209_v55 = vadd.f32 %v2381_v24, %v12615_v33  ;;  %v12620_v24 = vld [vmem:[#allocation46_spill] sm:$0xff] }
 0x475   :  { %v2413_v13 = vpop.f32.mrf.mxu3  ;;  %v2328_v58 = vpop.f32.mrf.mxu0 }
 0x476   :  { %v10234_v46 = vadd.f32 %v2413_v13, %v9642_v19  ;;  %v10237_v61 = vadd.f32 %v2328_v58, %v9644_v43  ;;  %v12624_v19 = vld [vmem:[#allocation47_spill] sm:$0xff] }
 0x477   :  { %v2357_v31 = vpop.f32.mrf.mxu1  ;;  %v12626_v58 = vld [vmem:[#allocation151_spill] sm:$0xff] }
 0x478   :  { %12622 = vst [vmem:[#allocation87_spill] sm:$0xff] %v10237_v61  ;;  %v10240_v52 = vadd.f32 %v2357_v31, %v9646_v32 }
 0x47a   :  { %v2384_v28 = vpop.f32.mrf.mxu2 }
 0x47b   :  { %v10231_v33 = vadd.f32 %v2384_v28, %v12620_v24 }
 0x47d   :  { %12621 = vst [vmem:[#allocation190_spill] sm:$0xff] %v10231_v33  ;;  %v2415_v28 = vpop.f32.mrf.mxu3  ;;  %v2331_v24 = vpop.f32.mrf.mxu0  ;;  %v12623_v33 = vld [vmem:[#allocation150_spill] sm:$0xff] }
 0x47e   :  { %v10248_v53 = vadd.f32 %v2415_v28, %v12623_v33  ;;  %v10251_v13 = vadd.f32 %v2331_v24, %v12624_v19 }
 0x47f   :  { %v2360_v43 = vpop.f32.mrf.mxu1 }
 0x480   :  { %12625 = vst [vmem:[#allocation191_spill] sm:$0xff] %v10251_v13  ;;  %v10254_v61 = vadd.f32 %v2360_v43, %v12626_v58  ;;  %6800 = vmatmul.msk.bf16.gmra.mxu0 %vm100_vm1, %v10105_v20  ;;  %v10275_v43 = vpop.permute.xlu0 %3314 }
 0x481   :  { %6804 = vmatmul.msk.bf16.gmra.mxu1 %vm100_vm1, %v10105_v20  ;;  %6808 = vmatmul.msk.bf16.gmra.mxu2 %vm100_vm1, %v10105_v20 }
 0x482   :  { %v2386_v36 = vpop.f32.mrf.mxu2  ;;  %12627 = vst [vmem:[#allocation88_spill] sm:$0xff] %v10254_v61  ;;  %6812 = vmatmul.msk.bf16.gmra.mxu3 %vm100_vm1, %v10105_v20 }
 0x483   :  { %v10245_v41 = vadd.f32 %v2386_v36, %v9656_v21  ;;  %v10264_v21 = vpop.permute.xlu1 %3299 }
 0x485   :  { %v2418_v31 = vpop.f32.mrf.mxu3  ;;  %v2333_v36 = vpop.f32.mrf.mxu0 }
 0x486   :  { %v10270_v28 = vadd.f32 %v2418_v31, %v9682_v17  ;;  %v10273_v24 = vadd.f32 %v2333_v36, %v9684_v5 }
 0x487   :  { %v2362_v19 = vpop.f32.mrf.mxu1 }
 0x488   :  { %12629 = vst [vmem:[#allocation89_spill] sm:$0xff] %v10270_v28  ;;  %v10278_v58 = vadd.f32 %v2362_v19, %v9686_v49 }
 0x489   :  { %12630 = vst [vmem:[#allocation193_spill] sm:$0xff] %v10273_v24 }
 0x48a   :  { %v2389_v32 = vpop.f32.mrf.mxu2  ;;  %12631 = vst [vmem:[#allocation90_spill] sm:$0xff] %v10278_v58 }
 0x48b   :  { %v10267_v33 = vadd.f32 %v2389_v32, %v9680_v23  ;;  %v10287_v5 = vpop.permute.xlu1 %3304 }
 0x48d   :  { %12628 = vst [vmem:[#allocation192_spill] sm:$0xff] %v10267_v33  ;;  %v2420_v23 = vpop.f32.mrf.mxu3  ;;  %v2662_v32 = vpop.f32.mrf.mxu0 }
 0x48e   :  { %v10284_v33 = vadd.f32 %v2420_v23, %v9694_v15  ;;  %v3117_v17 = vadd.f32 %v2662_v32, %v9697_v45 }
 0x48f   :  { %v2691_v31 = vpop.f32.mrf.mxu1 }
 0x490   :  { %12633 = vst [vmem:[#allocation91_spill] sm:$0xff] %v10284_v33  ;;  %v3118_v36 = vadd.f32 %v2691_v31, %v9700_v39  ;;  %6813 = vmatmul.msk.bf16.vlgmr.msra.gmra.mxu0 %vm100_vm1, %v9981_v8 }
 0x491   :  { %6817 = vmatmul.msk.bf16.vlgmr.msra.gmra.mxu1 %vm100_vm1, %v9981_v8  ;;  %6821 = vmatmul.msk.bf16.vlgmr.msra.gmra.mxu2 %vm100_vm1, %v9981_v8 }
 0x492   :  { %v2391_v61 = vpop.f32.mrf.mxu2  ;;  %v3269_v49 = vmax.f32 %v3117_v17, %v3118_v36  ;;  %6825 = vmatmul.msk.bf16.vlgmr.msra.gmra.mxu3 %vm100_vm1, %v9981_v8 }
 0x493   :  { %v10281_v13 = vadd.f32 %v2391_v61, %v9692_v11  ;;  %v10294_v11 = vpop.permute.xlu0 %3279  ;;  %v10305_v58 = vpop.permute.xlu1 %3284 }
 0x494   :  { %v3317_v15 = vadd.f32 %v10294_v11, %v3269_v49 }
 0x495   :  { %12632 = vst [vmem:[#allocation194_spill] sm:$0xff] %v10281_v13  ;;  %v2749_v19 = vpop.f32.mrf.mxu3  ;;  %v2664_v23 = vpop.f32.mrf.mxu0 }
 0x496   :  { %v3325_v61 = vmax.f32 %v3317_v15, 0.0  ;;  %v3120_v32 = vadd.f32 %v2749_v19, %v9714_v51  ;;  %v3133_v31 = vadd.f32 %v2664_v23, %v9717_v4 }
 0x497   :  { %v2693_v33 = vpop.f32.mrf.mxu1 }
 0x498   :  { %v3333_v17 = vpack.c.bf16 %v3325_v61, %v3325_v61  ;;  %v3134_v36 = vadd.f32 %v2693_v33, %v9720_v7 }
 0x49a   :  { %v2720_v45 = vpop.f32.mrf.mxu2  ;;  %3341 = vst [vmem:[#allocation2 + $0x8] sm:$0xf] %v3333_v17  ;;  %v3270_v24 = vmax.f32 %v3133_v31, %v3134_v36  ;;  %v6151_v17 = vld [vmem:[%s11969_s4 + $0x28] sm:$0xff] }
 0x49b   :  { %v3119_v39 = vadd.f32 %v2720_v45, %v9711_v0  ;;  %6189 = vperm.xlu1 %7964, %v6151_v17  }
 0x49c   :  { %v3318_v15 = vadd.f32 %v10305_v58, %v3270_v24 }
 0x49d   :  { %v3349_v13 = vmax.f32 %v3119_v39, %v3120_v32  ;;  %v2751_v19 = vpop.f32.mrf.mxu3  ;;  %v2667_v4 = vpop.f32.mrf.mxu0 }
 0x49e   :  { %v3326_v28 = vmax.f32 %v3318_v15, 0.0  ;;  %v3136_v61 = vadd.f32 %v2751_v19, %v9726_v6  ;;  %v3149_v7 = vadd.f32 %v2667_v4, %v9729_v48  ;;  %v10312_v39 = vpop.permute.xlu2 %3289 }
 0x49f   :  { %v3357_v49 = vadd.f32 %v3349_v13, %v10294_v11  ;;  %v2696_v33 = vpop.f32.mrf.mxu1 }
 0x4a0   :  { %v3334_v32 = vpack.c.bf16 %v3326_v28, %v3326_v28  ;;  %v3150_v13 = vadd.f32 %v2696_v33, %v9732_v30  ;;  %6814 = vmatmul.msk.bf16.gmra.mxu0 %vm100_vm1, %v10018_v62 }
 0x4a1   :  { %v3365_v0 = vmax.f32 %v3357_v49, 0.0  ;;  %6818 = vmatmul.msk.bf16.gmra.mxu1 %vm100_vm1, %v10018_v62  ;;  %6822 = vmatmul.msk.bf16.gmra.mxu2 %vm100_vm1, %v10018_v62 }
 0x4a2   :  { %v2722_v45 = vpop.f32.mrf.mxu2  ;;  %3342 = vst [vmem:[#allocation2 + $0x38] sm:$0xf] %v3334_v32  ;;  %v3271_v6 = vmax.f32 %v3149_v7, %v3150_v13  ;;  %6826 = vmatmul.msk.bf16.gmra.mxu3 %vm100_vm1, %v10018_v62  ;;  %v6149_v32 = vld [vmem:[%s11969_s4 + $0x18] sm:$0xff] }
 0x4a3   :  { %v3135_v51 = vadd.f32 %v2722_v45, %v9723_v59  ;;  %v3373_v23 = vpack.c.bf16 %v3365_v0, %v3365_v0  ;;  %v6152_v59 = vld [vmem:[%s11969_s4 + $0x30] sm:$0xff]  ;;  %v2563_v45 = vld [vmem:[%s11965_s0 + $0x20] sm:$0xff] }
 0x4a4   :  { %6194 = vperm.xlu0 %7963, %v6152_v59   ;;  %v3319_v30 = vadd.f32 %v10312_v39, %v3271_v6  ;;  %2600 = vst [vmem:[#allocation1 + $0x20] ss:$4 sm:$0xff] %v2563_v45 }
 0x4a5   :  { %3381 = vst [vmem:[#allocation2 + $0xc] sm:$0xf] %v3373_v23  ;;  %v3350_v24 = vmax.f32 %v3135_v51, %v3136_v61  ;;  %v2754_v15 = vpop.f32.mrf.mxu3  ;;  %v2669_v0 = vpop.f32.mrf.mxu0 }
 0x4a6   :  { %v3327_v36 = vmax.f32 %v3319_v30, 0.0  ;;  %v3152_v19 = vadd.f32 %v2754_v15, %v9749_v10  ;;  %v3165_v4 = vadd.f32 %v2669_v0, %v9752_v44 }
 0x4a7   :  { %v3358_v48 = vadd.f32 %v3350_v24, %v10305_v58  ;;  %v2698_v23 = vpop.f32.mrf.mxu1 }
 0x4a8   :  { %v3335_v61 = vpack.c.bf16 %v3327_v36, %v3327_v36  ;;  %v3166_v7 = vadd.f32 %v2698_v23, %v9755_v42  ;;  %v6148_v42 = vld [vmem:[%s11969_s4 + $0x10] sm:$0xff] }
 0x4a9   :  { %v3366_v28 = vmax.f32 %v3358_v48, 0.0  ;;  %6174 = vperm.xlu1 %7964, %v6148_v42  }
 0x4aa   :  { %v2725_v31 = vpop.f32.mrf.mxu2  ;;  %3343 = vst [vmem:[#allocation2 + $0x68] sm:$0xf] %v3335_v61  ;;  %v3272_v13 = vmax.f32 %v3165_v4, %v3166_v7  ;;  %v6146_v7 = vld [vmem:[%s11969_s4] sm:$0xff] }
 0x4ab   :  { %v3151_v49 = vadd.f32 %v2725_v31, %v9746_v35  ;;  %v3374_v51 = vpack.c.bf16 %v3366_v28, %v3366_v28  ;;  %v10338_v35 = vpop.permute.xlu2 %3294  ;;  %v2605_v31 = vld.sshfl [vmem:[#allocation1 + $0x20] sm:$0xff pattern:$0x73625140]  ;;  %v2606_v45 = vld.sshfl [vmem:[#allocation1 + $0x28] sm:$0xff pattern:$0x73625140] }
 0x4ac   :  { %6179 = vperm.xlu0 %7963, %v6149_v32   ;;  %v3320_v44 = vadd.f32 %v10338_v35, %v3272_v13  ;;  %v2645_v0 = vsel %vm113_vm0, %v2605_v31, 0  ;;  %v2647_v4 = vsel %vm113_vm0, %v2606_v45, 0 }
 0x4ad   :  { %3382 = vst [vmem:[#allocation2 + $0x3c] sm:$0xf] %v3374_v51  ;;  %v3351_v33 = vmax.f32 %v3151_v49, %v3152_v19  ;;  %v2756_v30 = vpop.f32.mrf.mxu3  ;;  %v2672_v28 = vpop.f32.mrf.mxu0  ;;  %3008 = vmatpush.bf16.msrb.mxu0 %v2645_v0  ;;  %3037 = vmatpush.bf16.msrb.mxu1 %v2647_v4 }
 0x4ae   :  { %v3328_v6 = vmax.f32 %v3320_v44, 0.0  ;;  %v3168_v36 = vadd.f32 %v2756_v30, %v9763_v27  ;;  %v3181_v49 = vadd.f32 %v2672_v28, %v9766_v56  ;;  %v2608_v56 = vld.sshfl [vmem:[#allocation1 + $0x38] sm:$0xff pattern:$0x73625140]  ;;  %v6388_v44 = vld [vmem:[#allocation3] sm:$0x1] }
 0x4af   :  { %v3359_v10 = vadd.f32 %v3351_v33, %v10312_v39  ;;  %v2701_v15 = vpop.f32.mrf.mxu1 }
 0x4b0   :  { %v3336_v51 = vpack.c.bf16 %v3328_v6, %v3328_v6  ;;  %v3182_v19 = vadd.f32 %v2701_v15, %v9771_v63  ;;  %6815 = vmatmul.msk.bf16.gmra.mxu0 %vm100_vm1, %v10063_v18  ;;  %v2651_v63 = vsel %vm113_vm0, %v2608_v56, 0 }
 0x4b1   :  { %v3367_v24 = vmax.f32 %v3359_v10, 0.0  ;;  %6819 = vmatmul.msk.bf16.gmra.mxu1 %vm100_vm1, %v10063_v18  ;;  %6823 = vmatmul.msk.bf16.gmra.mxu2 %vm100_vm1, %v10063_v18 }
 0x4b2   :  { %v2727_v59 = vpop.f32.mrf.mxu2  ;;  %3344 = vst [vmem:[#allocation2 + $0x98] sm:$0xf] %v3336_v51  ;;  %v3273_v61 = vmax.f32 %v3181_v49, %v3182_v19  ;;  %6827 = vmatmul.msk.bf16.gmra.mxu3 %vm100_vm1, %v10063_v18  ;;  %6391 = vperm.xlu1 %7964, %v6388_v44  }
 0x4b3   :  { %v3167_v48 = vadd.f32 %v2727_v59, %v9760_v29  ;;  %v3375_v17 = vpack.c.bf16 %v3367_v24, %v3367_v24  ;;  %v2607_v29 = vld.sshfl [vmem:[#allocation1 + $0x30] sm:$0xff pattern:$0x73625140]  ;;  %3095 = vmatpush.bf16.msrb.mxu3 %v2651_v63 }
 0x4b4   :  { %v2649_v27 = vsel %vm113_vm0, %v2607_v29, 0  ;;  %v3321_v32 = vadd.f32 %v10264_v21, %v3273_v61  ;;  %6164 = vperm.xlu0 %7963, %v6146_v7  }
 0x4b5   :  { %3383 = vst [vmem:[#allocation2 + $0x6c] sm:$0xf] %v3375_v17  ;;  %v3352_v23 = vmax.f32 %v3167_v48, %v3168_v36  ;;  %3066 = vmatpush.bf16.msrb.mxu2 %v2649_v27  ;;  %v2759_v42 = vpop.f32.mrf.mxu3  ;;  %v2674_v6 = vpop.f32.mrf.mxu0 }
 0x4b6   :  { %v3329_v24 = vmax.f32 %v3321_v32, 0.0  ;;  %v3184_v30 = vadd.f32 %v2759_v42, %v9785_v26  ;;  %v3197_v28 = vadd.f32 %v2674_v6, %v9788_v16 }
 0x4b7   :  { %v3360_v33 = vadd.f32 %v3352_v23, %v10338_v35  ;;  %v2703_v31 = vpop.f32.mrf.mxu1 }
 0x4b8   :  { %v3337_v17 = vpack.c.bf16 %v3329_v24, %v3329_v24  ;;  %v3198_v36 = vadd.f32 %v2703_v31, %v9791_v14  ;;  %v6150_v31 = vld [vmem:[%s11969_s4 + $0x20] sm:$0xff] }
 0x4b9   :  { %v3368_v13 = vmax.f32 %v3360_v33, 0.0 }
 0x4ba   :  { %v2730_v10 = vpop.f32.mrf.mxu2  ;;  %3345 = vst [vmem:[#allocation2 + $0xc8] sm:$0xf] %v3337_v17  ;;  %v3274_v15 = vmax.f32 %v3197_v28, %v3198_v36 }
 0x4bb   :  { %v3183_v59 = vadd.f32 %v2730_v10, %v9782_v34  ;;  %v3376_v48 = vpack.c.bf16 %v3368_v13, %v3368_v13 }
 0x4bc   :  { %v3322_v34 = vadd.f32 %v10287_v5, %v3274_v15 }
 0x4bd   :  { %3384 = vst [vmem:[#allocation2 + $0x9c] sm:$0xf] %v3376_v48  ;;  %v3353_v49 = vmax.f32 %v3183_v59, %v3184_v30  ;;  %v2761_v26 = vpop.f32.mrf.mxu3  ;;  %v2677_v29 = vpop.f32.mrf.mxu0 }
 0x4be   :  { %v3330_v19 = vmax.f32 %v3322_v34, 0.0  ;;  %v3200_v23 = vadd.f32 %v2761_v26, %v9797_v12  ;;  %v3213_v14 = vadd.f32 %v2677_v29, %v9800_v54 }
 0x4bf   :  { %v3361_v0 = vadd.f32 %v3353_v49, %v10264_v21  ;;  %v2706_v27 = vpop.f32.mrf.mxu1 }
 0x4c0   :  { %v3338_v56 = vpack.c.bf16 %v3330_v19, %v3330_v19  ;;  %v3214_v61 = vadd.f32 %v2706_v27, %v9803_v60  ;;  %6816 = vmatmul.msk.bf16.gmra.mxu0 %vm100_vm1, %v10105_v20  ;;  %v12635_v19 = vld [vmem:[#allocation152_spill] sm:$0xff] }
 0x4c1   :  { %v3369_v45 = vmax.f32 %v3361_v0, 0.0  ;;  %6820 = vmatmul.msk.bf16.gmra.mxu1 %vm100_vm1, %v10105_v20  ;;  %6824 = vmatmul.msk.bf16.gmra.mxu2 %vm100_vm1, %v10105_v20 }
 0x4c2   :  { %v2732_v51 = vpop.f32.mrf.mxu2  ;;  %3346 = vst [vmem:[#allocation2 + $0xf8] sm:$0xf] %v3338_v56  ;;  %v3275_v12 = vmax.f32 %v3213_v14, %v3214_v61  ;;  %6828 = vmatmul.msk.bf16.gmra.mxu3 %vm100_vm1, %v10105_v20 }
 0x4c3   :  { %v3199_v4 = vadd.f32 %v2732_v51, %v9794_v9  ;;  %v3377_v16 = vpack.c.bf16 %v3369_v45, %v3369_v45  ;;  %v6153_v9 = vld [vmem:[%s11969_s4 + $0x38] sm:$0xff] }
 0x4c4   :  { %6199 = vperm.xlu2 %7965, %v6153_v9   ;;  %v3323_v60 = vadd.f32 %v10242_v38, %v3275_v12  ;;  %v12634_v45 = vld [vmem:[#allocation48_spill] sm:$0xff] }
 0x4c5   :  { %3385 = vst [vmem:[#allocation2 + $0xcc] sm:$0xf] %v3377_v16  ;;  %v3354_v63 = vmax.f32 %v3199_v4, %v3200_v23  ;;  %v2764_v10 = vpop.f32.mrf.mxu3  ;;  %v2679_v44 = vpop.f32.mrf.mxu0  ;;  %v12636_v16 = vld [vmem:[#allocation49_spill] sm:$0xff] }
 0x4c6   :  { %v3331_v32 = vmax.f32 %v3323_v60, 0.0  ;;  %v3216_v59 = vadd.f32 %v2764_v10, %v9817_v1  ;;  %v3229_v42 = vadd.f32 %v2679_v44, %v9820_v2  ;;  %v12639_v44 = vld [vmem:[#allocation154_spill] sm:$0xff] }
 0x4c7   :  { %v3362_v54 = vadd.f32 %v3354_v63, %v10287_v5  ;;  %v2708_v6 = vpop.f32.mrf.mxu1 }
 0x4c8   :  { %v3339_v48 = vpack.c.bf16 %v3331_v32, %v3331_v32  ;;  %v3230_v30 = vadd.f32 %v2708_v6, %v9823_v3  ;;  %v12640_v6 = vld [vmem:[#allocation51_spill] sm:$0xff] }
 0x4c9   :  { %v3370_v7 = vmax.f32 %v3362_v54, 0.0  ;;  %v12637_v54 = vld [vmem:[#allocation153_spill] sm:$0xff] }
 0x4ca   :  { %v2735_v33 = vpop.f32.mrf.mxu2  ;;  %3347 = vst [vmem:[#allocation2 + $0x128] sm:$0xf] %v3339_v48  ;;  %v3276_v17 = vmax.f32 %v3229_v42, %v3230_v30 }
 0x4cb   :  { %v3215_v13 = vadd.f32 %v2735_v33, %v9814_v50  ;;  %v3378_v24 = vpack.c.bf16 %v3370_v7, %v3370_v7 }
 0x4cc   :  { %6184 = vperm.xlu2 %7965, %v6150_v31   ;;  %v3324_v36 = vadd.f32 %v10275_v43, %v3276_v17 }
 0x4cd   :  { %3386 = vst [vmem:[#allocation2 + $0xfc] sm:$0xf] %v3378_v24  ;;  %v3355_v28 = vmax.f32 %v3215_v13, %v3216_v59  ;;  %v2766_v0 = vpop.f32.mrf.mxu3  ;;  %v2778_v3 = vpop.f32.mrf.mxu0  ;;  %v12638_v13 = vld [vmem:[#allocation50_spill] sm:$0xff] }
 0x4ce   :  { %v3332_v2 = vmax.f32 %v3324_v36, 0.0  ;;  %v3232_v51 = vadd.f32 %v2766_v0, %v12634_v45  ;;  %v3121_v4 = vadd.f32 %v2778_v3, %v12635_v19  ;;  %v6937_v36 = vld [vmem:[#allocation2 + $0xf4] sm:$0xf0]  ;;  %v12641_v3 = vld [vmem:[#allocation155_spill] sm:$0xff] }
 0x4cf   :  { %v3363_v50 = vadd.f32 %v3355_v28, %v10242_v38  ;;  %v2807_v26 = vpop.f32.mrf.mxu1 }
 0x4d0   :  { %v3340_v29 = vpack.c.bf16 %v3332_v2, %v3332_v2  ;;  %v3122_v23 = vadd.f32 %v2807_v26, %v12636_v16  ;;  %6829 = vmatmul.msk.bf16.vlgmr.msrb.gmra.mxu0 %vm100_vm1, %v9981_v8  ;;  %v12642_v26 = vld [vmem:[#allocation52_spill] sm:$0xff] }
 0x4d1   :  { %v3371_v1 = vmax.f32 %v3363_v50, 0.0  ;;  %6833 = vmatmul.msk.bf16.vlgmr.msrb.gmra.mxu1 %vm100_vm1, %v9981_v8  ;;  %6837 = vmatmul.msk.bf16.vlgmr.msrb.gmra.mxu2 %vm100_vm1, %v9981_v8  ;;  %v7845_v30 = vld [vmem:[#allocation2 + $0x128] sm:$0xf] }
 0x4d2   :  { %v2737_v49 = vpop.f32.mrf.mxu2  ;;  %3348 = vst [vmem:[#allocation2 + $0x158] sm:$0xf] %v3340_v29  ;;  %v3389_v27 = vmax.f32 %v3121_v4, %v3122_v23  ;;  %6841 = vmatmul.msk.bf16.vlgmr.msrb.gmra.mxu3 %vm100_vm1, %v9981_v8  ;;  %v12643_v16 = vld [vmem:[#allocation156_spill] sm:$0xff] }
 0x4d3   :  { %v3231_v15 = vadd.f32 %v2737_v49, %v9826_v25  ;;  %v3379_v34 = vpack.c.bf16 %v3371_v1, %v3371_v1  ;;  %v6147_v25 = vld [vmem:[%s11969_s4 + $0x8] sm:$0xff] }
 0x4d4   :  { %6169 = vperm.xlu2 %7965, %v6147_v25   ;;  %v3397_v61 = vadd.f32 %v3389_v27, %v10294_v11  ;;  %v6905_v25 = vld [vmem:[#allocation2 + $0x94] sm:$0xf0] }
 0x4d5   :  { %3387 = vst [vmem:[#allocation2 + $0x12c] sm:$0xf] %v3379_v34  ;;  %v3356_v14 = vmax.f32 %v3231_v15, %v3232_v51  ;;  %v2865_v7 = vpop.f32.mrf.mxu3  ;;  %v2780_v33 = vpop.f32.mrf.mxu0  ;;  %v7837_v15 = vld [vmem:[#allocation2 + $0xc8] sm:$0xf] }
 0x4d6   :  { %v3405_v12 = vmax.f32 %v3397_v61, 0.0  ;;  %v3124_v10 = vadd.f32 %v2865_v7, %v12638_v13  ;;  %v3137_v24 = vadd.f32 %v2780_v33, %v12639_v44  ;;  %v6940_v19 = vor.u32 %v7837_v15, %v6937_v36  ;;  %v6967_v7 = vld [vmem:[#allocation2 + $0x124] sm:$0xf]  ;;  %v7849_v33 = vld [vmem:[#allocation2 + $0x150] sm:$0xf0] }
 0x4d7   :  { %v3364_v56 = vadd.f32 %v3356_v14, %v10275_v43  ;;  %v2809_v59 = vpop.f32.mrf.mxu1  ;;  %v6968_v44 = vor.u32 %v7849_v33, %v6967_v7  ;;  %v12645_v36 = vld [vmem:[#allocation157_spill] sm:$0xff] }
 0x4d8   :  { %v3413_v42 = vpack.c.bf16 %v3405_v12, %v3405_v12  ;;  %v3138_v48 = vadd.f32 %v2809_v59, %v12640_v6  ;;  %v7829_v12 = vld [vmem:[#allocation2 + $0x68] sm:$0xf]  ;;  %v6873_v59 = vld [vmem:[#allocation2 + $0x34] sm:$0xf0]  ;;  %v6943_v6 = vld [vmem:[#allocation2 + $0xcc] sm:$0xf] }
 0x4d9   :  { %v3372_v63 = vmax.f32 %v3364_v56, 0.0  ;;  %v6969_v28 = vld [vmem:[#allocation2 + $0x154] sm:$0xf0]  ;;  %v6908_v13 = vor.u32 %v7829_v12, %v6905_v25  ;;  %3907 = vmatpush.bf16.msra.mxu0 %v6968_v44 }
 0x4da   :  { %v2836_v9 = vpop.f32.mrf.mxu2  ;;  %3421 = vst [vmem:[#allocation2 + $0x10] sm:$0xf] %v3413_v42  ;;  %v3390_v31 = vmax.f32 %v3137_v24, %v3138_v48  ;;  %v6972_v17 = vor.u32 %v7845_v30, %v6969_v28  ;;  %v12644_v56 = vld [vmem:[#allocation53_spill] sm:$0xff]  ;;  %v7821_v48 = vld [vmem:[#allocation2 + $0x8] sm:$0xf] }
 0x4db   :  { %v3123_v60 = vadd.f32 %v2836_v9, %v12637_v54  ;;  %v3380_v32 = vpack.c.bf16 %v3372_v63, %v3372_v63  ;;  %v6876_v15 = vor.u32 %v7821_v48, %v6873_v59 }
 0x4dc   :  { %v3398_v1 = vadd.f32 %v3390_v31, %v10305_v58  ;;  %3936 = vmatpush.bf16.msra.mxu1 %v6972_v17  ;;  %v6975_v63 = vld [vmem:[#allocation2 + $0x12c] sm:$0xf]  ;;  %v6935_v31 = vld [vmem:[#allocation2 + $0xc4] sm:$0xf]  ;;  %v7841_v17 = vld [vmem:[#allocation2 + $0xf0] sm:$0xf0] }
 0x4dd   :  { %3388 = vst [vmem:[#allocation2 + $0x15c] sm:$0xf] %v3380_v32  ;;  %v3429_v8 = vmax.f32 %v3123_v60, %v3124_v10  ;;  %v2867_v45 = vpop.f32.mrf.mxu3  ;;  %v2783_v51 = vpop.f32.mrf.mxu0  ;;  %v7842_v10 = vld [vmem:[#allocation2 + $0xf8] sm:$0xf0] }
 0x4de   :  { %v3406_v0 = vmax.f32 %v3398_v1, 0.0  ;;  %v3140_v29 = vadd.f32 %v2867_v45, %v12642_v26  ;;  %v3153_v23 = vadd.f32 %v2783_v51, %v12643_v16  ;;  %v6944_v28 = vor.u32 %v7842_v10, %v6943_v6  ;;  %v12647_v51 = vld [vmem:[#allocation158_spill] sm:$0xff]  ;;  %v7825_v10 = vld [vmem:[#allocation2 + $0x30] sm:$0xf0] }
 0x4df   :  { %v3437_v50 = vadd.f32 %v3429_v8, %v10294_v11  ;;  %v2812_v14 = vpop.f32.mrf.mxu1 }
 0x4e0   :  { %v3414_v27 = vpack.c.bf16 %v3406_v0, %v3406_v0  ;;  %v3154_v61 = vadd.f32 %v2812_v14, %v12644_v56  ;;  %3937 = vmatpush.bf16.msra.mxu1 %v6940_v19  ;;  %6830 = vmatmul.msk.bf16.gmra.mxu0 %vm100_vm1, %v10018_v62  ;;  %v6936_v0 = vor.u32 %v7841_v17, %v6935_v31  ;;  %v7833_v56 = vld [vmem:[#allocation2 + $0x90] sm:$0xf0]  ;;  %v12651_v31 = vld [vmem:[#allocation160_spill] sm:$0xff] }
 0x4e1   :  { %v3445_v49 = vmax.f32 %v3437_v50, 0.0  ;;  %6834 = vmatmul.msk.bf16.gmra.mxu1 %vm100_vm1, %v10018_v62  ;;  %6838 = vmatmul.msk.bf16.gmra.mxu2 %vm100_vm1, %v10018_v62 }
 0x4e2   :  { %v2838_v2 = vpop.f32.mrf.mxu2  ;;  %3422 = vst [vmem:[#allocation2 + $0x40] sm:$0xf] %v3414_v27  ;;  %v3391_v32 = vmax.f32 %v3153_v23, %v3154_v61  ;;  %6842 = vmatmul.msk.bf16.gmra.mxu3 %vm100_vm1, %v10018_v62  ;;  %v7834_v62 = vld [vmem:[#allocation2 + $0x98] sm:$0xf0]  ;;  %v6911_v23 = vld [vmem:[#allocation2 + $0x6c] sm:$0xf]  ;;  %3908 = vmatpush.bf16.msra.mxu0 %v6936_v0 }
 0x4e3   :  { %v3139_v34 = vadd.f32 %v2838_v2, %v12641_v3  ;;  %v3453_v4 = vpack.c.bf16 %v3445_v49, %v3445_v49  ;;  %v6912_v25 = vor.u32 %v7834_v62, %v6911_v23  ;;  %v6903_v27 = vld [vmem:[#allocation2 + $0x64] sm:$0xf] }
 0x4e4   :  { %v7850_v9 = vld [vmem:[#allocation2 + $0x158] sm:$0xf0]  ;;  %v3399_v42 = vadd.f32 %v3391_v32, %v10312_v39  ;;  %3938 = vmatpush.bf16.msra.mxu1 %v6908_v13  ;;  %v6871_v13 = vld [vmem:[#allocation2 + $0x4] sm:$0xf] }
 0x4e5   :  { %3461 = vst [vmem:[#allocation2 + $0x14] sm:$0xf] %v3453_v4  ;;  %v3430_v54 = vmax.f32 %v3139_v34, %v3140_v29  ;;  %v6976_v60 = vor.u32 %v7850_v9, %v6975_v63  ;;  %v2870_v49 = vpop.f32.mrf.mxu3  ;;  %v2785_v2 = vpop.f32.mrf.mxu0  ;;  %v12646_v34 = vld [vmem:[#allocation54_spill] sm:$0xff]  ;;  %v12648_v29 = vld [vmem:[#allocation55_spill] sm:$0xff]  ;;  %v6904_v9 = vor.u32 %v7833_v56, %v6903_v27  ;;  %v6872_v48 = vor.u32 %v7825_v10, %v6871_v13 }
 0x4e6   :  { %v3407_v50 = vmax.f32 %v3399_v42, 0.0  ;;  %v3156_v45 = vadd.f32 %v2870_v49, %v12646_v34  ;;  %v3169_v19 = vadd.f32 %v2785_v2, %v12647_v51  ;;  %v7826_v63 = vld [vmem:[#allocation2 + $0x38] sm:$0xf0]  ;;  %v12653_v51 = vld [vmem:[#allocation161_spill] sm:$0xff] }
 0x4e7   :  { %v3438_v24 = vadd.f32 %v3430_v54, %v10305_v58  ;;  %3965 = vmatpush.bf16.msra.mxu2 %v6976_v60  ;;  %v2814_v4 = vpop.f32.mrf.mxu1  ;;  %v6879_v60 = vld [vmem:[#allocation2 + $0xc] sm:$0xf]  ;;  %3909 = vmatpush.bf16.msra.mxu0 %v6904_v9 }
 0x4e8   :  { %v3415_v26 = vpack.c.bf16 %v3407_v50, %v3407_v50  ;;  %v3170_v16 = vadd.f32 %v2814_v4, %v12648_v29  ;;  %3939 = vmatpush.bf16.msra.mxu1 %v6876_v15  ;;  %v6880_v32 = vor.u32 %v7826_v63, %v6879_v60 }
 0x4e9   :  { %v3446_v8 = vmax.f32 %v3438_v24, 0.0  ;;  %v12649_v24 = vld [vmem:[#allocation159_spill] sm:$0xff] }
 0x4ea   :  { %v2841_v30 = vpop.f32.mrf.mxu2  ;;  %3423 = vst [vmem:[#allocation2 + $0x70] sm:$0xf] %v3415_v26  ;;  %v3392_v61 = vmax.f32 %v3169_v19, %v3170_v16  ;;  %v12654_v16 = vld [vmem:[#allocation58_spill] sm:$0xff] }
 0x4eb   :  { %v3155_v1 = vadd.f32 %v2841_v30, %v12645_v36  ;;  %v3454_v3 = vpack.c.bf16 %v3446_v8, %v3446_v8  ;;  %3966 = vmatpush.bf16.msra.mxu2 %v6944_v28  ;;  %v12650_v30 = vld [vmem:[#allocation56_spill] sm:$0xff]  ;;  %3910 = vmatpush.bf16.msra.mxu0 %v6872_v48 }
 0x4ec   :  { %v3400_v54 = vadd.f32 %v3392_v61, %v10338_v35  ;;  %v12656_v61 = vld [vmem:[#allocation59_spill] sm:$0xff] }
 0x4ed   :  { %3462 = vst [vmem:[#allocation2 + $0x44] sm:$0xf] %v3454_v3  ;;  %v3431_v14 = vmax.f32 %v3155_v1, %v3156_v45  ;;  %v2872_v42 = vpop.f32.mrf.mxu3  ;;  %v2788_v6 = vpop.f32.mrf.mxu0  ;;  %v12652_v1 = vld [vmem:[#allocation57_spill] sm:$0xff] }
 0x4ee   :  { %v3408_v44 = vmax.f32 %v3400_v54, 0.0  ;;  %v3172_v28 = vadd.f32 %v2872_v42, %v12650_v30  ;;  %v3185_v17 = vadd.f32 %v2788_v6, %v12651_v31  ;;  %v12659_v6 = vld [vmem:[#allocation164_spill] sm:$0xff] }
 0x4ef   :  { %v3439_v12 = vadd.f32 %v3431_v14, %v10312_v39  ;;  %3967 = vmatpush.bf16.msra.mxu2 %v6912_v25  ;;  %v2817_v50 = vpop.f32.mrf.mxu1  ;;  %v12655_v14 = vld [vmem:[#allocation162_spill] sm:$0xff] }
 0x4f0   :  { %v3416_v36 = vpack.c.bf16 %v3408_v44, %v3408_v44  ;;  %v3186_v49 = vadd.f32 %v2817_v50, %v12652_v1  ;;  %6831 = vmatmul.msk.bf16.gmra.mxu0 %vm100_vm1, %v10063_v18 }
 0x4f1   :  { %v3447_v7 = vmax.f32 %v3439_v12, 0.0  ;;  %6835 = vmatmul.msk.bf16.gmra.mxu1 %vm100_vm1, %v10063_v18  ;;  %6839 = vmatmul.msk.bf16.gmra.mxu2 %vm100_vm1, %v10063_v18 }
 0x4f2   :  { %v2843_v33 = vpop.f32.mrf.mxu2  ;;  %3424 = vst [vmem:[#allocation2 + $0xa0] sm:$0xf] %v3416_v36  ;;  %v3393_v15 = vmax.f32 %v3185_v17, %v3186_v49  ;;  %6843 = vmatmul.msk.bf16.gmra.mxu3 %vm100_vm1, %v10063_v18 }
 0x4f3   :  { %v3171_v59 = vadd.f32 %v2843_v33, %v12649_v24  ;;  %v3455_v8 = vpack.c.bf16 %v3447_v7, %v3447_v7  ;;  %3968 = vmatpush.bf16.msra.mxu2 %v6880_v32  ;;  %v12657_v32 = vld [vmem:[#allocation163_spill] sm:$0xff] }
 0x4f4   :  { %v3401_v0 = vadd.f32 %v3393_v15, %v10264_v21 }
 0x4f5   :  { %3463 = vst [vmem:[#allocation2 + $0x74] sm:$0xf] %v3455_v8  ;;  %v3432_v2 = vmax.f32 %v3171_v59, %v3172_v28  ;;  %v2875_v4 = vpop.f32.mrf.mxu3  ;;  %v2790_v26 = vpop.f32.mrf.mxu0  ;;  %v12658_v59 = vld [vmem:[#allocation60_spill] sm:$0xff]  ;;  %v12660_v28 = vld [vmem:[#allocation61_spill] sm:$0xff] }
 0x4f6   :  { %v3409_v45 = vmax.f32 %v3401_v0, 0.0  ;;  %v3188_v23 = vadd.f32 %v2875_v4, %v12654_v16  ;;  %v3201_v25 = vadd.f32 %v2790_v26, %v12655_v14  ;;  %v12663_v4 = vld [vmem:[#allocation166_spill] sm:$0xff] }
 0x4f7   :  { %v3440_v62 = vadd.f32 %v3432_v2, %v10338_v35  ;;  %v2819_v27 = vpop.f32.mrf.mxu1 }
 0x4f8   :  { %v3417_v56 = vpack.c.bf16 %v3409_v45, %v3409_v45  ;;  %v3202_v63 = vadd.f32 %v2819_v27, %v12656_v61 }
 0x4f9   :  { %v3448_v3 = vmax.f32 %v3440_v62, 0.0  ;;  %v12661_v62 = vld [vmem:[#allocation165_spill] sm:$0xff] }
 0x4fa   :  { %v2846_v34 = vpop.f32.mrf.mxu2  ;;  %3425 = vst [vmem:[#allocation2 + $0xd0] sm:$0xf] %v3417_v56  ;;  %v3394_v9 = vmax.f32 %v3201_v25, %v3202_v63 }
 0x4fb   :  { %v3187_v19 = vadd.f32 %v2846_v34, %v12653_v51  ;;  %v3456_v29 = vpack.c.bf16 %v3448_v3, %v3448_v3  ;;  %v12662_v51 = vld [vmem:[#allocation62_spill] sm:$0xff] }
 0x4fc   :  { %v3402_v54 = vadd.f32 %v3394_v9, %v10287_v5 }
 0x4fd   :  { %3464 = vst [vmem:[#allocation2 + $0xa4] sm:$0xf] %v3456_v29  ;;  %v3433_v18 = vmax.f32 %v3187_v19, %v3188_v23  ;;  %v2877_v10 = vpop.f32.mrf.mxu3  ;;  %v2793_v44 = vpop.f32.mrf.mxu0  ;;  %v12664_v23 = vld [vmem:[#allocation63_spill] sm:$0xff] }
 0x4fe   :  { %v3410_v33 = vmax.f32 %v3402_v54, 0.0  ;;  %v3204_v42 = vadd.f32 %v2877_v10, %v12658_v59  ;;  %v3217_v48 = vadd.f32 %v2793_v44, %v12659_v6  ;;  %v12667_v10 = vld [vmem:[#allocation168_spill] sm:$0xff] }
 0x4ff   :  { %v3441_v12 = vadd.f32 %v3433_v18, %v10264_v21  ;;  %v2822_v8 = vpop.f32.mrf.mxu1  ;;  %v10487_v18 = vld [vmem:[%s11968_s3 + $0x20] sm:$0xff] }
 0x500   :  { %v3418_v30 = vpack.c.bf16 %v3410_v33, %v3410_v33  ;;  %v3218_v31 = vadd.f32 %v2822_v8, %v12660_v28  ;;  %6832 = vmatmul.msk.bf16.gmra.mxu0 %vm100_vm1, %v10105_v20 }
 0x501   :  { %v3449_v60 = vmax.f32 %v3441_v12, 0.0  ;;  %6836 = vmatmul.msk.bf16.gmra.mxu1 %vm100_vm1, %v10105_v20  ;;  %6840 = vmatmul.msk.bf16.gmra.mxu2 %vm100_vm1, %v10105_v20  ;;  %v12665_v12 = vld [vmem:[#allocation167_spill] sm:$0xff] }
 0x502   :  { %v2848_v7 = vpop.f32.mrf.mxu2  ;;  %3426 = vst [vmem:[#allocation2 + $0x100] sm:$0xf] %v3418_v30  ;;  %v3395_v50 = vmax.f32 %v3217_v48, %v3218_v31  ;;  %6844 = vmatmul.msk.bf16.gmra.mxu3 %vm100_vm1, %v10105_v20 }
 0x503   :  { %v3203_v13 = vadd.f32 %v2848_v7, %v12657_v32  ;;  %v3457_v24 = vpack.c.bf16 %v3449_v60, %v3449_v60  ;;  %v12666_v32 = vld [vmem:[#allocation64_spill] sm:$0xff] }
 0x504   :  { %v3403_v1 = vadd.f32 %v3395_v50, %v10242_v38 }
 0x505   :  { %3465 = vst [vmem:[#allocation2 + $0xd4] sm:$0xf] %v3457_v24  ;;  %v3434_v17 = vmax.f32 %v3203_v13, %v3204_v42  ;;  %v2880_v3 = vpop.f32.mrf.mxu3  ;;  %v2795_v34 = vpop.f32.mrf.mxu0  ;;  %v12668_v42 = vld [vmem:[#allocation65_spill] sm:$0xff] }
 0x506   :  { %v3411_v15 = vmax.f32 %v3403_v1, 0.0  ;;  %v3220_v19 = vadd.f32 %v2880_v3, %v12662_v51  ;;  %v3233_v26 = vadd.f32 %v2795_v34, %v12663_v4  ;;  %v12671_v3 = vld [vmem:[#allocation170_spill] sm:$0xff] }
 0x507   :  { %v3442_v36 = vadd.f32 %v3434_v17, %v10287_v5  ;;  %v2824_v29 = vpop.f32.mrf.mxu1 }
 0x508   :  { %v3419_v16 = vpack.c.bf16 %v3411_v15, %v3411_v15  ;;  %v3234_v14 = vadd.f32 %v2824_v29, %v12664_v23 }
 0x509   :  { %v3450_v49 = vmax.f32 %v3442_v36, 0.0  ;;  %v12669_v36 = vld [vmem:[#allocation169_spill] sm:$0xff] }
 0x50a   :  { %v2851_v2 = vpop.f32.mrf.mxu2  ;;  %3427 = vst [vmem:[#allocation2 + $0x130] sm:$0xf] %v3419_v16  ;;  %v3396_v25 = vmax.f32 %v3233_v26, %v3234_v14 }
 0x50b   :  { %v3219_v0 = vadd.f32 %v2851_v2, %v12661_v62  ;;  %v3458_v45 = vpack.c.bf16 %v3450_v49, %v3450_v49  ;;  %v12670_v62 = vld [vmem:[#allocation66_spill] sm:$0xff] }
 0x50c   :  { %v3404_v56 = vadd.f32 %v3396_v25, %v10275_v43  ;;  %v6945_v25 = vld [vmem:[#allocation2 + $0xfc] sm:$0xf0] }
 0x50d   :  { %3466 = vst [vmem:[#allocation2 + $0x104] sm:$0xf] %v3458_v45  ;;  %v3435_v20 = vmax.f32 %v3219_v0, %v3220_v19  ;;  %v2882_v60 = vpop.f32.mrf.mxu3  ;;  %v2894_v7 = vpop.f32.mrf.mxu0  ;;  %v12672_v19 = vld [vmem:[#allocation67_spill] sm:$0xff] }
 0x50e   :  { %v3412_v9 = vmax.f32 %v3404_v56, 0.0  ;;  %v3236_v13 = vadd.f32 %v2882_v60, %v12666_v32  ;;  %v3125_v44 = vadd.f32 %v2894_v7, %v12667_v10  ;;  %v12674_v10 = vld [vmem:[#allocation68_spill] sm:$0xff] }
 0x50f   :  { %v3443_v27 = vadd.f32 %v3435_v20, %v10242_v38  ;;  %v2923_v24 = vpop.f32.mrf.mxu1 }
 0x510   :  { %v3420_v59 = vpack.c.bf16 %v3412_v9, %v3412_v9  ;;  %v3126_v6 = vadd.f32 %v2923_v24, %v12668_v42  ;;  %6997 = vmatmul.msk.bf16.vlgmr.msra.gmra.mxu0 %vm3890_vm2, %v10487_v18  ;;  %v10510_v9 = vld [vmem:[%s11968_s3 + $0x28] sm:$0xff]  ;;  %v12675_v24 = vld [vmem:[#allocation172_spill] sm:$0xff] }
 0x511   :  { %v3451_v61 = vmax.f32 %v3443_v27, 0.0  ;;  %7001 = vmatmul.msk.bf16.vlgmr.msra.gmra.mxu1 %vm3890_vm2, %v10487_v18  ;;  %7005 = vmatmul.msk.bf16.vlgmr.msra.gmra.mxu2 %vm3890_vm2, %v10487_v18  ;;  %v7846_v29 = vld [vmem:[#allocation2 + $0x130] sm:$0xf] }
 0x512   :  { %v2853_v63 = vpop.f32.mrf.mxu2  ;;  %3428 = vst [vmem:[#allocation2 + $0x160] sm:$0xf] %v3420_v59  ;;  %v3469_v8 = vmax.f32 %v3125_v44, %v3126_v6  ;;  %v6913_v6 = vld [vmem:[#allocation2 + $0x9c] sm:$0xf0] }
 0x513   :  { %v3235_v54 = vadd.f32 %v2853_v63, %v12665_v12  ;;  %v3459_v33 = vpack.c.bf16 %v3451_v61, %v3451_v61  ;;  %v7838_v63 = vld [vmem:[#allocation2 + $0xd0] sm:$0xf] }
 0x514   :  { %v3477_v28 = vadd.f32 %v3469_v8, %v10294_v11  ;;  %v6948_v32 = vor.u32 %v7838_v63, %v6945_v25  ;;  %v12676_v8 = vld [vmem:[#allocation69_spill] sm:$0xff] }
 0x515   :  { %3467 = vst [vmem:[#allocation2 + $0x134] sm:$0xf] %v3459_v33  ;;  %v3436_v48 = vmax.f32 %v3235_v54, %v3236_v13  ;;  %v2981_v49 = vpop.f32.mrf.mxu3  ;;  %v2896_v2 = vpop.f32.mrf.mxu0  ;;  %v12673_v54 = vld [vmem:[#allocation171_spill] sm:$0xff] }
 0x516   :  { %v3485_v50 = vmax.f32 %v3477_v28, 0.0  ;;  %v3128_v0 = vadd.f32 %v2981_v49, %v12670_v62  ;;  %v3141_v34 = vadd.f32 %v2896_v2, %v12671_v3  ;;  %v7843_v2 = vld [vmem:[#allocation2 + $0x100] sm:$0xf0]  ;;  %v6881_v62 = vld [vmem:[#allocation2 + $0x3c] sm:$0xf0] }
 0x517   :  { %v3444_v30 = vadd.f32 %v3436_v48, %v10275_v43  ;;  %v2925_v45 = vpop.f32.mrf.mxu1  ;;  %v6951_v3 = vld [vmem:[#allocation2 + $0xd4] sm:$0xf] }
 0x518   :  { %v3493_v51 = vpack.c.bf16 %v3485_v50, %v3485_v50  ;;  %v3142_v4 = vadd.f32 %v2925_v45, %v12672_v19  ;;  %v7822_v19 = vld [vmem:[#allocation2 + $0x10] sm:$0xf] }
 0x519   :  { %v3452_v31 = vmax.f32 %v3444_v30, 0.0  ;;  %v6977_v16 = vld [vmem:[#allocation2 + $0x15c] sm:$0xf0] }
 0x51a   :  { %v2952_v17 = vpop.f32.mrf.mxu2  ;;  %3501 = vst [vmem:[#allocation2 + $0x18] sm:$0xf] %v3493_v51  ;;  %v3470_v23 = vmax.f32 %v3141_v34, %v3142_v4  ;;  %v6980_v14 = vor.u32 %v7846_v29, %v6977_v16  ;;  %v6952_v51 = vor.u32 %v7843_v2, %v6951_v3  ;;  %v12682_v3 = vld [vmem:[#allocation72_spill] sm:$0xff] }
 0x51b   :  { %v3127_v1 = vadd.f32 %v2952_v17, %v12669_v36  ;;  %v3460_v15 = vpack.c.bf16 %v3452_v31, %v3452_v31  ;;  %v7830_v36 = vld [vmem:[#allocation2 + $0x70] sm:$0xf] }
 0x51c   :  { %v3478_v27 = vadd.f32 %v3470_v23, %v10305_v58  ;;  %3994 = vmatpush.bf16.msra.mxu3 %v6980_v14  ;;  %v6983_v28 = vld [vmem:[#allocation2 + $0x134] sm:$0xf]  ;;  %v6916_v49 = vor.u32 %v7830_v36, %v6913_v6  ;;  %v6884_v14 = vor.u32 %v7822_v19, %v6881_v62  ;;  %v7805_v36 = vld [vmem:[#allocation2 + $0xec] sm:$0xf0] }
 0x51d   :  { %3468 = vst [vmem:[#allocation2 + $0x164] sm:$0xf] %v3460_v15  ;;  %v3509_v26 = vmax.f32 %v3127_v1, %v3128_v0  ;;  %v2983_v7 = vpop.f32.mrf.mxu3  ;;  %v2899_v33 = vpop.f32.mrf.mxu0 }
 0x51e   :  { %v3486_v12 = vmax.f32 %v3478_v27, 0.0  ;;  %v3144_v44 = vadd.f32 %v2983_v7, %v12674_v10  ;;  %v3157_v59 = vadd.f32 %v2899_v33, %v12675_v24  ;;  %v12678_v27 = vld [vmem:[#allocation70_spill] sm:$0xff]  ;;  %v6919_v33 = vld [vmem:[#allocation2 + $0x74] sm:$0xf] }
 0x51f   :  { %v3517_v20 = vadd.f32 %v3509_v26, %v10294_v11  ;;  %v2928_v42 = vpop.f32.mrf.mxu1  ;;  %v12677_v26 = vld [vmem:[#allocation173_spill] sm:$0xff]  ;;  %v7143_v10 = vld [vmem:[#allocation2 + $0x120] sm:$0xf] }
 0x520   :  { %v3494_v48 = vpack.c.bf16 %v3486_v12, %v3486_v12  ;;  %v3158_v30 = vadd.f32 %v2928_v42, %v12676_v8  ;;  %3995 = vmatpush.bf16.msra.mxu3 %v6948_v32  ;;  %6998 = vmatmul.msk.bf16.gmra.mxu0 %vm3890_vm2, %v10510_v9 }
 0x521   :  { %v3525_v56 = vmax.f32 %v3517_v20, 0.0  ;;  %7002 = vmatmul.msk.bf16.gmra.mxu1 %vm3890_vm2, %v10510_v9  ;;  %7006 = vmatmul.msk.bf16.gmra.mxu2 %vm3890_vm2, %v10510_v9  ;;  %v7835_v20 = vld [vmem:[#allocation2 + $0xa0] sm:$0xf0] }
 0x522   :  { %v2954_v61 = vpop.f32.mrf.mxu2  ;;  %3502 = vst [vmem:[#allocation2 + $0x48] sm:$0xf] %v3494_v48  ;;  %v3471_v1 = vmax.f32 %v3157_v59, %v3158_v30  ;;  %v7827_v59 = vld [vmem:[#allocation2 + $0x40] sm:$0xf0]  ;;  %v6887_v48 = vld [vmem:[#allocation2 + $0x14] sm:$0xf] }
 0x523   :  { %v3143_v60 = vadd.f32 %v2954_v61, %v12673_v54  ;;  %v3533_v13 = vpack.c.bf16 %v3525_v56, %v3525_v56  ;;  %v12679_v61 = vld [vmem:[#allocation174_spill] sm:$0xff] }
 0x524   :  { %v7851_v31 = vld [vmem:[#allocation2 + $0x160] sm:$0xf0]  ;;  %v3479_v0 = vadd.f32 %v3471_v1, %v10312_v39  ;;  %3996 = vmatpush.bf16.msra.mxu3 %v6916_v49 }
 0x525   :  { %3541 = vst [vmem:[#allocation2 + $0x1c] sm:$0xf] %v3533_v13  ;;  %v3510_v17 = vmax.f32 %v3143_v60, %v3144_v44  ;;  %v6984_v50 = vor.u32 %v7851_v31, %v6983_v28  ;;  %v2986_v16 = vpop.f32.mrf.mxu3  ;;  %v2901_v23 = vpop.f32.mrf.mxu0  ;;  %v12680_v60 = vld [vmem:[#allocation71_spill] sm:$0xff]  ;;  %v6920_v13 = vor.u32 %v7835_v20, %v6919_v33  ;;  %v7813_v44 = vld [vmem:[#allocation2 + $0x14c] sm:$0xf0]  ;;  %v6888_v31 = vor.u32 %v7827_v59, %v6887_v48 }
 0x526   :  { %v3487_v4 = vmax.f32 %v3479_v0, 0.0  ;;  %v3160_v56 = vadd.f32 %v2986_v16, %v12678_v27  ;;  %v3173_v63 = vadd.f32 %v2901_v23, %v12679_v61  ;;  %v7144_v8 = vor.u32 %v7813_v44, %v7143_v10  ;;  %v12681_v49 = vld [vmem:[#allocation175_spill] sm:$0xff]  ;;  %v7797_v20 = vld [vmem:[#allocation2 + $0x8c] sm:$0xf0] }
 0x527   :  { %v3518_v15 = vadd.f32 %v3510_v17, %v10305_v58  ;;  %4023 = vmatpush.bf16.msrb.mxu0 %v6984_v50  ;;  %v2930_v12 = vpop.f32.mrf.mxu1  ;;  %v10535_v17 = vld [vmem:[%s11968_s3 + $0x30] sm:$0xff]  ;;  %v7111_v50 = vld [vmem:[#allocation2 + $0xc0] sm:$0xf]  ;;  %v12685_v33 = vld [vmem:[#allocation177_spill] sm:$0xff] }
 0x528   :  { %v3495_v54 = vpack.c.bf16 %v3487_v4, %v3487_v4  ;;  %v3174_v7 = vadd.f32 %v2930_v12, %v12680_v60  ;;  %3997 = vmatpush.bf16.msra.mxu3 %v6884_v14  ;;  %v7112_v16 = vor.u32 %v7805_v36, %v7111_v50  ;;  %v7079_v14 = vld [vmem:[#allocation2 + $0x60] sm:$0xf]  ;;  %v7789_v60 = vld [vmem:[#allocation2 + $0x2c] sm:$0xf0] }
 0x529   :  { %v3526_v34 = vmax.f32 %v3518_v15, 0.0  ;;  %v7080_v61 = vor.u32 %v7797_v20, %v7079_v14  ;;  %v12692_v20 = vld [vmem:[#allocation77_spill] sm:$0xff] }
 0x52a   :  { %v2957_v45 = vpop.f32.mrf.mxu2  ;;  %3503 = vst [vmem:[#allocation2 + $0x78] sm:$0xf] %v3495_v54  ;;  %v3472_v24 = vmax.f32 %v3173_v63, %v3174_v7  ;;  %v7047_v54 = vld [vmem:[#allocation2] sm:$0xf] }
 0x52b   :  { %v3159_v29 = vadd.f32 %v2957_v45, %v12677_v26  ;;  %v3534_v25 = vpack.c.bf16 %v3526_v34, %v3526_v34  ;;  %4024 = vmatpush.bf16.msrb.mxu0 %v6952_v51  ;;  %7009 = vmatmul.msk.bf16.vlgmr.msra.gmra.mxu3 %vm3890_vm2, %v10487_v18  ;;  %v12683_v45 = vld [vmem:[#allocation176_spill] sm:$0xff]  ;;  %v12684_v26 = vld [vmem:[#allocation73_spill] sm:$0xff] }
 0x52c   :  { %v3480_v6 = vadd.f32 %v3472_v24, %v10338_v35  ;;  %v12686_v24 = vld [vmem:[#allocation74_spill] sm:$0xff] }
 0x52d   :  { %3542 = vst [vmem:[#allocation2 + $0x4c] sm:$0xf] %v3534_v25  ;;  %v3511_v32 = vmax.f32 %v3159_v29, %v3160_v56  ;;  %v2988_v15 = vpop.f32.mrf.mxu3  ;;  %v2904_v62 = vpop.f32.mrf.mxu0 }
 0x52e   :  { %v3488_v1 = vmax.f32 %v3480_v6, 0.0  ;;  %v3176_v34 = vadd.f32 %v2988_v15, %v12682_v3  ;;  %v3189_v51 = vadd.f32 %v2904_v62, %v12683_v45  ;;  %v10560_v62 = vld [vmem:[%s11968_s3 + $0x38] sm:$0xff]  ;;  %v12689_v3 = vld [vmem:[#allocation179_spill] sm:$0xff] }
 0x52f   :  { %v3519_v42 = vadd.f32 %v3511_v32, %v10312_v39  ;;  %4025 = vmatpush.bf16.msrb.mxu0 %v6920_v13  ;;  %v2933_v19 = vpop.f32.mrf.mxu1 }
 0x530   :  { %v3496_v4 = vpack.c.bf16 %v3488_v1, %v3488_v1  ;;  %v3190_v29 = vadd.f32 %v2933_v19, %v12684_v26  ;;  %6999 = vmatmul.msk.bf16.gmra.mxu0 %vm3890_vm2, %v10535_v17 }
 0x531   :  { %v3527_v30 = vmax.f32 %v3519_v42, 0.0  ;;  %7003 = vmatmul.msk.bf16.gmra.mxu1 %vm3890_vm2, %v10535_v17  ;;  %7007 = vmatmul.msk.bf16.gmra.mxu2 %vm3890_vm2, %v10535_v17  ;;  %v12687_v42 = vld [vmem:[#allocation178_spill] sm:$0xff] }
 0x532   :  { %v2959_v28 = vpop.f32.mrf.mxu2  ;;  %3504 = vst [vmem:[#allocation2 + $0xa8] sm:$0xf] %v3496_v4  ;;  %v3473_v25 = vmax.f32 %v3189_v51, %v3190_v29  ;;  %v12690_v4 = vld [vmem:[#allocation76_spill] sm:$0xff] }
 0x533   :  { %v3175_v2 = vadd.f32 %v2959_v28, %v12681_v49  ;;  %v3535_v0 = vpack.c.bf16 %v3527_v30, %v3527_v30  ;;  %4026 = vmatpush.bf16.msrb.mxu0 %v6888_v31  ;;  %v12688_v30 = vld [vmem:[#allocation75_spill] sm:$0xff]  ;;  %v7048_v31 = vor.u32 %v7789_v60, %v7047_v54  ;;  %v12691_v29 = vld [vmem:[#allocation180_spill] sm:$0xff] }
 0x534   :  { %v3481_v56 = vadd.f32 %v3473_v25, %v10264_v21 }
 0x535   :  { %3543 = vst [vmem:[#allocation2 + $0x7c] sm:$0xf] %v3535_v0  ;;  %v3512_v23 = vmax.f32 %v3175_v2, %v3176_v34  ;;  %v2991_v13 = vpop.f32.mrf.mxu3  ;;  %v2906_v10 = vpop.f32.mrf.mxu0 }
 0x536   :  { %v3489_v7 = vmax.f32 %v3481_v56, 0.0  ;;  %v3192_v59 = vadd.f32 %v2991_v13, %v12686_v24  ;;  %v3205_v6 = vadd.f32 %v2906_v10, %v12687_v42  ;;  %v12694_v24 = vld [vmem:[#allocation78_spill] sm:$0xff] }
 0x537   :  { %4331 = vmatpush.bf16.msra.mxu0 %v7144_v8  ;;  %v3520_v27 = vadd.f32 %v3512_v23, %v10338_v35  ;;  %v2935_v48 = vpop.f32.mrf.mxu1 }
 0x538   :  { %v3497_v8 = vpack.c.bf16 %v3489_v7, %v3489_v7  ;;  %v3206_v28 = vadd.f32 %v2935_v48, %v12688_v30  ;;  %v12693_v7 = vld [vmem:[#allocation181_spill] sm:$0xff]  ;;  %v12695_v48 = vld [vmem:[#allocation182_spill] sm:$0xff] }
 0x539   :  { %v3528_v63 = vmax.f32 %v3520_v27, 0.0 }
 0x53a   :  { %v2962_v12 = vpop.f32.mrf.mxu2  ;;  %3505 = vst [vmem:[#allocation2 + $0xd8] sm:$0xf] %v3497_v8  ;;  %v3474_v36 = vmax.f32 %v3205_v6, %v3206_v28 }
 0x53b   :  { %4332 = vmatpush.bf16.msra.mxu0 %v7112_v16  ;;  %v3191_v32 = vadd.f32 %v2962_v12, %v12685_v33  ;;  %v3536_v44 = vpack.c.bf16 %v3528_v63, %v3528_v63  ;;  %7010 = vmatmul.msk.bf16.gmra.mxu3 %vm3890_vm2, %v10510_v9 }
 0x53c   :  { %v3482_v49 = vadd.f32 %v3474_v36, %v10287_v5 }
 0x53d   :  { %3544 = vst [vmem:[#allocation2 + $0xac] sm:$0xf] %v3536_v44  ;;  %v3513_v50 = vmax.f32 %v3191_v32, %v3192_v59  ;;  %v2993_v45 = vpop.f32.mrf.mxu3  ;;  %v2909_v51 = vpop.f32.mrf.mxu0 }
 0x53e   :  { %v3490_v0 = vmax.f32 %v3482_v49, 0.0  ;;  %v3208_v26 = vadd.f32 %v2993_v45, %v12690_v4  ;;  %v3221_v16 = vadd.f32 %v2909_v51, %v12691_v29  ;;  %v12697_v45 = vld [vmem:[#allocation183_spill] sm:$0xff]  ;;  %v7159_v29 = vld [vmem:[#allocation2 + $0x130] sm:$0xf] }
 0x53f   :  { %4333 = vmatpush.bf16.msra.mxu0 %v7080_v61  ;;  %v3521_v1 = vadd.f32 %v3513_v50, %v10264_v21  ;;  %v2938_v23 = vpop.f32.mrf.mxu1 }
 0x540   :  { %v3498_v14 = vpack.c.bf16 %v3490_v0, %v3490_v0  ;;  %v3222_v25 = vadd.f32 %v2938_v23, %v12692_v20  ;;  %7000 = vmatmul.msk.bf16.gmra.mxu0 %vm3890_vm2, %v10560_v62  ;;  %v12699_v23 = vld [vmem:[#allocation184_spill] sm:$0xff] }
 0x541   :  { %v3529_v2 = vmax.f32 %v3521_v1, 0.0  ;;  %7004 = vmatmul.msk.bf16.gmra.mxu1 %vm3890_vm2, %v10560_v62  ;;  %7008 = vmatmul.msk.bf16.gmra.mxu2 %vm3890_vm2, %v10560_v62 }
 0x542   :  { %v2964_v15 = vpop.f32.mrf.mxu2  ;;  %3506 = vst [vmem:[#allocation2 + $0x108] sm:$0xf] %v3498_v14  ;;  %v3475_v56 = vmax.f32 %v3221_v16, %v3222_v25 }
 0x543   :  { %4334 = vmatpush.bf16.msra.mxu0 %v7048_v31  ;;  %v3207_v34 = vadd.f32 %v2964_v15, %v12689_v3  ;;  %v3537_v19 = vpack.c.bf16 %v3529_v2, %v3529_v2  ;;  %v12696_v2 = vld [vmem:[#allocation79_spill] sm:$0xff] }
 0x544   :  { %v3483_v63 = vadd.f32 %v3475_v56, %v10242_v38 }
 0x545   :  { %3545 = vst [vmem:[#allocation2 + $0xdc] sm:$0xf] %v3537_v19  ;;  %v3514_v27 = vmax.f32 %v3207_v34, %v3208_v26  ;;  %v2996_v32 = vpop.f32.mrf.mxu3  ;;  %v2911_v13 = vpop.f32.mrf.mxu0  ;;  %v12698_v19 = vld [vmem:[#allocation80_spill] sm:$0xff] }
 0x546   :  { %v3491_v60 = vmax.f32 %v3483_v63, 0.0  ;;  %v3224_v44 = vadd.f32 %v2996_v32, %v10131_v22  ;;  %v3237_v59 = vadd.f32 %v2911_v13, %v12694_v24  ;;  %v7815_v22 = vld [vmem:[#allocation2 + $0x15c] sm:$0xf0]  ;;  %v7127_v63 = vld [vmem:[#allocation2 + $0xd0] sm:$0xf] }
 0x547   :  { %v3522_v61 = vadd.f32 %v3514_v27, %v10287_v5  ;;  %v2940_v42 = vpop.f32.mrf.mxu1  ;;  %v7160_v20 = vor.u32 %v7815_v22, %v7159_v29  ;;  %v7807_v27 = vld [vmem:[#allocation2 + $0xfc] sm:$0xf0]  ;;  %v12700_v13 = vld [vmem:[#allocation81_spill] sm:$0xff] }
 0x548   :  { %v3499_v6 = vpack.c.bf16 %v3491_v60, %v3491_v60  ;;  %v3238_v8 = vadd.f32 %v2940_v42, %v12695_v48 }
 0x549   :  { %v3530_v12 = vmax.f32 %v3522_v61, 0.0 }
 0x54a   :  { %v2967_v54 = vpop.f32.mrf.mxu2  ;;  %3507 = vst [vmem:[#allocation2 + $0x138] sm:$0xf] %v3499_v6  ;;  %v3476_v28 = vmax.f32 %v3237_v59, %v3238_v8  ;;  %v7095_v8 = vld [vmem:[#allocation2 + $0x70] sm:$0xf] }
 0x54b   :  { %v3223_v33 = vadd.f32 %v2967_v54, %v12693_v7  ;;  %v3538_v10 = vpack.c.bf16 %v3530_v12, %v3530_v12  ;;  %7011 = vmatmul.msk.bf16.gmra.mxu3 %vm3890_vm2, %v10535_v17  ;;  %v7128_v54 = vor.u32 %v7807_v27, %v7127_v63  ;;  %v12704_v27 = vld [vmem:[#allocation83_spill] sm:$0xff] }
 0x54c   :  { %v3484_v50 = vadd.f32 %v3476_v28, %v10275_v43  ;;  %v12701_v28 = vld [vmem:[#allocation185_spill] sm:$0xff]  ;;  %v6921_v63 = vld [vmem:[#allocation2 + $0xa4] sm:$0xf0] }
 0x54d   :  { %3546 = vst [vmem:[#allocation2 + $0x10c] sm:$0xf] %v3538_v10  ;;  %v3515_v30 = vmax.f32 %v3223_v33, %v3224_v44  ;;  %v2998_v0 = vpop.f32.mrf.mxu3  ;;  %v3010_v3 = vpop.f32.mrf.mxu0  ;;  %v7799_v33 = vld [vmem:[#allocation2 + $0x9c] sm:$0xf0] }
 0x54e   :  { %v3492_v49 = vmax.f32 %v3484_v50, 0.0  ;;  %v3240_v51 = vadd.f32 %v2998_v0, %v12697_v45  ;;  %v3129_v4 = vadd.f32 %v3010_v3, %v12698_v19  ;;  %v7096_v50 = vor.u32 %v7799_v33, %v7095_v8  ;;  %v6953_v3 = vld [vmem:[#allocation2 + $0x104] sm:$0xf0]  ;;  %v7839_v19 = vld [vmem:[#allocation2 + $0xd8] sm:$0xf] }
 0x54f   :  { %v3523_v31 = vadd.f32 %v3515_v30, %v10242_v38  ;;  %v3039_v26 = vpop.f32.mrf.mxu1  ;;  %v6889_v8 = vld [vmem:[#allocation2 + $0x44] sm:$0xf0] }
 0x550   :  { %v3500_v16 = vpack.c.bf16 %v3492_v49, %v3492_v49  ;;  %v3130_v14 = vadd.f32 %v3039_v26, %v12699_v23  ;;  %7013 = vmatmul.msk.bf16.vlgmr.msrb.gmra.mxu0 %vm3890_vm2, %v10487_v18  ;;  %v12702_v26 = vld [vmem:[#allocation82_spill] sm:$0xff] }
 0x551   :  { %v3531_v36 = vmax.f32 %v3523_v31, 0.0  ;;  %4447 = vmatpush.bf16.msrb.mxu0 %v7160_v20  ;;  %v7847_v22 = vld [vmem:[#allocation2 + $0x138] sm:$0xf] }
 0x552   :  { %v2969_v1 = vpop.f32.mrf.mxu2  ;;  %3508 = vst [vmem:[#allocation2 + $0x168] sm:$0xf] %v3500_v16  ;;  %v3549_v56 = vmax.f32 %v3129_v4, %v3130_v14  ;;  %v6956_v14 = vor.u32 %v7839_v19, %v6953_v3  ;;  %v12703_v20 = vld [vmem:[#allocation186_spill] sm:$0xff] }
 0x553   :  { %v3239_v15 = vadd.f32 %v2969_v1, %v12696_v2  ;;  %v3539_v34 = vpack.c.bf16 %v3531_v36, %v3531_v36  ;;  %v7791_v36 = vld [vmem:[#allocation2 + $0x3c] sm:$0xf0] }
 0x554   :  { %v3557_v12 = vadd.f32 %v3549_v56, %v10294_v11 }
 0x555   :  { %3547 = vst [vmem:[#allocation2 + $0x13c] sm:$0xf] %v3539_v34  ;;  %v3516_v25 = vmax.f32 %v3239_v15, %v3240_v51  ;;  %v3097_v44 = vpop.f32.mrf.mxu3  ;;  %4448 = vmatpush.bf16.msrb.mxu0 %v7128_v54  ;;  %v3012_v24 = vpop.f32.mrf.mxu0  ;;  %v12705_v54 = vld [vmem:[#allocation187_spill] sm:$0xff] }
 0x556   :  { %v3565_v32 = vmax.f32 %v3557_v12, 0.0  ;;  %v3132_v42 = vadd.f32 %v3097_v44, %v10163_v47  ;;  %v3145_v6 = vadd.f32 %v3012_v24, %v10166_v37  ;;  %v7063_v47 = vld [vmem:[#allocation2 + $0x10] sm:$0xf]  ;;  %v7809_v44 = vld [vmem:[#allocation2 + $0x124] sm:$0xf] }
 0x557   :  { %v3524_v61 = vadd.f32 %v3516_v25, %v10275_v43  ;;  %v3041_v48 = vpop.f32.mrf.mxu1  ;;  %v7064_v34 = vor.u32 %v7791_v36, %v7063_v47 }
 0x558   :  { %v3573_v30 = vpack.c.bf16 %v3565_v32, %v3565_v32  ;;  %v3146_v31 = vadd.f32 %v3041_v48, %v12701_v28  ;;  %v6959_v28 = vld [vmem:[#allocation2 + $0xdc] sm:$0xf] }
 0x559   :  { %v3532_v60 = vmax.f32 %v3524_v61, 0.0  ;;  %v6985_v49 = vld [vmem:[#allocation2 + $0x164] sm:$0xf0]  ;;  %4449 = vmatpush.bf16.msrb.mxu0 %v7096_v50 }
 0x55a   :  { %v3068_v7 = vpop.f32.mrf.mxu2  ;;  %3581 = vst [vmem:[#allocation2 + $0x20] sm:$0xf] %v3573_v30  ;;  %v3550_v2 = vmax.f32 %v3145_v6, %v3146_v31  ;;  %v6988_v15 = vor.u32 %v7847_v22, %v6985_v49  ;;  %v7145_v6 = vld [vmem:[#allocation2 + $0x150] sm:$0xf0]  ;;  %v7836_v49 = vld [vmem:[#allocation2 + $0xa8] sm:$0xf0] }
 0x55b   :  { %v3131_v10 = vadd.f32 %v3068_v7, %v12700_v13  ;;  %v3540_v59 = vpack.c.bf16 %v3532_v60, %v3532_v60  ;;  %7012 = vmatmul.msk.bf16.gmra.mxu3 %vm3890_vm2, %v10560_v62  ;;  %v7148_v22 = vor.u32 %v7809_v44, %v7145_v6  ;;  %v7151_v44 = vld [vmem:[#allocation2 + $0x128] sm:$0xf] }
 0x55c   :  { %v3558_v37 = vadd.f32 %v3550_v2, %v10305_v58  ;;  %4052 = vmatpush.bf16.msrb.mxu1 %v6988_v15  ;;  %v6991_v7 = vld [vmem:[#allocation2 + $0x13c] sm:$0xf]  ;;  %v12706_v15 = vld [vmem:[#allocation84_spill] sm:$0xff] }
 0x55d   :  { %3548 = vst [vmem:[#allocation2 + $0x16c] sm:$0xf] %v3540_v59  ;;  %v3589_v1 = vmax.f32 %v3131_v10, %v3132_v42  ;;  %v3099_v16 = vpop.f32.mrf.mxu3  ;;  %4450 = vmatpush.bf16.msrb.mxu0 %v7064_v34  ;;  %v3015_v23 = vpop.f32.mrf.mxu0  ;;  %v7831_v10 = vld [vmem:[#allocation2 + $0x78] sm:$0xf]  ;;  %v7844_v42 = vld [vmem:[#allocation2 + $0x108] sm:$0xf0] }
 0x55e   :  { %v3566_v4 = vmax.f32 %v3558_v37, 0.0  ;;  %v3148_v25 = vadd.f32 %v3099_v16, %v12703_v20  ;;  %v3161_v56 = vadd.f32 %v3015_v23, %v12704_v27  ;;  %v6924_v59 = vor.u32 %v7831_v10, %v6921_v63  ;;  %v7801_v34 = vld [vmem:[#allocation2 + $0xc4] sm:$0xf]  ;;  %v12709_v23 = vld [vmem:[#allocation189_spill] sm:$0xff] }
 0x55f   :  { %v3597_v0 = vadd.f32 %v3589_v1, %v10294_v11  ;;  %v3044_v61 = vpop.f32.mrf.mxu1  ;;  %v6960_v36 = vor.u32 %v7844_v42, %v6959_v28  ;;  %v7823_v1 = vld [vmem:[#allocation2 + $0x18] sm:$0xf]  ;;  %v7793_v63 = vld [vmem:[#allocation2 + $0x64] sm:$0xf] }
 0x560   :  { %v3574_v12 = vpack.c.bf16 %v3566_v4, %v3566_v4  ;;  %v3162_v60 = vadd.f32 %v3044_v61, %v12705_v54  ;;  %4053 = vmatpush.bf16.msrb.mxu1 %v6956_v14  ;;  %7014 = vmatmul.msk.bf16.gmra.mxu0 %vm3890_vm2, %v10510_v9  ;;  %v6892_v37 = vor.u32 %v7823_v1, %v6889_v8  ;;  %v12708_v4 = vld [vmem:[#allocation85_spill] sm:$0xff]  ;;  %v7785_v8 = vld [vmem:[#allocation2 + $0x4] sm:$0xf] }
 0x561   :  { %v3605_v45 = vmax.f32 %v3597_v0, 0.0  ;;  %v7806_v1 = vld [vmem:[#allocation2 + $0xf4] sm:$0xf0] }
 0x562   :  { %v3070_v51 = vpop.f32.mrf.mxu2  ;;  %3582 = vst [vmem:[#allocation2 + $0x50] sm:$0xf] %v3574_v12  ;;  %v3551_v24 = vmax.f32 %v3161_v56, %v3162_v60  ;;  %v7828_v56 = vld [vmem:[#allocation2 + $0x48] sm:$0xf0]  ;;  %v7081_v12 = vld [vmem:[#allocation2 + $0x90] sm:$0xf0] }
 0x563   :  { %v3147_v29 = vadd.f32 %v3070_v51, %v12702_v26  ;;  %v3613_v11 = vpack.c.bf16 %v3605_v45, %v3605_v45  ;;  %v12707_v51 = vld [vmem:[#allocation188_spill] sm:$0xff]  ;;  %v7814_v60 = vld [vmem:[#allocation2 + $0x154] sm:$0xf0] }
 0x564   :  { %v7852_v33 = vld [vmem:[#allocation2 + $0x168] sm:$0xf0]  ;;  %v3559_v30 = vadd.f32 %v3551_v24, %v10312_v39  ;;  %4054 = vmatpush.bf16.msrb.mxu1 %v6924_v59  ;;  %v7084_v24 = vor.u32 %v7793_v63, %v7081_v12  ;;  %v7790_v63 = vld [vmem:[#allocation2 + $0x34] sm:$0xf0] }
 0x565   :  { %3621 = vst [vmem:[#allocation2 + $0x24] sm:$0xf] %v3613_v11  ;;  %v3590_v32 = vmax.f32 %v3147_v29, %v3148_v25  ;;  %v6992_v13 = vor.u32 %v7852_v33, %v6991_v7  ;;  %v3102_v47 = vpop.f32.mrf.mxu3  ;;  %v3017_v3 = vpop.f32.mrf.mxu0  ;;  %v6927_v11 = vld [vmem:[#allocation2 + $0x7c] sm:$0xf] }
 0x566   :  { %v3567_v2 = vmax.f32 %v3559_v30, 0.0  ;;  %v3164_v19 = vadd.f32 %v3102_v47, %v12707_v51  ;;  %v3177_v26 = vadd.f32 %v3017_v3, %v12708_v4  ;;  %v6928_v25 = vor.u32 %v7836_v49, %v6927_v11  ;;  %v6895_v33 = vld [vmem:[#allocation2 + $0x1c] sm:$0xf]  ;;  %v7049_v30 = vld [vmem:[#allocation2 + $0x30] sm:$0xf0] }
 0x567   :  { %v3598_v48 = vadd.f32 %v3590_v32, %v10305_v58  ;;  %4081 = vmatpush.bf16.msrb.mxu2 %v6992_v13  ;;  %v7113_v58 = vld [vmem:[#allocation2 + $0xf0] sm:$0xf0]  ;;  %v3046_v29 = vpop.f32.mrf.mxu1  ;;  %v6896_v10 = vor.u32 %v7828_v56, %v6895_v33  ;;  %v12710_v49 = vld [vmem:[#allocation86_spill] sm:$0xff]  ;;  %v7161_v47 = vld [vmem:[#allocation2 + $0x160] sm:$0xf0] }
 0x568   :  { %v3575_v16 = vpack.c.bf16 %v3567_v2, %v3567_v2  ;;  %v3178_v14 = vadd.f32 %v3046_v29, %v12709_v23  ;;  %4055 = vmatpush.bf16.msrb.mxu1 %v6892_v37  ;;  %v7116_v27 = vor.u32 %v7801_v34, %v7113_v58  ;;  %v7811_v37 = vld [vmem:[#allocation2 + $0x134] sm:$0xf]  ;;  %v7798_v34 = vld [vmem:[#allocation2 + $0x94] sm:$0xf0]  ;;  %v7087_v4 = vld [vmem:[#allocation2 + $0x68] sm:$0xf] }
 0x569   :  { %v3606_v31 = vmax.f32 %v3598_v48, 0.0  ;;  %v7088_v11 = vor.u32 %v7798_v34, %v7087_v4 }
 0x56a   :  { %v3073_v50 = vpop.f32.mrf.mxu2  ;;  %3583 = vst [vmem:[#allocation2 + $0x80] sm:$0xf] %v3575_v16  ;;  %v3552_v61 = vmax.f32 %v3177_v26, %v3178_v14  ;;  %v7129_v26 = vld [vmem:[#allocation2 + $0x100] sm:$0xf0]  ;;  %v12711_v16 = vld [vmem:[#allocation190_spill] sm:$0xff] }
 0x56b   :  { %v3163_v0 = vadd.f32 %v3073_v50, %v12706_v15  ;;  %v3614_v45 = vpack.c.bf16 %v3606_v31, %v3606_v31  ;;  %4082 = vmatpush.bf16.msrb.mxu2 %v6960_v36  ;;  %7017 = vmatmul.msk.bf16.vlgmr.msrb.gmra.mxu1 %vm3890_vm2, %v10487_v18 }
 0x56c   :  { %4360 = vmatpush.bf16.msra.mxu1 %v7148_v22  ;;  %v3560_v7 = vadd.f32 %v3552_v61, %v10338_v35  ;;  %v7803_v61 = vld [vmem:[#allocation2 + $0xd4] sm:$0xf] }
 0x56d   :  { %3622 = vst [vmem:[#allocation2 + $0x54] sm:$0xf] %v3614_v45  ;;  %v3591_v20 = vmax.f32 %v3163_v0, %v3164_v19  ;;  %v3104_v6 = vpop.f32.mrf.mxu3  ;;  %v3020_v48 = vpop.f32.mrf.mxu0  ;;  %v7052_v0 = vor.u32 %v7785_v8, %v7049_v30  ;;  %v7164_v45 = vor.u32 %v7811_v37, %v7161_v47  ;;  %v7065_v30 = vld [vmem:[#allocation2 + $0x40] sm:$0xf0]  ;;  %v7800_v37 = vld [vmem:[#allocation2 + $0xa4] sm:$0xf0] }
 0x56e   :  { %v3568_v59 = vmax.f32 %v3560_v7, 0.0  ;;  %v3180_v31 = vadd.f32 %v3104_v6, %v10212_v57  ;;  %v3193_v50 = vadd.f32 %v3020_v48, %v10215_v40  ;;  %v7816_v7 = vld [vmem:[#allocation2 + $0x164] sm:$0xf0] }
 0x56f   :  { %v3599_v54 = vadd.f32 %v3591_v20, %v10312_v39  ;;  %4083 = vmatpush.bf16.msrb.mxu2 %v6928_v25  ;;  %v7152_v39 = vor.u32 %v7814_v60, %v7151_v44  ;;  %v3049_v36 = vpop.f32.mrf.mxu1  ;;  %v12712_v25 = vld [vmem:[#allocation87_spill] sm:$0xff]  ;;  %v7132_v60 = vor.u32 %v7803_v61, %v7129_v26 }
 0x570   :  { %4361 = vmatpush.bf16.msra.mxu1 %v7116_v27  ;;  %v3576_v22 = vpack.c.bf16 %v3568_v59, %v3568_v59  ;;  %v3194_v2 = vadd.f32 %v3049_v36, %v12710_v49  ;;  %7015 = vmatmul.msk.bf16.gmra.mxu0 %vm3890_vm2, %v10535_v17  ;;  %v7808_v48 = vld [vmem:[#allocation2 + $0x104] sm:$0xf0]  ;;  %v7135_v36 = vld [vmem:[#allocation2 + $0xd8] sm:$0xf] }
 0x571   :  { %v3607_v32 = vmax.f32 %v3599_v54, 0.0  ;;  %v12713_v49 = vld [vmem:[#allocation191_spill] sm:$0xff] }
 0x572   :  { %v3075_v13 = vpop.f32.mrf.mxu2  ;;  %3584 = vst [vmem:[#allocation2 + $0xb0] sm:$0xf] %v3576_v22  ;;  %v3553_v57 = vmax.f32 %v3193_v50, %v3194_v2 }
 0x573   :  { %v3179_v42 = vadd.f32 %v3075_v13, %v10209_v55  ;;  %v3615_v28 = vpack.c.bf16 %v3607_v32, %v3607_v32  ;;  %4084 = vmatpush.bf16.msrb.mxu2 %v6896_v10  ;;  %v7119_v55 = vld [vmem:[#allocation2 + $0xc8] sm:$0xf]  ;;  %v7097_v13 = vld [vmem:[#allocation2 + $0xa0] sm:$0xf0] }
 0x574   :  { %4362 = vmatpush.bf16.msra.mxu1 %v7084_v24  ;;  %v7120_v40 = vor.u32 %v7806_v1, %v7119_v55  ;;  %v3561_v58 = vadd.f32 %v3553_v57, %v10264_v21  ;;  %v7055_v32 = vld [vmem:[#allocation2 + $0x8] sm:$0xf]  ;;  %v7136_v55 = vor.u32 %v7808_v48, %v7135_v36 }
 0x575   :  { %3623 = vst [vmem:[#allocation2 + $0x84] sm:$0xf] %v3615_v28  ;;  %v3592_v15 = vmax.f32 %v3179_v42, %v3180_v31  ;;  %v3107_v14 = vpop.f32.mrf.mxu3  ;;  %v7056_v44 = vor.u32 %v7790_v63, %v7055_v32  ;;  %v7795_v42 = vld [vmem:[#allocation2 + $0x74] sm:$0xf]  ;;  %v12714_v57 = vld [vmem:[#allocation88_spill] sm:$0xff]  ;;  %v12718_v63 = vld [vmem:[#allocation90_spill] sm:$0xff] }
 0x576   :  { %7021 = vmatmul.msk.bf16.vlgmr.msrb.gmra.mxu2 %vm3890_vm2, %v10487_v18  ;;  %v3569_v29 = vmax.f32 %v3561_v58, 0.0  ;;  %v3022_v18 = vpop.f32.mrf.mxu0  ;;  %v7100_v6 = vor.u32 %v7795_v42, %v7097_v13 }
 0x577   :  { %4389 = vmatpush.bf16.msra.mxu2 %v7152_v39  ;;  %v3600_v3 = vadd.f32 %v3592_v15, %v10338_v35  ;;  %v3196_v35 = vadd.f32 %v3107_v14, %v10234_v46  ;;  %v3209_v27 = vadd.f32 %v3022_v18, %v12712_v25  ;;  %v3051_v56 = vpop.f32.mrf.mxu1  ;;  %v7167_v46 = vld [vmem:[#allocation2 + $0x138] sm:$0xf] }
 0x578   :  { %4363 = vmatpush.bf16.msra.mxu1 %v7052_v0  ;;  %v3577_v12 = vpack.c.bf16 %v3569_v29, %v3569_v29  ;;  %v3210_v54 = vadd.f32 %v3051_v56, %v10240_v52  ;;  %v7168_v59 = vor.u32 %v7816_v7, %v7167_v46  ;;  %v7787_v0 = vld [vmem:[#allocation2 + $0x14] sm:$0xf] }
 0x579   :  { %v3608_v51 = vmax.f32 %v3600_v3, 0.0  ;;  %v7068_v3 = vor.u32 %v7787_v0, %v7065_v30  ;;  %v12717_v25 = vld [vmem:[#allocation193_spill] sm:$0xff] }
 0x57a   :  { %v3078_v19 = vpop.f32.mrf.mxu2  ;;  %3585 = vst [vmem:[#allocation2 + $0xe0] sm:$0xf] %v3577_v12  ;;  %v3554_v10 = vmax.f32 %v3209_v27, %v3210_v54  ;;  %v7861_v0 = vld [vmem:[#allocation2 + $0x34] sm:$0xf0] }
 0x57b   :  { %4390 = vmatpush.bf16.msra.mxu2 %v7120_v40  ;;  %v3195_v23 = vadd.f32 %v3078_v19, %v12711_v16  ;;  %v3616_v20 = vpack.c.bf16 %v3608_v51, %v3608_v51  ;;  %7018 = vmatmul.msk.bf16.gmra.mxu1 %vm3890_vm2, %v10510_v9  ;;  %v7792_v19 = vld [vmem:[#allocation2 + $0x44] sm:$0xf0] }
 0x57c   :  { %4476 = vmatpush.bf16.msrb.mxu1 %v7164_v45  ;;  %v3562_v52 = vadd.f32 %v3554_v10, %v10287_v5  ;;  %v12715_v16 = vld [vmem:[#allocation192_spill] sm:$0xff]  ;;  %v10653_v10 = vld [vmem:[%s11968_s3] sm:$0xff] }
 0x57d   :  { %3624 = vst [vmem:[#allocation2 + $0xb4] sm:$0xf] %v3616_v20  ;;  %v3593_v33 = vmax.f32 %v3195_v23, %v3196_v35  ;;  %v3109_v50 = vpop.f32.mrf.mxu3  ;;  %v12716_v35 = vld [vmem:[#allocation89_spill] sm:$0xff] }
 0x57e   :  { %v3570_v28 = vmax.f32 %v3562_v52, 0.0  ;;  %v3212_v22 = vadd.f32 %v3109_v50, %v10248_v53  ;;  %v7103_v53 = vld [vmem:[#allocation2 + $0x78] sm:$0xf] }
 0x57f   :  { %4391 = vmatpush.bf16.msra.mxu2 %v7088_v11  ;;  %v3601_v24 = vadd.f32 %v3593_v33, %v10264_v21  ;;  %v3025_v21 = vpop.f32.mrf.mxu0  ;;  %v3054_v15 = vpop.f32.mrf.mxu1  ;;  %v7104_v45 = vor.u32 %v7800_v37, %v7103_v53  ;;  %v7071_v11 = vld [vmem:[#allocation2 + $0x18] sm:$0xf]  ;;  %v10673_v53 = vld [vmem:[%s11968_s3 + $0x8] sm:$0xff] }
 0x580   :  { %4477 = vmatpush.bf16.msrb.mxu1 %v7132_v60  ;;  %v3225_v2 = vadd.f32 %v3025_v21, %v12713_v49  ;;  %v3578_v47 = vpack.c.bf16 %v3570_v28, %v3570_v28  ;;  %v3226_v40 = vadd.f32 %v3054_v15, %v12714_v57  ;;  %7016 = vmatmul.msk.bf16.gmra.mxu0 %vm3890_vm2, %v10560_v62  ;;  %v7295_v21 = vld [vmem:[#allocation2 + $0xc8] sm:$0xf] }
 0x581   :  { %v3609_v39 = vmax.f32 %v3601_v24, 0.0  ;;  %v12719_v24 = vld [vmem:[#allocation194_spill] sm:$0xff]  ;;  %v7263_v15 = vld [vmem:[#allocation2 + $0x68] sm:$0xf] }
 0x582   :  { %v3080_v8 = vpop.f32.mrf.mxu2  ;;  %3586 = vst [vmem:[#allocation2 + $0x110] sm:$0xf] %v3578_v47 }
 0x583   :  { %4392 = vmatpush.bf16.msra.mxu2 %v7056_v44  ;;  %v3211_v31 = vadd.f32 %v3080_v8, %v10245_v41  ;;  %v3617_v1 = vpack.c.bf16 %v3609_v39, %v3609_v39  ;;  %v3555_v41 = vmax.f32 %v3225_v2, %v3226_v40  ;;  %v7885_v44 = vld [vmem:[#allocation2 + $0x154] sm:$0xf0]  ;;  %v7327_v39 = vld [vmem:[#allocation2 + $0x128] sm:$0xf] }
 0x584   :  { %4478 = vmatpush.bf16.msrb.mxu1 %v7100_v6  ;;  %v12720_v6 = vld [vmem:[#allocation91_spill] sm:$0xff]  ;;  %v7328_v30 = vor.u32 %v7885_v44, %v7327_v39  ;;  %v7794_v44 = vld [vmem:[#allocation2 + $0x6c] sm:$0xf] }
 0x585   :  { %3625 = vst [vmem:[#allocation2 + $0xe4] sm:$0xf] %v3617_v1  ;;  %v3594_v34 = vmax.f32 %v3211_v31, %v3212_v22  ;;  %v3563_v51 = vadd.f32 %v3555_v41, %v10242_v38  ;;  %v3112_v14 = vpop.f32.mrf.mxu3  ;;  %v7877_v31 = vld [vmem:[#allocation2 + $0xf4] sm:$0xf0]  ;;  %v7840_v41 = vld [vmem:[#allocation2 + $0xe0] sm:$0xf] }
 0x586   :  { %7022 = vmatmul.msk.bf16.gmra.mxu2 %vm3890_vm2, %v10510_v9  ;;  %v3228_v9 = vadd.f32 %v3112_v14, %v12716_v35  ;;  %v7296_v36 = vor.u32 %v7877_v31, %v7295_v21  ;;  %v7869_v22 = vld [vmem:[#allocation2 + $0x94] sm:$0xf0]  ;;  %v7865_v39 = vld [vmem:[#allocation2 + $0x6c] sm:$0xf]  ;;  %v7878_v31 = vld [vmem:[#allocation2 + $0xfc] sm:$0xf0] }
 0x587   :  { %4505 = vmatpush.bf16.msrb.mxu2 %v7168_v59  ;;  %v3602_v58 = vadd.f32 %v3594_v34, %v10287_v5  ;;  %v3571_v29 = vmax.f32 %v3563_v51, 0.0  ;;  %v3027_v18 = vpop.f32.mrf.mxu0  ;;  %v3056_v56 = vpop.f32.mrf.mxu1  ;;  %v7072_v5 = vor.u32 %v7792_v19, %v7071_v11  ;;  %v6929_v51 = vld [vmem:[#allocation2 + $0xac] sm:$0xf0]  ;;  %v7832_v19 = vld [vmem:[#allocation2 + $0x80] sm:$0xf] }
 0x588   :  { %4479 = vmatpush.bf16.msrb.mxu1 %v7068_v3  ;;  %v3241_v27 = vadd.f32 %v3027_v18, %v12717_v25  ;;  %v3242_v12 = vadd.f32 %v3056_v56, %v12718_v63  ;;  %v7121_v25 = vld [vmem:[#allocation2 + $0xf8] sm:$0xf0] }
 0x589   :  { %v3610_v4 = vmax.f32 %v3602_v58, 0.0  ;;  %v3579_v61 = vpack.c.bf16 %v3571_v29, %v3571_v29  ;;  %v6961_v37 = vld [vmem:[#allocation2 + $0x10c] sm:$0xf0]  ;;  %v7812_v21 = vld [vmem:[#allocation2 + $0x13c] sm:$0xf] }
 0x58a   :  { %v3083_v26 = vpop.f32.mrf.mxu2  ;;  %v3556_v60 = vmax.f32 %v3241_v27, %v3242_v12  ;;  %v6897_v29 = vld [vmem:[#allocation2 + $0x4c] sm:$0xf0]  ;;  %v7881_v27 = vld [vmem:[#allocation2 + $0x12c] sm:$0xf]  ;;  %v7297_v12 = vld [vmem:[#allocation2 + $0xf8] sm:$0xf0] }
 0x58b   :  { %4506 = vmatpush.bf16.msrb.mxu2 %v7136_v55  ;;  %v3227_v23 = vadd.f32 %v3083_v26, %v12715_v16  ;;  %v3618_v20 = vpack.c.bf16 %v3610_v4, %v3610_v4  ;;  %3587 = vst [vmem:[#allocation2 + $0x140] sm:$0xf] %v3579_v61  ;;  %7019 = vmatmul.msk.bf16.gmra.mxu1 %vm3890_vm2, %v10535_v17  ;;  %v7153_v16 = vld [vmem:[#allocation2 + $0x158] sm:$0xf0] }
 0x58c   :  { %v3564_v33 = vadd.f32 %v3556_v60, %v10275_v43  ;;  %v7264_v55 = vor.u32 %v7869_v22, %v7263_v15  ;;  %v6932_v4 = vor.u32 %v7832_v19, %v6929_v51  ;;  %v7966_v61 = vld [vmem:[%s11968_s3 + $0x20] sm:$0xff]  ;;  %v7857_v15 = vld [vmem:[#allocation2 + $0xc] sm:$0xf]  ;;  %v7862_v19 = vld [vmem:[#allocation2 + $0x3c] sm:$0xf0] }
 0x58d   :  { %3626 = vst [vmem:[#allocation2 + $0x114] sm:$0xf] %v3618_v20  ;;  %v3595_v54 = vmax.f32 %v3227_v23, %v3228_v9  ;;  %v3114_v42 = vpop.f32.mrf.mxu3  ;;  %v7824_v23 = vld [vmem:[#allocation2 + $0x20] sm:$0xf]  ;;  %v7810_v20 = vld [vmem:[#allocation2 + $0x12c] sm:$0xf] }
 0x58e   :  { %v3572_v46 = vmax.f32 %v3564_v33, 0.0  ;;  %v3244_v48 = vadd.f32 %v3114_v42, %v12720_v6  ;;  %v6900_v11 = vor.u32 %v7824_v23, %v6897_v29  ;;  %v7156_v35 = vor.u32 %v7810_v20, %v7153_v16  ;;  %v7329_v9 = vld [vmem:[#allocation2 + $0x158] sm:$0xf0]  ;;  %v10698_v33 = vld [vmem:[%s11968_s3 + $0x10] sm:$0xff]  ;;  %v7239_v16 = vld [vmem:[#allocation2 + $0x10] sm:$0xf] }
 0x58f   :  { %4507 = vmatpush.bf16.msrb.mxu2 %v7104_v45  ;;  %v3603_v7 = vadd.f32 %v3595_v54, %v10242_v38  ;;  %v10656_v52 = vpop.f32.mrf.mxu0  ;;  %v10666_v47 = vpop.f32.mrf.mxu1  ;;  %v6964_v45 = vor.u32 %v7840_v41, %v6961_v37  ;;  %v7332_v56 = vor.u32 %v7881_v27, %v7329_v9  ;;  %v7089_v54 = vld [vmem:[#allocation2 + $0x98] sm:$0xf0]  ;;  %v7271_v37 = vld [vmem:[#allocation2 + $0x70] sm:$0xf] }
 0x590   :  { %v3580_v8 = vpack.c.bf16 %v3572_v46, %v3572_v46  ;;  %7173 = vmatmul.msk.bf16.vlgmr.msra.gmra.mxu0 %vm3890_vm2, %v10653_v10  ;;  %v7886_v46 = vld [vmem:[#allocation2 + $0x15c] sm:$0xf0]  ;;  %v7057_v6 = vld [vmem:[#allocation2 + $0x38] sm:$0xf0]  ;;  %v10723_v20 = vld [vmem:[%s11968_s3 + $0x18] sm:$0xff] }
 0x591   :  { %v3611_v32 = vmax.f32 %v3603_v7, 0.0  ;;  %4796 = vmatpush.bf16.msra.mxu0 %v7328_v30  ;;  %v7873_v7 = vld [vmem:[#allocation2 + $0xcc] sm:$0xf]  ;;  %v7796_v29 = vld [vmem:[#allocation2 + $0x7c] sm:$0xf] }
 0x592   :  { %v3085_v13 = vpop.f32.mrf.mxu2  ;;  %3588 = vst [vmem:[#allocation2 + $0x170] sm:$0xf] %v3580_v8  ;;  %v7848_v57 = vld [vmem:[#allocation2 + $0x140] sm:$0xf]  ;;  %v7169_v8 = vld [vmem:[#allocation2 + $0x168] sm:$0xf0] }
 0x593   :  { %4508 = vmatpush.bf16.msrb.mxu2 %v7072_v5  ;;  %v3243_v59 = vadd.f32 %v3085_v13, %v12719_v24  ;;  %v3619_v38 = vpack.c.bf16 %v3611_v32, %v3611_v32  ;;  %v7802_v5 = vld [vmem:[#allocation2 + $0xcc] sm:$0xf]  ;;  %v7300_v13 = vor.u32 %v7873_v7, %v7297_v12  ;;  %v7092_v24 = vor.u32 %v7794_v44, %v7089_v54  ;;  %v7887_v12 = vld [vmem:[#allocation2 + $0x164] sm:$0xf0] }
 0x594   :  { %v7124_v63 = vor.u32 %v7802_v5, %v7121_v25  ;;  %v7172_v22 = vor.u32 %v7812_v21, %v7169_v8  ;;  %v7788_v25 = vld [vmem:[#allocation2 + $0x1c] sm:$0xf] }
 0x595   :  { %3627 = vst [vmem:[#allocation2 + $0x144] sm:$0xf] %v3619_v38  ;;  %v3596_v28 = vmax.f32 %v3243_v59, %v3244_v48  ;;  %4797 = vmatpush.bf16.msra.mxu0 %v7296_v36  ;;  %v7265_v59 = vld [vmem:[#allocation2 + $0x98] sm:$0xf0]  ;;  %v7335_v38 = vld [vmem:[#allocation2 + $0x130] sm:$0xf] }
 0x596   :  { %7023 = vmatmul.msk.bf16.gmra.mxu2 %vm3890_vm2, %v10535_v17  ;;  %v7336_v48 = vor.u32 %v7886_v46, %v7335_v38  ;;  %v7268_v30 = vor.u32 %v7865_v39, %v7265_v59  ;;  %v7233_v36 = vld [vmem:[#allocation2 + $0x38] sm:$0xf0]  ;;  %v7879_v46 = vld [vmem:[#allocation2 + $0x104] sm:$0xf0] }
 0x597   :  { %v3604_v50 = vadd.f32 %v3596_v28, %v10275_v43  ;;  %v10664_v49 = vpop.f32.mrf.mxu0  ;;  %v7231_v43 = vld [vmem:[#allocation2 + $0x8] sm:$0xf]  ;;  %v10681_v26 = vpop.f32.mrf.mxu1  ;;  %v7786_v28 = vld [vmem:[#allocation2 + $0xc] sm:$0xf] }
 0x598   :  { %v7232_v34 = vor.u32 %v7861_v0, %v7231_v43  ;;  %v7804_v43 = vld [vmem:[#allocation2 + $0xdc] sm:$0xf]  ;;  %v7871_v38 = vld [vmem:[#allocation2 + $0xa4] sm:$0xf0] }
 0x599   :  { %v3612_v1 = vmax.f32 %v3604_v50, 0.0  ;;  %v6993_v40 = vld [vmem:[#allocation2 + $0x16c] sm:$0xf0]  ;;  %4798 = vmatpush.bf16.msra.mxu0 %v7264_v55  ;;  %v7060_v50 = vor.u32 %v7786_v28, %v7057_v6  ;;  %v7137_v55 = vld [vmem:[#allocation2 + $0x108] sm:$0xf0] }
 0x59a   :  { %v6996_v3 = vor.u32 %v7848_v57, %v6993_v40  ;;  %v10683_v14 = vpop.f32.mrf.mxu2  ;;  %v7236_v57 = vor.u32 %v7857_v15, %v7233_v36  ;;  %v7870_v40 = vld [vmem:[#allocation2 + $0x9c] sm:$0xf0]  ;;  %v7247_v28 = vld [vmem:[#allocation2 + $0x18] sm:$0xf]  ;;  %v7345_v15 = vld [vmem:[#allocation2 + $0x168] sm:$0xf0] }
 0x59b   :  { %v3620_v2 = vpack.c.bf16 %v3612_v1, %v3612_v1  ;;  %7020 = vmatmul.msk.bf16.gmra.mxu1 %vm3890_vm2, %v10560_v62  ;;  %v7303_v1 = vld [vmem:[#allocation2 + $0xd0] sm:$0xf]  ;;  %v7272_v41 = vor.u32 %v7870_v40, %v7271_v37  ;;  %v7883_v40 = vld [vmem:[#allocation2 + $0x13c] sm:$0xf] }
 0x59c   :  { %4110 = vmatpush.bf16.msrb.mxu3 %v6996_v3  ;;  %v7348_v37 = vor.u32 %v7883_v40, %v7345_v15  ;;  %v7858_v15 = vld [vmem:[#allocation2 + $0x14] sm:$0xf]  ;;  %v7859_v40 = vld [vmem:[#allocation2 + $0x1c] sm:$0xf] }
 0x59d   :  { %3628 = vst [vmem:[#allocation2 + $0x174] sm:$0xf] %v3620_v2  ;;  %4799 = vmatpush.bf16.msra.mxu0 %v7232_v34  ;;  %v7304_v2 = vor.u32 %v7878_v31, %v7303_v1  ;;  %v7140_v34 = vor.u32 %v7804_v43, %v7137_v55  ;;  %v7882_v55 = vld [vmem:[#allocation2 + $0x134] sm:$0xf] }
 0x59f   :  { %v10675_v58 = vpop.f32.mrf.mxu0  ;;  %v10693_v60 = vpop.f32.mrf.mxu1 }
 0x5a0   :  { %4111 = vmatpush.bf16.msrb.mxu3 %v6964_v45  ;;  %7174 = vmatmul.msk.bf16.gmra.mxu0 %vm3890_vm2, %v10673_v53  ;;  %v7105_v45 = vld [vmem:[#allocation2 + $0xa8] sm:$0xf0] }
 0x5a1   :  { %v7108_v23 = vor.u32 %v7796_v29, %v7105_v45  ;;  %v7313_v45 = vld [vmem:[#allocation2 + $0x108] sm:$0xf0] }
 0x5a2   :  { %v10702_v42 = vpop.f32.mrf.mxu2 }
 0x5a4   :  { %4112 = vmatpush.bf16.msrb.mxu3 %v6932_v4  ;;  %v7967_v4 = vld [vmem:[%s11968_s3 + $0x28] sm:$0xff] }
 0x5a6   :  { %7024 = vmatmul.msk.bf16.gmra.mxu2 %vm3890_vm2, %v10560_v62 }
 0x5a7   :  { %v10685_v18 = vpop.f32.mrf.mxu0  ;;  %v10710_v3 = vpop.f32.mrf.mxu1 }
 0x5a8   :  { %4113 = vmatpush.bf16.msrb.mxu3 %v6900_v11  ;;  %v7240_v11 = vor.u32 %v7862_v19, %v7239_v16  ;;  %v7874_v19 = vld [vmem:[#allocation2 + $0xd4] sm:$0xf]  ;;  %v7875_v16 = vld [vmem:[#allocation2 + $0xdc] sm:$0xf] }
 0x5aa   :  { %v10712_v51 = vpop.f32.mrf.mxu2 }
 0x5ab   :  { %7025 = vmatmul.msk.bf16.vlgmr.msrb.gmra.mxu3 %vm3890_vm2, %v7966_v61  ;;  %7177 = vmatmul.msk.bf16.vlgmr.msra.gmra.mxu1 %vm3890_vm2, %v10653_v10 }
 0x5ac   :  { %4418 = vmatpush.bf16.msra.mxu3 %v7156_v35  ;;  %4825 = vmatpush.bf16.msra.mxu1 %v7332_v56  ;;  %v7073_v35 = vld [vmem:[#allocation2 + $0x48] sm:$0xf0] }
 0x5ad   :  { %v7076_v27 = vor.u32 %v7788_v25, %v7073_v35  ;;  %v7273_v35 = vld [vmem:[#allocation2 + $0xa0] sm:$0xf0] }
 0x5ae   :  { %v10765_v36 = vpop.f32.mrf.mxu3 }
 0x5af   :  { %v10700_v32 = vpop.f32.mrf.mxu0  ;;  %v10727_v56 = vpop.f32.mrf.mxu1  ;;  %12725 = vst [vmem:[#allocation94_spill] sm:$0xff] %v10765_v36 }
 0x5b0   :  { %4419 = vmatpush.bf16.msra.mxu3 %v7124_v63  ;;  %4826 = vmatpush.bf16.msra.mxu1 %v7300_v13  ;;  %v7343_v13 = vld [vmem:[#allocation2 + $0x138] sm:$0xf] }
 0x5b1   :  { %7175 = vmatmul.msk.bf16.gmra.mxu0 %vm3890_vm2, %v10698_v33  ;;  %v7344_v44 = vor.u32 %v7887_v12, %v7343_v13  ;;  %v7281_v12 = vld [vmem:[#allocation2 + $0xa8] sm:$0xf0] }
 0x5b2   :  { %v10733_v5 = vpop.f32.mrf.mxu2 }
 0x5b4   :  { %4420 = vmatpush.bf16.msra.mxu3 %v7092_v24  ;;  %4827 = vmatpush.bf16.msra.mxu1 %v7268_v30  ;;  %v7311_v24 = vld [vmem:[#allocation2 + $0xd8] sm:$0xf]  ;;  %v7863_v30 = vld [vmem:[#allocation2 + $0x44] sm:$0xf0] }
 0x5b5   :  { %v7248_v31 = vor.u32 %v7863_v30, %v7247_v28  ;;  %v7249_v28 = vld [vmem:[#allocation2 + $0x48] sm:$0xf0] }
 0x5b6   :  { %7181 = vmatmul.msk.bf16.vlgmr.msra.gmra.mxu2 %vm3890_vm2, %v10653_v10  ;;  %v10777_v43 = vpop.f32.mrf.mxu3 }
 0x5b7   :  { %4854 = vmatpush.bf16.msra.mxu2 %v7336_v48  ;;  %v10708_v0 = vpop.f32.mrf.mxu0  ;;  %v10737_v63 = vpop.f32.mrf.mxu1  ;;  %v7279_v48 = vld [vmem:[#allocation2 + $0x78] sm:$0xf]  ;;  %12729 = vst [vmem:[#allocation96_spill] sm:$0xff] %v10777_v43  ;;  %v7893_v43 = vld [vmem:[#allocation2 + $0x10] sm:$0xf] }
 0x5b8   :  { %4421 = vmatpush.bf16.msra.mxu3 %v7060_v50  ;;  %4828 = vmatpush.bf16.msra.mxu1 %v7236_v57  ;;  %v7280_v8 = vor.u32 %v7871_v38, %v7279_v48  ;;  %v7241_v48 = vld [vmem:[#allocation2 + $0x40] sm:$0xf0] }
 0x5ba   :  { %v10743_v54 = vpop.f32.mrf.mxu2 }
 0x5bb   :  { %4855 = vmatpush.bf16.msra.mxu2 %v7304_v2  ;;  %7026 = vmatmul.msk.bf16.gmra.mxu3 %vm3890_vm2, %v7967_v4 }
 0x5bc   :  { %4534 = vmatpush.bf16.msrb.mxu3 %v7172_v22  ;;  %7178 = vmatmul.msk.bf16.gmra.mxu1 %vm3890_vm2, %v10673_v53  ;;  %v7337_v22 = vld [vmem:[#allocation2 + $0x160] sm:$0xf0] }
 0x5bd   :  { %v7340_v57 = vor.u32 %v7882_v55, %v7337_v22 }
 0x5be   :  { %v10793_v30 = vpop.f32.mrf.mxu3 }
 0x5bf   :  { %4856 = vmatpush.bf16.msra.mxu2 %v7272_v41  ;;  %v10725_v9 = vpop.f32.mrf.mxu0  ;;  %v10751_v59 = vpop.f32.mrf.mxu1  ;;  %v7305_v41 = vld [vmem:[#allocation2 + $0x100] sm:$0xf0]  ;;  %12733 = vst [vmem:[#allocation98_spill] sm:$0xff] %v10793_v30  ;;  %v7417_v30 = vld [vmem:[#allocation2 + $0x3c] sm:$0xf0] }
 0x5c0   :  { %4535 = vmatpush.bf16.msrb.mxu3 %v7140_v34  ;;  %12721 = vst [vmem:[#allocation195_spill] sm:$0xff] %v10751_v59  ;;  %v7308_v29 = vor.u32 %v7874_v19, %v7305_v41  ;;  %v7252_v41 = vor.u32 %v7859_v40, %v7249_v28  ;;  %v7287_v19 = vld [vmem:[#allocation2 + $0x80] sm:$0xf]  ;;  %v7913_v40 = vld [vmem:[#allocation2 + $0xf8] sm:$0xf0] }
 0x5c1   :  { %7176 = vmatmul.msk.bf16.gmra.mxu0 %vm3890_vm2, %v10723_v20  ;;  %v7895_v59 = vld [vmem:[#allocation2 + $0x20] sm:$0xf] }
 0x5c2   :  { %v10755_v39 = vpop.f32.mrf.mxu2 }
 0x5c3   :  { %4857 = vmatpush.bf16.msra.mxu2 %v7240_v11  ;;  %12722 = vst [vmem:[#allocation92_spill] sm:$0xff] %v10755_v39  ;;  %v7316_v11 = vor.u32 %v7875_v16, %v7313_v45  ;;  %v7864_v16 = vld [vmem:[#allocation2 + $0x4c] sm:$0xf0] }
 0x5c4   :  { %4536 = vmatpush.bf16.msrb.mxu3 %v7108_v23  ;;  %v7888_v23 = vld [vmem:[#allocation2 + $0x16c] sm:$0xf0] }
 0x5c6   :  { %7182 = vmatmul.msk.bf16.gmra.mxu2 %vm3890_vm2, %v10673_v53 }
 0x5c7   :  { %v10735_v61 = vpop.f32.mrf.mxu0  ;;  %v10763_v21 = vpop.f32.mrf.mxu1 }
 0x5c8   :  { %4537 = vmatpush.bf16.msrb.mxu3 %v7076_v27  ;;  %12724 = vst [vmem:[#allocation93_spill] sm:$0xff] %v10763_v21  ;;  %v7351_v27 = vld [vmem:[#allocation2 + $0x140] sm:$0xf] }
 0x5c9   :  { %v7352_v13 = vor.u32 %v7888_v23, %v7351_v27  ;;  %v7255_v23 = vld [vmem:[#allocation2 + $0x20] sm:$0xf]  ;;  %v10807_v27 = vpop.f32.mrf.mxu3 }
 0x5ca   :  { %v10769_v1 = vpop.f32.mrf.mxu2  ;;  %12738 = vst [vmem:[#allocation203_spill] sm:$0xff] %v10807_v27 }
 0x5cb   :  { %7027 = vmatmul.msk.bf16.gmra.mxu3 %vm3890_vm2, %v10535_v17  ;;  %v7312_v17 = vor.u32 %v7879_v46, %v7311_v24  ;;  %12726 = vst [vmem:[#allocation197_spill] sm:$0xff] %v10769_v1  ;;  %v7867_v24 = vld [vmem:[#allocation2 + $0x7c] sm:$0xf] }
 0x5cc   :  { %7179 = vmatmul.msk.bf16.gmra.mxu1 %vm3890_vm2, %v10698_v33  ;;  %v7284_v38 = vor.u32 %v7867_v24, %v7281_v12 }
 0x5cf   :  { %v10745_v7 = vpop.f32.mrf.mxu0 }
 0x5d1   :  { %7189 = vmatmul.msk.bf16.vlgmr.msrb.gmra.mxu0 %vm3890_vm2, %v10653_v10  ;;  %v10821_v24 = vpop.f32.mrf.mxu3 }
 0x5d2   :  { %4912 = vmatpush.bf16.msrb.mxu0 %v7344_v44  ;;  %v10781_v34 = vpop.f32.mrf.mxu2  ;;  %v7866_v44 = vld [vmem:[#allocation2 + $0x74] sm:$0xf]  ;;  %12743 = vst [vmem:[#allocation103_spill] sm:$0xff] %v10821_v24 }
 0x5d3   :  { %12730 = vst [vmem:[#allocation199_spill] sm:$0xff] %v10781_v34  ;;  %v7276_v46 = vor.u32 %v7866_v44, %v7273_v35  ;;  %v7256_v35 = vor.u32 %v7864_v16, %v7255_v23  ;;  %v7905_v16 = vld [vmem:[#allocation2 + $0x98] sm:$0xf0]  ;;  %v7899_v34 = vld [vmem:[#allocation2 + $0x48] sm:$0xf0] }
 0x5d6   :  { %7183 = vmatmul.msk.bf16.gmra.mxu2 %vm3890_vm2, %v10698_v33  ;;  %4913 = vmatpush.bf16.msrb.mxu0 %v7312_v17  ;;  %v7880_v17 = vld [vmem:[#allocation2 + $0x10c] sm:$0xf0] }
 0x5d7   :  { %v10753_v6 = vpop.f32.mrf.mxu0 }
 0x5da   :  { %4914 = vmatpush.bf16.msrb.mxu0 %v7280_v8  ;;  %v7319_v8 = vld [vmem:[#allocation2 + $0xe0] sm:$0xf] }
 0x5db   :  { %7028 = vmatmul.msk.bf16.gmra.mxu3 %vm3890_vm2, %v10560_v62  ;;  %v7320_v22 = vor.u32 %v7880_v17, %v7319_v8  ;;  %v7921_v8 = vld [vmem:[#allocation2 + $0x158] sm:$0xf0] }
 0x5dc   :  { %7180 = vmatmul.msk.bf16.gmra.mxu1 %vm3890_vm2, %v10723_v20 }
 0x5de   :  { %4915 = vmatpush.bf16.msrb.mxu0 %v7248_v31 }
 0x5df   :  { %v10761_v50 = vpop.f32.mrf.mxu0 }
 0x5e0   :  { %12723 = vst [vmem:[#allocation196_spill] sm:$0xff] %v10761_v50 }
 0x5e1   :  { %7190 = vmatmul.msk.bf16.gmra.mxu0 %vm3890_vm2, %v10673_v53 }
 0x5e6   :  { %7184 = vmatmul.msk.bf16.gmra.mxu2 %vm3890_vm2, %v10723_v20 }
 0x5e7   :  { %v10773_v62 = vpop.f32.mrf.mxu0 }
 0x5e8   :  { %12727 = vst [vmem:[#allocation95_spill] sm:$0xff] %v10773_v62  ;;  %v10775_v2 = vpop.f32.mrf.mxu1  ;;  %v7919_v62 = vld [vmem:[#allocation2 + $0x140] sm:$0xf] }
 0x5e9   :  { %12728 = vst [vmem:[#allocation198_spill] sm:$0xff] %v10775_v2 }
 0x5eb   :  { %7185 = vmatmul.msk.bf16.vlgmr.msra.gmra.mxu3 %vm3890_vm2, %v10653_v10 }
 0x5ec   :  { %7193 = vmatmul.msk.bf16.vlgmr.msrb.gmra.mxu1 %vm3890_vm2, %v10653_v10  ;;  %4883 = vmatpush.bf16.msra.mxu3 %v7340_v57  ;;  %v7244_v57 = vor.u32 %v7858_v15, %v7241_v48  ;;  %v10834_v48 = vld [vmem:[%s11968_s3 + $0x40] sm:$0xff] }
 0x5ed   :  { %4941 = vmatpush.bf16.msrb.mxu1 %v7348_v37  ;;  %v7872_v37 = vld [vmem:[#allocation2 + $0xac] sm:$0xf0] }
 0x5ef   :  { %v10785_v4 = vpop.f32.mrf.mxu0 }
 0x5f0   :  { %12731 = vst [vmem:[#allocation97_spill] sm:$0xff] %v10785_v4  ;;  %4884 = vmatpush.bf16.msra.mxu3 %v7308_v29  ;;  %v10787_v25 = vpop.f32.mrf.mxu1  ;;  %v7288_v29 = vor.u32 %v7872_v37, %v7287_v19  ;;  %v10842_v37 = vpop.f32.mrf.mxu3 }
 0x5f1   :  { %12732 = vst [vmem:[#allocation200_spill] sm:$0xff] %v10787_v25  ;;  %4942 = vmatpush.bf16.msrb.mxu1 %v7316_v11  ;;  %7191 = vmatmul.msk.bf16.gmra.mxu0 %vm3890_vm2, %v10698_v33  ;;  %v7907_v25 = vld [vmem:[#allocation2 + $0xa8] sm:$0xf0] }
 0x5f2   :  { %12747 = vst [vmem:[#allocation105_spill] sm:$0xff] %v10842_v37  ;;  %v7415_v37 = vld [vmem:[#allocation2 + $0xc] sm:$0xf] }
 0x5f4   :  { %4885 = vmatpush.bf16.msra.mxu3 %v7276_v46 }
 0x5f5   :  { %4943 = vmatpush.bf16.msrb.mxu1 %v7284_v38 }
 0x5f6   :  { %7197 = vmatmul.msk.bf16.vlgmr.msrb.gmra.mxu2 %vm3890_vm2, %v10653_v10 }
 0x5f7   :  { %4970 = vmatpush.bf16.msrb.mxu2 %v7352_v13  ;;  %v10797_v55 = vpop.f32.mrf.mxu0 }
 0x5f8   :  { %12735 = vst [vmem:[#allocation99_spill] sm:$0xff] %v10797_v55  ;;  %4886 = vmatpush.bf16.msra.mxu3 %v7244_v57  ;;  %v10799_v45 = vpop.f32.mrf.mxu1  ;;  %v10854_v24 = vpop.f32.mrf.mxu3 }
 0x5f9   :  { %v10795_v31 = vpop.f32.mrf.mxu2  ;;  %12736 = vst [vmem:[#allocation202_spill] sm:$0xff] %v10799_v45  ;;  %4944 = vmatpush.bf16.msrb.mxu1 %v7252_v41  ;;  %v7479_v41 = vld [vmem:[#allocation2 + $0xcc] sm:$0xf] }
 0x5fa   :  { %12734 = vst [vmem:[#allocation201_spill] sm:$0xff] %v10795_v31  ;;  %v7480_v19 = vor.u32 %v7913_v40, %v7479_v41  ;;  %v10863_v41 = vld [vmem:[%s11968_s3 + $0x48] sm:$0xff] }
 0x5fb   :  { %4971 = vmatpush.bf16.msrb.mxu2 %v7320_v22  ;;  %7186 = vmatmul.msk.bf16.gmra.mxu3 %vm3890_vm2, %v10673_v53  ;;  %v7511_v22 = vld [vmem:[#allocation2 + $0x12c] sm:$0xf]  ;;  %12750 = vst [vmem:[#allocation107_spill] sm:$0xff] %v10854_v24 }
 0x5fc   :  { %7194 = vmatmul.msk.bf16.gmra.mxu1 %vm3890_vm2, %v10673_v53  ;;  %v7512_v57 = vor.u32 %v7921_v8, %v7511_v22 }
 0x5ff   :  { %4972 = vmatpush.bf16.msrb.mxu2 %v7288_v29  ;;  %v10809_v12 = vpop.f32.mrf.mxu0 }
 0x600   :  { %12739 = vst [vmem:[#allocation101_spill] sm:$0xff] %v10809_v12  ;;  %v10811_v13 = vpop.f32.mrf.mxu1  ;;  %v7868_v12 = vld [vmem:[#allocation2 + $0x84] sm:$0xf] }
 0x601   :  { %v10805_v11 = vpop.f32.mrf.mxu2  ;;  %12740 = vst [vmem:[#allocation204_spill] sm:$0xff] %v10811_v13  ;;  %7192 = vmatmul.msk.bf16.gmra.mxu0 %vm3890_vm2, %v10723_v20 }
 0x602   :  { %12737 = vst [vmem:[#allocation100_spill] sm:$0xff] %v10805_v11 }
 0x603   :  { %4973 = vmatpush.bf16.msrb.mxu2 %v7256_v35  ;;  %v7447_v35 = vld [vmem:[#allocation2 + $0x6c] sm:$0xf] }
 0x604   :  { %v7448_v22 = vor.u32 %v7905_v16, %v7447_v35 }
 0x606   :  { %7198 = vmatmul.msk.bf16.gmra.mxu2 %vm3890_vm2, %v10673_v53 }
 0x607   :  { %v10819_v46 = vpop.f32.mrf.mxu0 }
 0x608   :  { %12742 = vst [vmem:[#allocation205_spill] sm:$0xff] %v10819_v46  ;;  %v10823_v17 = vpop.f32.mrf.mxu1  ;;  %v10890_v46 = vld [vmem:[%s11968_s3 + $0x50] sm:$0xff] }
 0x609   :  { %v10817_v44 = vpop.f32.mrf.mxu2  ;;  %12744 = vst [vmem:[#allocation206_spill] sm:$0xff] %v10823_v17  ;;  %v7876_v17 = vld [vmem:[#allocation2 + $0xe4] sm:$0xf] }
 0x60a   :  { %12741 = vst [vmem:[#allocation102_spill] sm:$0xff] %v10817_v44  ;;  %v7289_v44 = vld [vmem:[#allocation2 + $0xb0] sm:$0xf0] }
 0x60b   :  { %7187 = vmatmul.msk.bf16.gmra.mxu3 %vm3890_vm2, %v10698_v33 }
 0x60c   :  { %7195 = vmatmul.msk.bf16.gmra.mxu1 %vm3890_vm2, %v10698_v33 }
 0x60f   :  { %v10836_v28 = vpop.f32.mrf.mxu0 }
 0x610   :  { %v10838_v15 = vpop.f32.mrf.mxu1 }
 0x611   :  { %v10829_v38 = vpop.f32.mrf.mxu2  ;;  %12746 = vst [vmem:[#allocation207_spill] sm:$0xff] %v10838_v15  ;;  %7357 = vmatmul.msk.bf16.vlgmr.msra.gmra.mxu0 %vm3890_vm2, %v10834_v48  ;;  %v7897_v15 = vld [vmem:[#allocation2 + $0x38] sm:$0xf0] }
 0x612   :  { %12745 = vst [vmem:[#allocation104_spill] sm:$0xff] %v10829_v38  ;;  %5325 = vmatpush.bf16.msra.mxu0 %v7512_v57  ;;  %v7416_v57 = vor.u32 %v7897_v15, %v7415_v37  ;;  %v10875_v15 = vpop.f32.mrf.mxu3  ;;  %v7321_v38 = vld [vmem:[#allocation2 + $0x110] sm:$0xf0] }
 0x613   :  { %12754 = vst [vmem:[#allocation209_spill] sm:$0xff] %v10875_v15 }
 0x616   :  { %7199 = vmatmul.msk.bf16.gmra.mxu2 %vm3890_vm2, %v10698_v33  ;;  %5326 = vmatpush.bf16.msra.mxu0 %v7480_v19 }
 0x617   :  { %v10848_v23 = vpop.f32.mrf.mxu0 }
 0x618   :  { %v10850_v8 = vpop.f32.mrf.mxu1 }
 0x619   :  { %v10846_v29 = vpop.f32.mrf.mxu2  ;;  %12749 = vst [vmem:[#allocation106_spill] sm:$0xff] %v10850_v8 }
 0x61a   :  { %12748 = vst [vmem:[#allocation208_spill] sm:$0xff] %v10846_v29  ;;  %5327 = vmatpush.bf16.msra.mxu0 %v7448_v22  ;;  %v7353_v22 = vld [vmem:[#allocation2 + $0x170] sm:$0xf0]  ;;  %v7917_v29 = vld [vmem:[#allocation2 + $0x130] sm:$0xf] }
 0x61b   :  { %7188 = vmatmul.msk.bf16.gmra.mxu3 %vm3890_vm2, %v10723_v20 }
 0x61c   :  { %7196 = vmatmul.msk.bf16.gmra.mxu1 %vm3890_vm2, %v10723_v20 }
 0x61e   :  { %5328 = vmatpush.bf16.msra.mxu0 %v7416_v57  ;;  %v7513_v57 = vld [vmem:[#allocation2 + $0x15c] sm:$0xf0] }
 0x61f   :  { %v10865_v19 = vpop.f32.mrf.mxu0 }
 0x620   :  { %v10867_v16 = vpop.f32.mrf.mxu1 }
 0x621   :  { %v10858_v40 = vpop.f32.mrf.mxu2  ;;  %12752 = vst [vmem:[#allocation109_spill] sm:$0xff] %v10867_v16  ;;  %7358 = vmatmul.msk.bf16.gmra.mxu0 %vm3890_vm2, %v10863_v41  ;;  %v7516_v16 = vor.u32 %v7917_v29, %v7513_v57  ;;  %v7909_v29 = vld [vmem:[#allocation2 + $0xd0] sm:$0xf]  ;;  %v7922_v57 = vld [vmem:[#allocation2 + $0x160] sm:$0xf0] }
 0x622   :  { %12751 = vst [vmem:[#allocation108_spill] sm:$0xff] %v10858_v40  ;;  %v7884_v40 = vld [vmem:[#allocation2 + $0x144] sm:$0xf] }
 0x623   :  { %v7356_v8 = vor.u32 %v7884_v40, %v7353_v22 }
 0x626   :  { %7200 = vmatmul.msk.bf16.gmra.mxu2 %vm3890_vm2, %v10723_v20 }
 0x627   :  { %v10877_v37 = vpop.f32.mrf.mxu0 }
 0x628   :  { %v10879_v24 = vpop.f32.mrf.mxu1 }
 0x629   :  { %v10873_v35 = vpop.f32.mrf.mxu2 }
 0x62a   :  { %12753 = vst [vmem:[#allocation110_spill] sm:$0xff] %v10873_v35  ;;  %v7481_v35 = vld [vmem:[#allocation2 + $0xfc] sm:$0xf0] }
 0x62b   :  { %7201 = vmatmul.msk.bf16.vlgmr.msrb.gmra.mxu3 %vm3890_vm2, %v10653_v10  ;;  %v7324_v10 = vor.u32 %v7876_v17, %v7321_v38  ;;  %v7484_v27 = vor.u32 %v7909_v29, %v7481_v35  ;;  %v7901_v17 = vld [vmem:[#allocation2 + $0x70] sm:$0xf]  ;;  %v7914_v38 = vld [vmem:[#allocation2 + $0x100] sm:$0xf0]  ;;  %v7257_v29 = vld [vmem:[#allocation2 + $0x50] sm:$0xf0] }
 0x62c   :  { %7361 = vmatmul.msk.bf16.vlgmr.msra.gmra.mxu1 %vm3890_vm2, %v10834_v48  ;;  %4999 = vmatpush.bf16.msrb.mxu3 %v7356_v8 }
 0x62d   :  { %5354 = vmatpush.bf16.msra.mxu1 %v7516_v16  ;;  %v7519_v16 = vld [vmem:[#allocation2 + $0x134] sm:$0xf] }
 0x62e   :  { %v10892_v40 = vpop.f32.mrf.mxu3  ;;  %v7520_v13 = vor.u32 %v7922_v57, %v7519_v16  ;;  %v7860_v57 = vld [vmem:[#allocation2 + $0x24] sm:$0xf] }
 0x62f   :  { %12756 = vst [vmem:[#allocation211_spill] sm:$0xff] %v10892_v40  ;;  %v10894_v22 = vpop.f32.mrf.mxu0  ;;  %v7292_v40 = vor.u32 %v7868_v12, %v7289_v44  ;;  %v7260_v55 = vor.u32 %v7860_v57, %v7257_v29  ;;  %v7906_v12 = vld [vmem:[#allocation2 + $0xa0] sm:$0xf0]  ;;  %v7420_v44 = vor.u32 %v7893_v43, %v7417_v30  ;;  %v10919_v43 = vld [vmem:[%s11968_s3 + $0x58] sm:$0xff] }
 0x630   :  { %5000 = vmatpush.bf16.msrb.mxu3 %v7324_v10  ;;  %v10896_v8 = vpop.f32.mrf.mxu1  ;;  %v7487_v10 = vld [vmem:[#allocation2 + $0xd4] sm:$0xf] }
 0x631   :  { %v10885_v15 = vpop.f32.mrf.mxu2  ;;  %5355 = vmatpush.bf16.msra.mxu1 %v7484_v27  ;;  %7359 = vmatmul.msk.bf16.gmra.mxu0 %vm3890_vm2, %v10890_v46  ;;  %v7488_v27 = vor.u32 %v7914_v38, %v7487_v10  ;;  %v7423_v38 = vld [vmem:[#allocation2 + $0x14] sm:$0xf] }
 0x632   :  { %12755 = vst [vmem:[#allocation210_spill] sm:$0xff] %v10885_v15  ;;  %v7449_v15 = vld [vmem:[#allocation2 + $0x9c] sm:$0xf0] }
 0x633   :  { %v7452_v35 = vor.u32 %v7901_v17, %v7449_v15  ;;  %v7898_v17 = vld [vmem:[#allocation2 + $0x40] sm:$0xf0] }
 0x634   :  { %5001 = vmatpush.bf16.msrb.mxu3 %v7292_v40  ;;  %v7424_v29 = vor.u32 %v7898_v17, %v7423_v38  ;;  %v7527_v38 = vld [vmem:[#allocation2 + $0x13c] sm:$0xf] }
 0x635   :  { %5356 = vmatpush.bf16.msra.mxu1 %v7452_v35 }
 0x636   :  { %7365 = vmatmul.msk.bf16.vlgmr.msra.gmra.mxu2 %vm3890_vm2, %v10834_v48  ;;  %v10904_v16 = vpop.f32.mrf.mxu3 }
 0x637   :  { %5383 = vmatpush.bf16.msra.mxu2 %v7520_v13  ;;  %12757 = vst [vmem:[#allocation7_spill] sm:$0xff] %v10904_v16  ;;  %v10906_v45 = vpop.f32.mrf.mxu0  ;;  %v7455_v13 = vld [vmem:[#allocation2 + $0x74] sm:$0xf] }
 0x638   :  { %5002 = vmatpush.bf16.msrb.mxu3 %v7260_v55  ;;  %v7456_v40 = vor.u32 %v7906_v12, %v7455_v13  ;;  %v7923_v13 = vld [vmem:[#allocation2 + $0x168] sm:$0xf0] }
 0x639   :  { %v10902_v11 = vpop.f32.mrf.mxu2  ;;  %5357 = vmatpush.bf16.msra.mxu1 %v7420_v44  ;;  %v10908_v15 = vpop.f32.mrf.mxu1 }
 0x63b   :  { %5384 = vmatpush.bf16.msra.mxu2 %v7488_v27  ;;  %7202 = vmatmul.msk.bf16.gmra.mxu3 %vm3890_vm2, %v10673_v53 }
 0x63c   :  { %7362 = vmatmul.msk.bf16.gmra.mxu1 %vm3890_vm2, %v10863_v41 }
 0x63e   :  { %v10921_v30 = vpop.f32.mrf.mxu3 }
 0x63f   :  { %5385 = vmatpush.bf16.msra.mxu2 %v7456_v40  ;;  %12758 = vst [vmem:[#allocation111_spill] sm:$0xff] %v10921_v30  ;;  %v10923_v55 = vpop.f32.mrf.mxu0  ;;  %v7915_v30 = vld [vmem:[#allocation2 + $0x108] sm:$0xf0] }
 0x641   :  { %v10914_v35 = vpop.f32.mrf.mxu2  ;;  %v10925_v10 = vpop.f32.mrf.mxu1  ;;  %7360 = vmatmul.msk.bf16.gmra.mxu0 %vm3890_vm2, %v10919_v43 }
 0x643   :  { %5386 = vmatpush.bf16.msra.mxu2 %v7424_v29  ;;  %v7528_v29 = vor.u32 %v7923_v13, %v7527_v38  ;;  %v7463_v13 = vld [vmem:[#allocation2 + $0x7c] sm:$0xf] }
 0x644   :  { %v7464_v38 = vor.u32 %v7907_v25, %v7463_v13 }
 0x646   :  { %7366 = vmatmul.msk.bf16.gmra.mxu2 %vm3890_vm2, %v10863_v41  ;;  %v10933_v27 = vpop.f32.mrf.mxu3 }
 0x647   :  { %12759 = vst [vmem:[#allocation8_spill] sm:$0xff] %v10933_v27  ;;  %v10935_v57 = vpop.f32.mrf.mxu0 }
 0x649   :  { %v10931_v53 = vpop.f32.mrf.mxu2  ;;  %v10937_v12 = vpop.f32.mrf.mxu1 }
 0x64b   :  { %7203 = vmatmul.msk.bf16.gmra.mxu3 %vm3890_vm2, %v10698_v33  ;;  %v7495_v33 = vld [vmem:[#allocation2 + $0xdc] sm:$0xf] }
 0x64c   :  { %7363 = vmatmul.msk.bf16.gmra.mxu1 %vm3890_vm2, %v10890_v46  ;;  %v7496_v16 = vor.u32 %v7915_v30, %v7495_v33 }
 0x64e   :  { %v10945_v40 = vpop.f32.mrf.mxu3 }
 0x64f   :  { %12760 = vst [vmem:[#allocation112_spill] sm:$0xff] %v10945_v40  ;;  %v10947_v17 = vpop.f32.mrf.mxu0 }
 0x651   :  { %v10943_v44 = vpop.f32.mrf.mxu2  ;;  %v10949_v27 = vpop.f32.mrf.mxu1  ;;  %7373 = vmatmul.msk.bf16.vlgmr.msrb.gmra.mxu0 %vm3890_vm2, %v10834_v48 }
 0x652   :  { %5441 = vmatpush.bf16.msrb.mxu0 %v7528_v29  ;;  %v7431_v29 = vld [vmem:[#allocation2 + $0x1c] sm:$0xf] }
 0x653   :  { %v7432_v30 = vor.u32 %v7899_v34, %v7431_v29  ;;  %v7529_v29 = vld [vmem:[#allocation2 + $0x16c] sm:$0xf0] }
 0x654   :  { %v7532_v1 = vor.u32 %v7919_v62, %v7529_v29  ;;  %v7535_v62 = vld [vmem:[#allocation2 + $0x144] sm:$0xf]  ;;  %v7465_v29 = vld [vmem:[#allocation2 + $0xac] sm:$0xf0] }
 0x656   :  { %7367 = vmatmul.msk.bf16.gmra.mxu2 %vm3890_vm2, %v10890_v46  ;;  %v10957_v40 = vpop.f32.mrf.mxu3  ;;  %5442 = vmatpush.bf16.msrb.mxu0 %v7496_v16 }
 0x657   :  { %12761 = vst [vmem:[#allocation9_spill] sm:$0xff] %v10957_v40  ;;  %v10959_v4 = vpop.f32.mrf.mxu0 }
 0x659   :  { %v10955_v31 = vpop.f32.mrf.mxu2  ;;  %v10961_v36 = vpop.f32.mrf.mxu1 }
 0x65a   :  { %12762 = vst [vmem:[#allocation113_spill] sm:$0xff] %v10961_v36  ;;  %5443 = vmatpush.bf16.msrb.mxu0 %v7464_v38  ;;  %v7521_v38 = vld [vmem:[#allocation2 + $0x164] sm:$0xf0] }
 0x65b   :  { %7204 = vmatmul.msk.bf16.gmra.mxu3 %vm3890_vm2, %v10723_v20 }
 0x65c   :  { %7364 = vmatmul.msk.bf16.gmra.mxu1 %vm3890_vm2, %v10919_v43 }
 0x65e   :  { %v10969_v40 = vpop.f32.mrf.mxu3  ;;  %5444 = vmatpush.bf16.msrb.mxu0 %v7432_v30  ;;  %v7918_v30 = vld [vmem:[#allocation2 + $0x138] sm:$0xf] }
 0x65f   :  { %12764 = vst [vmem:[#allocation114_spill] sm:$0xff] %v10969_v40  ;;  %v10971_v16 = vpop.f32.mrf.mxu0  ;;  %v7524_v2 = vor.u32 %v7918_v30, %v7521_v38  ;;  %v7911_v30 = vld [vmem:[#allocation2 + $0xe0] sm:$0xf] }
 0x660   :  { %12765 = vst [vmem:[#allocation11_spill] sm:$0xff] %v10971_v16  ;;  %v7924_v16 = vld [vmem:[#allocation2 + $0x170] sm:$0xf0] }
 0x661   :  { %v10967_v33 = vpop.f32.mrf.mxu2  ;;  %v10973_v25 = vpop.f32.mrf.mxu1  ;;  %7374 = vmatmul.msk.bf16.gmra.mxu0 %vm3890_vm2, %v10863_v41 }
 0x662   :  { %12763 = vst [vmem:[#allocation10_spill] sm:$0xff] %v10967_v33  ;;  %v7457_v33 = vld [vmem:[#allocation2 + $0xa4] sm:$0xf0] }
 0x663   :  { %12766 = vst [vmem:[#allocation115_spill] sm:$0xff] %v10973_v25  ;;  %v7489_v25 = vld [vmem:[#allocation2 + $0x104] sm:$0xf0] }
 0x666   :  { %7368 = vmatmul.msk.bf16.gmra.mxu2 %vm3890_vm2, %v10919_v43  ;;  %v10981_v13 = vpop.f32.mrf.mxu3 }
 0x667   :  { %12768 = vst [vmem:[#allocation116_spill] sm:$0xff] %v10981_v13  ;;  %v10983_v34 = vpop.f32.mrf.mxu0 }
 0x668   :  { %12769 = vst [vmem:[#allocation13_spill] sm:$0xff] %v10983_v34  ;;  %v7910_v34 = vld [vmem:[#allocation2 + $0xd8] sm:$0xf] }
 0x669   :  { %v10979_v20 = vpop.f32.mrf.mxu2  ;;  %v10985_v40 = vpop.f32.mrf.mxu1  ;;  %v7492_v38 = vor.u32 %v7910_v34, %v7489_v25  ;;  %v7903_v25 = vld [vmem:[#allocation2 + $0x80] sm:$0xf]  ;;  %v7916_v34 = vld [vmem:[#allocation2 + $0x110] sm:$0xf0] }
 0x66a   :  { %12767 = vst [vmem:[#allocation12_spill] sm:$0xff] %v10979_v20  ;;  %v7497_v20 = vld [vmem:[#allocation2 + $0x10c] sm:$0xf0] }
 0x66b   :  { %12770 = vst [vmem:[#allocation117_spill] sm:$0xff] %v10985_v40  ;;  %7369 = vmatmul.msk.bf16.vlgmr.msra.gmra.mxu3 %vm3890_vm2, %v10834_v48  ;;  %v7500_v50 = vor.u32 %v7911_v30, %v7497_v20  ;;  %v7468_v20 = vor.u32 %v7903_v25, %v7465_v29  ;;  %v7425_v30 = vld [vmem:[#allocation2 + $0x44] sm:$0xf0]  ;;  %v7471_v29 = vld [vmem:[#allocation2 + $0x84] sm:$0xf] }
 0x66c   :  { %7377 = vmatmul.msk.bf16.vlgmr.msrb.gmra.mxu1 %vm3890_vm2, %v10834_v48  ;;  %5412 = vmatpush.bf16.msra.mxu3 %v7524_v2  ;;  %v7536_v2 = vor.u32 %v7924_v16, %v7535_v62  ;;  %v7894_v62 = vld [vmem:[#allocation2 + $0x18] sm:$0xf]  ;;  %v7900_v25 = vld [vmem:[#allocation2 + $0x50] sm:$0xf0] }
 0x66d   :  { %5470 = vmatpush.bf16.msrb.mxu1 %v7532_v1  ;;  %v7902_v1 = vld [vmem:[#allocation2 + $0x78] sm:$0xf]  ;;  %v7428_v36 = vor.u32 %v7894_v62, %v7425_v30 }
 0x66e   :  { %v10993_v21 = vpop.f32.mrf.mxu3 }
 0x66f   :  { %12772 = vst [vmem:[#allocation118_spill] sm:$0xff] %v10993_v21  ;;  %v10995_v40 = vpop.f32.mrf.mxu0  ;;  %v7433_v21 = vld [vmem:[#allocation2 + $0x4c] sm:$0xf0] }
 0x670   :  { %12773 = vst [vmem:[#allocation15_spill] sm:$0xff] %v10995_v40  ;;  %5413 = vmatpush.bf16.msra.mxu3 %v7492_v38  ;;  %v7460_v40 = vor.u32 %v7902_v1, %v7457_v33  ;;  %v7503_v38 = vld [vmem:[#allocation2 + $0xe4] sm:$0xf]  ;;  %v7908_v33 = vld [vmem:[#allocation2 + $0xb0] sm:$0xf0]  ;;  %v7436_v1 = vor.u32 %v7895_v59, %v7433_v21 }
 0x671   :  { %v10991_v13 = vpop.f32.mrf.mxu2  ;;  %5471 = vmatpush.bf16.msrb.mxu1 %v7500_v50  ;;  %v10997_v39 = vpop.f32.mrf.mxu1  ;;  %7375 = vmatmul.msk.bf16.gmra.mxu0 %vm3890_vm2, %v10890_v46  ;;  %v7504_v16 = vor.u32 %v7916_v34, %v7503_v38  ;;  %v7439_v34 = vld [vmem:[#allocation2 + $0x24] sm:$0xf] }
 0x672   :  { %12771 = vst [vmem:[#allocation14_spill] sm:$0xff] %v10991_v13  ;;  %v7440_v30 = vor.u32 %v7900_v25, %v7439_v34  ;;  %v7957_v25 = vld [vmem:[#allocation2 + $0x15c] sm:$0xf0] }
 0x673   :  { %12774 = vst [vmem:[#allocation119_spill] sm:$0xff] %v10997_v39 }
 0x674   :  { %5414 = vmatpush.bf16.msra.mxu3 %v7460_v40 }
 0x675   :  { %5472 = vmatpush.bf16.msrb.mxu1 %v7468_v20 }
 0x676   :  { %7381 = vmatmul.msk.bf16.vlgmr.msrb.gmra.mxu2 %vm3890_vm2, %v10834_v48  ;;  %v11005_v39 = vpop.f32.mrf.mxu3 }
 0x677   :  { %5499 = vmatpush.bf16.msrb.mxu2 %v7536_v2  ;;  %v11007_v13 = vpop.f32.mrf.mxu0  ;;  %v7472_v2 = vor.u32 %v7908_v33, %v7471_v29 }
 0x678   :  { %5415 = vmatpush.bf16.msra.mxu3 %v7428_v36 }
 0x679   :  { %v11003_v50 = vpop.f32.mrf.mxu2  ;;  %5473 = vmatpush.bf16.msrb.mxu1 %v7436_v1  ;;  %v11009_v40 = vpop.f32.mrf.mxu1  ;;  %v4337_v1 = vadd.f32 %v10836_v28, %v10656_v52  ;;  %v7949_v52 = vld [vmem:[#allocation2 + $0xfc] sm:$0xf0]  ;;  %v7663_v28 = vld [vmem:[#allocation2 + $0xd0] sm:$0xf] }
 0x67b   :  { %5500 = vmatpush.bf16.msrb.mxu2 %v7504_v16  ;;  %7370 = vmatmul.msk.bf16.gmra.mxu3 %vm3890_vm2, %v10863_v41 }
 0x67c   :  { %7378 = vmatmul.msk.bf16.gmra.mxu1 %vm3890_vm2, %v10863_v41 }
 0x67e   :  { %v11017_v38 = vpop.f32.mrf.mxu3 }
 0x67f   :  { %5501 = vmatpush.bf16.msrb.mxu2 %v7472_v2  ;;  %12775 = vst [vmem:[#allocation16_spill] sm:$0xff] %v11017_v38  ;;  %v11019_v59 = vpop.f32.mrf.mxu0  ;;  %v11046_v2 = vld [vmem:[%s11968_s3 + $0x60] sm:$0xff]  ;;  %v7933_v38 = vld [vmem:[#allocation2 + $0x3c] sm:$0xf0] }
 0x680   :  { %12776 = vst [vmem:[#allocation120_spill] sm:$0xff] %v11019_v59 }
 0x681   :  { %v11015_v20 = vpop.f32.mrf.mxu2  ;;  %v11021_v21 = vpop.f32.mrf.mxu1  ;;  %7376 = vmatmul.msk.bf16.gmra.mxu0 %vm3890_vm2, %v10919_v43 }
 0x682   :  { %12777 = vst [vmem:[#allocation17_spill] sm:$0xff] %v11021_v21 }
 0x683   :  { %5502 = vmatpush.bf16.msrb.mxu2 %v7440_v30 }
 0x686   :  { %7382 = vmatmul.msk.bf16.gmra.mxu2 %vm3890_vm2, %v10863_v41  ;;  %v11029_v16 = vpop.f32.mrf.mxu3 }
 0x687   :  { %12779 = vst [vmem:[#allocation18_spill] sm:$0xff] %v11029_v16  ;;  %v11031_v62 = vpop.f32.mrf.mxu0 }
 0x688   :  { %12780 = vst [vmem:[#allocation122_spill] sm:$0xff] %v11031_v62  ;;  %v7695_v62 = vld [vmem:[#allocation2 + $0x130] sm:$0xf] }
 0x689   :  { %v11027_v36 = vpop.f32.mrf.mxu2  ;;  %v11033_v33 = vpop.f32.mrf.mxu1  ;;  %v7696_v16 = vor.u32 %v7957_v25, %v7695_v62 }
 0x68a   :  { %12778 = vst [vmem:[#allocation121_spill] sm:$0xff] %v11027_v36 }
 0x68b   :  { %12781 = vst [vmem:[#allocation19_spill] sm:$0xff] %v11033_v33  ;;  %7371 = vmatmul.msk.bf16.gmra.mxu3 %vm3890_vm2, %v10890_v46 }
 0x68c   :  { %7379 = vmatmul.msk.bf16.gmra.mxu1 %vm3890_vm2, %v10890_v46 }
 0x68e   :  { %v11048_v34 = vpop.f32.mrf.mxu3 }
 0x68f   :  { %12783 = vst [vmem:[#allocation20_spill] sm:$0xff] %v11048_v34  ;;  %v4801_v30 = vpop.f32.mrf.mxu0  ;;  %v4339_v34 = vadd.f32 %v10848_v23, %v10664_v49  ;;  %v4342_v23 = vadd.f32 %v10865_v19, %v10675_v58  ;;  %v4344_v58 = vadd.f32 %v10877_v37, %v10685_v18  ;;  %v7665_v18 = vld [vmem:[#allocation2 + $0x100] sm:$0xf0]  ;;  %v4347_v37 = vadd.f32 %v10894_v22, %v10700_v32  ;;  %v7703_v32 = vld [vmem:[#allocation2 + $0x138] sm:$0xf] }
 0x690   :  { %v11050_v33 = vadd.f32 %v4801_v30, %v4337_v1  ;;  %v7941_v1 = vld [vmem:[#allocation2 + $0x9c] sm:$0xf0]  ;;  %v7633_v22 = vld [vmem:[#allocation2 + $0xa0] sm:$0xf0] }
 0x691   :  { %v11041_v29 = vpop.f32.mrf.mxu2  ;;  %v11052_v36 = vpop.f32.mrf.mxu1  ;;  %7541 = vmatmul.msk.bf16.vlgmr.msra.gmra.mxu0 %vm3890_vm2, %v11046_v2 }
 0x692   :  { %12782 = vst [vmem:[#allocation123_spill] sm:$0xff] %v11041_v29  ;;  %5854 = vmatpush.bf16.msra.mxu0 %v7696_v16  ;;  %v7664_v29 = vor.u32 %v7949_v52, %v7663_v28  ;;  %v7599_v16 = vld [vmem:[#allocation2 + $0x10] sm:$0xf] }
 0x693   :  { %12784 = vst [vmem:[#allocation124_spill] sm:$0xff] %v11050_v33  ;;  %v7600_v49 = vor.u32 %v7933_v38, %v7599_v16  ;;  %v4366_v16 = vadd.f32 %v10879_v24, %v10666_v47  ;;  %v11114_v47 = vld [vmem:[%s11968_s3 + $0x70] sm:$0xff] }
 0x694   :  { %12785 = vst [vmem:[#allocation21_spill] sm:$0xff] %v11052_v36  ;;  %v7631_v36 = vld [vmem:[#allocation2 + $0x70] sm:$0xf] }
 0x695   :  { %v7632_v33 = vor.u32 %v7941_v1, %v7631_v36  ;;  %v11079_v36 = vld [vmem:[%s11968_s3 + $0x68] sm:$0xff] }
 0x696   :  { %7383 = vmatmul.msk.bf16.gmra.mxu2 %vm3890_vm2, %v10890_v46  ;;  %v11062_v30 = vpop.f32.mrf.mxu3  ;;  %5855 = vmatpush.bf16.msra.mxu0 %v7664_v29 }
 0x697   :  { %v4803_v62 = vpop.f32.mrf.mxu0 }
 0x698   :  { %v11064_v25 = vadd.f32 %v4803_v62, %v4339_v34 }
 0x699   :  { %v11060_v21 = vpop.f32.mrf.mxu2  ;;  %v11066_v59 = vpop.f32.mrf.mxu1 }
 0x69a   :  { %5856 = vmatpush.bf16.msra.mxu0 %v7632_v33 }
 0x69b   :  { %7372 = vmatmul.msk.bf16.gmra.mxu3 %vm3890_vm2, %v10919_v43 }
 0x69c   :  { %7380 = vmatmul.msk.bf16.gmra.mxu1 %vm3890_vm2, %v10919_v43 }
 0x69e   :  { %v11081_v34 = vpop.f32.mrf.mxu3  ;;  %5857 = vmatpush.bf16.msra.mxu0 %v7600_v49  ;;  %v7697_v49 = vld [vmem:[#allocation2 + $0x160] sm:$0xf0] }
 0x69f   :  { %v4806_v33 = vpop.f32.mrf.mxu0 }
 0x6a0   :  { %v11083_v52 = vadd.f32 %v4806_v33, %v4342_v23 }
 0x6a1   :  { %v11074_v29 = vpop.f32.mrf.mxu2  ;;  %v11085_v28 = vpop.f32.mrf.mxu1  ;;  %7542 = vmatmul.msk.bf16.gmra.mxu0 %vm3890_vm2, %v11079_v36 }
 0x6a2   :  { %12786 = vst [vmem:[#allocation125_spill] sm:$0xff] %v11083_v52 }
 0x6a3   :  { %12787 = vst [vmem:[#allocation22_spill] sm:$0xff] %v11085_v28  ;;  %v7953_v28 = vld [vmem:[#allocation2 + $0x134] sm:$0xf] }
 0x6a4   :  { %v7700_v52 = vor.u32 %v7953_v28, %v7697_v49  ;;  %v7958_v28 = vld [vmem:[#allocation2 + $0x164] sm:$0xf0] }
 0x6a6   :  { %7384 = vmatmul.msk.bf16.gmra.mxu2 %vm3890_vm2, %v10919_v43  ;;  %v11095_v38 = vpop.f32.mrf.mxu3 }
 0x6a7   :  { %v4808_v1 = vpop.f32.mrf.mxu0 }
 0x6a8   :  { %v11097_v62 = vadd.f32 %v4808_v1, %v4344_v58 }
 0x6a9   :  { %v11093_v19 = vpop.f32.mrf.mxu2  ;;  %v4830_v23 = vpop.f32.mrf.mxu1 }
 0x6aa   :  { %v11101_v33 = vadd.f32 %v4830_v23, %v4366_v16  ;;  %v4368_v23 = vadd.f32 %v10896_v8, %v10681_v26  ;;  %v4395_v26 = vadd.f32 %v10902_v11, %v10683_v14  ;;  %v7671_v8 = vld [vmem:[#allocation2 + $0xd8] sm:$0xf]  ;;  %v4371_v14 = vadd.f32 %v10908_v15, %v10693_v60 }
 0x6ab   :  { %7385 = vmatmul.msk.bf16.vlgmr.msrb.gmra.mxu3 %vm3890_vm2, %v10834_v48  ;;  %v7945_v48 = vld [vmem:[#allocation2 + $0xd4] sm:$0xf]  ;;  %v7639_v11 = vld [vmem:[#allocation2 + $0x78] sm:$0xf]  ;;  %v4352_v60 = vadd.f32 %v10923_v55, %v10725_v9  ;;  %v4373_v9 = vadd.f32 %v10925_v10, %v10710_v3  ;;  %v4354_v3 = vadd.f32 %v10935_v57, %v10735_v61  ;;  %v7896_v61 = vld [vmem:[#allocation2 + $0x28] sm:$0xf] }
 0x6ac   :  { %12788 = vst [vmem:[#allocation126_spill] sm:$0xff] %v11101_v33  ;;  %7545 = vmatmul.msk.bf16.vlgmr.msra.gmra.mxu1 %vm3890_vm2, %v11046_v2  ;;  %v7668_v49 = vor.u32 %v7945_v48, %v7665_v18  ;;  %v4349_v48 = vadd.f32 %v10906_v45, %v10708_v0 }
 0x6ad   :  { %5883 = vmatpush.bf16.msra.mxu1 %v7700_v52 }
 0x6ae   :  { %v11116_v24 = vpop.f32.mrf.mxu3 }
 0x6af   :  { %12790 = vst [vmem:[#allocation127_spill] sm:$0xff] %v11116_v24  ;;  %v4811_v1 = vpop.f32.mrf.mxu0  ;;  %v7937_v24 = vld [vmem:[#allocation2 + $0x74] sm:$0xf] }
 0x6b0   :  { %v11118_v16 = vadd.f32 %v4811_v1, %v4347_v37  ;;  %v7950_v37 = vld [vmem:[#allocation2 + $0x104] sm:$0xf0]  ;;  %v7636_v18 = vor.u32 %v7937_v24, %v7633_v22  ;;  %v7601_v1 = vld [vmem:[#allocation2 + $0x40] sm:$0xf0] }
 0x6b1   :  { %v11109_v58 = vpop.f32.mrf.mxu2  ;;  %5884 = vmatpush.bf16.msra.mxu1 %v7668_v49  ;;  %v4832_v52 = vpop.f32.mrf.mxu1  ;;  %7543 = vmatmul.msk.bf16.gmra.mxu0 %vm3890_vm2, %v11114_v47  ;;  %v7672_v49 = vor.u32 %v7950_v37, %v7671_v8  ;;  %v7934_v37 = vld [vmem:[#allocation2 + $0x44] sm:$0xf0] }
 0x6b2   :  { %12789 = vst [vmem:[#allocation23_spill] sm:$0xff] %v11109_v58  ;;  %v7704_v58 = vor.u32 %v7958_v28, %v7703_v32  ;;  %v11124_v33 = vadd.f32 %v4832_v52, %v4368_v23 }
 0x6b3   :  { %12791 = vst [vmem:[#allocation24_spill] sm:$0xff] %v11118_v16  ;;  %v7942_v16 = vld [vmem:[#allocation2 + $0xa4] sm:$0xf0] }
 0x6b4   :  { %12792 = vst [vmem:[#allocation128_spill] sm:$0xff] %v11124_v33  ;;  %v7929_v33 = vld [vmem:[#allocation2 + $0x14] sm:$0xf]  ;;  %v7640_v45 = vor.u32 %v7942_v16, %v7639_v11  ;;  %v4400_v11 = vadd.f32 %v10931_v53, %v10712_v51  ;;  %v7441_v53 = vld [vmem:[#allocation2 + $0x54] sm:$0xf0] }
 0x6b5   :  { %5885 = vmatpush.bf16.msra.mxu1 %v7636_v18  ;;  %v7604_v24 = vor.u32 %v7929_v33, %v7601_v1  ;;  %v4397_v18 = vadd.f32 %v10914_v35, %v10702_v42  ;;  %v7607_v33 = vld [vmem:[#allocation2 + $0x18] sm:$0xf]  ;;  %v11153_v16 = vld [vmem:[%s11968_s3 + $0x78] sm:$0xff]  ;;  %v7920_v35 = vld [vmem:[#allocation2 + $0x148] sm:$0xf]  ;;  %v7444_v57 = vor.u32 %v7896_v61, %v7441_v53 }
 0x6b6   :  { %7549 = vmatmul.msk.bf16.vlgmr.msra.gmra.mxu2 %vm3890_vm2, %v11046_v2  ;;  %v11134_v32 = vpop.f32.mrf.mxu3  ;;  %v12795_v61 = vld [vmem:[#allocation113_spill] sm:$0xff] }
 0x6b7   :  { %5912 = vmatpush.bf16.msra.mxu2 %v7704_v58  ;;  %v4813_v52 = vpop.f32.mrf.mxu0 }
 0x6b8   :  { %v11136_v58 = vadd.f32 %v4813_v52, %v4349_v48  ;;  %v7537_v48 = vld [vmem:[#allocation2 + $0x174] sm:$0xf0]  ;;  %v7912_v52 = vld [vmem:[#allocation2 + $0xe8] sm:$0xf] }
 0x6b9   :  { %v4859_v28 = vpop.f32.mrf.mxu2  ;;  %5886 = vmatpush.bf16.msra.mxu1 %v7604_v24  ;;  %v4835_v0 = vpop.f32.mrf.mxu1  ;;  %v7540_v55 = vor.u32 %v7920_v35, %v7537_v48  ;;  %v7505_v24 = vld [vmem:[#allocation2 + $0x114] sm:$0xf0]  ;;  %v4402_v35 = vadd.f32 %v10943_v44, %v10733_v5  ;;  %v7959_v48 = vld [vmem:[#allocation2 + $0x16c] sm:$0xf0]  ;;  %v4378_v5 = vadd.f32 %v10949_v27, %v10737_v63  ;;  %v4455_v63 = vadd.f32 %v10959_v4, %v10753_v6  ;;  %v7615_v6 = vld [vmem:[#allocation2 + $0x20] sm:$0xf] }
 0x6ba   :  { %v11132_v23 = vadd.f32 %v4859_v28, %v4395_v26  ;;  %v11140_v22 = vadd.f32 %v4835_v0, %v4371_v14  ;;  %v7608_v26 = vor.u32 %v7934_v37, %v7607_v33  ;;  %v7508_v14 = vor.u32 %v7912_v52, %v7505_v24  ;;  %v7904_v33 = vld [vmem:[#allocation2 + $0x88] sm:$0xf] }
 0x6bb   :  { %5913 = vmatpush.bf16.msra.mxu2 %v7672_v49  ;;  %7386 = vmatmul.msk.bf16.gmra.mxu3 %vm3890_vm2, %v10863_v41  ;;  %v12796_v4 = vld [vmem:[#allocation92_spill] sm:$0xff] }
 0x6bc   :  { %7546 = vmatmul.msk.bf16.gmra.mxu1 %vm3890_vm2, %v11079_v36  ;;  %5528 = vmatpush.bf16.msrb.mxu3 %v7540_v55 }
 0x6be   :  { %v11157_v41 = vpop.f32.mrf.mxu3 }
 0x6bf   :  { %5914 = vmatpush.bf16.msra.mxu2 %v7640_v45  ;;  %v4816_v1 = vpop.f32.mrf.mxu0 }
 0x6c0   :  { %v11159_v42 = vadd.f32 %v4816_v1, %v4352_v60  ;;  %5529 = vmatpush.bf16.msrb.mxu3 %v7508_v14  ;;  %v7473_v60 = vld [vmem:[#allocation2 + $0xb4] sm:$0xf0]  ;;  %v7679_v14 = vld [vmem:[#allocation2 + $0xe0] sm:$0xf] }
 0x6c1   :  { %v4861_v15 = vpop.f32.mrf.mxu2  ;;  %v4837_v28 = vpop.f32.mrf.mxu1  ;;  %7544 = vmatmul.msk.bf16.gmra.mxu0 %vm3890_vm2, %v11153_v16 }
 0x6c2   :  { %v11155_v8 = vadd.f32 %v4861_v15, %v4397_v18  ;;  %v11165_v49 = vadd.f32 %v4837_v28, %v4373_v9  ;;  %v4376_v15 = vadd.f32 %v10937_v12, %v10727_v56  ;;  %v4453_v56 = vadd.f32 %v10947_v17, %v10745_v7  ;;  %v7951_v7 = vld [vmem:[#allocation2 + $0x10c] sm:$0xf0] }
 0x6c3   :  { %5915 = vmatpush.bf16.msra.mxu2 %v7608_v26  ;;  %v7476_v26 = vor.u32 %v7904_v33, %v7473_v60 }
 0x6c5   :  { %5530 = vmatpush.bf16.msrb.mxu3 %v7476_v26  ;;  %v7647_v26 = vld [vmem:[#allocation2 + $0x80] sm:$0xf] }
 0x6c6   :  { %7550 = vmatmul.msk.bf16.gmra.mxu2 %vm3890_vm2, %v11079_v36  ;;  %v11175_v45 = vpop.f32.mrf.mxu3 }
 0x6c7   :  { %v4818_v37 = vpop.f32.mrf.mxu0 }
 0x6c8   :  { %v11177_v18 = vadd.f32 %v4818_v37, %v4354_v3  ;;  %v7680_v3 = vor.u32 %v7951_v7, %v7679_v14 }
 0x6c9   :  { %v4864_v10 = vpop.f32.mrf.mxu2  ;;  %v4840_v1 = vpop.f32.mrf.mxu1  ;;  %5531 = vmatpush.bf16.msrb.mxu3 %v7444_v57 }
 0x6ca   :  { %v11173_v0 = vadd.f32 %v4864_v10, %v4400_v11  ;;  %v11181_v51 = vadd.f32 %v4840_v1, %v4376_v15  ;;  %v4405_v11 = vadd.f32 %v10955_v31, %v10743_v54  ;;  %v7943_v10 = vld [vmem:[#allocation2 + $0xac] sm:$0xf0]  ;;  %v12794_v1 = vld [vmem:[#allocation195_spill] sm:$0xff] }
 0x6cb   :  { %7387 = vmatmul.msk.bf16.gmra.mxu3 %vm3890_vm2, %v10890_v46  ;;  %v7711_v46 = vld [vmem:[#allocation2 + $0x140] sm:$0xf]  ;;  %v4381_v53 = vadd.f32 %v12795_v61, %v12794_v1  ;;  %v7648_v57 = vor.u32 %v7943_v10, %v7647_v26  ;;  %v7935_v31 = vld [vmem:[#allocation2 + $0x4c] sm:$0xf0] }
 0x6cc   :  { %7547 = vmatmul.msk.bf16.gmra.mxu1 %vm3890_vm2, %v11114_v47  ;;  %v7712_v44 = vor.u32 %v7959_v48, %v7711_v46  ;;  %v7616_v48 = vor.u32 %v7935_v31, %v7615_v6  ;;  %v12799_v46 = vld [vmem:[#allocation11_spill] sm:$0xff]  ;;  %v12803_v26 = vld [vmem:[#allocation12_spill] sm:$0xff] }
 0x6cd   :  { %v12804_v61 = vld [vmem:[#allocation95_spill] sm:$0xff] }
 0x6ce   :  { %v11193_v55 = vpop.f32.mrf.mxu3 }
 0x6cf   :  { %v4917_v28 = vpop.f32.mrf.mxu0 }
 0x6d0   :  { %v11195_v52 = vadd.f32 %v4917_v28, %v4453_v56  ;;  %v12797_v56 = vld [vmem:[#allocation10_spill] sm:$0xff]  ;;  %v12798_v28 = vld [vmem:[#allocation196_spill] sm:$0xff] }
 0x6d1   :  { %v4866_v12 = vpop.f32.mrf.mxu2  ;;  %v4842_v24 = vpop.f32.mrf.mxu1  ;;  %7557 = vmatmul.msk.bf16.vlgmr.msrb.gmra.mxu0 %vm3890_vm2, %v11046_v2 }
 0x6d2   :  { %v11191_v9 = vadd.f32 %v4866_v12, %v4402_v35  ;;  %12793 = vst [vmem:[#allocation25_spill] sm:$0xff] %v11195_v52  ;;  %v11201_v17 = vadd.f32 %v4842_v24, %v4378_v5  ;;  %5970 = vmatpush.bf16.msrb.mxu0 %v7712_v44  ;;  %v4407_v12 = vadd.f32 %v12797_v56, %v12796_v4 }
 0x6d3   :  { %v4458_v5 = vadd.f32 %v12799_v46, %v12798_v28  ;;  %v12809_v28 = vld [vmem:[#allocation117_spill] sm:$0xff] }
 0x6d6   :  { %7551 = vmatmul.msk.bf16.gmra.mxu2 %vm3890_vm2, %v11114_v47  ;;  %v11211_v33 = vpop.f32.mrf.mxu3  ;;  %5971 = vmatpush.bf16.msrb.mxu0 %v7680_v3  ;;  %v12801_v3 = vld [vmem:[#allocation115_spill] sm:$0xff] }
 0x6d7   :  { %v4919_v60 = vpop.f32.mrf.mxu0 }
 0x6d8   :  { %v11213_v15 = vadd.f32 %v4919_v60, %v4455_v63  ;;  %v12802_v60 = vld [vmem:[#allocation197_spill] sm:$0xff] }
 0x6d9   :  { %v4869_v27 = vpop.f32.mrf.mxu2  ;;  %v4845_v54 = vpop.f32.mrf.mxu1  ;;  %v4410_v1 = vadd.f32 %v12803_v26, %v12802_v60  ;;  %v7673_v60 = vld [vmem:[#allocation2 + $0x108] sm:$0xf0]  ;;  %v12811_v26 = vld [vmem:[#allocation199_spill] sm:$0xff] }
 0x6da   :  { %v11209_v37 = vadd.f32 %v4869_v27, %v4405_v11  ;;  %v11217_v35 = vadd.f32 %v4845_v54, %v4381_v53  ;;  %5972 = vmatpush.bf16.msrb.mxu0 %v7648_v57  ;;  %v12805_v53 = vld [vmem:[#allocation13_spill] sm:$0xff] }
 0x6db   :  { %7388 = vmatmul.msk.bf16.gmra.mxu3 %vm3890_vm2, %v10919_v43  ;;  %v12800_v43 = vld [vmem:[#allocation93_spill] sm:$0xff]  ;;  %v4460_v57 = vadd.f32 %v12805_v53, %v12804_v61 }
 0x6dc   :  { %7548 = vmatmul.msk.bf16.gmra.mxu1 %vm3890_vm2, %v11153_v16  ;;  %v4383_v63 = vadd.f32 %v12801_v3, %v12800_v43  ;;  %v7681_v53 = vld [vmem:[#allocation2 + $0x110] sm:$0xf0] }
 0x6de   :  { %v11229_v7 = vpop.f32.mrf.mxu3  ;;  %5973 = vmatpush.bf16.msrb.mxu0 %v7616_v48  ;;  %v12808_v48 = vld [vmem:[#allocation198_spill] sm:$0xff] }
 0x6df   :  { %v4922_v14 = vpop.f32.mrf.mxu0  ;;  %v4482_v46 = vadd.f32 %v12809_v28, %v12808_v48  ;;  %v12815_v48 = vld [vmem:[#allocation97_spill] sm:$0xff]  ;;  %v12816_v28 = vld [vmem:[#allocation15_spill] sm:$0xff] }
 0x6e0   :  { %v11231_v11 = vadd.f32 %v4922_v14, %v4458_v5  ;;  %v7713_v5 = vld [vmem:[#allocation2 + $0x170] sm:$0xf0]  ;;  %v7954_v14 = vld [vmem:[#allocation2 + $0x13c] sm:$0xf] }
 0x6e1   :  { %v4871_v44 = vpop.f32.mrf.mxu2  ;;  %v4847_v27 = vpop.f32.mrf.mxu1  ;;  %7558 = vmatmul.msk.bf16.gmra.mxu0 %vm3890_vm2, %v11079_v36 }
 0x6e2   :  { %v11227_v24 = vadd.f32 %v4871_v44, %v4407_v12  ;;  %v11237_v10 = vadd.f32 %v4847_v27, %v4383_v63  ;;  %v7705_v12 = vld [vmem:[#allocation2 + $0x168] sm:$0xf0]  ;;  %v7955_v63 = vld [vmem:[#allocation2 + $0x144] sm:$0xf] }
 0x6e3   :  { %v7708_v3 = vor.u32 %v7954_v14, %v7705_v12  ;;  %v7716_v27 = vor.u32 %v7955_v63, %v7713_v5  ;;  %v4463_v12 = vadd.f32 %v12816_v28, %v12815_v48  ;;  %v7649_v48 = vld [vmem:[#allocation2 + $0xb0] sm:$0xf0] }
 0x6e6   :  { %7552 = vmatmul.msk.bf16.gmra.mxu2 %vm3890_vm2, %v11153_v16  ;;  %v11247_v6 = vpop.f32.mrf.mxu3 }
 0x6e7   :  { %v4924_v4 = vpop.f32.mrf.mxu0 }
 0x6e8   :  { %v11249_v56 = vadd.f32 %v4924_v4, %v4460_v57  ;;  %v12813_v57 = vld [vmem:[#allocation94_spill] sm:$0xff] }
 0x6e9   :  { %v4874_v54 = vpop.f32.mrf.mxu2  ;;  %v4946_v44 = vpop.f32.mrf.mxu1 }
 0x6ea   :  { %v11245_v31 = vadd.f32 %v4874_v54, %v4410_v1  ;;  %12807 = vst [vmem:[#allocation26_spill] sm:$0xff] %v11249_v56  ;;  %v11253_v43 = vadd.f32 %v4946_v44, %v4482_v46  ;;  %v12812_v1 = vld [vmem:[#allocation14_spill] sm:$0xff]  ;;  %v7641_v56 = vld [vmem:[#allocation2 + $0xa8] sm:$0xf0] }
 0x6eb   :  { %7553 = vmatmul.msk.bf16.vlgmr.msra.gmra.mxu3 %vm3890_vm2, %v11046_v2  ;;  %v4412_v61 = vadd.f32 %v12812_v1, %v12811_v26  ;;  %v12814_v54 = vld [vmem:[#allocation118_spill] sm:$0xff]  ;;  %v7947_v26 = vld [vmem:[#allocation2 + $0xe4] sm:$0xf] }
 0x6ec   :  { %12806 = vst [vmem:[#allocation129_spill] sm:$0xff] %v11245_v31  ;;  %7561 = vmatmul.msk.bf16.vlgmr.msrb.gmra.mxu1 %vm3890_vm2, %v11046_v2  ;;  %5941 = vmatpush.bf16.msra.mxu3 %v7708_v3  ;;  %v4424_v4 = vadd.f32 %v12814_v54, %v12813_v57  ;;  %v7946_v44 = vld [vmem:[#allocation2 + $0xdc] sm:$0xf]  ;;  %v7684_v3 = vor.u32 %v7947_v26, %v7681_v53  ;;  %v12817_v31 = vld [vmem:[#allocation200_spill] sm:$0xff]  ;;  %v12818_v57 = vld [vmem:[#allocation119_spill] sm:$0xff] }
 0x6ed   :  { %12810 = vst [vmem:[#allocation130_spill] sm:$0xff] %v11253_v43  ;;  %5999 = vmatpush.bf16.msrb.mxu1 %v7716_v27  ;;  %v7676_v43 = vor.u32 %v7946_v44, %v7673_v60  ;;  %v4484_v54 = vadd.f32 %v12818_v57, %v12817_v31  ;;  %v12820_v44 = vld [vmem:[#allocation96_spill] sm:$0xff]  ;;  %v7930_v57 = vld [vmem:[#allocation2 + $0x1c] sm:$0xf] }
 0x6ee   :  { %v4888_v5 = vpop.f32.mrf.mxu3 }
 0x6ef   :  { %v4927_v63 = vpop.f32.mrf.mxu0  ;;  %v11267_v1 = vadd.f32 %v4888_v5, %v4424_v4  ;;  %v7939_v4 = vld [vmem:[#allocation2 + $0x84] sm:$0xf]  ;;  %v4426_v5 = vadd.f32 %v11005_v39, %v12820_v44  ;;  %v12825_v44 = vld [vmem:[#allocation98_spill] sm:$0xff] }
 0x6f0   :  { %v11269_v52 = vadd.f32 %v4927_v63, %v4463_v12  ;;  %5942 = vmatpush.bf16.msra.mxu3 %v7676_v43  ;;  %v7652_v53 = vor.u32 %v7939_v4, %v7649_v48  ;;  %v7609_v12 = vld [vmem:[#allocation2 + $0x48] sm:$0xf0]  ;;  %v7617_v43 = vld [vmem:[#allocation2 + $0x50] sm:$0xf0]  ;;  %v12821_v63 = vld [vmem:[#allocation99_spill] sm:$0xff] }
 0x6f1   :  { %v4876_v46 = vpop.f32.mrf.mxu2  ;;  %6000 = vmatpush.bf16.msrb.mxu1 %v7684_v3  ;;  %v4948_v27 = vpop.f32.mrf.mxu1  ;;  %7559 = vmatmul.msk.bf16.gmra.mxu0 %vm3890_vm2, %v11114_v47  ;;  %v4465_v26 = vadd.f32 %v11007_v13, %v12821_v63  ;;  %v7612_v48 = vor.u32 %v7930_v57, %v7609_v12  ;;  %v12827_v63 = vld [vmem:[#allocation101_spill] sm:$0xff] }
 0x6f2   :  { %v11265_v14 = vadd.f32 %v4876_v46, %v4412_v61  ;;  %v7938_v61 = vld [vmem:[#allocation2 + $0x7c] sm:$0xf]  ;;  %v11275_v28 = vadd.f32 %v4948_v27, %v4484_v54  ;;  %v12819_v46 = vld [vmem:[#allocation201_spill] sm:$0xff] }
 0x6f3   :  { %v7644_v60 = vor.u32 %v7938_v61, %v7641_v56  ;;  %v4511_v31 = vadd.f32 %v11003_v50, %v12819_v46  ;;  %v7931_v61 = vld [vmem:[#allocation2 + $0x24] sm:$0xf]  ;;  %v12823_v46 = vld [vmem:[#allocation202_spill] sm:$0xff] }
 0x6f4   :  { %v4487_v39 = vadd.f32 %v11009_v40, %v12823_v46 }
 0x6f5   :  { %5943 = vmatpush.bf16.msra.mxu3 %v7644_v60  ;;  %6001 = vmatpush.bf16.msrb.mxu1 %v7652_v53  ;;  %v7620_v60 = vor.u32 %v7931_v61, %v7617_v43 }
 0x6f6   :  { %7565 = vmatmul.msk.bf16.vlgmr.msrb.gmra.mxu2 %vm3890_vm2, %v11046_v2  ;;  %v4890_v56 = vpop.f32.mrf.mxu3 }
 0x6f7   :  { %v4929_v27 = vpop.f32.mrf.mxu0  ;;  %v11287_v4 = vadd.f32 %v4890_v56, %v4426_v5  ;;  %v12826_v5 = vld [vmem:[#allocation16_spill] sm:$0xff] }
 0x6f8   :  { %v11289_v50 = vadd.f32 %v4929_v27, %v4465_v26  ;;  %v4429_v43 = vadd.f32 %v12826_v5, %v12825_v44  ;;  %v12828_v26 = vld [vmem:[#allocation120_spill] sm:$0xff]  ;;  %v12836_v5 = vld [vmem:[#allocation203_spill] sm:$0xff] }
 0x6f9   :  { %v4975_v3 = vpop.f32.mrf.mxu2  ;;  %5944 = vmatpush.bf16.msra.mxu3 %v7612_v48  ;;  %6002 = vmatpush.bf16.msrb.mxu1 %v7620_v60  ;;  %v4951_v13 = vpop.f32.mrf.mxu1  ;;  %v4468_v40 = vadd.f32 %v12828_v26, %v12827_v63  ;;  %v12831_v60 = vld [vmem:[#allocation204_spill] sm:$0xff]  ;;  %v12838_v26 = vld [vmem:[#allocation205_spill] sm:$0xff] }
 0x6fa   :  { %v11285_v54 = vadd.f32 %v4975_v3, %v4511_v31  ;;  %v11293_v53 = vadd.f32 %v4951_v13, %v4487_v39  ;;  %v12824_v31 = vld [vmem:[#allocation100_spill] sm:$0xff] }
 0x6fb   :  { %7554 = vmatmul.msk.bf16.gmra.mxu3 %vm3890_vm2, %v11079_v36  ;;  %v4513_v12 = vadd.f32 %v11015_v20, %v12824_v31  ;;  %v12832_v20 = vld [vmem:[#allocation17_spill] sm:$0xff]  ;;  %v12834_v31 = vld [vmem:[#allocation102_spill] sm:$0xff] }
 0x6fc   :  { %12822 = vst [vmem:[#allocation27_spill] sm:$0xff] %v11285_v54  ;;  %7562 = vmatmul.msk.bf16.gmra.mxu1 %vm3890_vm2, %v11079_v36  ;;  %v4489_v46 = vadd.f32 %v12832_v20, %v12831_v60 }
 0x6fe   :  { %v4893_v56 = vpop.f32.mrf.mxu3 }
 0x6ff   :  { %v4932_v27 = vpop.f32.mrf.mxu0  ;;  %v11307_v48 = vadd.f32 %v4893_v56, %v4429_v43  ;;  %v12837_v43 = vld [vmem:[#allocation18_spill] sm:$0xff] }
 0x700   :  { %v11309_v61 = vadd.f32 %v4932_v27, %v4468_v40  ;;  %v4431_v63 = vadd.f32 %v12837_v43, %v12836_v5  ;;  %v12839_v40 = vld [vmem:[#allocation122_spill] sm:$0xff]  ;;  %v12844_v5 = vld [vmem:[#allocation123_spill] sm:$0xff] }
 0x701   :  { %v4977_v3 = vpop.f32.mrf.mxu2  ;;  %12829 = vst [vmem:[#allocation131_spill] sm:$0xff] %v11307_v48  ;;  %v4953_v39 = vpop.f32.mrf.mxu1  ;;  %7560 = vmatmul.msk.bf16.gmra.mxu0 %vm3890_vm2, %v11153_v16 }
 0x702   :  { %v11305_v57 = vadd.f32 %v4977_v3, %v4513_v12  ;;  %12830 = vst [vmem:[#allocation28_spill] sm:$0xff] %v11309_v61  ;;  %v11315_v13 = vadd.f32 %v4953_v39, %v4489_v46  ;;  %v12835_v12 = vld [vmem:[#allocation121_spill] sm:$0xff]  ;;  %v4470_v3 = vadd.f32 %v12839_v40, %v12838_v26  ;;  %v12840_v39 = vld [vmem:[#allocation206_spill] sm:$0xff] }
 0x703   :  { %v4516_v44 = vadd.f32 %v12835_v12, %v12834_v31  ;;  %v12843_v12 = vld [vmem:[#allocation104_spill] sm:$0xff] }
 0x704   :  { %12833 = vst [vmem:[#allocation132_spill] sm:$0xff] %v11315_v13  ;;  %v12841_v13 = vld [vmem:[#allocation19_spill] sm:$0xff]  ;;  %v4518_v43 = vadd.f32 %v12844_v5, %v12843_v12  ;;  %v12851_v12 = vld [vmem:[#allocation21_spill] sm:$0xff] }
 0x705   :  { %v4492_v61 = vadd.f32 %v12841_v13, %v12840_v39  ;;  %v11346_v13 = vld [vmem:[%s11968_s3 + $0x80] sm:$0xff]  ;;  %v12850_v39 = vld [vmem:[#allocation207_spill] sm:$0xff] }
 0x706   :  { %7566 = vmatmul.msk.bf16.gmra.mxu2 %vm3890_vm2, %v11079_v36  ;;  %v4895_v60 = vpop.f32.mrf.mxu3  ;;  %v4494_v5 = vadd.f32 %v12851_v12, %v12850_v39 }
 0x707   :  { %v4934_v20 = vpop.f32.mrf.mxu0  ;;  %v11327_v54 = vadd.f32 %v4895_v60, %v4431_v63  ;;  %v12846_v63 = vld [vmem:[#allocation20_spill] sm:$0xff] }
 0x708   :  { %v11329_v46 = vadd.f32 %v4934_v20, %v4470_v3  ;;  %v12848_v60 = vld [vmem:[#allocation124_spill] sm:$0xff] }
 0x709   :  { %v4980_v56 = vpop.f32.mrf.mxu2  ;;  %v4956_v48 = vpop.f32.mrf.mxu1 }
 0x70a   :  { %v11325_v27 = vadd.f32 %v4980_v56, %v4516_v44  ;;  %v11333_v31 = vadd.f32 %v4956_v48, %v4492_v61  ;;  %v12845_v44 = vld [vmem:[#allocation103_spill] sm:$0xff] }
 0x70b   :  { %7555 = vmatmul.msk.bf16.gmra.mxu3 %vm3890_vm2, %v11114_v47  ;;  %v4434_v26 = vadd.f32 %v12846_v63, %v12845_v44 }
 0x70c   :  { %12842 = vst [vmem:[#allocation29_spill] sm:$0xff] %v11333_v31  ;;  %7563 = vmatmul.msk.bf16.gmra.mxu1 %vm3890_vm2, %v11114_v47 }
 0x70e   :  { %v4898_v61 = vpop.f32.mrf.mxu3 }
 0x70f   :  { %v5330_v3 = vpop.f32.mrf.mxu0  ;;  %v11350_v56 = vadd.f32 %v4898_v61, %v4434_v26  ;;  %v12854_v26 = vld [vmem:[#allocation105_spill] sm:$0xff] }
 0x710   :  { %v11353_v20 = vadd.f32 %v5330_v3, %v12848_v60 }
 0x711   :  { %v4982_v40 = vpop.f32.mrf.mxu2  ;;  %12847 = vst [vmem:[#allocation133_spill] sm:$0xff] %v11350_v56  ;;  %v4958_v31 = vpop.f32.mrf.mxu1  ;;  %7725 = vmatmul.msk.bf16.vlgmr.msra.gmra.mxu0 %vm3890_vm2, %v11346_v13 }
 0x712   :  { %v11348_v48 = vadd.f32 %v4982_v40, %v4518_v43  ;;  %12849 = vst [vmem:[#allocation30_spill] sm:$0xff] %v11353_v20  ;;  %v11359_v44 = vadd.f32 %v4958_v31, %v4494_v5  ;;  %v12853_v43 = vld [vmem:[#allocation208_spill] sm:$0xff]  ;;  %v4436_v40 = vadd.f32 %v11062_v30, %v12854_v26  ;;  %v12856_v31 = vld [vmem:[#allocation106_spill] sm:$0xff] }
 0x713   :  { %v4521_v63 = vadd.f32 %v11060_v21, %v12853_v43  ;;  %v4497_v5 = vadd.f32 %v11066_v59, %v12856_v31  ;;  %v12857_v21 = vld [vmem:[#allocation108_spill] sm:$0xff]  ;;  %v12858_v43 = vld [vmem:[#allocation107_spill] sm:$0xff]  ;;  %v12862_v31 = vld [vmem:[#allocation22_spill] sm:$0xff] }
 0x714   :  { %12852 = vst [vmem:[#allocation134_spill] sm:$0xff] %v11359_v44  ;;  %v4523_v30 = vadd.f32 %v11074_v29, %v12857_v21  ;;  %v11389_v59 = vld [vmem:[%s11968_s3 + $0x88] sm:$0xff] }
 0x716   :  { %7567 = vmatmul.msk.bf16.gmra.mxu2 %vm3890_vm2, %v11114_v47  ;;  %v4900_v60 = vpop.f32.mrf.mxu3 }
 0x717   :  { %v5332_v39 = vpop.f32.mrf.mxu0  ;;  %v11369_v12 = vadd.f32 %v4900_v60, %v4436_v40  ;;  %v12859_v60 = vld [vmem:[#allocation125_spill] sm:$0xff] }
 0x718   :  { %v11372_v20 = vadd.f32 %v5332_v39, %v11064_v25  ;;  %v12861_v39 = vld [vmem:[#allocation109_spill] sm:$0xff] }
 0x719   :  { %v4985_v61 = vpop.f32.mrf.mxu2  ;;  %v4961_v44 = vpop.f32.mrf.mxu1 }
 0x71a   :  { %v11367_v3 = vadd.f32 %v4985_v61, %v4521_v63  ;;  %12855 = vst [vmem:[#allocation31_spill] sm:$0xff] %v11372_v20  ;;  %v11376_v56 = vadd.f32 %v4961_v44, %v4497_v5  ;;  %v4439_v63 = vadd.f32 %v11081_v34, %v12858_v43  ;;  %v4499_v5 = vadd.f32 %v12862_v31, %v12861_v39 }
 0x71b   :  { %7556 = vmatmul.msk.bf16.gmra.mxu3 %vm3890_vm2, %v11153_v16 }
 0x71c   :  { %7564 = vmatmul.msk.bf16.gmra.mxu1 %vm3890_vm2, %v11153_v16 }
 0x71e   :  { %v4903_v26 = vpop.f32.mrf.mxu3 }
 0x71f   :  { %v5335_v40 = vpop.f32.mrf.mxu0  ;;  %v11393_v61 = vadd.f32 %v4903_v26, %v4439_v63  ;;  %v12864_v63 = vld [vmem:[#allocation209_spill] sm:$0xff] }
 0x720   :  { %v11396_v29 = vadd.f32 %v5335_v40, %v12859_v60 }
 0x721   :  { %v4987_v25 = vpop.f32.mrf.mxu2  ;;  %v4963_v21 = vpop.f32.mrf.mxu1  ;;  %7726 = vmatmul.msk.bf16.gmra.mxu0 %vm3890_vm2, %v11389_v59 }
 0x722   :  { %v11391_v44 = vadd.f32 %v4987_v25, %v4523_v30  ;;  %12860 = vst [vmem:[#allocation135_spill] sm:$0xff] %v11396_v29  ;;  %v11402_v34 = vadd.f32 %v4963_v21, %v4499_v5  ;;  %v12863_v30 = vld [vmem:[#allocation110_spill] sm:$0xff]  ;;  %v4441_v25 = vadd.f32 %v11095_v38, %v12864_v63  ;;  %v12870_v63 = vld [vmem:[#allocation127_spill] sm:$0xff] }
 0x723   :  { %v4526_v43 = vadd.f32 %v11093_v19, %v12863_v30  ;;  %v12866_v21 = vld [vmem:[#allocation126_spill] sm:$0xff]  ;;  %v12868_v30 = vld [vmem:[#allocation23_spill] sm:$0xff] }
 0x724   :  { %v12867_v19 = vld [vmem:[#allocation210_spill] sm:$0xff] }
 0x725   :  { %v4528_v38 = vadd.f32 %v12868_v30, %v12867_v19 }
 0x726   :  { %7568 = vmatmul.msk.bf16.gmra.mxu2 %vm3890_vm2, %v11153_v16  ;;  %v4905_v60 = vpop.f32.mrf.mxu3 }
 0x727   :  { %v5337_v39 = vpop.f32.mrf.mxu0  ;;  %v11412_v31 = vadd.f32 %v4905_v60, %v4441_v25 }
 0x728   :  { %v11415_v29 = vadd.f32 %v5337_v39, %v11097_v62  ;;  %v11431_v62 = vld [vmem:[%s11968_s3 + $0x90] sm:$0xff] }
 0x729   :  { %v4990_v26 = vpop.f32.mrf.mxu2  ;;  %v5359_v5 = vpop.f32.mrf.mxu1 }
 0x72a   :  { %v11410_v40 = vadd.f32 %v4990_v26, %v4526_v43  ;;  %12865 = vst [vmem:[#allocation32_spill] sm:$0xff] %v11415_v29  ;;  %v11418_v20 = vadd.f32 %v5359_v5, %v12866_v21  ;;  %v12869_v43 = vld [vmem:[#allocation211_spill] sm:$0xff]  ;;  %v12872_v21 = vld [vmem:[#allocation24_spill] sm:$0xff] }
 0x72b   :  { %7569 = vmatmul.msk.bf16.vlgmr.msrb.gmra.mxu3 %vm3890_vm2, %v11046_v2  ;;  %v4540_v25 = vadd.f32 %v12870_v63, %v12869_v43  ;;  %v12874_v43 = vld [vmem:[#allocation128_spill] sm:$0xff]  ;;  %v12875_v29 = vld [vmem:[#allocation7_spill] sm:$0xff] }
 0x72c   :  { %7729 = vmatmul.msk.bf16.vlgmr.msra.gmra.mxu1 %vm3890_vm2, %v11346_v13 }
 0x72e   :  { %v5004_v39 = vpop.f32.mrf.mxu3 }
 0x72f   :  { %v5340_v5 = vpop.f32.mrf.mxu0  ;;  %v11435_v2 = vadd.f32 %v5004_v39, %v4540_v25 }
 0x730   :  { %v11438_v19 = vadd.f32 %v5340_v5, %v12872_v21 }
 0x731   :  { %v4992_v26 = vpop.f32.mrf.mxu2  ;;  %12871 = vst [vmem:[#allocation136_spill] sm:$0xff] %v11435_v2  ;;  %v5361_v30 = vpop.f32.mrf.mxu1  ;;  %7727 = vmatmul.msk.bf16.gmra.mxu0 %vm3890_vm2, %v11431_v62 }
 0x732   :  { %v11433_v60 = vadd.f32 %v4992_v26, %v4528_v38  ;;  %12873 = vst [vmem:[#allocation33_spill] sm:$0xff] %v11438_v19  ;;  %v11443_v63 = vadd.f32 %v5361_v30, %v12874_v43  ;;  %v4542_v38 = vadd.f32 %v11134_v32, %v12875_v29  ;;  %v12877_v32 = vld [vmem:[#allocation111_spill] sm:$0xff]  ;;  %v11469_v43 = vld [vmem:[%s11968_s3 + $0x98] sm:$0xff] }
 0x736   :  { %7733 = vmatmul.msk.bf16.vlgmr.msra.gmra.mxu2 %vm3890_vm2, %v11346_v13  ;;  %v5006_v39 = vpop.f32.mrf.mxu3 }
 0x737   :  { %v5342_v5 = vpop.f32.mrf.mxu0  ;;  %v11452_v21 = vadd.f32 %v5006_v39, %v4542_v38  ;;  %v7719_v39 = vld [vmem:[#allocation2 + $0x148] sm:$0xf] }
 0x738   :  { %v11455_v2 = vadd.f32 %v5342_v5, %v11136_v58 }
 0x739   :  { %v5388_v26 = vpop.f32.mrf.mxu2  ;;  %v5364_v19 = vpop.f32.mrf.mxu1 }
 0x73a   :  { %v11450_v25 = vadd.f32 %v5388_v26, %v11132_v23  ;;  %12876 = vst [vmem:[#allocation137_spill] sm:$0xff] %v11455_v2  ;;  %v11458_v30 = vadd.f32 %v5364_v19, %v11140_v22  ;;  %v4545_v23 = vadd.f32 %v11157_v41, %v12877_v32  ;;  %v12881_v32 = vld [vmem:[#allocation8_spill] sm:$0xff] }
 0x73b   :  { %7570 = vmatmul.msk.bf16.gmra.mxu3 %vm3890_vm2, %v11079_v36 }
 0x73c   :  { %7730 = vmatmul.msk.bf16.gmra.mxu1 %vm3890_vm2, %v11389_v59 }
 0x73e   :  { %v5009_v22 = vpop.f32.mrf.mxu3 }
 0x73f   :  { %v5345_v19 = vpop.f32.mrf.mxu0  ;;  %v11474_v38 = vadd.f32 %v5009_v22, %v4545_v23  ;;  %v4547_v23 = vadd.f32 %v11175_v45, %v12881_v32  ;;  %v7655_v45 = vld [vmem:[#allocation2 + $0x88] sm:$0xf] }
 0x740   :  { %v11477_v36 = vadd.f32 %v5345_v19, %v11159_v42 }
 0x741   :  { %v5390_v29 = vpop.f32.mrf.mxu2  ;;  %v5366_v26 = vpop.f32.mrf.mxu1  ;;  %7728 = vmatmul.msk.bf16.gmra.mxu0 %vm3890_vm2, %v11469_v43 }
 0x742   :  { %v11472_v58 = vadd.f32 %v5390_v29, %v11155_v8  ;;  %12879 = vst [vmem:[#allocation138_spill] sm:$0xff] %v11477_v36  ;;  %v11482_v41 = vadd.f32 %v5366_v26, %v11165_v49  ;;  %v7960_v8 = vld [vmem:[#allocation2 + $0x174] sm:$0xf0]  ;;  %v7687_v26 = vld [vmem:[#allocation2 + $0xe8] sm:$0xf] }
 0x743   :  { %v7720_v5 = vor.u32 %v7960_v8, %v7719_v39  ;;  %v7952_v36 = vld [vmem:[#allocation2 + $0x114] sm:$0xf0] }
 0x744   :  { %12878 = vst [vmem:[#allocation34_spill] sm:$0xff] %v11472_v58  ;;  %v7688_v2 = vor.u32 %v7952_v36, %v7687_v26  ;;  %v7944_v8 = vld [vmem:[#allocation2 + $0xb4] sm:$0xf0] }
 0x745   :  { %12880 = vst [vmem:[#allocation35_spill] sm:$0xff] %v11482_v41  ;;  %6028 = vmatpush.bf16.msrb.mxu2 %v7720_v5  ;;  %v12882_v5 = vld [vmem:[#allocation112_spill] sm:$0xff] }
 0x746   :  { %7734 = vmatmul.msk.bf16.gmra.mxu2 %vm3890_vm2, %v11389_v59  ;;  %v5011_v22 = vpop.f32.mrf.mxu3 }
 0x747   :  { %v5347_v19 = vpop.f32.mrf.mxu0  ;;  %v11491_v58 = vadd.f32 %v5011_v22, %v4547_v23 }
 0x748   :  { %v11494_v49 = vadd.f32 %v5347_v19, %v11177_v18  ;;  %v4550_v18 = vadd.f32 %v11193_v55, %v12882_v5 }
 0x749   :  { %v5393_v29 = vpop.f32.mrf.mxu2  ;;  %v5369_v41 = vpop.f32.mrf.mxu1  ;;  %6029 = vmatpush.bf16.msrb.mxu2 %v7688_v2 }
 0x74a   :  { %v11489_v42 = vadd.f32 %v5393_v29, %v11173_v0  ;;  %v11497_v39 = vadd.f32 %v5369_v41, %v11181_v51  ;;  %v7656_v0 = vor.u32 %v7944_v8, %v7655_v45  ;;  %v7623_v41 = vld [vmem:[#allocation2 + $0x28] sm:$0xf]  ;;  %v7936_v29 = vld [vmem:[#allocation2 + $0x54] sm:$0xf0] }
 0x74b   :  { %7571 = vmatmul.msk.bf16.gmra.mxu3 %vm3890_vm2, %v11114_v47  ;;  %v7624_v47 = vor.u32 %v7936_v29, %v7623_v41 }
 0x74c   :  { %7731 = vmatmul.msk.bf16.gmra.mxu1 %vm3890_vm2, %v11431_v62 }
 0x74d   :  { %6030 = vmatpush.bf16.msrb.mxu2 %v7656_v0 }
 0x74e   :  { %v5014_v23 = vpop.f32.mrf.mxu3 }
 0x74f   :  { %v11508_v51 = vpop.f32.mrf.mxu0  ;;  %v11510_v2 = vadd.f32 %v5014_v23, %v4550_v18 }
 0x751   :  { %v5395_v32 = vpop.f32.mrf.mxu2  ;;  %v5371_v22 = vpop.f32.mrf.mxu1  ;;  %7741 = vmatmul.msk.bf16.vlgmr.msrb.gmra.mxu0 %vm3890_vm2, %v11346_v13  ;;  %6031 = vmatpush.bf16.msrb.mxu2 %v7624_v47 }
 0x752   :  { %v11506_v36 = vadd.f32 %v5395_v32, %v11191_v9  ;;  %v11515_v19 = vadd.f32 %v5371_v22, %v11201_v17  ;;  %v12883_v9 = vld [vmem:[#allocation9_spill] sm:$0xff] }
 0x753   :  { %v4552_v55 = vadd.f32 %v11211_v33, %v12883_v9  ;;  %v12884_v33 = vld [vmem:[#allocation114_spill] sm:$0xff] }
 0x756   :  { %7735 = vmatmul.msk.bf16.gmra.mxu2 %vm3890_vm2, %v11431_v62  ;;  %v5016_v8 = vpop.f32.mrf.mxu3 }
 0x757   :  { %v5448_v0 = vpop.f32.mrf.mxu0  ;;  %v11524_v5 = vadd.f32 %v5016_v8, %v4552_v55  ;;  %v12887_v55 = vld [vmem:[#allocation129_spill] sm:$0xff] }
 0x758   :  { %v11527_v18 = vadd.f32 %v5448_v0, %v11213_v15 }
 0x759   :  { %v5398_v26 = vpop.f32.mrf.mxu2  ;;  %v5374_v17 = vpop.f32.mrf.mxu1 }
 0x75a   :  { %v11522_v45 = vadd.f32 %v5398_v26, %v11209_v37  ;;  %v11530_v32 = vadd.f32 %v5374_v17, %v11217_v35  ;;  %v4555_v37 = vadd.f32 %v11229_v7, %v12884_v33  ;;  %v12886_v7 = vld [vmem:[#allocation116_spill] sm:$0xff]  ;;  %v12889_v17 = vld [vmem:[#allocation26_spill] sm:$0xff] }
 0x75b   :  { %7572 = vmatmul.msk.bf16.gmra.mxu3 %vm3890_vm2, %v11153_v16 }
 0x75c   :  { %7732 = vmatmul.msk.bf16.gmra.mxu1 %vm3890_vm2, %v11469_v43 }
 0x75e   :  { %v5019_v29 = vpop.f32.mrf.mxu3 }
 0x75f   :  { %v5451_v15 = vpop.f32.mrf.mxu0  ;;  %v11541_v47 = vadd.f32 %v5019_v29, %v4555_v37 }
 0x760   :  { %v11544_v35 = vadd.f32 %v5451_v15, %v11231_v11 }
 0x761   :  { %v5400_v23 = vpop.f32.mrf.mxu2  ;;  %v5376_v22 = vpop.f32.mrf.mxu1  ;;  %7742 = vmatmul.msk.bf16.gmra.mxu0 %vm3890_vm2, %v11389_v59 }
 0x762   :  { %v11539_v41 = vadd.f32 %v5400_v23, %v11227_v24  ;;  %v11549_v16 = vadd.f32 %v5376_v22, %v11237_v10  ;;  %v4557_v24 = vadd.f32 %v11247_v6, %v12886_v7 }
 0x764   :  { %12885 = vst [vmem:[#allocation139_spill] sm:$0xff] %v11539_v41  ;;  %v12898_v41 = vld [vmem:[#allocation29_spill] sm:$0xff] }
 0x766   :  { %7736 = vmatmul.msk.bf16.gmra.mxu2 %vm3890_vm2, %v11469_v43  ;;  %v5021_v8 = vpop.f32.mrf.mxu3 }
 0x767   :  { %v5453_v11 = vpop.f32.mrf.mxu0  ;;  %v11558_v0 = vadd.f32 %v5021_v8, %v4557_v24 }
 0x768   :  { %v11561_v33 = vadd.f32 %v5453_v11, %v12889_v17 }
 0x769   :  { %v5403_v9 = vpop.f32.mrf.mxu2  ;;  %v11563_v37 = vpop.f32.mrf.mxu1 }
 0x76a   :  { %v11556_v26 = vadd.f32 %v5403_v9, %v12887_v55 }
 0x76b   :  { %7737 = vmatmul.msk.bf16.vlgmr.msra.gmra.mxu3 %vm3890_vm2, %v11346_v13 }
 0x76c   :  { %12888 = vst [vmem:[#allocation36_spill] sm:$0xff] %v11556_v26  ;;  %7745 = vmatmul.msk.bf16.vlgmr.msrb.gmra.mxu1 %vm3890_vm2, %v11346_v13 }
 0x76e   :  { %v5417_v23 = vpop.f32.mrf.mxu3 }
 0x76f   :  { %v5456_v29 = vpop.f32.mrf.mxu0  ;;  %v11573_v15 = vadd.f32 %v5417_v23, %v11267_v1  ;;  %v7956_v23 = vld [vmem:[#allocation2 + $0x14c] sm:$0xf] }
 0x770   :  { %v11576_v22 = vadd.f32 %v5456_v29, %v11269_v52  ;;  %v7721_v29 = vld [vmem:[#allocation2 + $0x178] sm:$0xf0] }
 0x771   :  { %v5405_v10 = vpop.f32.mrf.mxu2  ;;  %v5477_v7 = vpop.f32.mrf.mxu1  ;;  %7743 = vmatmul.msk.bf16.gmra.mxu0 %vm3890_vm2, %v11431_v62 }
 0x772   :  { %v11570_v6 = vadd.f32 %v5405_v10, %v11265_v14  ;;  %v11581_v24 = vadd.f32 %v5477_v7, %v11275_v28 }
 0x774   :  { %12890 = vst [vmem:[#allocation140_spill] sm:$0xff] %v11570_v6  ;;  %v12895_v6 = vld [vmem:[#allocation132_spill] sm:$0xff] }
 0x776   :  { %7749 = vmatmul.msk.bf16.vlgmr.msrb.gmra.mxu2 %vm3890_vm2, %v11346_v13  ;;  %v5419_v9 = vpop.f32.mrf.mxu3 }
 0x777   :  { %v5458_v55 = vpop.f32.mrf.mxu0  ;;  %v11588_v1 = vadd.f32 %v5419_v9, %v11287_v4  ;;  %v12893_v9 = vld [vmem:[#allocation28_spill] sm:$0xff] }
 0x778   :  { %v11591_v52 = vadd.f32 %v5458_v55, %v11289_v50  ;;  %v12892_v50 = vld [vmem:[#allocation131_spill] sm:$0xff]  ;;  %v7724_v55 = vor.u32 %v7956_v23, %v7721_v29 }
 0x779   :  { %v11585_v14 = vpop.f32.mrf.mxu2  ;;  %v5480_v8 = vpop.f32.mrf.mxu1 }
 0x77a   :  { %v11594_v11 = vadd.f32 %v5480_v8, %v11293_v53  ;;  %6057 = vmatpush.bf16.msrb.mxu3 %v7724_v55 }
 0x77b   :  { %7738 = vmatmul.msk.bf16.gmra.mxu3 %vm3890_vm2, %v11389_v59 }
 0x77c   :  { %7746 = vmatmul.msk.bf16.gmra.mxu1 %vm3890_vm2, %v11389_v59 }
 0x77e   :  { %v5422_v10 = vpop.f32.mrf.mxu3 }
 0x77f   :  { %v5461_v4 = vpop.f32.mrf.mxu0  ;;  %v11604_v7 = vadd.f32 %v5422_v10, %v12892_v50  ;;  %v7940_v50 = vld [vmem:[#allocation2 + $0x8c] sm:$0xf] }
 0x780   :  { %v11607_v53 = vadd.f32 %v5461_v4, %v12893_v9  ;;  %v7657_v9 = vld [vmem:[#allocation2 + $0xb8] sm:$0xf0] }
 0x781   :  { %v5506_v28 = vpop.f32.mrf.mxu2  ;;  %v5482_v8 = vpop.f32.mrf.mxu1  ;;  %7744 = vmatmul.msk.bf16.gmra.mxu0 %vm3890_vm2, %v11469_v43 }
 0x782   :  { %v11601_v17 = vadd.f32 %v5506_v28, %v11305_v57  ;;  %12894 = vst [vmem:[#allocation141_spill] sm:$0xff] %v11607_v53  ;;  %v11612_v26 = vadd.f32 %v5482_v8, %v12895_v6  ;;  %v7948_v57 = vld [vmem:[#allocation2 + $0xec] sm:$0xf]  ;;  %v7689_v28 = vld [vmem:[#allocation2 + $0x118] sm:$0xf0]  ;;  %v7660_v8 = vor.u32 %v7940_v50, %v7657_v9 }
 0x784   :  { %12891 = vst [vmem:[#allocation37_spill] sm:$0xff] %v11601_v17  ;;  %v7692_v17 = vor.u32 %v7948_v57, %v7689_v28  ;;  %v7625_v28 = vld [vmem:[#allocation2 + $0x58] sm:$0xf0] }
 0x786   :  { %7750 = vmatmul.msk.bf16.gmra.mxu2 %vm3890_vm2, %v11389_v59  ;;  %6058 = vmatpush.bf16.msrb.mxu3 %v7692_v17  ;;  %v5424_v23 = vpop.f32.mrf.mxu3  ;;  %v7932_v17 = vld [vmem:[#allocation2 + $0x2c] sm:$0xf] }
 0x787   :  { %v5463_v29 = vpop.f32.mrf.mxu0  ;;  %v11620_v55 = vadd.f32 %v5424_v23, %v11327_v54 }
 0x788   :  { %v11623_v6 = vadd.f32 %v5463_v29, %v11329_v46  ;;  %v12900_v29 = vld [vmem:[#allocation133_spill] sm:$0xff] }
 0x789   :  { %v5509_v10 = vpop.f32.mrf.mxu2  ;;  %v5485_v53 = vpop.f32.mrf.mxu1 }
 0x78a   :  { %v11617_v4 = vadd.f32 %v5509_v10, %v11325_v27  ;;  %12897 = vst [vmem:[#allocation142_spill] sm:$0xff] %v11623_v6  ;;  %6059 = vmatpush.bf16.msrb.mxu3 %v7660_v8  ;;  %v11626_v57 = vadd.f32 %v5485_v53, %v12898_v41  ;;  %v7628_v27 = vor.u32 %v7932_v17, %v7625_v28  ;;  %v12901_v41 = vld [vmem:[#allocation30_spill] sm:$0xff] }
 0x78b   :  { %7739 = vmatmul.msk.bf16.gmra.mxu3 %vm3890_vm2, %v11431_v62  ;;  %v12902_v8 = vld [vmem:[#allocation134_spill] sm:$0xff] }
 0x78c   :  { %12896 = vst [vmem:[#allocation38_spill] sm:$0xff] %v11617_v4  ;;  %7747 = vmatmul.msk.bf16.gmra.mxu1 %vm3890_vm2, %v11431_v62 }
 0x78e   :  { %6060 = vmatpush.bf16.msrb.mxu3 %v7628_v27  ;;  %v5427_v10 = vpop.f32.mrf.mxu3 }
 0x78f   :  { %v5859_v23 = vpop.f32.mrf.mxu0  ;;  %v11636_v50 = vadd.f32 %v5427_v10, %v12900_v29 }
 0x790   :  { %v11639_v53 = vadd.f32 %v5859_v23, %v12901_v41 }
 0x791   :  { %v5511_v54 = vpop.f32.mrf.mxu2  ;;  %v5487_v9 = vpop.f32.mrf.mxu1 }
 0x792   :  { %v11633_v46 = vadd.f32 %v5511_v54, %v11348_v48  ;;  %v11642_v4 = vadd.f32 %v5487_v9, %v12902_v8 }
 0x794   :  { %12899 = vst [vmem:[#allocation39_spill] sm:$0xff] %v11633_v46  ;;  %v12913_v46 = vld [vmem:[#allocation135_spill] sm:$0xff] }
 0x796   :  { %7751 = vmatmul.msk.bf16.gmra.mxu2 %vm3890_vm2, %v11431_v62  ;;  %v5429_v48 = vpop.f32.mrf.mxu3 }
 0x797   :  { %v5861_v27 = vpop.f32.mrf.mxu0  ;;  %v11650_v54 = vadd.f32 %v5429_v48, %v11369_v12 }
 0x799   :  { %v5514_v17 = vpop.f32.mrf.mxu2  ;;  %v5490_v10 = vpop.f32.mrf.mxu1 }
 0x79a   :  { %v11647_v28 = vadd.f32 %v5514_v17, %v11367_v3  ;;  %v11653_v23 = vadd.f32 %v5490_v10, %v11376_v56 }
 0x79b   :  { %7740 = vmatmul.msk.bf16.gmra.mxu3 %vm3890_vm2, %v11469_v43 }
 0x79c   :  { %12903 = vst [vmem:[#allocation143_spill] sm:$0xff] %v11647_v28  ;;  %7748 = vmatmul.msk.bf16.gmra.mxu1 %vm3890_vm2, %v11469_v43 }
 0x79e   :  { %v5432_v3 = vpop.f32.mrf.mxu3 }
 0x79f   :  { %v5864_v9 = vpop.f32.mrf.mxu0  ;;  %v11663_v8 = vadd.f32 %v5432_v3, %v11393_v61 }
 0x7a1   :  { %v5516_v29 = vpop.f32.mrf.mxu2  ;;  %12905 = vst [vmem:[#allocation144_spill] sm:$0xff] %v11663_v8  ;;  %v5492_v12 = vpop.f32.mrf.mxu1 }
 0x7a2   :  { %v11660_v41 = vadd.f32 %v5516_v29, %v11391_v44  ;;  %v11666_v17 = vadd.f32 %v5492_v12, %v11402_v34 }
 0x7a4   :  { %12904 = vst [vmem:[#allocation40_spill] sm:$0xff] %v11660_v41 }
 0x7a5   :  { %12906 = vst [vmem:[#allocation41_spill] sm:$0xff] %v11666_v17  ;;  %v12916_v17 = vld [vmem:[#allocation33_spill] sm:$0xff] }
 0x7a6   :  { %7752 = vmatmul.msk.bf16.gmra.mxu2 %vm3890_vm2, %v11469_v43  ;;  %v5434_v10 = vpop.f32.mrf.mxu3 }
 0x7a7   :  { %v5866_v28 = vpop.f32.mrf.mxu0  ;;  %v11674_v44 = vadd.f32 %v5434_v10, %v11412_v31  ;;  %v12911_v31 = vld [vmem:[#allocation31_spill] sm:$0xff] }
 0x7a8   :  { %v11689_v10 = vadd.f32 %v5861_v27, %v12911_v31 }
 0x7a9   :  { %v5519_v56 = vpop.f32.mrf.mxu2  ;;  %12908 = vst [vmem:[#allocation42_spill] sm:$0xff] %v11674_v44  ;;  %v5888_v29 = vpop.f32.mrf.mxu1 }
 0x7aa   :  { %v11671_v48 = vadd.f32 %v5519_v56, %v11410_v40  ;;  %v11677_v61 = vadd.f32 %v5888_v29, %v11418_v20 }
 0x7ab   :  { %7753 = vmatmul.msk.bf16.vlgmr.msrb.gmra.mxu3 %vm3890_vm2, %v11346_v13 }
 0x7ac   :  { %12907 = vst [vmem:[#allocation145_spill] sm:$0xff] %v11671_v48 }
 0x7ae   :  { %v11686_v40 = vpop.f32.mrf.mxu3 }
 0x7af   :  { %12910 = vst [vmem:[#allocation43_spill] sm:$0xff] %v11686_v40  ;;  %v5869_v56 = vpop.f32.mrf.mxu0  ;;  %v11703_v40 = vadd.f32 %v5864_v9, %v12913_v46  ;;  %v12915_v9 = vld [vmem:[#allocation35_spill] sm:$0xff] }
 0x7b0   :  { %v6114_v6 = vadd.f32 %v5869_v56, %v12916_v17  ;;  %v12918_v17 = vld [vmem:[#allocation137_spill] sm:$0xff] }
 0x7b1   :  { %v5521_v3 = vpop.f32.mrf.mxu2  ;;  %v5890_v48 = vpop.f32.mrf.mxu1 }
 0x7b2   :  { %v11684_v12 = vadd.f32 %v5521_v3, %v11433_v60  ;;  %v11692_v20 = vadd.f32 %v5890_v48, %v11443_v63 }
 0x7b4   :  { %12909 = vst [vmem:[#allocation146_spill] sm:$0xff] %v11684_v12 }
 0x7b6   :  { %v5535_v41 = vpop.f32.mrf.mxu3 }
 0x7b7   :  { %v5871_v60 = vpop.f32.mrf.mxu0  ;;  %v11700_v3 = vadd.f32 %v5535_v41, %v11452_v21 }
 0x7b8   :  { %v6122_v56 = vadd.f32 %v5871_v60, %v12918_v17  ;;  %v11757_v17 = vpop.permute.xlu1 %6189 }
 0x7b9   :  { %v5917_v29 = vpop.f32.mrf.mxu2  ;;  %12912 = vst [vmem:[#allocation147_spill] sm:$0xff] %v11700_v3  ;;  %v5893_v12 = vpop.f32.mrf.mxu1 }
 0x7ba   :  { %v11697_v34 = vadd.f32 %v5917_v29, %v11450_v25  ;;  %v11706_v27 = vadd.f32 %v5893_v12, %v11458_v30  ;;  %v12914_v29 = vld [vmem:[#allocation32_spill] sm:$0xff] }
 0x7bb   :  { %7754 = vmatmul.msk.bf16.gmra.mxu3 %vm3890_vm2, %v11389_v59  ;;  %v6106_v46 = vadd.f32 %v5866_v28, %v12914_v29  ;;  %v12917_v28 = vld [vmem:[#allocation25_spill] sm:$0xff] }
 0x7be   :  { %v5538_v48 = vpop.f32.mrf.mxu3 }
 0x7bf   :  { %v5874_v31 = vpop.f32.mrf.mxu0  ;;  %v11715_v21 = vadd.f32 %v5538_v48, %v11474_v38  ;;  %v5557_v48 = vadd.f32 %v11508_v51, %v12917_v28 }
 0x7c1   :  { %v11712_v25 = vpop.f32.mrf.mxu2  ;;  %v5895_v41 = vpop.f32.mrf.mxu1 }
 0x7c2   :  { %v6107_v13 = vadd.f32 %v5895_v41, %v12915_v9  ;;  %v12919_v9 = vld [vmem:[#allocation138_spill] sm:$0xff] }
 0x7c3   :  { %v6130_v28 = vadd.f32 %v5874_v31, %v12919_v9 }
 0x7c4   :  { %v6157_v30 = vmax.f32 %v6106_v46, %v6107_v13 }
 0x7c6   :  { %v5540_v3 = vpop.f32.mrf.mxu3 }
 0x7c7   :  { %v5876_v59 = vpop.f32.mrf.mxu0  ;;  %v11722_v44 = vadd.f32 %v5540_v3, %v11491_v58 }
 0x7c8   :  { %v6138_v31 = vadd.f32 %v5876_v59, %v11494_v49 }
 0x7c9   :  { %v11719_v12 = vpop.f32.mrf.mxu2  ;;  %v5898_v63 = vpop.f32.mrf.mxu1 }
 0x7ca   :  { %v6115_v8 = vadd.f32 %v5898_v63, %v11497_v39 }
 0x7cb   :  { %7755 = vmatmul.msk.bf16.gmra.mxu3 %vm3890_vm2, %v11431_v62 }
 0x7cc   :  { %v6158_v38 = vmax.f32 %v6114_v6, %v6115_v8 }
 0x7ce   :  { %v5543_v41 = vpop.f32.mrf.mxu3 }
 0x7cf   :  { %v5975_v29 = vpop.f32.mrf.mxu0  ;;  %v11733_v46 = vadd.f32 %v5543_v41, %v11510_v2  ;;  %v11746_v41 = vpop.permute.xlu2 %6199 }
 0x7d0   :  { %v11735_v58 = vadd.f32 %v5975_v29, %v5557_v48  ;;  %v11750_v48 = vpop.permute.xlu0 %6194 }
 0x7d1   :  { %v11730_v13 = vpop.f32.mrf.mxu2  ;;  %v5900_v3 = vpop.f32.mrf.mxu1 }
 0x7d2   :  { %v6123_v39 = vadd.f32 %v5900_v3, %v11515_v19 }
 0x7d4   :  { %v6159_v63 = vmax.f32 %v6122_v56, %v6123_v39 }
 0x7d6   :  { %v5545_v6 = vpop.f32.mrf.mxu3  ;;  %v6207_v59 = vadd.f32 %v11757_v17, %v6159_v63 }
 0x7d7   :  { %v11742_v51 = vadd.f32 %v5545_v6, %v11524_v5  ;;  %v5977_v56 = vpop.f32.mrf.mxu0  ;;  %v11761_v6 = vpop.permute.xlu2 %6184 }
 0x7d9   :  { %v11739_v62 = vpop.f32.mrf.mxu2  ;;  %v5903_v8 = vpop.f32.mrf.mxu1 }
 0x7da   :  { %v6131_v2 = vadd.f32 %v5903_v8, %v11530_v32 }
 0x7db   :  { %7756 = vmatmul.msk.bf16.gmra.mxu3 %vm3890_vm2, %v11469_v43 }
 0x7dc   :  { %v6160_v60 = vmax.f32 %v6130_v28, %v6131_v2 }
 0x7de   :  { %v5548_v29 = vpop.f32.mrf.mxu3  ;;  %v6208_v28 = vadd.f32 %v11750_v48, %v6160_v60 }
 0x7df   :  { %v11755_v3 = vadd.f32 %v5548_v29, %v11541_v47  ;;  %v11767_v47 = vpop.permute.xlu0 %6179  ;;  %v12921_v29 = vld [vmem:[#allocation130_spill] sm:$0xff] }
 0x7e0   :  { %v5558_v49 = vadd.f32 %v11563_v37, %v12921_v29  ;;  %v5980_v37 = vpop.f32.mrf.mxu0 }
 0x7e1   :  { %v11752_v19 = vpop.f32.mrf.mxu2  ;;  %12920 = vst [vmem:[#allocation44_spill] sm:$0xff] %v11755_v3  ;;  %v5905_v5 = vpop.f32.mrf.mxu1 }
 0x7e2   :  { %v6139_v32 = vadd.f32 %v5905_v5, %v11549_v16  ;;  %v11778_v3 = vpop.permute.xlu1 %6174 }
 0x7e4   :  { %v6161_v39 = vmax.f32 %v6138_v31, %v6139_v32  ;;  %v6216_v32 = vmax.f32 %v6208_v28, 0.0  ;;  %v12922_v28 = vmax.f32 %v11703_v40, %v11706_v27  ;;  %v11803_v27 = vadd.f32 %v5977_v56, %v11527_v18 }
 0x7e6   :  { %v6209_v8 = vadd.f32 %v11746_v41, %v6161_v39  ;;  %v5550_v9 = vpop.f32.mrf.mxu3  ;;  %v6206_v39 = vadd.f32 %v11761_v6, %v6158_v38  ;;  %v6204_v38 = vadd.f32 %v11778_v3, %v12922_v28 }
 0x7e7   :  { %v11770_v2 = vadd.f32 %v5550_v9, %v11558_v0  ;;  %v6215_v0 = vmax.f32 %v6207_v59, 0.0  ;;  %v6205_v9 = vadd.f32 %v11767_v47, %v6157_v30  ;;  %v12923_v30 = vmax.f32 %v11689_v10, %v11692_v20  ;;  %v12925_v20 = vld [vmem:[#allocation27_spill] sm:$0xff] }
 0x7e8   :  { %v6217_v16 = vmax.f32 %v6209_v8, 0.0  ;;  %v6214_v29 = vmax.f32 %v6206_v39, 0.0 }
 0x7e9   :  { %v11763_v43 = vpop.f32.mrf.mxu2  ;;  %v6004_v5 = vpop.f32.mrf.mxu1  ;;  %v6213_v59 = vmax.f32 %v6205_v9, 0.0  ;;  %v12924_v9 = vmax.f32 %v11639_v53, %v11677_v61 }
 0x7ea   :  { %v11775_v31 = vadd.f32 %v6004_v5, %v5558_v49  ;;  %6278 = vmatpush.msra.mxu1 %v6217_v16  ;;  %v11789_v49 = vpop.permute.xlu2 %6169  ;;  %v5982_v53 = vpop.f32.mrf.mxu0 }
 0x7eb   :  { %v6203_v5 = vadd.f32 %v11789_v49, %v12923_v30 }
 0x7ec   :  { %v6290_v60 = vmax.f32 %v11735_v58, %v11775_v31  ;;  %6279 = vmatpush.msra.mxu1 %v6216_v32  ;;  %v11798_v32 = vpop.permute.xlu0 %6164  ;;  %v12937_v31 = vld [vmem:[#allocation37_spill] sm:$0xff] }
 0x7ed   :  { %v6202_v10 = vadd.f32 %v11798_v32, %v12924_v9  ;;  %v6211_v28 = vmax.f32 %v6203_v5, 0.0  ;;  %v11828_v5 = vadd.f32 %v5980_v37, %v11544_v35  ;;  %v6110_v37 = vadd.f32 %v5982_v53, %v11561_v33 }
 0x7ee   :  { %6280 = vmatpush.msra.mxu1 %v6215_v0  ;;  %v5946_v63 = vpop.f32.mrf.mxu3 }
 0x7ef   :  { %v11792_v16 = vadd.f32 %v5946_v63, %v11573_v15  ;;  %v6212_v15 = vmax.f32 %v6204_v38, 0.0  ;;  %v5559_v63 = vadd.f32 %v11585_v14, %v12925_v20  ;;  %v12926_v38 = vld [vmem:[#allocation34_spill] sm:$0xff] }
 0x7f0   :  { %6281 = vmatpush.msra.mxu1 %v6214_v29  ;;  %v11820_v30 = vadd.f32 %v11712_v25, %v12926_v38 }
 0x7f1   :  { %v11783_v8 = vpop.f32.mrf.mxu2  ;;  %v6219_v39 = vmax.f32 %v11697_v34, %v11792_v16  ;;  %v6006_v40 = vpop.f32.mrf.mxu1 }
 0x7f2   :  { %v11806_v0 = vadd.f32 %v6006_v40, %v11581_v24  ;;  %6282 = vmatpush.msra.mxu1 %v6213_v59  ;;  %v6210_v59 = vmax.f32 %v6202_v10, 0.0  ;;  %v11837_v10 = vadd.f32 %v11719_v12, %v11489_v42  ;;  %v5985_v20 = vpop.f32.mrf.mxu0 }
 0x7f4   :  { %v6291_v29 = vmax.f32 %v11803_v27, %v11806_v0  ;;  %6283 = vmatpush.msra.mxu1 %v6212_v15 }
 0x7f6   :  { %6284 = vmatpush.msra.mxu1 %v6211_v28  ;;  %v5948_v24 = vpop.f32.mrf.mxu3 }
 0x7f7   :  { %v11823_v61 = vadd.f32 %v5948_v24, %v11588_v1  ;;  %v11848_v24 = vadd.f32 %v11730_v13, %v11506_v36 }
 0x7f8   :  { %6285 = vmatpush.msra.mxu1 %v6210_v59  ;;  %v6118_v59 = vadd.f32 %v5985_v20, %v11576_v22  ;;  %v12927_v22 = vld [vmem:[#allocation139_spill] sm:$0xff] }
 0x7f9   :  { %v6033_v18 = vpop.f32.mrf.mxu2  ;;  %v6220_v14 = vmax.f32 %v11820_v30, %v11823_v61  ;;  %v6009_v40 = vpop.f32.mrf.mxu1 }
 0x7fa   :  { %v11816_v56 = vadd.f32 %v6033_v18, %v5559_v63  ;;  %v11831_v15 = vadd.f32 %v6009_v40, %v11594_v11  ;;  %v5987_v33 = vpop.f32.mrf.mxu0  ;;  %v6116_v40 = vadd.f32 %v11739_v62, %v11522_v45 }
 0x7fc   :  { %v6292_v9 = vmax.f32 %v11828_v5, %v11831_v15 }
 0x7fe   :  { %v5951_v25 = vpop.f32.mrf.mxu3 }
 0x7ff   :  { %v11840_v1 = vadd.f32 %v5951_v25, %v11604_v7 }
 0x801   :  { %v6221_v63 = vmax.f32 %v11837_v10, %v11840_v1  ;;  %v6011_v35 = vpop.f32.mrf.mxu1  ;;  %v6227_v1 = vadd.f32 %v6219_v39, %v11798_v32 }
 0x802   :  { %v6111_v11 = vadd.f32 %v6011_v35, %v11612_v26 }
 0x803   :  { %v6229_v0 = vadd.f32 %v6221_v63, %v11778_v3  ;;  %v6235_v61 = vmax.f32 %v6227_v1, 0.0 }
 0x804   :  { %v6293_v28 = vmax.f32 %v6110_v37, %v6111_v11  ;;  %v5990_v11 = vpop.f32.mrf.mxu0 }
 0x805   :  { %v6237_v10 = vmax.f32 %v6229_v0, 0.0 }
 0x806   :  { %v5953_v18 = vpop.f32.mrf.mxu3 }
 0x807   :  { %v11851_v42 = vadd.f32 %v5953_v18, %v11620_v55  ;;  %v6126_v55 = vadd.f32 %v5987_v33, %v11591_v52  ;;  %v12930_v33 = vld [vmem:[#allocation144_spill] sm:$0xff] }
 0x809   :  { %v6222_v7 = vmax.f32 %v11848_v24, %v11851_v42  ;;  %v6014_v12 = vpop.f32.mrf.mxu1  ;;  %v6228_v42 = vadd.f32 %v6220_v14, %v11789_v49 }
 0x80a   :  { %v6119_v38 = vadd.f32 %v6014_v12, %v11626_v57  ;;  %v6124_v57 = vadd.f32 %v11752_v19, %v12927_v22  ;;  %v12932_v22 = vld [vmem:[#allocation41_spill] sm:$0xff] }
 0x80b   :  { %v6230_v5 = vadd.f32 %v6222_v7, %v11767_v47  ;;  %v6236_v30 = vmax.f32 %v6228_v42, 0.0 }
 0x80c   :  { %v6294_v53 = vmax.f32 %v6118_v59, %v6119_v38  ;;  %v12928_v38 = vld [vmem:[#allocation141_spill] sm:$0xff] }
 0x80d   :  { %v6134_v45 = vadd.f32 %v5990_v11, %v12928_v38  ;;  %v12934_v38 = vld [vmem:[#allocation42_spill] sm:$0xff]  ;;  %v6238_v24 = vmax.f32 %v6230_v5, 0.0 }
 0x80e   :  { %v5956_v26 = vpop.f32.mrf.mxu3 }
 0x80f   :  { %v6117_v36 = vadd.f32 %v5956_v26, %v11636_v50 }
 0x811   :  { %v6223_v13 = vmax.f32 %v6116_v40, %v6117_v36  ;;  %v6016_v25 = vpop.f32.mrf.mxu1  ;;  %v12929_v40 = vld [vmem:[#allocation36_spill] sm:$0xff] }
 0x812   :  { %v6127_v35 = vadd.f32 %v6016_v25, %v11642_v4  ;;  %v6132_v52 = vadd.f32 %v11763_v43, %v12929_v40  ;;  %v5992_v4 = vpop.f32.mrf.mxu0 }
 0x814   :  { %v6295_v37 = vmax.f32 %v6126_v55, %v6127_v35  ;;  %v12931_v35 = vld [vmem:[#allocation142_spill] sm:$0xff] }
 0x815   :  { %v6142_v19 = vadd.f32 %v5992_v4, %v12931_v35  ;;  %v6302_v4 = vadd.f32 %v6294_v53, %v11761_v6  ;;  %v12936_v35 = vld [vmem:[#allocation43_spill] sm:$0xff]  ;;  %v6300_v53 = vadd.f32 %v6292_v9, %v11778_v3 }
 0x816   :  { %v5958_v18 = vpop.f32.mrf.mxu3 }
 0x817   :  { %v6125_v20 = vadd.f32 %v5958_v18, %v11650_v54  ;;  %v6308_v9 = vmax.f32 %v6300_v53, 0.0 }
 0x819   :  { %v6224_v12 = vmax.f32 %v6124_v57, %v6125_v20  ;;  %v6019_v59 = vpop.f32.mrf.mxu1  ;;  %v12933_v20 = vld [vmem:[#allocation140_spill] sm:$0xff] }
 0x81a   :  { %v6135_v50 = vadd.f32 %v6019_v59, %v11653_v23  ;;  %v6140_v59 = vadd.f32 %v11783_v8, %v12933_v20  ;;  %v12935_v8 = vld [vmem:[#allocation136_spill] sm:$0xff] }
 0x81c   :  { %v6296_v62 = vmax.f32 %v6134_v45, %v6135_v50  ;;  %v6035_v45 = vpop.f32.mrf.mxu2 }
 0x81e   :  { %v5961_v26 = vpop.f32.mrf.mxu3  ;;  %v6304_v23 = vadd.f32 %v6296_v62, %v11750_v48 }
 0x81f   :  { %v6133_v36 = vadd.f32 %v5961_v26, %v12930_v33  ;;  %v6303_v26 = vadd.f32 %v6295_v37, %v11757_v17 }
 0x821   :  { %v6225_v25 = vmax.f32 %v6132_v52, %v6133_v36  ;;  %v6021_v55 = vpop.f32.mrf.mxu1  ;;  %v6312_v52 = vmax.f32 %v6304_v23, 0.0  ;;  %v6311_v62 = vmax.f32 %v6303_v26, 0.0 }
 0x822   :  { %v6143_v54 = vadd.f32 %v6021_v55, %v12932_v22  ;;  %v6301_v55 = vadd.f32 %v6293_v28, %v11767_v47  ;;  %v6231_v28 = vadd.f32 %v6223_v13, %v11761_v6  ;;  %v6298_v13 = vadd.f32 %v6290_v60, %v11798_v32 }
 0x823   :  { %v6233_v36 = vadd.f32 %v6225_v25, %v11750_v48  ;;  %v11915_v60 = vadd.f32 %v6035_v45, %v12937_v31  ;;  %v12939_v45 = vld [vmem:[#allocation38_spill] sm:$0xff] }
 0x824   :  { %v6297_v18 = vmax.f32 %v6142_v19, %v6143_v54  ;;  %v5560_v19 = vadd.f32 %v12936_v35, %v12935_v8  ;;  %v6232_v54 = vadd.f32 %v6224_v12, %v11757_v17  ;;  %v6299_v12 = vadd.f32 %v6291_v29, %v11789_v49  ;;  %v6038_v15 = vpop.f32.mrf.mxu2 }
 0x825   :  { %v6241_v25 = vmax.f32 %v6233_v36, 0.0  ;;  %v6239_v27 = vmax.f32 %v6231_v28, 0.0  ;;  %v6306_v58 = vmax.f32 %v6298_v13, 0.0  ;;  %v6218_v28 = vld [vmem:[%s11970_s5] sm:$0x1]  ;;  %v12945_v13 = vld [vmem:[#allocation146_spill] sm:$0xff] }
 0x826   :  { %v6305_v57 = vadd.f32 %v6297_v18, %v11746_v41  ;;  %v5963_v11 = vpop.f32.mrf.mxu3  ;;  %v6310_v18 = vmax.f32 %v6302_v4, 0.0  ;;  %v6240_v20 = vmax.f32 %v6232_v54, 0.0  ;;  %v6307_v29 = vmax.f32 %v6299_v12, 0.0  ;;  %v12942_v54 = vld [vmem:[#allocation40_spill] sm:$0xff]  ;;  %7758 = vmatmul.msk.f32.vlgmr.msra.gmra.mxu1 %vm3890_vm2, %v6218_v28 }
 0x827   :  { %v6141_v43 = vadd.f32 %v5963_v11, %v12934_v38  ;;  %v6309_v11 = vmax.f32 %v6301_v55, 0.0 }
 0x828   :  { %v6313_v50 = vmax.f32 %v6305_v57, 0.0 }
 0x829   :  { %v6226_v40 = vmax.f32 %v6140_v59, %v6141_v43  ;;  %v12938_v59 = vld [vmem:[#allocation147_spill] sm:$0xff] }
 0x82a   :  { %6326 = vmatpush.msra.mxu2 %v6313_v50  ;;  %v6104_v50 = vadd.f32 %v6038_v15, %v12939_v45 }
 0x82b   :  { %v6234_v33 = vadd.f32 %v6226_v40, %v11746_v41 }
 0x82c   :  { %6327 = vmatpush.msra.mxu2 %v6312_v52  ;;  %v6040_v14 = vpop.f32.mrf.mxu2 }
 0x82d   :  { %v6242_v22 = vmax.f32 %v6234_v33, 0.0  ;;  %v12940_v33 = vld [vmem:[#allocation39_spill] sm:$0xff] }
 0x82e   :  { %6328 = vmatpush.msra.mxu2 %v6311_v62  ;;  %v6062_v37 = vpop.f32.mrf.mxu3  ;;  %v6112_v34 = vadd.f32 %v6040_v14, %v12940_v33  ;;  %v12941_v62 = vld [vmem:[#allocation143_spill] sm:$0xff] }
 0x82f   :  { %v11889_v57 = vadd.f32 %v6062_v37, %v5560_v19  ;;  %6255 = vmatpush.msra.mxu0 %v6242_v22 }
 0x830   :  { %6329 = vmatpush.msra.mxu2 %v6310_v18 }
 0x831   :  { %v6339_v23 = vmax.f32 %v11816_v56, %v11889_v57  ;;  %6256 = vmatpush.msra.mxu0 %v6241_v25  ;;  %v6314_v25 = vld [vmem:[%s11970_s5 + $0x2] sm:$0x1] }
 0x832   :  { %6330 = vmatpush.msra.mxu2 %v6309_v11  ;;  %v12943_v11 = vld [vmem:[#allocation145_spill] sm:$0xff] }
 0x833   :  { %6257 = vmatpush.msra.mxu0 %v6240_v20 }
 0x834   :  { %6331 = vmatpush.msra.mxu2 %v6308_v9  ;;  %v6043_v52 = vpop.f32.mrf.mxu2 }
 0x835   :  { %6258 = vmatpush.msra.mxu0 %v6239_v27  ;;  %v6120_v55 = vadd.f32 %v6043_v52, %v12941_v62 }
 0x836   :  { %6332 = vmatpush.msra.mxu2 %v6307_v29  ;;  %v6064_v7 = vpop.f32.mrf.mxu3 }
 0x837   :  { %v6097_v38 = vadd.f32 %v6064_v7, %v12938_v59  ;;  %6259 = vmatpush.msra.mxu0 %v6238_v24 }
 0x838   :  { %6333 = vmatpush.msra.mxu2 %v6306_v58 }
 0x839   :  { %v6340_v63 = vmax.f32 %v11915_v60, %v6097_v38  ;;  %6260 = vmatpush.msra.mxu0 %v6237_v10  ;;  %7759 = vmatmul.msk.f32.vlgmr.msra.gmra.mxu2 %vm3890_vm2, %v6314_v25 }
 0x83b   :  { %6261 = vmatpush.msra.mxu0 %v6236_v30 }
 0x83c   :  { %v6045_v35 = vpop.f32.mrf.mxu2 }
 0x83d   :  { %6262 = vmatpush.msra.mxu0 %v6235_v61  ;;  %v6128_v37 = vadd.f32 %v6045_v35, %v12942_v54 }
 0x83e   :  { %v6067_v43 = vpop.f32.mrf.mxu3 }
 0x83f   :  { %v6105_v26 = vadd.f32 %v6067_v43, %v11715_v21  ;;  %v6392_v43 = vpop.permute.xlu1 %6391 }
 0x841   :  { %v6341_v40 = vmax.f32 %v6104_v50, %v6105_v26 }
 0x844   :  { %v6048_v53 = vpop.f32.mrf.mxu2 }
 0x845   :  { %v6136_v12 = vadd.f32 %v6048_v53, %v12943_v11 }
 0x846   :  { %v6069_v4 = vpop.f32.mrf.mxu3 }
 0x847   :  { %v6113_v16 = vadd.f32 %v6069_v4, %v11722_v44 }
 0x849   :  { %v6342_v39 = vmax.f32 %v6112_v34, %v6113_v16 }
 0x84b   :  { %v6350_v38 = vadd.f32 %v6342_v39, %v11767_v47  ;;  %v6363_v47 = vld [vmem:[%s11970_s5 + $0x3] sm:$0x1] }
 0x84c   :  { %v6050_v15 = vpop.f32.mrf.mxu2 }
 0x84d   :  { %v6144_v27 = vadd.f32 %v6050_v15, %v12945_v13  ;;  %v6358_v1 = vmax.f32 %v6350_v38, 0.0 }
 0x84e   :  { %v6072_v36 = vpop.f32.mrf.mxu3 }
 0x84f   :  { %v6121_v8 = vadd.f32 %v6072_v36, %v11733_v46  ;;  %v6243_v46 = vld [vmem:[%s11970_s5 + $0x1] sm:$0x1] }
 0x850   :  { %7757 = vmatmul.msk.f32.vlgmr.msra.gmra.mxu0 %vm3890_vm2, %v6243_v46 }
 0x851   :  { %v6343_v19 = vmax.f32 %v6120_v55, %v6121_v8 }
 0x853   :  { %v6351_v60 = vadd.f32 %v6343_v19, %v11761_v6 }
 0x855   :  { %v6359_v10 = vmax.f32 %v6351_v60, 0.0 }
 0x856   :  { %v6074_v22 = vpop.f32.mrf.mxu3 }
 0x857   :  { %v6129_v21 = vadd.f32 %v6074_v22, %v11742_v51  ;;  %v12944_v51 = vld [vmem:[#allocation44_spill] sm:$0xff] }
 0x859   :  { %v6344_v18 = vmax.f32 %v6128_v37, %v6129_v21 }
 0x85b   :  { %v6352_v58 = vadd.f32 %v6344_v18, %v11757_v17  ;;  %v6347_v17 = vadd.f32 %v6339_v23, %v11798_v32  ;;  %v6394_v32 = vperm.slane %v6392_v43, 0 }
 0x85d   :  { %v6360_v59 = vmax.f32 %v6352_v58, 0.0  ;;  %v6355_v30 = vmax.f32 %v6347_v17, 0.0 }
 0x85e   :  { %v6077_v44 = vpop.f32.mrf.mxu3 }
 0x85f   :  { %v6137_v20 = vadd.f32 %v6077_v44, %v12944_v51 }
 0x861   :  { %v6345_v5 = vmax.f32 %v6136_v12, %v6137_v20 }
 0x863   :  { %v6353_v42 = vadd.f32 %v6345_v5, %v11750_v48 }
 0x865   :  { %v6361_v31 = vmax.f32 %v6353_v42, 0.0 }
 0x866   :  { %v6079_v9 = vpop.f32.mrf.mxu3 }
 0x867   :  { %v6145_v0 = vadd.f32 %v6079_v9, %v11770_v2  ;;  %v6349_v2 = vadd.f32 %v6341_v40, %v11778_v3 }
 0x869   :  { %v6346_v29 = vmax.f32 %v6144_v27, %v6145_v0  ;;  %v6357_v48 = vmax.f32 %v6349_v2, 0.0 }
 0x86b   :  { %v6354_v24 = vadd.f32 %v6346_v29, %v11746_v41  ;;  %v6348_v41 = vadd.f32 %v6340_v63, %v11789_v49 }
 0x86d   :  { %v6362_v7 = vmax.f32 %v6354_v24, 0.0  ;;  %v6356_v6 = vmax.f32 %v6348_v41, 0.0 }
 0x86f   :  { %6375 = vmatpush.msra.mxu3 %v6362_v7 }
 0x871   :  { %6376 = vmatpush.msra.mxu3 %v6361_v31 }
 0x873   :  { %6377 = vmatpush.msra.mxu3 %v6360_v59 }
 0x875   :  { %6378 = vmatpush.msra.mxu3 %v6359_v10 }
 0x877   :  { %6379 = vmatpush.msra.mxu3 %v6358_v1 }
 0x879   :  { %6380 = vmatpush.msra.mxu3 %v6357_v48 }
 0x87b   :  { %6381 = vmatpush.msra.mxu3 %v6356_v6 }
 0x87d   :  { %6382 = vmatpush.msra.mxu3 %v6355_v30 }
 0x87e   :  { %7760 = vmatmul.msk.f32.vlgmr.msra.gmra.mxu3 %vm3890_vm2, %v6363_v47 }
 0x8a3   :  { %v6287_v49 = vpop.f32.mrf.mxu1 }
 0x8bc   :  { %v6335_v61 = vpop.f32.mrf.mxu2 }
 0x8cd   :  { %v6264_v3 = vpop.f32.mrf.mxu0 }
 0x8ce   :  { %v6288_v63 = vadd.f32 %v6287_v49, %v6264_v3 }
 0x8d0   :  { %v6338_v14 = vadd.f32 %v6335_v61, %v6288_v63 }
 0x901   :  { %v6384_v45 = vpop.f32.mrf.mxu3 }
 0x902   :  { %v6387_v56 = vadd.f32 %v6384_v45, %v6338_v14 }
 0x904   :  { %v6395_v57 = vadd.f32 %v6394_v32, %v6387_v56 }
 0x906   :  { %6396 = vst [vmem:[#allocation4] sm:$0x1] %v6395_v57 }
 0x907   :  { %6407 = dma.vmem_to_hbm [thread:$0]  %s6403_s11, 16, %s6405_s14, [#allocation5]  }
 0x908   :  { %7992 = dma.done.wait [#allocation5], 16  }
 0x909   :  { %7993 = vsyncadd [#allocation5], 4294967280 }
 0x90a   :  { %6412 = vsyncpa [#allocation5], 1 }

</bundles_post_ra>
